<compile_context>
chip_gen: v6e
topology: v6e:2x2x1
jax: 0.10.0
libtpu: 0.0.40
codegen_flags: <defaults>
</compile_context>

<pallas_src>
import jax
import jax.numpy as jnp
import numpy as np
from jax.experimental import pallas as pl
from jax.experimental.pallas import tpu as pltpu


# ----------------------------- fused kernel ---------------------------------
def _fused_kernel(lens_c_ref, lens_t_ref, xc_ref, xx_ref,
                  w_ih_c_ref, w_hh_c_ref, b_c_ref,
                  w_ih_x_ref, w_hh_x_ref, b_x_ref,
                  w1_ref, b1_ref, w2_ref, b2_ref,
                  w3a_ref, w3b_ref, b3_ref,
                  out_ref, gc_sc, gx_sc):
    f32 = jnp.float32
    bf16 = jnp.bfloat16
    NB = lens_c_ref.shape[0]            # padded batch (multiple of 8)
    Hc = w_hh_c_ref.shape[0]
    Hx = w_hh_x_ref.shape[0]
    Tc = xc_ref.shape[0] // NB
    Tt = xx_ref.shape[0] // NB

    # ---- prologue: hoisted input projections for ALL timesteps, ONE matmul
    # per LSTM (embedding already folded into w_ih_c rows 0..16; K padded to
    # 128 in the wrapper) ------------------------------------------------------
    gc_sc[...] = (jnp.dot(xc_ref[...], w_ih_c_ref[...],
                          preferred_element_type=f32) + b_c_ref[...])
    gx_sc[...] = (jnp.dot(xx_ref[...], w_ih_x_ref[...],
                          preferred_element_type=f32) + b_x_ref[...])

    lens_c = lens_c_ref[...]            # (NB, 1) int32
    lens_t = lens_t_ref[...]

    # ---- one LSTM step: only h @ W_hh (bf16 MXU, f32 accum) + gate math ----
    # Gate order is (i, f, o, g): one sigmoid slab [:, :3H], one tanh [:, 3H:].
    def lstm_step(t, g_sc, whh_ref, lens, state, H):
        h, c, last = state
        gates = g_sc[pl.ds(t * NB, NB), :] + jnp.dot(
            h.astype(bf16), whh_ref[...], preferred_element_type=f32)
        s = jax.nn.sigmoid(gates[:, :3 * H])          # i | f | o
        g = jnp.tanh(gates[:, 3 * H:])                # g
        c_new = s[:, H:2 * H] * c + s[:, :H] * g
        h_new = s[:, 2 * H:3 * H] * jnp.tanh(c_new)
        # capture hidden state at the last *valid* timestep (t == len-1)
        last = jnp.where(lens == (t + 1), h_new, last)
        return h_new, c_new, last

    zc = jnp.zeros((NB, Hc), f32)
    zx = jnp.zeros((NB, Hx), f32)
    st_c = (zc, zc, zc)
    st_x = (zx, zx, zx)
    # Interleaved, fully-unrolled recurrence: both dependency chains live in
    # the same basic block so MXU / EUP / VPU work of the two LSTMs overlaps.
    # TODO(synk): cap the unroll (chunked fori_loop) if T grows beyond ~32.
    for t in range(max(Tc, Tt)):
        if t < Tc:
            st_c = lstm_step(t, gc_sc, w_hh_c_ref, lens_c, st_c, Hc)
        if t < Tt:
            st_x = lstm_step(t, gx_sc, w_hh_x_ref, lens_t, st_x, Hx)
    h_cond = st_c[2]                                   # (NB, Hc)
    h_ctx = st_x[2]                                    # (NB, Hx)

    # ---- head: relu(lin_condition) / relu(lin_context) / lin / sigmoid ----
    a = jnp.maximum(
        jnp.dot(h_cond, w1_ref[...], preferred_element_type=f32) + b1_ref[...],
        0.0)
    b = jnp.maximum(
        jnp.dot(h_ctx, w2_ref[...], preferred_element_type=f32) + b2_ref[...],
        0.0)
    # lin(cat([a, b], 1)) == sum(a * w3a_row) + sum(b * w3b_row) + b3
    # (VPU mul + XLU lane-reduce instead of two N=1 MXU matmuls).
    logits = (jnp.sum(a * w3a_ref[...], axis=-1, keepdims=True)
              + jnp.sum(b * w3b_ref[...], axis=-1, keepdims=True)
              + b3_ref[...])
    out_ref[...] = jax.nn.sigmoid(logits)


# ------------------------------ wrapper --------------------------------------
def _pad_batch(x, nb):
    pad = [(0, nb - x.shape[0])] + [(0, 0)] * (x.ndim - 1)
    return jnp.pad(x, pad)


@jax.jit
def lstm_net_forward(p, type_ids, prop, tok, pad_lens, pad_token_lens):
    f32 = jnp.float32
    B, Tc = type_ids.shape
    Tt = tok.shape[1]
    V = p["embedding"].shape[0]                      # 17
    Hc = p["w_hh_cond"].shape[0]
    Hx = p["w_hh_ctx"].shape[0]
    nb = ((B + 7) // 8) * 8                          # pad batch to f32 sublane
    KC = 128                                         # 17 one-hot + 100 prop -> 128
    KX = 128                                         # 100 tok -> 128

    # ---- layout prep (tiny XLA glue; all heavy compute is in the kernel) ----
    ids = _pad_batch(type_ids.astype(jnp.int32), nb)                  # (nb, Tc)
    one_hot = (ids[..., None] == jnp.arange(V, dtype=jnp.int32)).astype(f32)
    x_cond = jnp.concatenate([one_hot, _pad_batch(prop.astype(f32), nb)], axis=2)
    x_cond = jnp.pad(x_cond, ((0, 0), (0, 0), (0, KC - x_cond.shape[2])))
    x_cond = jnp.transpose(x_cond, (1, 0, 2)).reshape(Tc * nb, KC)    # time-major

    x_ctx = jnp.pad(_pad_batch(tok.astype(f32), nb),
                    ((0, 0), (0, 0), (0, KX - tok.shape[2])))
    x_ctx = jnp.transpose(x_ctx, (1, 0, 2)).reshape(Tt * nb, KX)

    lens_c = _pad_batch(pad_lens.astype(jnp.int32), nb).reshape(nb, 1)
    lens_t = _pad_batch(pad_token_lens.astype(jnp.int32), nb).reshape(nb, 1)

    # ---- weight prep: fold embedding (exact: one_hot @ (E@W) == E[id] @ W),
    # merge K blocks, permute gate columns (i,f,g,o)->(i,f,o,g), bf16 W_hh ----
    def perm(w, H):
        return jnp.concatenate(
            [w[..., :2 * H], w[..., 3 * H:], w[..., 2 * H:3 * H]], axis=-1)

    w_ih_c = jnp.concatenate([p["embedding"] @ p["w_ih_cond"][:50],   # (17, 4Hc)
                              p["w_ih_cond"][50:]], axis=0)           # (117, 4Hc)
    w_ih_c = perm(jnp.pad(w_ih_c, ((0, KC - w_ih_c.shape[0]), (0, 0))), Hc)
    w_hh_c = perm(p["w_hh_cond"], Hc).astype(jnp.bfloat16)
    b_c = perm(p["b_cond"], Hc)

    w_ih_x = perm(jnp.pad(p["w_ih_ctx"],
                          ((0, KX - p["w_ih_ctx"].shape[0]), (0, 0))), Hx)
    w_hh_x = perm(p["w_hh_ctx"], Hx).astype(jnp.bfloat16)
    b_x = perm(p["b_ctx"], Hx)

    w3a = p["w_lin_a"].reshape(1, -1)     # (1, 128) row for VPU mul + reduce
    w3b = p["w_lin_b"].reshape(1, -1)     # (1, 64)

    out = pl.pallas_call(
        _fused_kernel,
        out_shape=jax.ShapeDtypeStruct((nb, 1), f32),
        scratch_shapes=[pltpu.VMEM((Tc * nb, 4 * Hc), f32),
                        pltpu.VMEM((Tt * nb, 4 * Hx), f32)],
        compiler_params=pltpu.CompilerParams(
            vmem_limit_bytes=32 * 1024 * 1024),
    )(lens_c, lens_t, x_cond, x_ctx,
      w_ih_c, w_hh_c, b_c, w_ih_x, w_hh_x, b_x,
      p["w_lin_cond"], p["b_lin_cond"], p["w_lin_ctx"], p["b_lin_ctx"],
      w3a, w3b, p["b_lin"])
    return out[:B]


# ------------------------------ Reference (JAX) ------------------------------
def _lstm_ref(x_btd, lens, w_ih_t, w_hh_t, bias):
    B, T, D = x_btd.shape
    H = w_hh_t.shape[0]

    def step(carry, x_t):
        h, c = carry
        g = x_t @ w_ih_t + h @ w_hh_t + bias
        i = jax.nn.sigmoid(g[:, :H]);     f = jax.nn.sigmoid(g[:, H:2 * H])
        gg = jnp.tanh(g[:, 2 * H:3 * H]); o = jax.nn.sigmoid(g[:, 3 * H:])
        c = f * c + i * gg
        h = o * jnp.tanh(c)
        return (h, c), h

    h0 = jnp.zeros((B, H), jnp.float32)
    (_, _), hs = jax.lax.scan(step, (h0, h0), jnp.transpose(x_btd, (1, 0, 2)))
    hs = jnp.transpose(hs, (1, 0, 2))                            # (B, T, H)
    return hs[jnp.arange(B), (lens - 1).astype(jnp.int32)]


def _forward_ref(p, type_ids, prop, tok, pad_lens, pad_token_lens):
    emb = p["embedding"][type_ids.astype(jnp.int32)]
    x_cond = jnp.concatenate([emb, prop], axis=2)
    hc = _lstm_ref(x_cond, pad_lens, p["w_ih_cond"], p["w_hh_cond"], p["b_cond"])
    hx = _lstm_ref(tok, pad_token_lens, p["w_ih_ctx"], p["w_hh_ctx"], p["b_ctx"])
    a = jnp.maximum(hc @ p["w_lin_cond"] + p["b_lin_cond"], 0.0)
    b = jnp.maximum(hx @ p["w_lin_ctx"] + p["b_lin_ctx"], 0.0)
    logits = a @ p["w_lin_a"] + b @ p["w_lin_b"] + p["b_lin"]
    return jax.nn.sigmoid(logits)


# ------------------------------ Param init -----------------------------------
def init_params(key):
    def u(key, shape, k):
        return jax.random.uniform(key, shape, jnp.float32, -k, k)

    ks = jax.random.split(key, 16)
    Hc, Hx = 256, 128
    kc, kx = 1.0 / np.sqrt(Hc), 1.0 / np.sqrt(Hx)
    return {
        "embedding":  jax.random.normal(ks[0], (17, 50), jnp.float32),
        # condition LSTM: 150 -> 256 (weights pre-transposed, biases combined)
        "w_ih_cond":  u(ks[1], (150, 4 * Hc), kc),
        "w_hh_cond":  u(ks[2], (Hc, 4 * Hc), kc),
        "b_cond":     u(ks[3], (1, 4 * Hc), kc),
        # context LSTM: 100 -> 128
        "w_ih_ctx":   u(ks[4], (100, 4 * Hx), kx),
        "w_hh_ctx":   u(ks[5], (Hx, 4 * Hx), kx),
        "b_ctx":      u(ks[6], (1, 4 * Hx), kx),
        # lin_condition: 256 -> 128
        "w_lin_cond": u(ks[7], (256, 128), 1.0 / np.sqrt(256)),
        "b_lin_cond": u(ks[8], (1, 128), 1.0 / np.sqrt(256)),
        # lin_context: 128 -> 64
        "w_lin_ctx":  u(ks[9], (128, 64), 1.0 / np.sqrt(128)),
        "b_lin_ctx":  u(ks[10], (1, 64), 1.0 / np.sqrt(128)),
        # lin: 192 -> 1, split into the 128-part and the 64-part of cat([a,b])
        "w_lin_a":    u(ks[11], (128, 1), 1.0 / np.sqrt(192)),
        "w_lin_b":    u(ks[12], (64, 1), 1.0 / np.sqrt(192)),
        "b_lin":      u(ks[13], (1, 1), 1.0 / np.sqrt(192)),
    }


if __name__ == "__main__":
    key = jax.random.PRNGKey(0)
    pkey, k1, k2, k3 = jax.random.split(key, 4)
    params = init_params(pkey)

    B, Tc, Tt = 2, 8, 6
    type_ids = jax.random.randint(k1, (B, Tc), 0, 17, jnp.int32)   # (B, Tc)
    prop = jax.random.normal(k2, (B, Tc, 100), jnp.float32)        # (B, Tc, 100)
    tok = jax.random.normal(k3, (B, Tt, 100), jnp.float32)         # (B, Tt, 100)
    pad_lens = jnp.array([8, 5], jnp.int32)
    pad_token_lens = jnp.array([6, 3], jnp.int32)

    out = lstm_net_forward(params, type_ids, prop, tok, pad_lens, pad_token_lens)
    out = jax.block_until_ready(out)
    assert out.shape == (B, 1) and out.dtype == jnp.float32

    ref = jax.block_until_ready(
        _forward_ref(params, type_ids, prop, tok, pad_lens, pad_token_lens))
    np.testing.assert_allclose(np.asarray(out), np.asarray(ref),
                               atol=5e-3, rtol=0)

    print("KERNEL_OK")
</pallas_src>

<mosaic_0001>
module attributes {stable_mosaic.version = 11 : i64} {
  func.func @_fused_kernel(%arg0: memref<8x1xi32, #tpu.memory_space<vmem>>, %arg1: memref<8x1xi32, #tpu.memory_space<vmem>>, %arg2: memref<64x128xf32, #tpu.memory_space<vmem>>, %arg3: memref<48x128xf32, #tpu.memory_space<vmem>>, %arg4: memref<128x1024xf32, #tpu.memory_space<vmem>>, %arg5: memref<256x1024xbf16, #tpu.memory_space<vmem>>, %arg6: memref<1x1024xf32, #tpu.memory_space<vmem>>, %arg7: memref<128x512xf32, #tpu.memory_space<vmem>>, %arg8: memref<128x512xbf16, #tpu.memory_space<vmem>>, %arg9: memref<1x512xf32, #tpu.memory_space<vmem>>, %arg10: memref<256x128xf32, #tpu.memory_space<vmem>>, %arg11: memref<1x128xf32, #tpu.memory_space<vmem>>, %arg12: memref<128x64xf32, #tpu.memory_space<vmem>>, %arg13: memref<1x64xf32, #tpu.memory_space<vmem>>, %arg14: memref<1x128xf32, #tpu.memory_space<vmem>>, %arg15: memref<1x64xf32, #tpu.memory_space<vmem>>, %arg16: memref<1x1xf32, #tpu.memory_space<vmem>>, %arg17: memref<8x1xf32, #tpu.memory_space<vmem>>, %arg18: memref<64x1024xf32, #tpu.memory_space<vmem>>, %arg19: memref<48x512xf32, #tpu.memory_space<vmem>>) attributes {dimension_semantics = [], scalar_prefetch = 0 : i64, scratch_operands = 2 : i64, tpu.core_type = #tpu.core_type<tc>} {
    %c0 = arith.constant 0 : index
    %c0_0 = arith.constant 0 : index
    %0 = vector.load %arg2[%c0, %c0_0] : memref<64x128xf32, #tpu.memory_space<vmem>>, vector<64x128xf32>
    %c0_1 = arith.constant 0 : index
    %c0_2 = arith.constant 0 : index
    %1 = vector.load %arg4[%c0_1, %c0_2] : memref<128x1024xf32, #tpu.memory_space<vmem>>, vector<128x1024xf32>
    %cst = arith.constant dense<0.000000e+00> : vector<64x1024xf32>
    %2 = tpu.matmul %0, %1, %cst {dimension_numbers = #tpu.dot_dimension_numbers<[1], [0], [0], [1], [0, 0, 1, 1], [], []>} : vector<64x128xf32>, vector<128x1024xf32>, vector<64x1024xf32> -> vector<64x1024xf32>
    %c0_3 = arith.constant 0 : index
    %c0_4 = arith.constant 0 : index
    %3 = vector.load %arg6[%c0_3, %c0_4] : memref<1x1024xf32, #tpu.memory_space<vmem>>, vector<1x1024xf32>
    %4 = vector.broadcast %3 : vector<1x1024xf32> to vector<64x1024xf32>
    %5 = arith.addf %2, %4 : vector<64x1024xf32>
    %c0_5 = arith.constant 0 : index
    %c0_6 = arith.constant 0 : index
    %6 = vector.load %arg18[%c0_5, %c0_6] : memref<64x1024xf32, #tpu.memory_space<vmem>>, vector<64x1024xf32>
    tpu.vector_store %arg18[%c0_5, %c0_6], %5 {strides = array<i32>} : memref<64x1024xf32, #tpu.memory_space<vmem>>, vector<64x1024xf32>,
    %c0_7 = arith.constant 0 : index
    %c0_8 = arith.constant 0 : index
    %7 = vector.load %arg3[%c0_7, %c0_8] : memref<48x128xf32, #tpu.memory_space<vmem>>, vector<48x128xf32>
    %c0_9 = arith.constant 0 : index
    %c0_10 = arith.constant 0 : index
    %8 = vector.load %arg7[%c0_9, %c0_10] : memref<128x512xf32, #tpu.memory_space<vmem>>, vector<128x512xf32>
    %cst_11 = arith.constant dense<0.000000e+00> : vector<48x512xf32>
    %9 = tpu.matmul %7, %8, %cst_11 {dimension_numbers = #tpu.dot_dimension_numbers<[1], [0], [0], [1], [0, 0, 1, 1], [], []>} : vector<48x128xf32>, vector<128x512xf32>, vector<48x512xf32> -> vector<48x512xf32>
    %c0_12 = arith.constant 0 : index
    %c0_13 = arith.constant 0 : index
    %10 = vector.load %arg9[%c0_12, %c0_13] : memref<1x512xf32, #tpu.memory_space<vmem>>, vector<1x512xf32>
    %11 = vector.broadcast %10 : vector<1x512xf32> to vector<48x512xf32>
    %12 = arith.addf %9, %11 : vector<48x512xf32>
    %c0_14 = arith.constant 0 : index
    %c0_15 = arith.constant 0 : index
    %13 = vector.load %arg19[%c0_14, %c0_15] : memref<48x512xf32, #tpu.memory_space<vmem>>, vector<48x512xf32>
    tpu.vector_store %arg19[%c0_14, %c0_15], %12 {strides = array<i32>} : memref<48x512xf32, #tpu.memory_space<vmem>>, vector<48x512xf32>,
    %c0_16 = arith.constant 0 : index
    %c0_17 = arith.constant 0 : index
    %14 = vector.load %arg0[%c0_16, %c0_17] : memref<8x1xi32, #tpu.memory_space<vmem>>, vector<8x1xi32>
    %c0_18 = arith.constant 0 : index
    %c0_19 = arith.constant 0 : index
    %15 = vector.load %arg1[%c0_18, %c0_19] : memref<8x1xi32, #tpu.memory_space<vmem>>, vector<8x1xi32>
    %cst_20 = arith.constant 0.000000e+00 : f32
    %16 = vector.broadcast %cst_20 : f32 to vector<8x256xf32>
    %cst_21 = arith.constant 0.000000e+00 : f32
    %17 = vector.broadcast %cst_21 : f32 to vector<8x128xf32>
    %c0_22 = arith.constant 0 : index
    %c0_23 = arith.constant 0 : index
    %18 = vector.load %arg18[%c0_22, %c0_23] : memref<64x1024xf32, #tpu.memory_space<vmem>>, vector<8x1024xf32>
    %19 = arith.truncf %16 : vector<8x256xf32> to vector<8x256xbf16>
    %c0_24 = arith.constant 0 : index
    %c0_25 = arith.constant 0 : index
    %20 = vector.load %arg5[%c0_24, %c0_25] : memref<256x1024xbf16, #tpu.memory_space<vmem>>, vector<256x1024xbf16>
    %cst_26 = arith.constant dense<0.000000e+00> : vector<8x1024xf32>
    %21 = tpu.matmul %19, %20, %cst_26 {dimension_numbers = #tpu.dot_dimension_numbers<[1], [0], [0], [1], [0, 0, 1, 1], [], []>} : vector<8x256xbf16>, vector<256x1024xbf16>, vector<8x1024xf32> -> vector<8x1024xf32>
    %22 = arith.addf %18, %21 : vector<8x1024xf32>
    %23 = vector.extract_strided_slice %22 {offsets = [0, 0], sizes = [8, 768], strides = [1, 1]} : vector<8x1024xf32> to vector<8x768xf32>
    %24 = arith.negf %23 : vector<8x768xf32>
    %25 = math.exp %24 : vector<8x768xf32>
    %cst_27 = arith.constant 1.000000e+00 : f32
    %26 = vector.broadcast %cst_27 : f32 to vector<8x768xf32>
    %27 = arith.addf %26, %25 : vector<8x768xf32>
    %28 = arith.divf %26, %27 : vector<8x768xf32>
    %29 = vector.extract_strided_slice %22 {offsets = [0, 768], sizes = [8, 256], strides = [1, 1]} : vector<8x1024xf32> to vector<8x256xf32>
    %30 = math.tanh %29 : vector<8x256xf32>
    %31 = vector.extract_strided_slice %28 {offsets = [0, 256], sizes = [8, 256], strides = [1, 1]} : vector<8x768xf32> to vector<8x256xf32>
    %32 = arith.mulf %31, %16 : vector<8x256xf32>
    %33 = vector.extract_strided_slice %28 {offsets = [0, 0], sizes = [8, 256], strides = [1, 1]} : vector<8x768xf32> to vector<8x256xf32>
    %34 = arith.mulf %33, %30 : vector<8x256xf32>
    %35 = arith.addf %32, %34 : vector<8x256xf32>
    %36 = vector.extract_strided_slice %28 {offsets = [0, 512], sizes = [8, 256], strides = [1, 1]} : vector<8x768xf32> to vector<8x256xf32>
    %37 = math.tanh %35 : vector<8x256xf32>
    %38 = arith.mulf %36, %37 : vector<8x256xf32>
    %c1_i32 = arith.constant 1 : i32
    %39 = vector.broadcast %c1_i32 : i32 to vector<8x1xi32>
    %40 = arith.cmpi eq, %14, %39 : vector<8x1xi32>
    %41 = vector.shape_cast %40 : vector<8x1xi1> to vector<8x1xi1>
    %42 = vector.broadcast %41 : vector<8x1xi1> to vector<8x256xi1>
    %43 = arith.select %42, %38, %16 : vector<8x256xi1>, vector<8x256xf32>
    %c0_28 = arith.constant 0 : index
    %c0_29 = arith.constant 0 : index
    %44 = vector.load %arg19[%c0_28, %c0_29] : memref<48x512xf32, #tpu.memory_space<vmem>>, vector<8x512xf32>
    %45 = arith.truncf %17 : vector<8x128xf32> to vector<8x128xbf16>
    %c0_30 = arith.constant 0 : index
    %c0_31 = arith.constant 0 : index
    %46 = vector.load %arg8[%c0_30, %c0_31] : memref<128x512xbf16, #tpu.memory_space<vmem>>, vector<128x512xbf16>
    %cst_32 = arith.constant dense<0.000000e+00> : vector<8x512xf32>
    %47 = tpu.matmul %45, %46, %cst_32 {dimension_numbers = #tpu.dot_dimension_numbers<[1], [0], [0], [1], [0, 0, 1, 1], [], []>} : vector<8x128xbf16>, vector<128x512xbf16>, vector<8x512xf32> -> vector<8x512xf32>
    %48 = arith.addf %44, %47 : vector<8x512xf32>
    %49 = vector.extract_strided_slice %48 {offsets = [0, 0], sizes = [8, 384], strides = [1, 1]} : vector<8x512xf32> to vector<8x384xf32>
    %50 = arith.negf %49 : vector<8x384xf32>
    %51 = math.exp %50 : vector<8x384xf32>
    %cst_33 = arith.constant 1.000000e+00 : f32
    %52 = vector.broadcast %cst_33 : f32 to vector<8x384xf32>
    %53 = arith.addf %52, %51 : vector<8x384xf32>
    %54 = arith.divf %52, %53 : vector<8x384xf32>
    %55 = vector.extract_strided_slice %48 {offsets = [0, 384], sizes = [8, 128], strides = [1, 1]} : vector<8x512xf32> to vector<8x128xf32>
    %56 = math.tanh %55 : vector<8x128xf32>
    %57 = vector.extract_strided_slice %54 {offsets = [0, 128], sizes = [8, 128], strides = [1, 1]} : vector<8x384xf32> to vector<8x128xf32>
    %58 = arith.mulf %57, %17 : vector<8x128xf32>
    %59 = vector.extract_strided_slice %54 {offsets = [0, 0], sizes = [8, 128], strides = [1, 1]} : vector<8x384xf32> to vector<8x128xf32>
    %60 = arith.mulf %59, %56 : vector<8x128xf32>
    %61 = arith.addf %58, %60 : vector<8x128xf32>
    %62 = vector.extract_strided_slice %54 {offsets = [0, 256], sizes = [8, 128], strides = [1, 1]} : vector<8x384xf32> to vector<8x128xf32>
    %63 = math.tanh %61 : vector<8x128xf32>
    %64 = arith.mulf %62, %63 : vector<8x128xf32>
    %c1_i32_34 = arith.constant 1 : i32
    %65 = vector.broadcast %c1_i32_34 : i32 to vector<8x1xi32>
    %66 = arith.cmpi eq, %15, %65 : vector<8x1xi32>
    %67 = vector.shape_cast %66 : vector<8x1xi1> to vector<8x1xi1>
    %68 = vector.broadcast %67 : vector<8x1xi1> to vector<8x128xi1>
    %69 = arith.select %68, %64, %17 : vector<8x128xi1>, vector<8x128xf32>
    %c8 = arith.constant 8 : index
    %c0_35 = arith.constant 0 : index
    %70 = vector.load %arg18[%c8, %c0_35] : memref<64x1024xf32, #tpu.memory_space<vmem>>, vector<8x1024xf32>
    %71 = arith.truncf %38 : vector<8x256xf32> to vector<8x256xbf16>
    %c0_36 = arith.constant 0 : index
    %c0_37 = arith.constant 0 : index
    %72 = vector.load %arg5[%c0_36, %c0_37] : memref<256x1024xbf16, #tpu.memory_space<vmem>>, vector<256x1024xbf16>
    %cst_38 = arith.constant dense<0.000000e+00> : vector<8x1024xf32>
    %73 = tpu.matmul %71, %72, %cst_38 {dimension_numbers = #tpu.dot_dimension_numbers<[1], [0], [0], [1], [0, 0, 1, 1], [], []>} : vector<8x256xbf16>, vector<256x1024xbf16>, vector<8x1024xf32> -> vector<8x1024xf32>
    %74 = arith.addf %70, %73 : vector<8x1024xf32>
    %75 = vector.extract_strided_slice %74 {offsets = [0, 0], sizes = [8, 768], strides = [1, 1]} : vector<8x1024xf32> to vector<8x768xf32>
    %76 = arith.negf %75 : vector<8x768xf32>
    %77 = math.exp %76 : vector<8x768xf32>
    %cst_39 = arith.constant 1.000000e+00 : f32
    %78 = vector.broadcast %cst_39 : f32 to vector<8x768xf32>
    %79 = arith.addf %78, %77 : vector<8x768xf32>
    %80 = arith.divf %78, %79 : vector<8x768xf32>
    %81 = vector.extract_strided_slice %74 {offsets = [0, 768], sizes = [8, 256], strides = [1, 1]} : vector<8x1024xf32> to vector<8x256xf32>
    %82 = math.tanh %81 : vector<8x256xf32>
    %83 = vector.extract_strided_slice %80 {offsets = [0, 256], sizes = [8, 256], strides = [1, 1]} : vector<8x768xf32> to vector<8x256xf32>
    %84 = arith.mulf %83, %35 : vector<8x256xf32>
    %85 = vector.extract_strided_slice %80 {offsets = [0, 0], sizes = [8, 256], strides = [1, 1]} : vector<8x768xf32> to vector<8x256xf32>
    %86 = arith.mulf %85, %82 : vector<8x256xf32>
    %87 = arith.addf %84, %86 : vector<8x256xf32>
    %88 = vector.extract_strided_slice %80 {offsets = [0, 512], sizes = [8, 256], strides = [1, 1]} : vector<8x768xf32> to vector<8x256xf32>
    %89 = math.tanh %87 : vector<8x256xf32>
    %90 = arith.mulf %88, %89 : vector<8x256xf32>
    %c2_i32 = arith.constant 2 : i32
    %91 = vector.broadcast %c2_i32 : i32 to vector<8x1xi32>
    %92 = arith.cmpi eq, %14, %91 : vector<8x1xi32>
    %93 = vector.shape_cast %92 : vector<8x1xi1> to vector<8x1xi1>
    %94 = vector.broadcast %93 : vector<8x1xi1> to vector<8x256xi1>
    %95 = arith.select %94, %90, %43 : vector<8x256xi1>, vector<8x256xf32>
    %c8_40 = arith.constant 8 : index
    %c0_41 = arith.constant 0 : index
    %96 = vector.load %arg19[%c8_40, %c0_41] : memref<48x512xf32, #tpu.memory_space<vmem>>, vector<8x512xf32>
    %97 = arith.truncf %64 : vector<8x128xf32> to vector<8x128xbf16>
    %c0_42 = arith.constant 0 : index
    %c0_43 = arith.constant 0 : index
    %98 = vector.load %arg8[%c0_42, %c0_43] : memref<128x512xbf16, #tpu.memory_space<vmem>>, vector<128x512xbf16>
    %cst_44 = arith.constant dense<0.000000e+00> : vector<8x512xf32>
    %99 = tpu.matmul %97, %98, %cst_44 {dimension_numbers = #tpu.dot_dimension_numbers<[1], [0], [0], [1], [0, 0, 1, 1], [], []>} : vector<8x128xbf16>, vector<128x512xbf16>, vector<8x512xf32> -> vector<8x512xf32>
    %100 = arith.addf %96, %99 : vector<8x512xf32>
    %101 = vector.extract_strided_slice %100 {offsets = [0, 0], sizes = [8, 384], strides = [1, 1]} : vector<8x512xf32> to vector<8x384xf32>
    %102 = arith.negf %101 : vector<8x384xf32>
    %103 = math.exp %102 : vector<8x384xf32>
    %cst_45 = arith.constant 1.000000e+00 : f32
    %104 = vector.broadcast %cst_45 : f32 to vector<8x384xf32>
    %105 = arith.addf %104, %103 : vector<8x384xf32>
    %106 = arith.divf %104, %105 : vector<8x384xf32>
    %107 = vector.extract_strided_slice %100 {offsets = [0, 384], sizes = [8, 128], strides = [1, 1]} : vector<8x512xf32> to vector<8x128xf32>
    %108 = math.tanh %107 : vector<8x128xf32>
    %109 = vector.extract_strided_slice %106 {offsets = [0, 128], sizes = [8, 128], strides = [1, 1]} : vector<8x384xf32> to vector<8x128xf32>
    %110 = arith.mulf %109, %61 : vector<8x128xf32>
    %111 = vector.extract_strided_slice %106 {offsets = [0, 0], sizes = [8, 128], strides = [1, 1]} : vector<8x384xf32> to vector<8x128xf32>
    %112 = arith.mulf %111, %108 : vector<8x128xf32>
    %113 = arith.addf %110, %112 : vector<8x128xf32>
    %114 = vector.extract_strided_slice %106 {offsets = [0, 256], sizes = [8, 128], strides = [1, 1]} : vector<8x384xf32> to vector<8x128xf32>
    %115 = math.tanh %113 : vector<8x128xf32>
    %116 = arith.mulf %114, %115 : vector<8x128xf32>
    %c2_i32_46 = arith.constant 2 : i32
    %117 = vector.broadcast %c2_i32_46 : i32 to vector<8x1xi32>
    %118 = arith.cmpi eq, %15, %117 : vector<8x1xi32>
    %119 = vector.shape_cast %118 : vector<8x1xi1> to vector<8x1xi1>
    %120 = vector.broadcast %119 : vector<8x1xi1> to vector<8x128xi1>
    %121 = arith.select %120, %116, %69 : vector<8x128xi1>, vector<8x128xf32>
    %c16 = arith.constant 16 : index
    %c0_47 = arith.constant 0 : index
    %122 = vector.load %arg18[%c16, %c0_47] : memref<64x1024xf32, #tpu.memory_space<vmem>>, vector<8x1024xf32>
    %123 = arith.truncf %90 : vector<8x256xf32> to vector<8x256xbf16>
    %c0_48 = arith.constant 0 : index
    %c0_49 = arith.constant 0 : index
    %124 = vector.load %arg5[%c0_48, %c0_49] : memref<256x1024xbf16, #tpu.memory_space<vmem>>, vector<256x1024xbf16>
    %cst_50 = arith.constant dense<0.000000e+00> : vector<8x1024xf32>
    %125 = tpu.matmul %123, %124, %cst_50 {dimension_numbers = #tpu.dot_dimension_numbers<[1], [0], [0], [1], [0, 0, 1, 1], [], []>} : vector<8x256xbf16>, vector<256x1024xbf16>, vector<8x1024xf32> -> vector<8x1024xf32>
    %126 = arith.addf %122, %125 : vector<8x1024xf32>
    %127 = vector.extract_strided_slice %126 {offsets = [0, 0], sizes = [8, 768], strides = [1, 1]} : vector<8x1024xf32> to vector<8x768xf32>
    %128 = arith.negf %127 : vector<8x768xf32>
    %129 = math.exp %128 : vector<8x768xf32>
    %cst_51 = arith.constant 1.000000e+00 : f32
    %130 = vector.broadcast %cst_51 : f32 to vector<8x768xf32>
    %131 = arith.addf %130, %129 : vector<8x768xf32>
    %132 = arith.divf %130, %131 : vector<8x768xf32>
    %133 = vector.extract_strided_slice %126 {offsets = [0, 768], sizes = [8, 256], strides = [1, 1]} : vector<8x1024xf32> to vector<8x256xf32>
    %134 = math.tanh %133 : vector<8x256xf32>
    %135 = vector.extract_strided_slice %132 {offsets = [0, 256], sizes = [8, 256], strides = [1, 1]} : vector<8x768xf32> to vector<8x256xf32>
    %136 = arith.mulf %135, %87 : vector<8x256xf32>
    %137 = vector.extract_strided_slice %132 {offsets = [0, 0], sizes = [8, 256], strides = [1, 1]} : vector<8x768xf32> to vector<8x256xf32>
    %138 = arith.mulf %137, %134 : vector<8x256xf32>
    %139 = arith.addf %136, %138 : vector<8x256xf32>
    %140 = vector.extract_strided_slice %132 {offsets = [0, 512], sizes = [8, 256], strides = [1, 1]} : vector<8x768xf32> to vector<8x256xf32>
    %141 = math.tanh %139 : vector<8x256xf32>
    %142 = arith.mulf %140, %141 : vector<8x256xf32>
    %c3_i32 = arith.constant 3 : i32
    %143 = vector.broadcast %c3_i32 : i32 to vector<8x1xi32>
    %144 = arith.cmpi eq, %14, %143 : vector<8x1xi32>
    %145 = vector.shape_cast %144 : vector<8x1xi1> to vector<8x1xi1>
    %146 = vector.broadcast %145 : vector<8x1xi1> to vector<8x256xi1>
    %147 = arith.select %146, %142, %95 : vector<8x256xi1>, vector<8x256xf32>
    %c16_52 = arith.constant 16 : index
    %c0_53 = arith.constant 0 : index
    %148 = vector.load %arg19[%c16_52, %c0_53] : memref<48x512xf32, #tpu.memory_space<vmem>>, vector<8x512xf32>
    %149 = arith.truncf %116 : vector<8x128xf32> to vector<8x128xbf16>
    %c0_54 = arith.constant 0 : index
    %c0_55 = arith.constant 0 : index
    %150 = vector.load %arg8[%c0_54, %c0_55] : memref<128x512xbf16, #tpu.memory_space<vmem>>, vector<128x512xbf16>
    %cst_56 = arith.constant dense<0.000000e+00> : vector<8x512xf32>
    %151 = tpu.matmul %149, %150, %cst_56 {dimension_numbers = #tpu.dot_dimension_numbers<[1], [0], [0], [1], [0, 0, 1, 1], [], []>} : vector<8x128xbf16>, vector<128x512xbf16>, vector<8x512xf32> -> vector<8x512xf32>
    %152 = arith.addf %148, %151 : vector<8x512xf32>
    %153 = vector.extract_strided_slice %152 {offsets = [0, 0], sizes = [8, 384], strides = [1, 1]} : vector<8x512xf32> to vector<8x384xf32>
    %154 = arith.negf %153 : vector<8x384xf32>
    %155 = math.exp %154 : vector<8x384xf32>
    %cst_57 = arith.constant 1.000000e+00 : f32
    %156 = vector.broadcast %cst_57 : f32 to vector<8x384xf32>
    %157 = arith.addf %156, %155 : vector<8x384xf32>
    %158 = arith.divf %156, %157 : vector<8x384xf32>
    %159 = vector.extract_strided_slice %152 {offsets = [0, 384], sizes = [8, 128], strides = [1, 1]} : vector<8x512xf32> to vector<8x128xf32>
    %160 = math.tanh %159 : vector<8x128xf32>
    %161 = vector.extract_strided_slice %158 {offsets = [0, 128], sizes = [8, 128], strides = [1, 1]} : vector<8x384xf32> to vector<8x128xf32>
    %162 = arith.mulf %161, %113 : vector<8x128xf32>
    %163 = vector.extract_strided_slice %158 {offsets = [0, 0], sizes = [8, 128], strides = [1, 1]} : vector<8x384xf32> to vector<8x128xf32>
    %164 = arith.mulf %163, %160 : vector<8x128xf32>
    %165 = arith.addf %162, %164 : vector<8x128xf32>
    %166 = vector.extract_strided_slice %158 {offsets = [0, 256], sizes = [8, 128], strides = [1, 1]} : vector<8x384xf32> to vector<8x128xf32>
    %167 = math.tanh %165 : vector<8x128xf32>
    %168 = arith.mulf %166, %167 : vector<8x128xf32>
    %c3_i32_58 = arith.constant 3 : i32
    %169 = vector.broadcast %c3_i32_58 : i32 to vector<8x1xi32>
    %170 = arith.cmpi eq, %15, %169 : vector<8x1xi32>
    %171 = vector.shape_cast %170 : vector<8x1xi1> to vector<8x1xi1>
    %172 = vector.broadcast %171 : vector<8x1xi1> to vector<8x128xi1>
    %173 = arith.select %172, %168, %121 : vector<8x128xi1>, vector<8x128xf32>
    %c24 = arith.constant 24 : index
    %c0_59 = arith.constant 0 : index
    %174 = vector.load %arg18[%c24, %c0_59] : memref<64x1024xf32, #tpu.memory_space<vmem>>, vector<8x1024xf32>
    %175 = arith.truncf %142 : vector<8x256xf32> to vector<8x256xbf16>
    %c0_60 = arith.constant 0 : index
    %c0_61 = arith.constant 0 : index
    %176 = vector.load %arg5[%c0_60, %c0_61] : memref<256x1024xbf16, #tpu.memory_space<vmem>>, vector<256x1024xbf16>
    %cst_62 = arith.constant dense<0.000000e+00> : vector<8x1024xf32>
    %177 = tpu.matmul %175, %176, %cst_62 {dimension_numbers = #tpu.dot_dimension_numbers<[1], [0], [0], [1], [0, 0, 1, 1], [], []>} : vector<8x256xbf16>, vector<256x1024xbf16>, vector<8x1024xf32> -> vector<8x1024xf32>
    %178 = arith.addf %174, %177 : vector<8x1024xf32>
    %179 = vector.extract_strided_slice %178 {offsets = [0, 0], sizes = [8, 768], strides = [1, 1]} : vector<8x1024xf32> to vector<8x768xf32>
    %180 = arith.negf %179 : vector<8x768xf32>
    %181 = math.exp %180 : vector<8x768xf32>
    %cst_63 = arith.constant 1.000000e+00 : f32
    %182 = vector.broadcast %cst_63 : f32 to vector<8x768xf32>
    %183 = arith.addf %182, %181 : vector<8x768xf32>
    %184 = arith.divf %182, %183 : vector<8x768xf32>
    %185 = vector.extract_strided_slice %178 {offsets = [0, 768], sizes = [8, 256], strides = [1, 1]} : vector<8x1024xf32> to vector<8x256xf32>
    %186 = math.tanh %185 : vector<8x256xf32>
    %187 = vector.extract_strided_slice %184 {offsets = [0, 256], sizes = [8, 256], strides = [1, 1]} : vector<8x768xf32> to vector<8x256xf32>
    %188 = arith.mulf %187, %139 : vector<8x256xf32>
    %189 = vector.extract_strided_slice %184 {offsets = [0, 0], sizes = [8, 256], strides = [1, 1]} : vector<8x768xf32> to vector<8x256xf32>
    %190 = arith.mulf %189, %186 : vector<8x256xf32>
    %191 = arith.addf %188, %190 : vector<8x256xf32>
    %192 = vector.extract_strided_slice %184 {offsets = [0, 512], sizes = [8, 256], strides = [1, 1]} : vector<8x768xf32> to vector<8x256xf32>
    %193 = math.tanh %191 : vector<8x256xf32>
    %194 = arith.mulf %192, %193 : vector<8x256xf32>
    %c4_i32 = arith.constant 4 : i32
    %195 = vector.broadcast %c4_i32 : i32 to vector<8x1xi32>
    %196 = arith.cmpi eq, %14, %195 : vector<8x1xi32>
    %197 = vector.shape_cast %196 : vector<8x1xi1> to vector<8x1xi1>
    %198 = vector.broadcast %197 : vector<8x1xi1> to vector<8x256xi1>
    %199 = arith.select %198, %194, %147 : vector<8x256xi1>, vector<8x256xf32>
    %c24_64 = arith.constant 24 : index
    %c0_65 = arith.constant 0 : index
    %200 = vector.load %arg19[%c24_64, %c0_65] : memref<48x512xf32, #tpu.memory_space<vmem>>, vector<8x512xf32>
    %201 = arith.truncf %168 : vector<8x128xf32> to vector<8x128xbf16>
    %c0_66 = arith.constant 0 : index
    %c0_67 = arith.constant 0 : index
    %202 = vector.load %arg8[%c0_66, %c0_67] : memref<128x512xbf16, #tpu.memory_space<vmem>>, vector<128x512xbf16>
    %cst_68 = arith.constant dense<0.000000e+00> : vector<8x512xf32>
    %203 = tpu.matmul %201, %202, %cst_68 {dimension_numbers = #tpu.dot_dimension_numbers<[1], [0], [0], [1], [0, 0, 1, 1], [], []>} : vector<8x128xbf16>, vector<128x512xbf16>, vector<8x512xf32> -> vector<8x512xf32>
    %204 = arith.addf %200, %203 : vector<8x512xf32>
    %205 = vector.extract_strided_slice %204 {offsets = [0, 0], sizes = [8, 384], strides = [1, 1]} : vector<8x512xf32> to vector<8x384xf32>
    %206 = arith.negf %205 : vector<8x384xf32>
    %207 = math.exp %206 : vector<8x384xf32>
    %cst_69 = arith.constant 1.000000e+00 : f32
    %208 = vector.broadcast %cst_69 : f32 to vector<8x384xf32>
    %209 = arith.addf %208, %207 : vector<8x384xf32>
    %210 = arith.divf %208, %209 : vector<8x384xf32>
    %211 = vector.extract_strided_slice %204 {offsets = [0, 384], sizes = [8, 128], strides = [1, 1]} : vector<8x512xf32> to vector<8x128xf32>
    %212 = math.tanh %211 : vector<8x128xf32>
    %213 = vector.extract_strided_slice %210 {offsets = [0, 128], sizes = [8, 128], strides = [1, 1]} : vector<8x384xf32> to vector<8x128xf32>
    %214 = arith.mulf %213, %165 : vector<8x128xf32>
    %215 = vector.extract_strided_slice %210 {offsets = [0, 0], sizes = [8, 128], strides = [1, 1]} : vector<8x384xf32> to vector<8x128xf32>
    %216 = arith.mulf %215, %212 : vector<8x128xf32>
    %217 = arith.addf %214, %216 : vector<8x128xf32>
    %218 = vector.extract_strided_slice %210 {offsets = [0, 256], sizes = [8, 128], strides = [1, 1]} : vector<8x384xf32> to vector<8x128xf32>
    %219 = math.tanh %217 : vector<8x128xf32>
    %220 = arith.mulf %218, %219 : vector<8x128xf32>
    %c4_i32_70 = arith.constant 4 : i32
    %221 = vector.broadcast %c4_i32_70 : i32 to vector<8x1xi32>
    %222 = arith.cmpi eq, %15, %221 : vector<8x1xi32>
    %223 = vector.shape_cast %222 : vector<8x1xi1> to vector<8x1xi1>
    %224 = vector.broadcast %223 : vector<8x1xi1> to vector<8x128xi1>
    %225 = arith.select %224, %220, %173 : vector<8x128xi1>, vector<8x128xf32>
    %c32 = arith.constant 32 : index
    %c0_71 = arith.constant 0 : index
    %226 = vector.load %arg18[%c32, %c0_71] : memref<64x1024xf32, #tpu.memory_space<vmem>>, vector<8x1024xf32>
    %227 = arith.truncf %194 : vector<8x256xf32> to vector<8x256xbf16>
    %c0_72 = arith.constant 0 : index
    %c0_73 = arith.constant 0 : index
    %228 = vector.load %arg5[%c0_72, %c0_73] : memref<256x1024xbf16, #tpu.memory_space<vmem>>, vector<256x1024xbf16>
    %cst_74 = arith.constant dense<0.000000e+00> : vector<8x1024xf32>
    %229 = tpu.matmul %227, %228, %cst_74 {dimension_numbers = #tpu.dot_dimension_numbers<[1], [0], [0], [1], [0, 0, 1, 1], [], []>} : vector<8x256xbf16>, vector<256x1024xbf16>, vector<8x1024xf32> -> vector<8x1024xf32>
    %230 = arith.addf %226, %229 : vector<8x1024xf32>
    %231 = vector.extract_strided_slice %230 {offsets = [0, 0], sizes = [8, 768], strides = [1, 1]} : vector<8x1024xf32> to vector<8x768xf32>
    %232 = arith.negf %231 : vector<8x768xf32>
    %233 = math.exp %232 : vector<8x768xf32>
    %cst_75 = arith.constant 1.000000e+00 : f32
    %234 = vector.broadcast %cst_75 : f32 to vector<8x768xf32>
    %235 = arith.addf %234, %233 : vector<8x768xf32>
    %236 = arith.divf %234, %235 : vector<8x768xf32>
    %237 = vector.extract_strided_slice %230 {offsets = [0, 768], sizes = [8, 256], strides = [1, 1]} : vector<8x1024xf32> to vector<8x256xf32>
    %238 = math.tanh %237 : vector<8x256xf32>
    %239 = vector.extract_strided_slice %236 {offsets = [0, 256], sizes = [8, 256], strides = [1, 1]} : vector<8x768xf32> to vector<8x256xf32>
    %240 = arith.mulf %239, %191 : vector<8x256xf32>
    %241 = vector.extract_strided_slice %236 {offsets = [0, 0], sizes = [8, 256], strides = [1, 1]} : vector<8x768xf32> to vector<8x256xf32>
    %242 = arith.mulf %241, %238 : vector<8x256xf32>
    %243 = arith.addf %240, %242 : vector<8x256xf32>
    %244 = vector.extract_strided_slice %236 {offsets = [0, 512], sizes = [8, 256], strides = [1, 1]} : vector<8x768xf32> to vector<8x256xf32>
    %245 = math.tanh %243 : vector<8x256xf32>
    %246 = arith.mulf %244, %245 : vector<8x256xf32>
    %c5_i32 = arith.constant 5 : i32
    %247 = vector.broadcast %c5_i32 : i32 to vector<8x1xi32>
    %248 = arith.cmpi eq, %14, %247 : vector<8x1xi32>
    %249 = vector.shape_cast %248 : vector<8x1xi1> to vector<8x1xi1>
    %250 = vector.broadcast %249 : vector<8x1xi1> to vector<8x256xi1>
    %251 = arith.select %250, %246, %199 : vector<8x256xi1>, vector<8x256xf32>
    %c32_76 = arith.constant 32 : index
    %c0_77 = arith.constant 0 : index
    %252 = vector.load %arg19[%c32_76, %c0_77] : memref<48x512xf32, #tpu.memory_space<vmem>>, vector<8x512xf32>
    %253 = arith.truncf %220 : vector<8x128xf32> to vector<8x128xbf16>
    %c0_78 = arith.constant 0 : index
    %c0_79 = arith.constant 0 : index
    %254 = vector.load %arg8[%c0_78, %c0_79] : memref<128x512xbf16, #tpu.memory_space<vmem>>, vector<128x512xbf16>
    %cst_80 = arith.constant dense<0.000000e+00> : vector<8x512xf32>
    %255 = tpu.matmul %253, %254, %cst_80 {dimension_numbers = #tpu.dot_dimension_numbers<[1], [0], [0], [1], [0, 0, 1, 1], [], []>} : vector<8x128xbf16>, vector<128x512xbf16>, vector<8x512xf32> -> vector<8x512xf32>
    %256 = arith.addf %252, %255 : vector<8x512xf32>
    %257 = vector.extract_strided_slice %256 {offsets = [0, 0], sizes = [8, 384], strides = [1, 1]} : vector<8x512xf32> to vector<8x384xf32>
    %258 = arith.negf %257 : vector<8x384xf32>
    %259 = math.exp %258 : vector<8x384xf32>
    %cst_81 = arith.constant 1.000000e+00 : f32
    %260 = vector.broadcast %cst_81 : f32 to vector<8x384xf32>
    %261 = arith.addf %260, %259 : vector<8x384xf32>
    %262 = arith.divf %260, %261 : vector<8x384xf32>
    %263 = vector.extract_strided_slice %256 {offsets = [0, 384], sizes = [8, 128], strides = [1, 1]} : vector<8x512xf32> to vector<8x128xf32>
    %264 = math.tanh %263 : vector<8x128xf32>
    %265 = vector.extract_strided_slice %262 {offsets = [0, 128], sizes = [8, 128], strides = [1, 1]} : vector<8x384xf32> to vector<8x128xf32>
    %266 = arith.mulf %265, %217 : vector<8x128xf32>
    %267 = vector.extract_strided_slice %262 {offsets = [0, 0], sizes = [8, 128], strides = [1, 1]} : vector<8x384xf32> to vector<8x128xf32>
    %268 = arith.mulf %267, %264 : vector<8x128xf32>
    %269 = arith.addf %266, %268 : vector<8x128xf32>
    %270 = vector.extract_strided_slice %262 {offsets = [0, 256], sizes = [8, 128], strides = [1, 1]} : vector<8x384xf32> to vector<8x128xf32>
    %271 = math.tanh %269 : vector<8x128xf32>
    %272 = arith.mulf %270, %271 : vector<8x128xf32>
    %c5_i32_82 = arith.constant 5 : i32
    %273 = vector.broadcast %c5_i32_82 : i32 to vector<8x1xi32>
    %274 = arith.cmpi eq, %15, %273 : vector<8x1xi32>
    %275 = vector.shape_cast %274 : vector<8x1xi1> to vector<8x1xi1>
    %276 = vector.broadcast %275 : vector<8x1xi1> to vector<8x128xi1>
    %277 = arith.select %276, %272, %225 : vector<8x128xi1>, vector<8x128xf32>
    %c40 = arith.constant 40 : index
    %c0_83 = arith.constant 0 : index
    %278 = vector.load %arg18[%c40, %c0_83] : memref<64x1024xf32, #tpu.memory_space<vmem>>, vector<8x1024xf32>
    %279 = arith.truncf %246 : vector<8x256xf32> to vector<8x256xbf16>
    %c0_84 = arith.constant 0 : index
    %c0_85 = arith.constant 0 : index
    %280 = vector.load %arg5[%c0_84, %c0_85] : memref<256x1024xbf16, #tpu.memory_space<vmem>>, vector<256x1024xbf16>
    %cst_86 = arith.constant dense<0.000000e+00> : vector<8x1024xf32>
    %281 = tpu.matmul %279, %280, %cst_86 {dimension_numbers = #tpu.dot_dimension_numbers<[1], [0], [0], [1], [0, 0, 1, 1], [], []>} : vector<8x256xbf16>, vector<256x1024xbf16>, vector<8x1024xf32> -> vector<8x1024xf32>
    %282 = arith.addf %278, %281 : vector<8x1024xf32>
    %283 = vector.extract_strided_slice %282 {offsets = [0, 0], sizes = [8, 768], strides = [1, 1]} : vector<8x1024xf32> to vector<8x768xf32>
    %284 = arith.negf %283 : vector<8x768xf32>
    %285 = math.exp %284 : vector<8x768xf32>
    %cst_87 = arith.constant 1.000000e+00 : f32
    %286 = vector.broadcast %cst_87 : f32 to vector<8x768xf32>
    %287 = arith.addf %286, %285 : vector<8x768xf32>
    %288 = arith.divf %286, %287 : vector<8x768xf32>
    %289 = vector.extract_strided_slice %282 {offsets = [0, 768], sizes = [8, 256], strides = [1, 1]} : vector<8x1024xf32> to vector<8x256xf32>
    %290 = math.tanh %289 : vector<8x256xf32>
    %291 = vector.extract_strided_slice %288 {offsets = [0, 256], sizes = [8, 256], strides = [1, 1]} : vector<8x768xf32> to vector<8x256xf32>
    %292 = arith.mulf %291, %243 : vector<8x256xf32>
    %293 = vector.extract_strided_slice %288 {offsets = [0, 0], sizes = [8, 256], strides = [1, 1]} : vector<8x768xf32> to vector<8x256xf32>
    %294 = arith.mulf %293, %290 : vector<8x256xf32>
    %295 = arith.addf %292, %294 : vector<8x256xf32>
    %296 = vector.extract_strided_slice %288 {offsets = [0, 512], sizes = [8, 256], strides = [1, 1]} : vector<8x768xf32> to vector<8x256xf32>
    %297 = math.tanh %295 : vector<8x256xf32>
    %298 = arith.mulf %296, %297 : vector<8x256xf32>
    %c6_i32 = arith.constant 6 : i32
    %299 = vector.broadcast %c6_i32 : i32 to vector<8x1xi32>
    %300 = arith.cmpi eq, %14, %299 : vector<8x1xi32>
    %301 = vector.shape_cast %300 : vector<8x1xi1> to vector<8x1xi1>
    %302 = vector.broadcast %301 : vector<8x1xi1> to vector<8x256xi1>
    %303 = arith.select %302, %298, %251 : vector<8x256xi1>, vector<8x256xf32>
    %c40_88 = arith.constant 40 : index
    %c0_89 = arith.constant 0 : index
    %304 = vector.load %arg19[%c40_88, %c0_89] : memref<48x512xf32, #tpu.memory_space<vmem>>, vector<8x512xf32>
    %305 = arith.truncf %272 : vector<8x128xf32> to vector<8x128xbf16>
    %c0_90 = arith.constant 0 : index
    %c0_91 = arith.constant 0 : index
    %306 = vector.load %arg8[%c0_90, %c0_91] : memref<128x512xbf16, #tpu.memory_space<vmem>>, vector<128x512xbf16>
    %cst_92 = arith.constant dense<0.000000e+00> : vector<8x512xf32>
    %307 = tpu.matmul %305, %306, %cst_92 {dimension_numbers = #tpu.dot_dimension_numbers<[1], [0], [0], [1], [0, 0, 1, 1], [], []>} : vector<8x128xbf16>, vector<128x512xbf16>, vector<8x512xf32> -> vector<8x512xf32>
    %308 = arith.addf %304, %307 : vector<8x512xf32>
    %309 = vector.extract_strided_slice %308 {offsets = [0, 0], sizes = [8, 384], strides = [1, 1]} : vector<8x512xf32> to vector<8x384xf32>
    %310 = arith.negf %309 : vector<8x384xf32>
    %311 = math.exp %310 : vector<8x384xf32>
    %cst_93 = arith.constant 1.000000e+00 : f32
    %312 = vector.broadcast %cst_93 : f32 to vector<8x384xf32>
    %313 = arith.addf %312, %311 : vector<8x384xf32>
    %314 = arith.divf %312, %313 : vector<8x384xf32>
    %315 = vector.extract_strided_slice %308 {offsets = [0, 384], sizes = [8, 128], strides = [1, 1]} : vector<8x512xf32> to vector<8x128xf32>
    %316 = math.tanh %315 : vector<8x128xf32>
    %317 = vector.extract_strided_slice %314 {offsets = [0, 128], sizes = [8, 128], strides = [1, 1]} : vector<8x384xf32> to vector<8x128xf32>
    %318 = arith.mulf %317, %269 : vector<8x128xf32>
    %319 = vector.extract_strided_slice %314 {offsets = [0, 0], sizes = [8, 128], strides = [1, 1]} : vector<8x384xf32> to vector<8x128xf32>
    %320 = arith.mulf %319, %316 : vector<8x128xf32>
    %321 = arith.addf %318, %320 : vector<8x128xf32>
    %322 = vector.extract_strided_slice %314 {offsets = [0, 256], sizes = [8, 128], strides = [1, 1]} : vector<8x384xf32> to vector<8x128xf32>
    %323 = math.tanh %321 : vector<8x128xf32>
    %324 = arith.mulf %322, %323 : vector<8x128xf32>
    %c6_i32_94 = arith.constant 6 : i32
    %325 = vector.broadcast %c6_i32_94 : i32 to vector<8x1xi32>
    %326 = arith.cmpi eq, %15, %325 : vector<8x1xi32>
    %327 = vector.shape_cast %326 : vector<8x1xi1> to vector<8x1xi1>
    %328 = vector.broadcast %327 : vector<8x1xi1> to vector<8x128xi1>
    %329 = arith.select %328, %324, %277 : vector<8x128xi1>, vector<8x128xf32>
    %c48 = arith.constant 48 : index
    %c0_95 = arith.constant 0 : index
    %330 = vector.load %arg18[%c48, %c0_95] : memref<64x1024xf32, #tpu.memory_space<vmem>>, vector<8x1024xf32>
    %331 = arith.truncf %298 : vector<8x256xf32> to vector<8x256xbf16>
    %c0_96 = arith.constant 0 : index
    %c0_97 = arith.constant 0 : index
    %332 = vector.load %arg5[%c0_96, %c0_97] : memref<256x1024xbf16, #tpu.memory_space<vmem>>, vector<256x1024xbf16>
    %cst_98 = arith.constant dense<0.000000e+00> : vector<8x1024xf32>
    %333 = tpu.matmul %331, %332, %cst_98 {dimension_numbers = #tpu.dot_dimension_numbers<[1], [0], [0], [1], [0, 0, 1, 1], [], []>} : vector<8x256xbf16>, vector<256x1024xbf16>, vector<8x1024xf32> -> vector<8x1024xf32>
    %334 = arith.addf %330, %333 : vector<8x1024xf32>
    %335 = vector.extract_strided_slice %334 {offsets = [0, 0], sizes = [8, 768], strides = [1, 1]} : vector<8x1024xf32> to vector<8x768xf32>
    %336 = arith.negf %335 : vector<8x768xf32>
    %337 = math.exp %336 : vector<8x768xf32>
    %cst_99 = arith.constant 1.000000e+00 : f32
    %338 = vector.broadcast %cst_99 : f32 to vector<8x768xf32>
    %339 = arith.addf %338, %337 : vector<8x768xf32>
    %340 = arith.divf %338, %339 : vector<8x768xf32>
    %341 = vector.extract_strided_slice %334 {offsets = [0, 768], sizes = [8, 256], strides = [1, 1]} : vector<8x1024xf32> to vector<8x256xf32>
    %342 = math.tanh %341 : vector<8x256xf32>
    %343 = vector.extract_strided_slice %340 {offsets = [0, 256], sizes = [8, 256], strides = [1, 1]} : vector<8x768xf32> to vector<8x256xf32>
    %344 = arith.mulf %343, %295 : vector<8x256xf32>
    %345 = vector.extract_strided_slice %340 {offsets = [0, 0], sizes = [8, 256], strides = [1, 1]} : vector<8x768xf32> to vector<8x256xf32>
    %346 = arith.mulf %345, %342 : vector<8x256xf32>
    %347 = arith.addf %344, %346 : vector<8x256xf32>
    %348 = vector.extract_strided_slice %340 {offsets = [0, 512], sizes = [8, 256], strides = [1, 1]} : vector<8x768xf32> to vector<8x256xf32>
    %349 = math.tanh %347 : vector<8x256xf32>
    %350 = arith.mulf %348, %349 : vector<8x256xf32>
    %c7_i32 = arith.constant 7 : i32
    %351 = vector.broadcast %c7_i32 : i32 to vector<8x1xi32>
    %352 = arith.cmpi eq, %14, %351 : vector<8x1xi32>
    %353 = vector.shape_cast %352 : vector<8x1xi1> to vector<8x1xi1>
    %354 = vector.broadcast %353 : vector<8x1xi1> to vector<8x256xi1>
    %355 = arith.select %354, %350, %303 : vector<8x256xi1>, vector<8x256xf32>
    %c56 = arith.constant 56 : index
    %c0_100 = arith.constant 0 : index
    %356 = vector.load %arg18[%c56, %c0_100] : memref<64x1024xf32, #tpu.memory_space<vmem>>, vector<8x1024xf32>
    %357 = arith.truncf %350 : vector<8x256xf32> to vector<8x256xbf16>
    %c0_101 = arith.constant 0 : index
    %c0_102 = arith.constant 0 : index
    %358 = vector.load %arg5[%c0_101, %c0_102] : memref<256x1024xbf16, #tpu.memory_space<vmem>>, vector<256x1024xbf16>
    %cst_103 = arith.constant dense<0.000000e+00> : vector<8x1024xf32>
    %359 = tpu.matmul %357, %358, %cst_103 {dimension_numbers = #tpu.dot_dimension_numbers<[1], [0], [0], [1], [0, 0, 1, 1], [], []>} : vector<8x256xbf16>, vector<256x1024xbf16>, vector<8x1024xf32> -> vector<8x1024xf32>
    %360 = arith.addf %356, %359 : vector<8x1024xf32>
    %361 = vector.extract_strided_slice %360 {offsets = [0, 0], sizes = [8, 768], strides = [1, 1]} : vector<8x1024xf32> to vector<8x768xf32>
    %362 = arith.negf %361 : vector<8x768xf32>
    %363 = math.exp %362 : vector<8x768xf32>
    %cst_104 = arith.constant 1.000000e+00 : f32
    %364 = vector.broadcast %cst_104 : f32 to vector<8x768xf32>
    %365 = arith.addf %364, %363 : vector<8x768xf32>
    %366 = arith.divf %364, %365 : vector<8x768xf32>
    %367 = vector.extract_strided_slice %360 {offsets = [0, 768], sizes = [8, 256], strides = [1, 1]} : vector<8x1024xf32> to vector<8x256xf32>
    %368 = math.tanh %367 : vector<8x256xf32>
    %369 = vector.extract_strided_slice %366 {offsets = [0, 256], sizes = [8, 256], strides = [1, 1]} : vector<8x768xf32> to vector<8x256xf32>
    %370 = arith.mulf %369, %347 : vector<8x256xf32>
    %371 = vector.extract_strided_slice %366 {offsets = [0, 0], sizes = [8, 256], strides = [1, 1]} : vector<8x768xf32> to vector<8x256xf32>
    %372 = arith.mulf %371, %368 : vector<8x256xf32>
    %373 = arith.addf %370, %372 : vector<8x256xf32>
    %374 = vector.extract_strided_slice %366 {offsets = [0, 512], sizes = [8, 256], strides = [1, 1]} : vector<8x768xf32> to vector<8x256xf32>
    %375 = math.tanh %373 : vector<8x256xf32>
    %376 = arith.mulf %374, %375 : vector<8x256xf32>
    %c8_i32 = arith.constant 8 : i32
    %377 = vector.broadcast %c8_i32 : i32 to vector<8x1xi32>
    %378 = arith.cmpi eq, %14, %377 : vector<8x1xi32>
    %379 = vector.shape_cast %378 : vector<8x1xi1> to vector<8x1xi1>
    %380 = vector.broadcast %379 : vector<8x1xi1> to vector<8x256xi1>
    %381 = arith.select %380, %376, %355 : vector<8x256xi1>, vector<8x256xf32>
    %c0_105 = arith.constant 0 : index
    %c0_106 = arith.constant 0 : index
    %382 = vector.load %arg10[%c0_105, %c0_106] : memref<256x128xf32, #tpu.memory_space<vmem>>, vector<256x128xf32>
    %cst_107 = arith.constant dense<0.000000e+00> : vector<8x128xf32>
    %383 = tpu.matmul %381, %382, %cst_107 {dimension_numbers = #tpu.dot_dimension_numbers<[1], [0], [0], [1], [0, 0, 1, 1], [], []>} : vector<8x256xf32>, vector<256x128xf32>, vector<8x128xf32> -> vector<8x128xf32>
    %c0_108 = arith.constant 0 : index
    %c0_109 = arith.constant 0 : index
    %384 = vector.load %arg11[%c0_108, %c0_109] : memref<1x128xf32, #tpu.memory_space<vmem>>, vector<1x128xf32>
    %385 = vector.broadcast %384 : vector<1x128xf32> to vector<8x128xf32>
    %386 = arith.addf %383, %385 : vector<8x128xf32>
    %cst_110 = arith.constant 0.000000e+00 : f32
    %387 = vector.broadcast %cst_110 : f32 to vector<8x128xf32>
    %388 = arith.maximumf %386, %387 : vector<8x128xf32>
    %c0_111 = arith.constant 0 : index
    %c0_112 = arith.constant 0 : index
    %389 = vector.load %arg12[%c0_111, %c0_112] : memref<128x64xf32, #tpu.memory_space<vmem>>, vector<128x64xf32>
    %cst_113 = arith.constant dense<0.000000e+00> : vector<8x64xf32>
    %390 = tpu.matmul %329, %389, %cst_113 {dimension_numbers = #tpu.dot_dimension_numbers<[1], [0], [0], [1], [0, 0, 1, 1], [], []>} : vector<8x128xf32>, vector<128x64xf32>, vector<8x64xf32> -> vector<8x64xf32>
    %c0_114 = arith.constant 0 : index
    %c0_115 = arith.constant 0 : index
    %391 = vector.load %arg13[%c0_114, %c0_115] : memref<1x64xf32, #tpu.memory_space<vmem>>, vector<1x64xf32>
    %392 = vector.broadcast %391 : vector<1x64xf32> to vector<8x64xf32>
    %393 = arith.addf %390, %392 : vector<8x64xf32>
    %cst_116 = arith.constant 0.000000e+00 : f32
    %394 = vector.broadcast %cst_116 : f32 to vector<8x64xf32>
    %395 = arith.maximumf %393, %394 : vector<8x64xf32>
    %c0_117 = arith.constant 0 : index
    %c0_118 = arith.constant 0 : index
    %396 = vector.load %arg14[%c0_117, %c0_118] : memref<1x128xf32, #tpu.memory_space<vmem>>, vector<1x128xf32>
    %397 = vector.broadcast %396 : vector<1x128xf32> to vector<8x128xf32>
    %398 = arith.mulf %388, %397 : vector<8x128xf32>
    %cst_119 = arith.constant dense<0.000000e+00> : vector<8xf32>
    %399 = vector.multi_reduction <add>, %398, %cst_119 [1] : vector<8x128xf32> to vector<8xf32>
    %400 = vector.shape_cast %399 : vector<8xf32> to vector<8x1xf32>
    %c0_120 = arith.constant 0 : index
    %c0_121 = arith.constant 0 : index
    %401 = vector.load %arg15[%c0_120, %c0_121] : memref<1x64xf32, #tpu.memory_space<vmem>>, vector<1x64xf32>
    %402 = vector.broadcast %401 : vector<1x64xf32> to vector<8x64xf32>
    %403 = arith.mulf %395, %402 : vector<8x64xf32>
    %cst_122 = arith.constant dense<0.000000e+00> : vector<8xf32>
    %404 = vector.multi_reduction <add>, %403, %cst_122 [1] : vector<8x64xf32> to vector<8xf32>
    %405 = vector.shape_cast %404 : vector<8xf32> to vector<8x1xf32>
    %406 = arith.addf %400, %405 : vector<8x1xf32>
    %c0_123 = arith.constant 0 : index
    %c0_124 = arith.constant 0 : index
    %407 = vector.load %arg16[%c0_123, %c0_124] : memref<1x1xf32, #tpu.memory_space<vmem>>, vector<1x1xf32>
    %408 = vector.broadcast %407 : vector<1x1xf32> to vector<8x1xf32>
    %409 = arith.addf %406, %408 : vector<8x1xf32>
    %410 = arith.negf %409 : vector<8x1xf32>
    %411 = math.exp %410 : vector<8x1xf32>
    %cst_125 = arith.constant 1.000000e+00 : f32
    %412 = vector.broadcast %cst_125 : f32 to vector<8x1xf32>
    %413 = arith.addf %412, %411 : vector<8x1xf32>
    %414 = arith.divf %412, %413 : vector<8x1xf32>
    %c0_126 = arith.constant 0 : index
    %c0_127 = arith.constant 0 : index
    %415 = vector.load %arg17[%c0_126, %c0_127] : memref<8x1xf32, #tpu.memory_space<vmem>>, vector<8x1xf32>
    tpu.vector_store %arg17[%c0_126, %c0_127], %414 {strides = array<i32>} : memref<8x1xf32, #tpu.memory_space<vmem>>, vector<8x1xf32>,
    return
  }
}

</mosaic_0001>

<bundles_post_ra>
// kernel: lstm_net_forward.1
= control target key start
LH: loop header
LB: loop body
LE: loop exit
PB: predicated region body
PF: predicated region fallthrough
CT: control target
= control target key end

     0   :  { %v9761_v3 = vmov 0.0   ;;  %s9741_s4 = inlined_call_operand.vmem [shape: f32[128,1024], index: 4, kind: input, shape index: {}]   ;;  %s9742_s2 = inlined_call_operand.vmem [shape: f32[64,128], index: 2, kind: input, shape index: {}]   ;;  %s9743_s7 = inlined_call_operand.vmem [shape: f32[128,512], index: 7, kind: input, shape index: {}]   ;;  %s9744_s5 = inlined_call_operand.vmem [shape: bf16[256,1024], index: 5, kind: input, shape index: {}]   ;;  %s9745_s3 = inlined_call_operand.vmem [shape: f32[48,128], index: 3, kind: input, shape index: {}]   ;;  %s9746_s8 = inlined_call_operand.vmem [shape: bf16[128,512], index: 8, kind: input, shape index: {}]   ;;  %s9747_s0 = inlined_call_operand.vmem [shape: s32[8,1], index: 0, kind: input, shape index: {}]   ;;  %s9748_s6 = inlined_call_operand.vmem [shape: f32[1,1024], index: 6, kind: input, shape index: {}]   ;;  %s9749_s1 = inlined_call_operand.vmem [shape: s32[8,1], index: 1, kind: input, shape index: {}]   ;;  %s9750_s9 = inlined_call_operand.vmem [shape: f32[1,512], index: 9, kind: input, shape index: {}]   ;;  %s9751_s12 = inlined_call_operand.vmem [shape: f32[128,64], index: 12, kind: input, shape index: {}]   ;;  %s9752_s10 = inlined_call_operand.vmem [shape: f32[256,128], index: 10, kind: input, shape index: {}]   ;;  %s9753_s13 = inlined_call_operand.vmem [shape: f32[1,64], index: 13, kind: input, shape index: {}]   ;;  %s9754_s15 = inlined_call_operand.vmem [shape: f32[1,64], index: 15, kind: input, shape index: {}]   ;;  %s9755_s16 = inlined_call_operand.<no memory space> [shape: f32[1,1], index: 16, kind: input, shape index: {}]   ;;  %s9756_s11 = inlined_call_operand.vmem [shape: f32[1,128], index: 11, kind: input, shape index: {}]   ;;  %s9757_s14 = inlined_call_operand.vmem [shape: f32[1,128], index: 14, kind: input, shape index: {}]   ;;  %s9758_s17 = inlined_call_operand.vmem [shape: f32[8,1], index: 17, kind: output, shape index: {}]  }
   0x1   :  { %10138 = sst [smem:[#allocation244_spill]] %s9741_s4  ;;  %301 = vmatprep.mubr.f32.mxu0 %v9761_v3  ;;  %414 = vmatprep.mubr.f32.mxu1 %v9761_v3 }
   0x2   :  { %10139 = sst [smem:[#allocation245_spill]] %s9742_s2 }
   0x3   :  { %s10140_s26 = sld [smem:[#allocation244_spill]] }
   0x4   :  { %s10141_s29 = sld [smem:[#allocation245_spill]] }
   0x9   :  { %v188_v0 = vld [vmem:[%s10140_s26 + $0x3c8] sm:$0xff]  ;;  %v190_v1 = vld [vmem:[%s10140_s26 + $0x3d8] sm:$0xff]  ;;  %v187_v2 = vld [vmem:[%s10140_s26 + $0x3c0] sm:$0xff] }
   0xa   :  { %237 = vmatprep.subr.mxu0 %v188_v0  ;;  %350 = vmatprep.subr.mxu1 %v190_v1  ;;  %v189_v4 = vld [vmem:[%s10140_s26 + $0x3d0] sm:$0xff]  ;;  %v180_v5 = vld [vmem:[%s10140_s26 + $0x388] sm:$0xff]  ;;  %v182_v6 = vld [vmem:[%s10140_s26 + $0x398] sm:$0xff] }
   0xb   :  { %238 = vmatpush1.msra.mxu0 %v187_v2  ;;  %351 = vmatpush1.msra.mxu1 %v189_v4  ;;  %v179_v7 = vld [vmem:[%s10140_s26 + $0x380] sm:$0xff]  ;;  %v181_v8 = vld [vmem:[%s10140_s26 + $0x390] sm:$0xff]  ;;  %v172_v9 = vld [vmem:[%s10140_s26 + $0x348] sm:$0xff] }
   0xc   :  { %239 = vmatprep.subr.mxu0 %v180_v5  ;;  %352 = vmatprep.subr.mxu1 %v182_v6  ;;  %v174_v10 = vld [vmem:[%s10140_s26 + $0x358] sm:$0xff]  ;;  %v171_v11 = vld [vmem:[%s10140_s26 + $0x340] sm:$0xff]  ;;  %v173_v12 = vld [vmem:[%s10140_s26 + $0x350] sm:$0xff] }
   0xd   :  { %240 = vmatpush1.msra.mxu0 %v179_v7  ;;  %353 = vmatpush1.msra.mxu1 %v181_v8  ;;  %v164_v13 = vld [vmem:[%s10140_s26 + $0x308] sm:$0xff]  ;;  %v166_v14 = vld [vmem:[%s10140_s26 + $0x318] sm:$0xff]  ;;  %v163_v15 = vld [vmem:[%s10140_s26 + $0x300] sm:$0xff] }
   0xe   :  { %241 = vmatprep.subr.mxu0 %v172_v9  ;;  %354 = vmatprep.subr.mxu1 %v174_v10  ;;  %v165_v16 = vld [vmem:[%s10140_s26 + $0x310] sm:$0xff]  ;;  %v156_v17 = vld [vmem:[%s10140_s26 + $0x2c8] sm:$0xff]  ;;  %v158_v18 = vld [vmem:[%s10140_s26 + $0x2d8] sm:$0xff] }
   0xf   :  { %242 = vmatpush1.msra.mxu0 %v171_v11  ;;  %355 = vmatpush1.msra.mxu1 %v173_v12  ;;  %v155_v19 = vld [vmem:[%s10140_s26 + $0x2c0] sm:$0xff]  ;;  %v157_v20 = vld [vmem:[%s10140_s26 + $0x2d0] sm:$0xff]  ;;  %v148_v21 = vld [vmem:[%s10140_s26 + $0x288] sm:$0xff] }
  0x10   :  { %243 = vmatprep.subr.mxu0 %v164_v13  ;;  %356 = vmatprep.subr.mxu1 %v166_v14  ;;  %v150_v22 = vld [vmem:[%s10140_s26 + $0x298] sm:$0xff]  ;;  %v147_v23 = vld [vmem:[%s10140_s26 + $0x280] sm:$0xff]  ;;  %v149_v24 = vld [vmem:[%s10140_s26 + $0x290] sm:$0xff] }
  0x11   :  { %244 = vmatpush1.msra.mxu0 %v163_v15  ;;  %357 = vmatpush1.msra.mxu1 %v165_v16  ;;  %v140_v25 = vld [vmem:[%s10140_s26 + $0x248] sm:$0xff]  ;;  %v142_v26 = vld [vmem:[%s10140_s26 + $0x258] sm:$0xff]  ;;  %v139_v27 = vld [vmem:[%s10140_s26 + $0x240] sm:$0xff] }
  0x12   :  { %245 = vmatprep.subr.mxu0 %v156_v17  ;;  %358 = vmatprep.subr.mxu1 %v158_v18  ;;  %v141_v28 = vld [vmem:[%s10140_s26 + $0x250] sm:$0xff]  ;;  %v132_v29 = vld [vmem:[%s10140_s26 + $0x208] sm:$0xff]  ;;  %v134_v30 = vld [vmem:[%s10140_s26 + $0x218] sm:$0xff] }
  0x13   :  { %246 = vmatpush1.msra.mxu0 %v155_v19  ;;  %359 = vmatpush1.msra.mxu1 %v157_v20  ;;  %v131_v31 = vld [vmem:[%s10140_s26 + $0x200] sm:$0xff]  ;;  %v133_v32 = vld [vmem:[%s10140_s26 + $0x210] sm:$0xff]  ;;  %v124_v33 = vld [vmem:[%s10140_s26 + $0x1c8] sm:$0xff] }
  0x14   :  { %247 = vmatprep.subr.mxu0 %v148_v21  ;;  %360 = vmatprep.subr.mxu1 %v150_v22  ;;  %v126_v34 = vld [vmem:[%s10140_s26 + $0x1d8] sm:$0xff]  ;;  %v123_v35 = vld [vmem:[%s10140_s26 + $0x1c0] sm:$0xff]  ;;  %v125_v36 = vld [vmem:[%s10140_s26 + $0x1d0] sm:$0xff] }
  0x15   :  { %248 = vmatpush1.msra.mxu0 %v147_v23  ;;  %361 = vmatpush1.msra.mxu1 %v149_v24  ;;  %v116_v37 = vld [vmem:[%s10140_s26 + $0x188] sm:$0xff]  ;;  %v118_v38 = vld [vmem:[%s10140_s26 + $0x198] sm:$0xff]  ;;  %v115_v39 = vld [vmem:[%s10140_s26 + $0x180] sm:$0xff] }
  0x16   :  { %249 = vmatprep.subr.mxu0 %v140_v25  ;;  %362 = vmatprep.subr.mxu1 %v142_v26  ;;  %v117_v40 = vld [vmem:[%s10140_s26 + $0x190] sm:$0xff]  ;;  %v108_v41 = vld [vmem:[%s10140_s26 + $0x148] sm:$0xff]  ;;  %v110_v42 = vld [vmem:[%s10140_s26 + $0x158] sm:$0xff] }
  0x17   :  { %250 = vmatpush1.msra.mxu0 %v139_v27  ;;  %363 = vmatpush1.msra.mxu1 %v141_v28  ;;  %v107_v43 = vld [vmem:[%s10140_s26 + $0x140] sm:$0xff]  ;;  %v109_v44 = vld [vmem:[%s10140_s26 + $0x150] sm:$0xff]  ;;  %v100_v45 = vld [vmem:[%s10140_s26 + $0x108] sm:$0xff] }
  0x18   :  { %251 = vmatprep.subr.mxu0 %v132_v29  ;;  %364 = vmatprep.subr.mxu1 %v134_v30  ;;  %v102_v46 = vld [vmem:[%s10140_s26 + $0x118] sm:$0xff]  ;;  %v99_v47 = vld [vmem:[%s10140_s26 + $0x100] sm:$0xff]  ;;  %v101_v48 = vld [vmem:[%s10140_s26 + $0x110] sm:$0xff] }
  0x19   :  { %252 = vmatpush1.msra.mxu0 %v131_v31  ;;  %365 = vmatpush1.msra.mxu1 %v133_v32  ;;  %v92_v49 = vld [vmem:[%s10140_s26 + $0xc8] sm:$0xff]  ;;  %v94_v50 = vld [vmem:[%s10140_s26 + $0xd8] sm:$0xff]  ;;  %v91_v51 = vld [vmem:[%s10140_s26 + $0xc0] sm:$0xff] }
  0x1a   :  { %253 = vmatprep.subr.mxu0 %v124_v33  ;;  %366 = vmatprep.subr.mxu1 %v126_v34  ;;  %v93_v52 = vld [vmem:[%s10140_s26 + $0xd0] sm:$0xff]  ;;  %v84_v53 = vld [vmem:[%s10140_s26 + $0x88] sm:$0xff]  ;;  %v86_v54 = vld [vmem:[%s10140_s26 + $0x98] sm:$0xff] }
  0x1b   :  { %254 = vmatpush1.msra.mxu0 %v123_v35  ;;  %367 = vmatpush1.msra.mxu1 %v125_v36  ;;  %v83_v55 = vld [vmem:[%s10140_s26 + $0x80] sm:$0xff]  ;;  %v85_v56 = vld [vmem:[%s10140_s26 + $0x90] sm:$0xff]  ;;  %v76_v57 = vld [vmem:[%s10140_s26 + $0x48] sm:$0xff] }
  0x1c   :  { %255 = vmatprep.subr.mxu0 %v116_v37  ;;  %368 = vmatprep.subr.mxu1 %v118_v38  ;;  %v78_v58 = vld [vmem:[%s10140_s26 + $0x58] sm:$0xff]  ;;  %v75_v59 = vld [vmem:[%s10140_s26 + $0x40] sm:$0xff]  ;;  %v77_v60 = vld [vmem:[%s10140_s26 + $0x50] sm:$0xff] }
  0x1d   :  { %256 = vmatpush1.msra.mxu0 %v115_v39  ;;  %369 = vmatpush1.msra.mxu1 %v117_v40  ;;  %v68_v61 = vld [vmem:[%s10140_s26 + $0x8] sm:$0xff]  ;;  %v70_v62 = vld [vmem:[%s10140_s26 + $0x18] sm:$0xff]  ;;  %v67_v63 = vld [vmem:[%s10140_s26] sm:$0xff] }
  0x1e   :  { %257 = vmatprep.subr.mxu0 %v108_v41  ;;  %370 = vmatprep.subr.mxu1 %v110_v42  ;;  %v69_v0 = vld [vmem:[%s10140_s26 + $0x10] sm:$0xff]  ;;  %v5998_v1 = vld [vmem:[%s10141_s29] sm:$0xff]  ;;  %v192_v2 = vld [vmem:[%s10140_s26 + $0x3e8] sm:$0xff] }
  0x1f   :  { %258 = vmatpush1.msra.mxu0 %v107_v43  ;;  %371 = vmatpush1.msra.mxu1 %v109_v44  ;;  %v194_v4 = vld [vmem:[%s10140_s26 + $0x3f8] sm:$0xff]  ;;  %v191_v5 = vld [vmem:[%s10140_s26 + $0x3e0] sm:$0xff]  ;;  %v193_v6 = vld [vmem:[%s10140_s26 + $0x3f0] sm:$0xff] }
  0x20   :  { %259 = vmatprep.subr.mxu0 %v100_v45  ;;  %372 = vmatprep.subr.mxu1 %v102_v46  ;;  %v184_v7 = vld [vmem:[%s10140_s26 + $0x3a8] sm:$0xff]  ;;  %v186_v8 = vld [vmem:[%s10140_s26 + $0x3b8] sm:$0xff]  ;;  %v183_v9 = vld [vmem:[%s10140_s26 + $0x3a0] sm:$0xff] }
  0x21   :  { %260 = vmatpush1.msra.mxu0 %v99_v47  ;;  %373 = vmatpush1.msra.mxu1 %v101_v48  ;;  %v185_v10 = vld [vmem:[%s10140_s26 + $0x3b0] sm:$0xff]  ;;  %v6029_v11 = vld [vmem:[%s10141_s29 + $0x8] sm:$0xff]  ;;  %v178_v13 = vld [vmem:[%s10140_s26 + $0x378] sm:$0xff] }
  0x22   :  { %261 = vmatprep.subr.mxu0 %v92_v49  ;;  %374 = vmatprep.subr.mxu1 %v94_v50  ;;  %v176_v12 = vld [vmem:[%s10140_s26 + $0x368] sm:$0xff]  ;;  %v175_v14 = vld [vmem:[%s10140_s26 + $0x360] sm:$0xff]  ;;  %v177_v15 = vld [vmem:[%s10140_s26 + $0x370] sm:$0xff] }
  0x23   :  { %262 = vmatpush1.msra.mxu0 %v91_v51  ;;  %375 = vmatpush1.msra.mxu1 %v93_v52  ;;  %v168_v16 = vld [vmem:[%s10140_s26 + $0x328] sm:$0xff]  ;;  %v170_v17 = vld [vmem:[%s10140_s26 + $0x338] sm:$0xff]  ;;  %v167_v18 = vld [vmem:[%s10140_s26 + $0x320] sm:$0xff] }
  0x24   :  { %263 = vmatprep.subr.mxu0 %v84_v53  ;;  %376 = vmatprep.subr.mxu1 %v86_v54  ;;  %v169_v19 = vld [vmem:[%s10140_s26 + $0x330] sm:$0xff]  ;;  %v160_v21 = vld [vmem:[%s10140_s26 + $0x2e8] sm:$0xff]  ;;  %v162_v22 = vld [vmem:[%s10140_s26 + $0x2f8] sm:$0xff] }
  0x25   :  { %264 = vmatpush1.msra.mxu0 %v83_v55  ;;  %377 = vmatpush1.msra.mxu1 %v85_v56  ;;  %v6062_v20 = vld [vmem:[%s10141_s29 + $0x10] sm:$0xff]  ;;  %v159_v23 = vld [vmem:[%s10140_s26 + $0x2e0] sm:$0xff]  ;;  %v152_v25 = vld [vmem:[%s10140_s26 + $0x2a8] sm:$0xff] }
  0x26   :  { %265 = vmatprep.subr.mxu0 %v76_v57  ;;  %378 = vmatprep.subr.mxu1 %v78_v58  ;;  %v161_v24 = vld [vmem:[%s10140_s26 + $0x2f0] sm:$0xff]  ;;  %v154_v26 = vld [vmem:[%s10140_s26 + $0x2b8] sm:$0xff]  ;;  %v151_v27 = vld [vmem:[%s10140_s26 + $0x2a0] sm:$0xff] }
  0x27   :  { %266 = vmatpush1.msra.mxu0 %v75_v59  ;;  %379 = vmatpush1.msra.mxu1 %v77_v60  ;;  %v153_v28 = vld [vmem:[%s10140_s26 + $0x2b0] sm:$0xff]  ;;  %v6095_v29 = vld [vmem:[%s10141_s29 + $0x18] sm:$0xff]  ;;  %v144_v30 = vld [vmem:[%s10140_s26 + $0x268] sm:$0xff] }
  0x28   :  { %267 = vmatprep.subr.mxu0 %v68_v61  ;;  %380 = vmatprep.subr.mxu1 %v70_v62  ;;  %v146_v31 = vld [vmem:[%s10140_s26 + $0x278] sm:$0xff]  ;;  %v143_v32 = vld [vmem:[%s10140_s26 + $0x260] sm:$0xff]  ;;  %v145_v33 = vld [vmem:[%s10140_s26 + $0x270] sm:$0xff] }
  0x29   :  { %268 = vmatpush1.msra.mxu0 %v67_v63  ;;  %381 = vmatpush1.msra.mxu1 %v69_v0  ;;  %v136_v34 = vld [vmem:[%s10140_s26 + $0x228] sm:$0xff]  ;;  %v138_v35 = vld [vmem:[%s10140_s26 + $0x238] sm:$0xff]  ;;  %v135_v36 = vld [vmem:[%s10140_s26 + $0x220] sm:$0xff] }
  0x2a   :  { %302 = vmatmul.mubr.f32.vlgmr.msra.gmra.mxu0 %v5998_v1  ;;  %415 = vmatmul.mubr.f32.vlgmr.msra.gmra.mxu1 %v5998_v1  ;;  %v137_v37 = vld [vmem:[%s10140_s26 + $0x230] sm:$0xff]  ;;  %v6128_v38 = vld [vmem:[%s10141_s29 + $0x20] sm:$0xff]  ;;  %v128_v39 = vld [vmem:[%s10140_s26 + $0x1e8] sm:$0xff] }
  0x2b   :  { %463 = vmatprep.subr.mxu0 %v192_v2  ;;  %576 = vmatprep.subr.mxu1 %v194_v4  ;;  %v130_v40 = vld [vmem:[%s10140_s26 + $0x1f8] sm:$0xff]  ;;  %v127_v41 = vld [vmem:[%s10140_s26 + $0x1e0] sm:$0xff]  ;;  %v129_v42 = vld [vmem:[%s10140_s26 + $0x1f0] sm:$0xff] }
  0x2c   :  { %464 = vmatpush1.msra.mxu0 %v191_v5  ;;  %577 = vmatpush1.msra.mxu1 %v193_v6  ;;  %v120_v43 = vld [vmem:[%s10140_s26 + $0x1a8] sm:$0xff]  ;;  %v122_v44 = vld [vmem:[%s10140_s26 + $0x1b8] sm:$0xff]  ;;  %v119_v45 = vld [vmem:[%s10140_s26 + $0x1a0] sm:$0xff] }
  0x2d   :  { %465 = vmatprep.subr.mxu0 %v184_v7  ;;  %578 = vmatprep.subr.mxu1 %v186_v8  ;;  %v121_v46 = vld [vmem:[%s10140_s26 + $0x1b0] sm:$0xff]  ;;  %v6161_v47 = vld [vmem:[%s10141_s29 + $0x28] sm:$0xff]  ;;  %v114_v49 = vld [vmem:[%s10140_s26 + $0x178] sm:$0xff] }
  0x2e   :  { %307 = vmatprep.mubr.f32.mxu0 %v9761_v3  ;;  %420 = vmatprep.mubr.f32.mxu1 %v9761_v3  ;;  %v112_v48 = vld [vmem:[%s10140_s26 + $0x168] sm:$0xff]  ;;  %v111_v50 = vld [vmem:[%s10140_s26 + $0x160] sm:$0xff]  ;;  %v113_v51 = vld [vmem:[%s10140_s26 + $0x170] sm:$0xff] }
  0x2f   :  { %466 = vmatpush1.msra.mxu0 %v183_v9  ;;  %579 = vmatpush1.msra.mxu1 %v185_v10  ;;  %v104_v52 = vld [vmem:[%s10140_s26 + $0x128] sm:$0xff]  ;;  %v106_v53 = vld [vmem:[%s10140_s26 + $0x138] sm:$0xff]  ;;  %v103_v54 = vld [vmem:[%s10140_s26 + $0x120] sm:$0xff] }
  0x30   :  { %308 = vmatmul.mubr.f32.gmra.mxu0 %v6029_v11  ;;  %421 = vmatmul.mubr.f32.gmra.mxu1 %v6029_v11  ;;  %v105_v55 = vld [vmem:[%s10140_s26 + $0x130] sm:$0xff]  ;;  %v96_v57 = vld [vmem:[%s10140_s26 + $0xe8] sm:$0xff]  ;;  %v98_v58 = vld [vmem:[%s10140_s26 + $0xf8] sm:$0xff] }
  0x31   :  { %467 = vmatprep.subr.mxu0 %v176_v12  ;;  %580 = vmatprep.subr.mxu1 %v178_v13  ;;  %v6194_v56 = vld [vmem:[%s10141_s29 + $0x30] sm:$0xff]  ;;  %v95_v59 = vld [vmem:[%s10140_s26 + $0xe0] sm:$0xff]  ;;  %v88_v61 = vld [vmem:[%s10140_s26 + $0xa8] sm:$0xff] }
  0x32   :  { %468 = vmatpush1.msra.mxu0 %v175_v14  ;;  %581 = vmatpush1.msra.mxu1 %v177_v15  ;;  %v97_v60 = vld [vmem:[%s10140_s26 + $0xf0] sm:$0xff]  ;;  %v90_v62 = vld [vmem:[%s10140_s26 + $0xb8] sm:$0xff]  ;;  %v87_v63 = vld [vmem:[%s10140_s26 + $0xa0] sm:$0xff] }
  0x33   :  { %469 = vmatprep.subr.mxu0 %v168_v16  ;;  %582 = vmatprep.subr.mxu1 %v170_v17  ;;  %v89_v0 = vld [vmem:[%s10140_s26 + $0xb0] sm:$0xff]  ;;  %v6227_v2 = vld [vmem:[%s10141_s29 + $0x38] sm:$0xff]  ;;  %v80_v4 = vld [vmem:[%s10140_s26 + $0x68] sm:$0xff] }
  0x34   :  { %313 = vmatprep.mubr.f32.mxu0 %v9761_v3  ;;  %426 = vmatprep.mubr.f32.mxu1 %v9761_v3  ;;  %v82_v5 = vld [vmem:[%s10140_s26 + $0x78] sm:$0xff]  ;;  %v79_v6 = vld [vmem:[%s10140_s26 + $0x60] sm:$0xff]  ;;  %v81_v7 = vld [vmem:[%s10140_s26 + $0x70] sm:$0xff] }
  0x35   :  { %470 = vmatpush1.msra.mxu0 %v167_v18  ;;  %583 = vmatpush1.msra.mxu1 %v169_v19  ;;  %v72_v8 = vld [vmem:[%s10140_s26 + $0x28] sm:$0xff]  ;;  %v74_v9 = vld [vmem:[%s10140_s26 + $0x38] sm:$0xff]  ;;  %v71_v10 = vld [vmem:[%s10140_s26 + $0x20] sm:$0xff] }
  0x36   :  { %314 = vmatmul.mubr.f32.gmra.mxu0 %v6062_v20  ;;  %427 = vmatmul.mubr.f32.gmra.mxu1 %v6062_v20  ;;  %v73_v12 = vld [vmem:[%s10140_s26 + $0x30] sm:$0xff]  ;;  %v820_v13 = vld [vmem:[%s9743_s7 + $0x1e8] sm:$0xff]  ;;  %v822_v14 = vld [vmem:[%s9743_s7 + $0x1f8] sm:$0xff] }
  0x37   :  { %471 = vmatprep.subr.mxu0 %v160_v21  ;;  %584 = vmatprep.subr.mxu1 %v162_v22  ;;  %v819_v15 = vld [vmem:[%s9743_s7 + $0x1e0] sm:$0xff]  ;;  %v821_v16 = vld [vmem:[%s9743_s7 + $0x1f0] sm:$0xff]  ;;  %v816_v17 = vld [vmem:[%s9743_s7 + $0x1c8] sm:$0xff] }
  0x38   :  { %472 = vmatpush1.msra.mxu0 %v159_v23  ;;  %585 = vmatpush1.msra.mxu1 %v161_v24  ;;  %v818_v18 = vld [vmem:[%s9743_s7 + $0x1d8] sm:$0xff]  ;;  %v815_v19 = vld [vmem:[%s9743_s7 + $0x1c0] sm:$0xff]  ;;  %v812_v21 = vld [vmem:[%s9743_s7 + $0x1a8] sm:$0xff] }
  0x39   :  { %473 = vmatprep.subr.mxu0 %v152_v25  ;;  %586 = vmatprep.subr.mxu1 %v154_v26  ;;  %v814_v22 = vld [vmem:[%s9743_s7 + $0x1b8] sm:$0xff]  ;;  %v811_v23 = vld [vmem:[%s9743_s7 + $0x1a0] sm:$0xff]  ;;  %v813_v24 = vld [vmem:[%s9743_s7 + $0x1b0] sm:$0xff] }
  0x3a   :  { %319 = vmatprep.mubr.f32.mxu0 %v9761_v3  ;;  %432 = vmatprep.mubr.f32.mxu1 %v9761_v3  ;;  %v808_v25 = vld [vmem:[%s9743_s7 + $0x188] sm:$0xff]  ;;  %v810_v26 = vld [vmem:[%s9743_s7 + $0x198] sm:$0xff] }
  0x3b   :  { %474 = vmatpush1.msra.mxu0 %v151_v27  ;;  %587 = vmatpush1.msra.mxu1 %v153_v28  ;;  %v807_v27 = vld [vmem:[%s9743_s7 + $0x180] sm:$0xff]  ;;  %v804_v28 = vld [vmem:[%s9743_s7 + $0x168] sm:$0xff] }
  0x3c   :  { %320 = vmatmul.mubr.f32.gmra.mxu0 %v6095_v29  ;;  %433 = vmatmul.mubr.f32.gmra.mxu1 %v6095_v29 }
  0x3d   :  { %475 = vmatprep.subr.mxu0 %v144_v30  ;;  %588 = vmatprep.subr.mxu1 %v146_v31  ;;  %v806_v30 = vld [vmem:[%s9743_s7 + $0x178] sm:$0xff]  ;;  %v803_v31 = vld [vmem:[%s9743_s7 + $0x160] sm:$0xff] }
  0x3e   :  { %476 = vmatpush1.msra.mxu0 %v143_v32  ;;  %589 = vmatpush1.msra.mxu1 %v145_v33  ;;  %v805_v32 = vld [vmem:[%s9743_s7 + $0x170] sm:$0xff]  ;;  %v800_v33 = vld [vmem:[%s9743_s7 + $0x148] sm:$0xff] }
  0x3f   :  { %477 = vmatprep.subr.mxu0 %v136_v34  ;;  %590 = vmatprep.subr.mxu1 %v138_v35  ;;  %v802_v34 = vld [vmem:[%s9743_s7 + $0x158] sm:$0xff]  ;;  %v799_v35 = vld [vmem:[%s9743_s7 + $0x140] sm:$0xff] }
  0x40   :  { %325 = vmatprep.mubr.f32.mxu0 %v9761_v3  ;;  %438 = vmatprep.mubr.f32.mxu1 %v9761_v3 }
  0x41   :  { %478 = vmatpush1.msra.mxu0 %v135_v36  ;;  %591 = vmatpush1.msra.mxu1 %v137_v37  ;;  %v796_v36 = vld [vmem:[%s9743_s7 + $0x128] sm:$0xff]  ;;  %v798_v37 = vld [vmem:[%s9743_s7 + $0x138] sm:$0xff] }
  0x42   :  { %326 = vmatmul.mubr.f32.gmra.mxu0 %v6128_v38  ;;  %439 = vmatmul.mubr.f32.gmra.mxu1 %v6128_v38 }
  0x43   :  { %479 = vmatprep.subr.mxu0 %v128_v39  ;;  %592 = vmatprep.subr.mxu1 %v130_v40  ;;  %v795_v39 = vld [vmem:[%s9743_s7 + $0x120] sm:$0xff]  ;;  %v797_v40 = vld [vmem:[%s9743_s7 + $0x130] sm:$0xff] }
  0x44   :  { %480 = vmatpush1.msra.mxu0 %v127_v41  ;;  %593 = vmatpush1.msra.mxu1 %v129_v42  ;;  %v792_v41 = vld [vmem:[%s9743_s7 + $0x108] sm:$0xff]  ;;  %v794_v42 = vld [vmem:[%s9743_s7 + $0x118] sm:$0xff] }
  0x45   :  { %481 = vmatprep.subr.mxu0 %v120_v43  ;;  %594 = vmatprep.subr.mxu1 %v122_v44  ;;  %v791_v43 = vld [vmem:[%s9743_s7 + $0x100] sm:$0xff]  ;;  %v788_v44 = vld [vmem:[%s9743_s7 + $0xe8] sm:$0xff] }
  0x46   :  { %331 = vmatprep.mubr.f32.mxu0 %v9761_v3  ;;  %444 = vmatprep.mubr.f32.mxu1 %v9761_v3 }
  0x47   :  { %482 = vmatpush1.msra.mxu0 %v119_v45  ;;  %595 = vmatpush1.msra.mxu1 %v121_v46  ;;  %v790_v45 = vld [vmem:[%s9743_s7 + $0xf8] sm:$0xff]  ;;  %v787_v46 = vld [vmem:[%s9743_s7 + $0xe0] sm:$0xff] }
  0x48   :  { %332 = vmatmul.mubr.f32.gmra.mxu0 %v6161_v47  ;;  %445 = vmatmul.mubr.f32.gmra.mxu1 %v6161_v47 }
  0x49   :  { %483 = vmatprep.subr.mxu0 %v112_v48  ;;  %596 = vmatprep.subr.mxu1 %v114_v49  ;;  %v789_v48 = vld [vmem:[%s9743_s7 + $0xf0] sm:$0xff]  ;;  %v784_v49 = vld [vmem:[%s9743_s7 + $0xc8] sm:$0xff] }
  0x4a   :  { %484 = vmatpush1.msra.mxu0 %v111_v50  ;;  %597 = vmatpush1.msra.mxu1 %v113_v51  ;;  %v786_v50 = vld [vmem:[%s9743_s7 + $0xd8] sm:$0xff]  ;;  %v783_v51 = vld [vmem:[%s9743_s7 + $0xc0] sm:$0xff] }
  0x4b   :  { %485 = vmatprep.subr.mxu0 %v104_v52  ;;  %598 = vmatprep.subr.mxu1 %v106_v53  ;;  %v780_v52 = vld [vmem:[%s9743_s7 + $0xa8] sm:$0xff]  ;;  %v782_v53 = vld [vmem:[%s9743_s7 + $0xb8] sm:$0xff] }
  0x4c   :  { %337 = vmatprep.mubr.f32.mxu0 %v9761_v3  ;;  %450 = vmatprep.mubr.f32.mxu1 %v9761_v3 }
  0x4d   :  { %486 = vmatpush1.msra.mxu0 %v103_v54  ;;  %599 = vmatpush1.msra.mxu1 %v105_v55  ;;  %v779_v54 = vld [vmem:[%s9743_s7 + $0xa0] sm:$0xff]  ;;  %v781_v55 = vld [vmem:[%s9743_s7 + $0xb0] sm:$0xff] }
  0x4e   :  { %338 = vmatmul.mubr.f32.gmra.mxu0 %v6194_v56  ;;  %451 = vmatmul.mubr.f32.gmra.mxu1 %v6194_v56 }
  0x4f   :  { %487 = vmatprep.subr.mxu0 %v96_v57  ;;  %600 = vmatprep.subr.mxu1 %v98_v58  ;;  %v776_v57 = vld [vmem:[%s9743_s7 + $0x88] sm:$0xff]  ;;  %v778_v58 = vld [vmem:[%s9743_s7 + $0x98] sm:$0xff] }
  0x50   :  { %488 = vmatpush1.msra.mxu0 %v95_v59  ;;  %601 = vmatpush1.msra.mxu1 %v97_v60  ;;  %v775_v59 = vld [vmem:[%s9743_s7 + $0x80] sm:$0xff]  ;;  %v772_v60 = vld [vmem:[%s9743_s7 + $0x68] sm:$0xff] }
  0x51   :  { %489 = vmatprep.subr.mxu0 %v88_v61  ;;  %602 = vmatprep.subr.mxu1 %v90_v62  ;;  %v774_v61 = vld [vmem:[%s9743_s7 + $0x78] sm:$0xff]  ;;  %v771_v62 = vld [vmem:[%s9743_s7 + $0x60] sm:$0xff] }
  0x52   :  { %343 = vmatprep.mubr.f32.mxu0 %v9761_v3  ;;  %456 = vmatprep.mubr.f32.mxu1 %v9761_v3 }
  0x53   :  { %490 = vmatpush1.msra.mxu0 %v87_v63  ;;  %603 = vmatpush1.msra.mxu1 %v89_v0  ;;  %v773_v63 = vld [vmem:[%s9743_s7 + $0x70] sm:$0xff]  ;;  %v768_v0 = vld [vmem:[%s9743_s7 + $0x48] sm:$0xff] }
  0x54   :  { %344 = vmatmul.mubr.f32.gmra.mxu0 %v6227_v2  ;;  %457 = vmatmul.mubr.f32.gmra.mxu1 %v6227_v2 }
  0x55   :  { %491 = vmatprep.subr.mxu0 %v80_v4  ;;  %604 = vmatprep.subr.mxu1 %v82_v5  ;;  %v770_v4 = vld [vmem:[%s9743_s7 + $0x58] sm:$0xff]  ;;  %v767_v5 = vld [vmem:[%s9743_s7 + $0x40] sm:$0xff] }
  0x56   :  { %492 = vmatpush1.msra.mxu0 %v79_v6  ;;  %605 = vmatpush1.msra.mxu1 %v81_v7  ;;  %v764_v6 = vld [vmem:[%s9743_s7 + $0x28] sm:$0xff]  ;;  %v766_v7 = vld [vmem:[%s9743_s7 + $0x38] sm:$0xff] }
  0x57   :  { %493 = vmatprep.subr.mxu0 %v72_v8  ;;  %606 = vmatprep.subr.mxu1 %v74_v9  ;;  %v763_v8 = vld [vmem:[%s9743_s7 + $0x20] sm:$0xff]  ;;  %v765_v9 = vld [vmem:[%s9743_s7 + $0x30] sm:$0xff] }
  0x58   :  { %494 = vmatpush1.msra.mxu0 %v71_v10  ;;  %527 = vmatprep.mubr.f32.mxu0 %v9761_v3  ;;  %v760_v10 = vld [vmem:[%s9743_s7 + $0x8] sm:$0xff] }
  0x59   :  { %607 = vmatpush1.msra.mxu1 %v73_v12  ;;  %640 = vmatprep.mubr.f32.mxu1 %v9761_v3  ;;  %v762_v12 = vld [vmem:[%s9743_s7 + $0x18] sm:$0xff] }
  0x5a   :  { %528 = vmatmul.mubr.f32.vlgmr.msra.gmra.mxu0 %v5998_v1  ;;  %641 = vmatmul.mubr.f32.vlgmr.msra.gmra.mxu1 %v5998_v1  ;;  %v817_v1 = vld [vmem:[%s9743_s7 + $0x1d0] sm:$0xff] }
  0x5b   :  { %845 = vmatprep.subr.mxu0 %v820_v13  ;;  %946 = vmatprep.subr.mxu1 %v822_v14  ;;  %v1137_v13 = vld [vmem:[%s9744_s5 + $0x1c0] sm:$0xff] }
  0x5c   :  { %846 = vmatpush1.msra.mxu0 %v819_v15  ;;  %947 = vmatpush1.msra.mxu1 %v821_v16  ;;  %v1141_v14 = vld [vmem:[%s9744_s5 + $0x1e0] sm:$0xff]  ;;  %v1138_v15 = vld [vmem:[%s9744_s5 + $0x1c8] sm:$0xff] }
  0x5d   :  { %847 = vmatprep.subr.mxu0 %v816_v17  ;;  %948 = vmatprep.subr.mxu1 %v818_v18  ;;  %v1142_v16 = vld [vmem:[%s9744_s5 + $0x1e8] sm:$0xff]  ;;  %v759_v17 = vld [vmem:[%s9743_s7] sm:$0xff] }
  0x5e   :  { %533 = vmatprep.mubr.f32.mxu0 %v9761_v3  ;;  %646 = vmatprep.mubr.f32.mxu1 %v9761_v3  ;;  %v1129_v18 = vld [vmem:[%s9744_s5 + $0x180] sm:$0xff] }
  0x5f   :  { %848 = vmatpush1.msra.mxu0 %v815_v19  ;;  %949 = vmatpush1.msra.mxu1 %v817_v1  ;;  %v1133_v19 = vld [vmem:[%s9744_s5 + $0x1a0] sm:$0xff]  ;;  %v1130_v1 = vld [vmem:[%s9744_s5 + $0x188] sm:$0xff] }
  0x60   :  { %534 = vmatmul.mubr.f32.gmra.mxu0 %v6029_v11  ;;  %647 = vmatmul.mubr.f32.gmra.mxu1 %v6029_v11  ;;  %v809_v11 = vld [vmem:[%s9743_s7 + $0x190] sm:$0xff] }
  0x61   :  { %849 = vmatprep.subr.mxu0 %v812_v21  ;;  %950 = vmatprep.subr.mxu1 %v814_v22  ;;  %v1134_v21 = vld [vmem:[%s9744_s5 + $0x1a8] sm:$0xff]  ;;  %v753_v22 = vld [vmem:[%s9745_s3] sm:$0xff] }
  0x62   :  { %850 = vmatpush1.msra.mxu0 %v811_v23  ;;  %951 = vmatpush1.msra.mxu1 %v813_v24  ;;  %v6508_v23 = vcombine.high %v1137_v13, %v1141_v14  ;;  %v6510_v24 = vcombine.high %v1138_v15, %v1142_v16 }
  0x63   :  { %851 = vmatprep.subr.mxu0 %v808_v25  ;;  %952 = vmatprep.subr.mxu1 %v810_v26  ;;  %v6513_v25 = vcombine.low %v1137_v13, %v1141_v14  ;;  %v6515_v26 = vcombine.low %v1138_v15, %v1142_v16  ;;  %v1085_v13 = vld [vmem:[%s9744_s5 + $0x20] sm:$0xff]  ;;  %v1082_v14 = vld [vmem:[%s9744_s5 + $0x8] sm:$0xff] }
  0x64   :  { %539 = vmatprep.mubr.f32.mxu0 %v9761_v3  ;;  %652 = vmatprep.mubr.f32.mxu1 %v9761_v3  ;;  %10142 = vst [vmem:[#allocation5_spill] sm:$0xff] %v6508_v23  ;;  %10143 = vst [vmem:[#allocation6_spill] sm:$0xff] %v6510_v24  ;;  %v1086_v15 = vld [vmem:[%s9744_s5 + $0x28] sm:$0xff] }
  0x65   :  { %852 = vmatpush1.msra.mxu0 %v807_v27  ;;  %953 = vmatpush1.msra.mxu1 %v809_v11  ;;  %10144 = vst [vmem:[#allocation7_spill] sm:$0xff] %v6513_v25  ;;  %10145 = vst [vmem:[#allocation8_spill] sm:$0xff] %v6515_v26  ;;  %v1121_v27 = vld [vmem:[%s9744_s5 + $0x140] sm:$0xff] }
  0x66   :  { %540 = vmatmul.mubr.f32.gmra.mxu0 %v6062_v20  ;;  %653 = vmatmul.mubr.f32.gmra.mxu1 %v6062_v20  ;;  %v801_v20 = vld [vmem:[%s9743_s7 + $0x150] sm:$0xff]  ;;  %v1125_v11 = vld [vmem:[%s9744_s5 + $0x160] sm:$0xff] }
  0x67   :  { %853 = vmatprep.subr.mxu0 %v804_v28  ;;  %954 = vmatprep.subr.mxu1 %v806_v30  ;;  %v6524_v28 = vcombine.high %v1129_v18, %v1133_v19  ;;  %v6526_v30 = vcombine.high %v1130_v1, %v1134_v21 }
  0x68   :  { %854 = vmatpush1.msra.mxu0 %v803_v31  ;;  %955 = vmatpush1.msra.mxu1 %v805_v32  ;;  %v1122_v31 = vld [vmem:[%s9744_s5 + $0x148] sm:$0xff] }
  0x69   :  { %855 = vmatprep.subr.mxu0 %v800_v33  ;;  %956 = vmatprep.subr.mxu1 %v802_v34  ;;  %10146 = vst [vmem:[#allocation9_spill] sm:$0xff] %v6524_v28  ;;  %10147 = vst [vmem:[#allocation10_spill] sm:$0xff] %v6526_v30  ;;  %v1126_v32 = vld [vmem:[%s9744_s5 + $0x168] sm:$0xff]  ;;  %v6538_v33 = vcombine.low %v1129_v18, %v1133_v19  ;;  %v6540_v34 = vcombine.low %v1130_v1, %v1134_v21  ;;  %v1201_v19 = vld [vmem:[%s9744_s5 + $0x3c0] sm:$0xff] }
  0x6a   :  { %545 = vmatprep.mubr.f32.mxu0 %v9761_v3  ;;  %658 = vmatprep.mubr.f32.mxu1 %v9761_v3  ;;  %v6691_v18 = vcombine.high %v1082_v14, %v1086_v15  ;;  %v1205_v1 = vld [vmem:[%s9744_s5 + $0x3e0] sm:$0xff]  ;;  %v1202_v21 = vld [vmem:[%s9744_s5 + $0x3c8] sm:$0xff] }
  0x6b   :  { %856 = vmatpush1.msra.mxu0 %v799_v35  ;;  %957 = vmatpush1.msra.mxu1 %v801_v20  ;;  %10148 = vst [vmem:[#allocation11_spill] sm:$0xff] %v6538_v33  ;;  %10149 = vst [vmem:[#allocation12_spill] sm:$0xff] %v6540_v34  ;;  %v1113_v35 = vld [vmem:[%s9744_s5 + $0x100] sm:$0xff]  ;;  %v754_v20 = vld [vmem:[%s9745_s3 + $0x8] sm:$0xff] }
  0x6c   :  { %546 = vmatmul.mubr.f32.gmra.mxu0 %v6095_v29  ;;  %659 = vmatmul.mubr.f32.gmra.mxu1 %v6095_v29  ;;  %v793_v29 = vld [vmem:[%s9743_s7 + $0x110] sm:$0xff]  ;;  %10171 = vst [vmem:[#allocation34_spill] sm:$0xff] %v6691_v18 }
  0x6d   :  { %857 = vmatprep.subr.mxu0 %v796_v36  ;;  %958 = vmatprep.subr.mxu1 %v798_v37  ;;  %v6550_v36 = vcombine.high %v1121_v27, %v1125_v11  ;;  %v6552_v37 = vcombine.high %v1122_v31, %v1126_v32 }
  0x6e   :  { %858 = vmatpush1.msra.mxu0 %v795_v39  ;;  %959 = vmatpush1.msra.mxu1 %v797_v40  ;;  %v1117_v39 = vld [vmem:[%s9744_s5 + $0x120] sm:$0xff]  ;;  %v1114_v40 = vld [vmem:[%s9744_s5 + $0x108] sm:$0xff] }
  0x6f   :  { %859 = vmatprep.subr.mxu0 %v792_v41  ;;  %960 = vmatprep.subr.mxu1 %v794_v42  ;;  %10150 = vst [vmem:[#allocation13_spill] sm:$0xff] %v6550_v36  ;;  %10151 = vst [vmem:[#allocation14_spill] sm:$0xff] %v6552_v37  ;;  %v1118_v41 = vld [vmem:[%s9744_s5 + $0x128] sm:$0xff]  ;;  %v6567_v42 = vcombine.low %v1121_v27, %v1125_v11  ;;  %v9763_v27 = vmov 0  }
  0x70   :  { %551 = vmatprep.mubr.f32.mxu0 %v9761_v3  ;;  %664 = vmatprep.mubr.f32.mxu1 %v9761_v3 }
  0x71   :  { %860 = vmatpush1.msra.mxu0 %v791_v43  ;;  %961 = vmatpush1.msra.mxu1 %v793_v29  ;;  %10152 = vst [vmem:[#allocation15_spill] sm:$0xff] %v6567_v42  ;;  %v6569_v43 = vcombine.low %v1122_v31, %v1126_v32  ;;  %v1105_v29 = vld [vmem:[%s9744_s5 + $0xc0] sm:$0xff]  ;;  %v6713_v31 = vcombine.low %v1082_v14, %v1086_v15 }
  0x72   :  { %552 = vmatmul.mubr.f32.gmra.mxu0 %v6128_v38  ;;  %665 = vmatmul.mubr.f32.gmra.mxu1 %v6128_v38  ;;  %v785_v38 = vld [vmem:[%s9743_s7 + $0xd0] sm:$0xff]  ;;  %v6717_v32 = vcombine.high %v1201_v19, %v1205_v1 }
  0x73   :  { %861 = vmatprep.subr.mxu0 %v788_v44  ;;  %962 = vmatprep.subr.mxu1 %v790_v45  ;;  %10153 = vst [vmem:[#allocation16_spill] sm:$0xff] %v6569_v43  ;;  %v755_v44 = vld [vmem:[%s9745_s3 + $0x10] sm:$0xff]  ;;  %v6579_v45 = vcombine.high %v1113_v35, %v1117_v39  ;;  %10173 = vst [vmem:[#allocation36_spill] sm:$0xff] %v6713_v31 }
  0x74   :  { %862 = vmatpush1.msra.mxu0 %v787_v46  ;;  %963 = vmatpush1.msra.mxu1 %v789_v48  ;;  %v6581_v46 = vcombine.high %v1114_v40, %v1118_v41  ;;  %v1109_v48 = vld [vmem:[%s9744_s5 + $0xe0] sm:$0xff]  ;;  %10174 = vst [vmem:[#allocation37_spill] sm:$0xff] %v6717_v32 }
  0x75   :  { %863 = vmatprep.subr.mxu0 %v784_v49  ;;  %964 = vmatprep.subr.mxu1 %v786_v50  ;;  %10154 = vst [vmem:[#allocation17_spill] sm:$0xff] %v6579_v45  ;;  %v1106_v49 = vld [vmem:[%s9744_s5 + $0xc8] sm:$0xff] }
  0x76   :  { %557 = vmatprep.mubr.f32.mxu0 %v9761_v3  ;;  %670 = vmatprep.mubr.f32.mxu1 %v9761_v3  ;;  %10155 = vst [vmem:[#allocation18_spill] sm:$0xff] %v6581_v46  ;;  %v1110_v50 = vld [vmem:[%s9744_s5 + $0xe8] sm:$0xff] }
  0x77   :  { %864 = vmatpush1.msra.mxu0 %v783_v51  ;;  %965 = vmatpush1.msra.mxu1 %v785_v38  ;;  %v6596_v51 = vcombine.low %v1113_v35, %v1117_v39  ;;  %v6598_v38 = vcombine.low %v1114_v40, %v1118_v41  ;;  %v1197_v39 = vld [vmem:[%s9744_s5 + $0x3a0] sm:$0xff]  ;;  %v1194_v40 = vld [vmem:[%s9744_s5 + $0x388] sm:$0xff] }
  0x78   :  { %558 = vmatmul.mubr.f32.gmra.mxu0 %v6161_v47  ;;  %671 = vmatmul.mubr.f32.gmra.mxu1 %v6161_v47  ;;  %v777_v47 = vld [vmem:[%s9743_s7 + $0x90] sm:$0xff]  ;;  %v1198_v41 = vld [vmem:[%s9744_s5 + $0x3a8] sm:$0xff] }
  0x79   :  { %865 = vmatprep.subr.mxu0 %v780_v52  ;;  %966 = vmatprep.subr.mxu1 %v782_v53  ;;  %10156 = vst [vmem:[#allocation19_spill] sm:$0xff] %v6596_v51  ;;  %10157 = vst [vmem:[#allocation20_spill] sm:$0xff] %v6598_v38  ;;  %v1097_v52 = vld [vmem:[%s9744_s5 + $0x80] sm:$0xff]  ;;  %v756_v53 = vld [vmem:[%s9745_s3 + $0x18] sm:$0xff] }
  0x7a   :  { %866 = vmatpush1.msra.mxu0 %v779_v54  ;;  %967 = vmatpush1.msra.mxu1 %v781_v55  ;;  %v6608_v54 = vcombine.high %v1105_v29, %v1109_v48  ;;  %v6610_v55 = vcombine.high %v1106_v49, %v1110_v50 }
  0x7b   :  { %867 = vmatprep.subr.mxu0 %v776_v57  ;;  %968 = vmatprep.subr.mxu1 %v778_v58  ;;  %v1101_v57 = vld [vmem:[%s9744_s5 + $0xa0] sm:$0xff]  ;;  %v1098_v58 = vld [vmem:[%s9744_s5 + $0x88] sm:$0xff] }
  0x7c   :  { %563 = vmatprep.mubr.f32.mxu0 %v9761_v3  ;;  %676 = vmatprep.mubr.f32.mxu1 %v9761_v3  ;;  %10158 = vst [vmem:[#allocation21_spill] sm:$0xff] %v6608_v54  ;;  %10159 = vst [vmem:[#allocation22_spill] sm:$0xff] %v6610_v55 }
  0x7d   :  { %868 = vmatpush1.msra.mxu0 %v775_v59  ;;  %969 = vmatpush1.msra.mxu1 %v777_v47  ;;  %v1102_v59 = vld [vmem:[%s9744_s5 + $0xa8] sm:$0xff]  ;;  %v6625_v47 = vcombine.low %v1105_v29, %v1109_v48  ;;  %v6735_v29 = vcombine.low %v1201_v19, %v1205_v1  ;;  %v1169_v19 = vld [vmem:[%s9744_s5 + $0x2c0] sm:$0xff] }
  0x7e   :  { %564 = vmatmul.mubr.f32.gmra.mxu0 %v6194_v56  ;;  %677 = vmatmul.mubr.f32.gmra.mxu1 %v6194_v56  ;;  %v769_v56 = vld [vmem:[%s9743_s7 + $0x50] sm:$0xff]  ;;  %v1173_v1 = vld [vmem:[%s9744_s5 + $0x2e0] sm:$0xff] }
  0x7f   :  { %869 = vmatprep.subr.mxu0 %v772_v60  ;;  %970 = vmatprep.subr.mxu1 %v774_v61  ;;  %10160 = vst [vmem:[#allocation23_spill] sm:$0xff] %v6625_v47  ;;  %v6627_v60 = vcombine.low %v1106_v49, %v1110_v50  ;;  %v757_v61 = vld [vmem:[%s9745_s3 + $0x20] sm:$0xff]  ;;  %10176 = vst [vmem:[#allocation39_spill] sm:$0xff] %v6735_v29  ;;  %v6743_v49 = vcombine.high %v1194_v40, %v1198_v41 }
  0x80   :  { %870 = vmatpush1.msra.mxu0 %v771_v62  ;;  %971 = vmatpush1.msra.mxu1 %v773_v63  ;;  %v6634_v62 = vcombine.high %v1097_v52, %v1101_v57  ;;  %v6636_v63 = vcombine.high %v1098_v58, %v1102_v59  ;;  %v1185_v50 = vld [vmem:[%s9744_s5 + $0x340] sm:$0xff] }
  0x81   :  { %871 = vmatprep.subr.mxu0 %v768_v0  ;;  %972 = vmatprep.subr.mxu1 %v770_v4  ;;  %10161 = vst [vmem:[#allocation24_spill] sm:$0xff] %v6627_v60  ;;  %v1089_v0 = vld [vmem:[%s9744_s5 + $0x40] sm:$0xff]  ;;  %10179 = vst [vmem:[#allocation42_spill] sm:$0xff] %v6743_v49 }
  0x82   :  { %569 = vmatprep.mubr.f32.mxu0 %v9761_v3  ;;  %682 = vmatprep.mubr.f32.mxu1 %v9761_v3  ;;  %10162 = vst [vmem:[#allocation25_spill] sm:$0xff] %v6634_v62  ;;  %10163 = vst [vmem:[#allocation26_spill] sm:$0xff] %v6636_v63  ;;  %v1093_v4 = vld [vmem:[%s9744_s5 + $0x60] sm:$0xff] }
  0x83   :  { %872 = vmatpush1.msra.mxu0 %v767_v5  ;;  %973 = vmatpush1.msra.mxu1 %v769_v56  ;;  %v1090_v5 = vld [vmem:[%s9744_s5 + $0x48] sm:$0xff]  ;;  %v6683_v16 = vcombine.low %v1089_v0, %v1093_v4 }
  0x84   :  { %570 = vmatmul.mubr.f32.gmra.mxu0 %v6227_v2  ;;  %683 = vmatmul.mubr.f32.gmra.mxu1 %v6227_v2  ;;  %v761_v2 = vld [vmem:[%s9743_s7 + $0x10] sm:$0xff]  ;;  %v1094_v56 = vld [vmem:[%s9744_s5 + $0x68] sm:$0xff] }
  0x85   :  { %873 = vmatprep.subr.mxu0 %v764_v6  ;;  %974 = vmatprep.subr.mxu1 %v766_v7  ;;  %v6654_v6 = vcombine.low %v1097_v52, %v1101_v57  ;;  %v6656_v7 = vcombine.low %v1098_v58, %v1102_v59  ;;  %10168 = vst [vmem:[#allocation31_spill] sm:$0xff] %v6683_v16  ;;  %v1189_v52 = vld [vmem:[%s9744_s5 + $0x360] sm:$0xff]  ;;  %v1190_v57 = vld [vmem:[%s9744_s5 + $0x368] sm:$0xff] }
  0x86   :  { %874 = vmatpush1.msra.mxu0 %v763_v8  ;;  %975 = vmatpush1.msra.mxu1 %v765_v9  ;;  %v758_v8 = vld [vmem:[%s9745_s3 + $0x28] sm:$0xff]  ;;  %v6663_v9 = vcombine.high %v1089_v0, %v1093_v4  ;;  %v6761_v59 = vcombine.low %v1194_v40, %v1198_v41  ;;  %v1177_v4 = vld [vmem:[%s9744_s5 + $0x300] sm:$0xff]  ;;  %v6813_v40 = vcombine.high %v1169_v19, %v1173_v1 }
  0x87   :  { %875 = vmatprep.subr.mxu0 %v760_v10  ;;  %976 = vmatprep.subr.mxu1 %v762_v12  ;;  %10164 = vst [vmem:[#allocation27_spill] sm:$0xff] %v6654_v6  ;;  %10165 = vst [vmem:[#allocation28_spill] sm:$0xff] %v6656_v7  ;;  %v6665_v10 = vcombine.high %v1090_v5, %v1094_v56  ;;  %v1081_v12 = vld [vmem:[%s9744_s5] sm:$0xff] }
  0x88   :  { %876 = vmatpush1.msra.mxu0 %v759_v17  ;;  %909 = vmatprep.mubr.f32.mxu0 %v9761_v3  ;;  %10166 = vst [vmem:[#allocation29_spill] sm:$0xff] %v6663_v9  ;;  %v6685_v17 = vcombine.low %v1090_v5, %v1094_v56  ;;  %v6711_v11 = vcombine.low %v1081_v12, %v1085_v13  ;;  %10181 = vst [vmem:[#allocation44_spill] sm:$0xff] %v6761_v59  ;;  %v1181_v5 = vld [vmem:[%s9744_s5 + $0x320] sm:$0xff]  ;;  %v1178_v56 = vld [vmem:[%s9744_s5 + $0x308] sm:$0xff] }
  0x89   :  { %977 = vmatpush1.msra.mxu1 %v761_v2  ;;  %1010 = vmatprep.mubr.f32.mxu1 %v9761_v3  ;;  %10167 = vst [vmem:[#allocation30_spill] sm:$0xff] %v6665_v10  ;;  %v6689_v2 = vcombine.high %v1081_v12, %v1085_v13  ;;  %v6783_v12 = vcombine.low %v1185_v50, %v1189_v52  ;;  %10190 = vst [vmem:[#allocation53_spill] sm:$0xff] %v6813_v40 }
  0x8a   :  { %910 = vmatmul.mubr.f32.vlgmr.msra.gmra.mxu0 %v753_v22  ;;  %1011 = vmatmul.mubr.f32.vlgmr.msra.gmra.mxu1 %v753_v22  ;;  %10169 = vst [vmem:[#allocation32_spill] sm:$0xff] %v6685_v17  ;;  %v1206_v22 = vld [vmem:[%s9744_s5 + $0x3e8] sm:$0xff]  ;;  %10172 = vst [vmem:[#allocation35_spill] sm:$0xff] %v6711_v11  ;;  %v6789_v14 = vcombine.high %v1177_v4, %v1181_v5 }
  0x8b   :  { %1849 = vmatprep.subr.bf16.mxu0 %v6508_v23  ;;  %1890 = vmatprep.subr.bf16.mxu1 %v6510_v24  ;;  %10170 = vst [vmem:[#allocation33_spill] sm:$0xff] %v6689_v2  ;;  %v6719_v35 = vcombine.high %v1202_v21, %v1206_v22  ;;  %10184 = vst [vmem:[#allocation47_spill] sm:$0xff] %v6783_v12 }
  0x8c   :  { %1850 = vmatpush1.bf16.msra.mxu0 %v6513_v25  ;;  %1891 = vmatpush1.bf16.msra.mxu1 %v6515_v26  ;;  %10186 = vst [vmem:[#allocation49_spill] sm:$0xff] %v6789_v14 }
  0x8d   :  { %1851 = vmatprep.subr.bf16.mxu0 %v6524_v28  ;;  %1892 = vmatprep.subr.bf16.mxu1 %v6526_v30  ;;  %10175 = vst [vmem:[#allocation38_spill] sm:$0xff] %v6719_v35 }
  0x8e   :  { %915 = vmatprep.mubr.f32.mxu0 %v9761_v3  ;;  %1016 = vmatprep.mubr.f32.mxu1 %v9761_v3 }
  0x8f   :  { %916 = vmatmul.mubr.f32.gmra.mxu0 %v754_v20  ;;  %1017 = vmatmul.mubr.f32.gmra.mxu1 %v754_v20  ;;  %v1193_v20 = vld [vmem:[%s9744_s5 + $0x380] sm:$0xff] }
  0x90   :  { %1852 = vmatpush1.bf16.msra.mxu0 %v6538_v33  ;;  %1893 = vmatpush1.bf16.msra.mxu1 %v6540_v34  ;;  %v6741_v48 = vcombine.high %v1193_v20, %v1197_v39  ;;  %v6759_v58 = vcombine.low %v1193_v20, %v1197_v39  ;;  %v6807_v20 = vcombine.low %v1177_v4, %v1181_v5 }
  0x91   :  { %1853 = vmatprep.subr.bf16.mxu0 %v6550_v36  ;;  %1894 = vmatprep.subr.bf16.mxu1 %v6552_v37  ;;  %v6831_v4 = vcombine.low %v1169_v19, %v1173_v1  ;;  %v1154_v19 = vld [vmem:[%s9744_s5 + $0x248] sm:$0xff] }
  0x92   :  { %921 = vmatprep.mubr.f32.mxu0 %v9761_v3  ;;  %1022 = vmatprep.mubr.f32.mxu1 %v9761_v3  ;;  %10178 = vst [vmem:[#allocation41_spill] sm:$0xff] %v6741_v48  ;;  %10180 = vst [vmem:[#allocation43_spill] sm:$0xff] %v6759_v58  ;;  %v1158_v1 = vld [vmem:[%s9744_s5 + $0x268] sm:$0xff] }
  0x93   :  { %922 = vmatmul.mubr.f32.gmra.mxu0 %v755_v44  ;;  %1023 = vmatmul.mubr.f32.gmra.mxu1 %v755_v44  ;;  %v6737_v44 = vcombine.low %v1202_v21, %v1206_v22  ;;  %v1170_v21 = vld [vmem:[%s9744_s5 + $0x2c8] sm:$0xff]  ;;  %10188 = vst [vmem:[#allocation51_spill] sm:$0xff] %v6807_v20  ;;  %10192 = vst [vmem:[#allocation55_spill] sm:$0xff] %v6831_v4 }
  0x94   :  { %1854 = vmatpush1.bf16.msra.mxu0 %v6567_v42  ;;  %1895 = vmatpush1.bf16.msra.mxu1 %v6569_v43  ;;  %v1174_v22 = vld [vmem:[%s9744_s5 + $0x2e8] sm:$0xff] }
  0x95   :  { %1855 = vmatprep.subr.bf16.mxu0 %v6579_v45  ;;  %1896 = vmatprep.subr.bf16.mxu1 %v6581_v46  ;;  %10177 = vst [vmem:[#allocation40_spill] sm:$0xff] %v6737_v44  ;;  %v6815_v41 = vcombine.high %v1170_v21, %v1174_v22  ;;  %v6833_v5 = vcombine.low %v1170_v21, %v1174_v22 }
  0x96   :  { %927 = vmatprep.mubr.f32.mxu0 %v9761_v3  ;;  %1028 = vmatprep.mubr.f32.mxu1 %v9761_v3 }
  0x97   :  { %928 = vmatmul.mubr.f32.gmra.mxu0 %v756_v53  ;;  %1029 = vmatmul.mubr.f32.gmra.mxu1 %v756_v53  ;;  %v1186_v53 = vld [vmem:[%s9744_s5 + $0x348] sm:$0xff]  ;;  %10191 = vst [vmem:[#allocation54_spill] sm:$0xff] %v6815_v41  ;;  %10193 = vst [vmem:[#allocation56_spill] sm:$0xff] %v6833_v5 }
  0x98   :  { %1856 = vmatpush1.bf16.msra.mxu0 %v6596_v51  ;;  %1897 = vmatpush1.bf16.msra.mxu1 %v6598_v38  ;;  %v6767_v0 = vcombine.high %v1186_v53, %v1190_v57  ;;  %v6785_v13 = vcombine.low %v1186_v53, %v1190_v57  ;;  %v1162_v53 = vld [vmem:[%s9744_s5 + $0x288] sm:$0xff] }
  0x99   :  { %1857 = vmatprep.subr.bf16.mxu0 %v6608_v54  ;;  %1898 = vmatprep.subr.bf16.mxu1 %v6610_v55  ;;  %v1166_v57 = vld [vmem:[%s9744_s5 + $0x2a8] sm:$0xff] }
  0x9a   :  { %933 = vmatprep.mubr.f32.mxu0 %v9761_v3  ;;  %1034 = vmatprep.mubr.f32.mxu1 %v9761_v3  ;;  %10183 = vst [vmem:[#allocation46_spill] sm:$0xff] %v6767_v0  ;;  %10185 = vst [vmem:[#allocation48_spill] sm:$0xff] %v6785_v13  ;;  %v6857_v22 = vcombine.low %v1162_v53, %v1166_v57 }
  0x9b   :  { %934 = vmatmul.mubr.f32.gmra.mxu0 %v757_v61  ;;  %1035 = vmatmul.mubr.f32.gmra.mxu1 %v757_v61  ;;  %v6765_v61 = vcombine.high %v1185_v50, %v1189_v52  ;;  %v1161_v50 = vld [vmem:[%s9744_s5 + $0x280] sm:$0xff] }
  0x9c   :  { %1858 = vmatpush1.bf16.msra.mxu0 %v6625_v47  ;;  %1899 = vmatpush1.bf16.msra.mxu1 %v6627_v60  ;;  %v1165_v52 = vld [vmem:[%s9744_s5 + $0x2a0] sm:$0xff]  ;;  %10197 = vst [vmem:[#allocation60_spill] sm:$0xff] %v6857_v22 }
  0x9d   :  { %1859 = vmatprep.subr.bf16.mxu0 %v6634_v62  ;;  %1900 = vmatprep.subr.bf16.mxu1 %v6636_v63  ;;  %10182 = vst [vmem:[#allocation45_spill] sm:$0xff] %v6765_v61  ;;  %v6855_v21 = vcombine.low %v1161_v50, %v1165_v52 }
  0x9e   :  { %939 = vmatprep.mubr.f32.mxu0 %v9761_v3  ;;  %1040 = vmatprep.mubr.f32.mxu1 %v9761_v3  ;;  %v1153_v3 = vld [vmem:[%s9744_s5 + $0x240] sm:$0xff] }
  0x9f   :  { %940 = vmatmul.mubr.f32.gmra.mxu0 %v758_v8  ;;  %1041 = vmatmul.mubr.f32.gmra.mxu1 %v758_v8  ;;  %v1182_v8 = vld [vmem:[%s9744_s5 + $0x328] sm:$0xff]  ;;  %10196 = vst [vmem:[#allocation59_spill] sm:$0xff] %v6855_v21 }
  0xa0   :  { %1860 = vmatpush1.bf16.msra.mxu0 %v6654_v6  ;;  %1901 = vmatpush1.bf16.msra.mxu1 %v6656_v7  ;;  %v6791_v15 = vcombine.high %v1178_v56, %v1182_v8  ;;  %v6809_v39 = vcombine.low %v1178_v56, %v1182_v8  ;;  %v6837_v56 = vcombine.high %v1161_v50, %v1165_v52  ;;  %v1146_v50 = vld [vmem:[%s9744_s5 + $0x208] sm:$0xff] }
  0xa1   :  { %1861 = vmatprep.subr.bf16.mxu0 %v6663_v9  ;;  %1902 = vmatprep.subr.bf16.mxu1 %v6665_v10  ;;  %v6839_v8 = vcombine.high %v1162_v53, %v1166_v57  ;;  %v1150_v52 = vld [vmem:[%s9744_s5 + $0x228] sm:$0xff]  ;;  %v6881_v57 = vcombine.low %v1154_v19, %v1158_v1 }
  0xa2   :  { %1881 = vmatprep.mubr.bf16.mxu0 %v9763_v27  ;;  %1922 = vmatprep.mubr.bf16.mxu1 %v9763_v27  ;;  %10187 = vst [vmem:[#allocation50_spill] sm:$0xff] %v6791_v15  ;;  %10189 = vst [vmem:[#allocation52_spill] sm:$0xff] %v6809_v39 }
  0xa3   :  { %5235 = vset.pattern.permute.xlu0 %v9763_v27  ;;  %5236 = vset.pattern.permute.xlu1 %v9763_v27  ;;  %10194 = vst [vmem:[#allocation57_spill] sm:$0xff] %v6837_v56  ;;  %10195 = vst [vmem:[#allocation58_spill] sm:$0xff] %v6839_v8  ;;  %v1157_v27 = vld [vmem:[%s9744_s5 + $0x260] sm:$0xff] }
  0xa4   :  { %1862 = vmatpush1.bf16.msra.mxu0 %v6683_v16  ;;  %1903 = vmatpush1.bf16.msra.mxu1 %v6685_v17  ;;  %v6879_v53 = vcombine.low %v1153_v3, %v1157_v27  ;;  %10201 = vst [vmem:[#allocation64_spill] sm:$0xff] %v6881_v57 }
  0xa5   :  { %1863 = vmatprep.subr.bf16.mxu0 %v6689_v2  ;;  %1904 = vmatprep.subr.bf16.mxu1 %v6691_v18 }
  0xa6   :  { %10200 = vst [vmem:[#allocation63_spill] sm:$0xff] %v6879_v53 }
  0xa8   :  { %1864 = vmatpush1.bf16.msra.mxu0 %v6711_v11  ;;  %1905 = vmatpush1.bf16.msra.mxu1 %v6713_v31 }
  0xa9   :  { %1865 = vmatprep.subr.bf16.mxu0 %v6717_v32  ;;  %1906 = vmatprep.subr.bf16.mxu1 %v6719_v35 }
  0xac   :  { %1866 = vmatpush2.bf16.msra.mxu0 %v6735_v29  ;;  %1907 = vmatpush2.bf16.msra.mxu1 %v6737_v44 }
  0xad   :  { %1867 = vmatprep.subr.bf16.mxu0 %v6741_v48  ;;  %1908 = vmatprep.subr.bf16.mxu1 %v6743_v49 }
  0xb0   :  { %1868 = vmatpush2.bf16.msra.mxu0 %v6759_v58  ;;  %1909 = vmatpush2.bf16.msra.mxu1 %v6761_v59 }
  0xb1   :  { %1869 = vmatprep.subr.bf16.mxu0 %v6765_v61  ;;  %1910 = vmatprep.subr.bf16.mxu1 %v6767_v0 }
  0xb4   :  { %1870 = vmatpush2.bf16.msra.mxu0 %v6783_v12  ;;  %1911 = vmatpush2.bf16.msra.mxu1 %v6785_v13  ;;  %v7169_v12 = vld [vmem:[%s9748_s6] sm:$0xff] }
  0xb5   :  { %1871 = vmatprep.subr.bf16.mxu0 %v6789_v14  ;;  %1912 = vmatprep.subr.bf16.mxu1 %v6791_v15  ;;  %v1195_v14 = vld [vmem:[%s9744_s5 + $0x390] sm:$0xff] }
  0xb8   :  { %1872 = vmatpush2.bf16.msra.mxu0 %v6807_v20  ;;  %1913 = vmatpush2.bf16.msra.mxu1 %v6809_v39  ;;  %v1145_v39 = vld [vmem:[%s9744_s5 + $0x200] sm:$0xff]  ;;  %v1115_v20 = vld [vmem:[%s9744_s5 + $0x110] sm:$0xff] }
  0xb9   :  { %1873 = vmatprep.subr.bf16.mxu0 %v6813_v40  ;;  %1914 = vmatprep.subr.bf16.mxu1 %v6815_v41  ;;  %v6861_v41 = vcombine.high %v1153_v3, %v1157_v27  ;;  %v6863_v40 = vcombine.high %v1154_v19, %v1158_v1  ;;  %v1140_v3 = vld [vmem:[%s9744_s5 + $0x1d8] sm:$0xff]  ;;  %v6905_v1 = vcombine.low %v1146_v50, %v1150_v52 }
  0xba   :  { %v1144_v27 = vld [vmem:[%s9744_s5 + $0x1f8] sm:$0xff] }
  0xbb   :  { %10198 = vst [vmem:[#allocation61_spill] sm:$0xff] %v6861_v41  ;;  %10199 = vst [vmem:[#allocation62_spill] sm:$0xff] %v6863_v40 }
  0xbc   :  { %1874 = vmatpush2.bf16.msra.mxu0 %v6831_v4  ;;  %1915 = vmatpush2.bf16.msra.mxu1 %v6833_v5  ;;  %v1149_v5 = vld [vmem:[%s9744_s5 + $0x220] sm:$0xff]  ;;  %v1139_v4 = vld [vmem:[%s9744_s5 + $0x1d0] sm:$0xff]  ;;  %10205 = vst [vmem:[#allocation68_spill] sm:$0xff] %v6905_v1 }
  0xbd   :  { %1875 = vmatprep.subr.bf16.mxu0 %v6837_v56  ;;  %1916 = vmatprep.subr.bf16.mxu1 %v6839_v8  ;;  %v6885_v8 = vcombine.high %v1145_v39, %v1149_v5  ;;  %v6887_v56 = vcombine.high %v1146_v50, %v1150_v52  ;;  %v6903_v19 = vcombine.low %v1145_v39, %v1149_v5  ;;  %v1132_v39 = vld [vmem:[%s9744_s5 + $0x198] sm:$0xff] }
  0xbe   :  { %v1136_v5 = vld [vmem:[%s9744_s5 + $0x1b8] sm:$0xff]  ;;  %v6929_v52 = vcombine.low %v1140_v3, %v1144_v27 }
  0xbf   :  { %10202 = vst [vmem:[#allocation65_spill] sm:$0xff] %v6885_v8  ;;  %10203 = vst [vmem:[#allocation66_spill] sm:$0xff] %v6887_v56 }
  0xc0   :  { %1876 = vmatpush2.bf16.msra.mxu0 %v6855_v21  ;;  %1917 = vmatpush2.bf16.msra.mxu1 %v6857_v22  ;;  %v1143_v22 = vld [vmem:[%s9744_s5 + $0x1f0] sm:$0xff]  ;;  %10204 = vst [vmem:[#allocation67_spill] sm:$0xff] %v6903_v19  ;;  %10209 = vst [vmem:[#allocation72_spill] sm:$0xff] %v6929_v52 }
  0xc1   :  { %1877 = vmatprep.subr.bf16.mxu0 %v6861_v41  ;;  %1918 = vmatprep.subr.bf16.mxu1 %v6863_v40  ;;  %v6909_v40 = vcombine.high %v1139_v4, %v1143_v22  ;;  %v6911_v41 = vcombine.high %v1140_v3, %v1144_v27  ;;  %v1131_v21 = vld [vmem:[%s9744_s5 + $0x190] sm:$0xff]  ;;  %v6927_v50 = vcombine.low %v1139_v4, %v1143_v22  ;;  %v1124_v4 = vld [vmem:[%s9744_s5 + $0x158] sm:$0xff]  ;;  %v10212_v3 = vmov 0  }
  0xc2   :  { %v1128_v22 = vld [vmem:[%s9744_s5 + $0x178] sm:$0xff] }
  0xc3   :  { %10206 = vst [vmem:[#allocation69_spill] sm:$0xff] %v6909_v40  ;;  %10207 = vst [vmem:[#allocation70_spill] sm:$0xff] %v6911_v41 }
  0xc4   :  { %1878 = vmatpush2.bf16.msra.mxu0 %v6879_v53  ;;  %1919 = vmatpush2.bf16.msra.mxu1 %v6881_v57  ;;  %v1135_v57 = vld [vmem:[%s9744_s5 + $0x1b0] sm:$0xff]  ;;  %10208 = vst [vmem:[#allocation71_spill] sm:$0xff] %v6927_v50 }
  0xc5   :  { %1879 = vmatprep.subr.bf16.mxu0 %v6885_v8  ;;  %1920 = vmatprep.subr.bf16.mxu1 %v6887_v56  ;;  %v6933_v56 = vcombine.high %v1131_v21, %v1135_v57  ;;  %v6935_v8 = vcombine.high %v1132_v39, %v1136_v5  ;;  %v1123_v53 = vld [vmem:[%s9744_s5 + $0x150] sm:$0xff]  ;;  %v6953_v27 = vcombine.low %v1131_v21, %v1135_v57  ;;  %v1116_v21 = vld [vmem:[%s9744_s5 + $0x118] sm:$0xff] }
  0xc6   :  { %v1120_v57 = vld [vmem:[%s9744_s5 + $0x138] sm:$0xff] }
  0xc7   :  { %10210 = vst [vmem:[#allocation73_spill] sm:$0xff] %v6933_v56  ;;  %10211 = vst [vmem:[#allocation74_spill] sm:$0xff] %v6935_v8  ;;  %v6994_v15 = vcombine.high %v1116_v21, %v1120_v57 }
  0xc8   :  { %1880 = vmatpush2.bf16.msra.mxu0 %v6903_v19  ;;  %1921 = vmatpush2.bf16.msra.mxu1 %v6905_v1  ;;  %v1127_v1 = vld [vmem:[%s9744_s5 + $0x170] sm:$0xff]  ;;  %10213 = vst [vmem:[#allocation75_spill] sm:$0xff] %v6953_v27  ;;  %v6961_v19 = vcombine.high %v1124_v4, %v1128_v22 }
  0xc9   :  { %1931 = vmatprep.subr.bf16.mxu0 %v6909_v40  ;;  %1972 = vmatprep.subr.bf16.mxu1 %v6911_v41  ;;  %v6955_v41 = vcombine.low %v1132_v39, %v1136_v5  ;;  %v6959_v40 = vcombine.high %v1123_v53, %v1127_v1  ;;  %v6980_v39 = vld [vmem:[%s9747_s0] sm:$0xff]  ;;  %v6985_v5 = vcombine.low %v1123_v53, %v1127_v1  ;;  %v1111_v53 = vld [vmem:[%s9744_s5 + $0xf0] sm:$0xff]  ;;  %v1108_v1 = vld [vmem:[%s9744_s5 + $0xd8] sm:$0xff] }
  0xca   :  { %10216 = vst [vmem:[#allocation78_spill] sm:$0xff] %v6961_v19  ;;  %vm2069_vm0 = vcmp.eq.s32.totalorder %v6980_v39, 1  ;;  %10220 = vst [vmem:[#allocation82_spill] sm:$0xff] %v6994_v15  ;;  %vm2620_vm1 = vcmp.eq.s32.totalorder %v6980_v39, 2  ;;  %vm3700_vm2 = vcmp.eq.s32.totalorder %v6980_v39, 5  ;;  %v7636_v39 = vld [vmem:[%s9749_s1] sm:$0xff] }
  0xcb   :  { %1882 = vmatmul.mubr.bf16.vlgmr.msra.gmra.mxu0 %v10212_v3  ;;  %1923 = vmatmul.mubr.bf16.vlgmr.msra.gmra.mxu1 %v10212_v3  ;;  %10214 = vst [vmem:[#allocation76_spill] sm:$0xff] %v6955_v41  ;;  %10215 = vst [vmem:[#allocation77_spill] sm:$0xff] %v6959_v40  ;;  %vm2383_vm3 = vcmp.eq.s32.totalorder %v7636_v39, 1  ;;  %vm2743_vm5 = vcmp.eq.s32.totalorder %v7636_v39, 2 }
  0xcc   :  { %1932 = vmatpush1.bf16.msra.mxu0 %v6927_v50  ;;  %1973 = vmatpush1.bf16.msra.mxu1 %v6929_v52  ;;  %v1119_v52 = vld [vmem:[%s9744_s5 + $0x130] sm:$0xff]  ;;  %10217 = vst [vmem:[#allocation79_spill] sm:$0xff] %v6985_v5 }
  0xcd   :  { %1933 = vmatprep.subr.bf16.mxu0 %v6933_v56  ;;  %1974 = vmatprep.subr.bf16.mxu1 %v6935_v8  ;;  %v6987_v8 = vcombine.low %v1124_v4, %v1128_v22  ;;  %v2070_v56 = vsel %vm2069_vm0, 1, %v10212_v3  ;;  %v6992_v50 = vcombine.high %v1115_v20, %v1119_v52  ;;  %v1112_v4 = vld [vmem:[%s9744_s5 + $0xf8] sm:$0xff]  ;;  %v7010_v22 = vcombine.low %v1115_v20, %v1119_v52 }
  0xce   :  { %1963 = vmatprep.mubr.bf16.mxu0 %v10212_v3  ;;  %2004 = vmatprep.mubr.bf16.mxu1 %v10212_v3  ;;  %v1100_v20 = vld [vmem:[%s9744_s5 + $0x98] sm:$0xff] }
  0xcf   :  { %10218 = vst [vmem:[#allocation80_spill] sm:$0xff] %v6987_v8  ;;  %10219 = vst [vmem:[#allocation81_spill] sm:$0xff] %v6992_v50  ;;  %2072 = vperm.xlu0 %5235, %v2070_v56   ;;  %v1099_v56 = vld [vmem:[%s9744_s5 + $0x90] sm:$0xff]  ;;  %v1104_v52 = vld [vmem:[%s9744_s5 + $0xb8] sm:$0xff] }
  0xd0   :  { %1934 = vmatpush1.bf16.msra.mxu0 %v6953_v27  ;;  %1975 = vmatpush1.bf16.msra.mxu1 %v6955_v41  ;;  %v1107_v27 = vld [vmem:[%s9744_s5 + $0xd0] sm:$0xff]  ;;  %10221 = vst [vmem:[#allocation83_spill] sm:$0xff] %v7010_v22  ;;  %v7018_v41 = vcombine.high %v1108_v1, %v1112_v4 }
  0xd1   :  { %1935 = vmatprep.subr.bf16.mxu0 %v6959_v40  ;;  %1976 = vmatprep.subr.bf16.mxu1 %v6961_v19  ;;  %v7012_v19 = vcombine.low %v1116_v21, %v1120_v57  ;;  %v7016_v40 = vcombine.high %v1107_v27, %v1111_v53  ;;  %v7034_v21 = vcombine.low %v1107_v27, %v1111_v53  ;;  %v1092_v27 = vld [vmem:[%s9744_s5 + $0x58] sm:$0xff] }
  0xd2   :  { %10224 = vst [vmem:[#allocation86_spill] sm:$0xff] %v7018_v41  ;;  %v7036_v57 = vcombine.low %v1108_v1, %v1112_v4  ;;  %v1096_v53 = vld [vmem:[%s9744_s5 + $0x78] sm:$0xff]  ;;  %v7060_v4 = vcombine.low %v1100_v20, %v1104_v52 }
  0xd3   :  { %10222 = vst [vmem:[#allocation84_spill] sm:$0xff] %v7012_v19  ;;  %10223 = vst [vmem:[#allocation85_spill] sm:$0xff] %v7016_v40 }
  0xd4   :  { %1936 = vmatpush1.bf16.msra.mxu0 %v6985_v5  ;;  %1977 = vmatpush1.bf16.msra.mxu1 %v6987_v8  ;;  %v1103_v8 = vld [vmem:[%s9744_s5 + $0xb0] sm:$0xff]  ;;  %10225 = vst [vmem:[#allocation87_spill] sm:$0xff] %v7034_v21  ;;  %10226 = vst [vmem:[#allocation88_spill] sm:$0xff] %v7036_v57 }
  0xd5   :  { %1937 = vmatprep.subr.bf16.mxu0 %v6992_v50  ;;  %1978 = vmatprep.subr.bf16.mxu1 %v6994_v15  ;;  %v7040_v15 = vcombine.high %v1099_v56, %v1103_v8  ;;  %v7042_v50 = vcombine.high %v1100_v20, %v1104_v52  ;;  %v1091_v5 = vld [vmem:[%s9744_s5 + $0x50] sm:$0xff]  ;;  %v7058_v1 = vcombine.low %v1099_v56, %v1103_v8  ;;  %v1084_v8 = vld [vmem:[%s9744_s5 + $0x18] sm:$0xff] }
  0xd6   :  { %10230 = vst [vmem:[#allocation92_spill] sm:$0xff] %v7060_v4  ;;  %v1088_v56 = vld [vmem:[%s9744_s5 + $0x38] sm:$0xff]  ;;  %v7084_v52 = vcombine.low %v1092_v27, %v1096_v53 }
  0xd7   :  { %10227 = vst [vmem:[#allocation89_spill] sm:$0xff] %v7040_v15  ;;  %10228 = vst [vmem:[#allocation90_spill] sm:$0xff] %v7042_v50 }
  0xd8   :  { %1938 = vmatpush1.bf16.msra.mxu0 %v7010_v22  ;;  %1979 = vmatpush1.bf16.msra.mxu1 %v7012_v19  ;;  %v1095_v19 = vld [vmem:[%s9744_s5 + $0x70] sm:$0xff]  ;;  %10229 = vst [vmem:[#allocation91_spill] sm:$0xff] %v7058_v1  ;;  %10234 = vst [vmem:[#allocation96_spill] sm:$0xff] %v7084_v52 }
  0xd9   :  { %1939 = vmatprep.subr.bf16.mxu0 %v7016_v40  ;;  %1980 = vmatprep.subr.bf16.mxu1 %v7018_v41  ;;  %v7064_v41 = vcombine.high %v1091_v5, %v1095_v19  ;;  %v7066_v40 = vcombine.high %v1092_v27, %v1096_v53  ;;  %v1083_v22 = vld [vmem:[%s9744_s5 + $0x10] sm:$0xff]  ;;  %v7082_v20 = vcombine.low %v1091_v5, %v1095_v19  ;;  %v1204_v19 = vld [vmem:[%s9744_s5 + $0x3d8] sm:$0xff]  ;;  %v197_v27 = vlaneseq }
  0xda   :  { %v1208_v5 = vld [vmem:[%s9744_s5 + $0x3f8] sm:$0xff] }
  0xdb   :  { %10231 = vst [vmem:[#allocation93_spill] sm:$0xff] %v7064_v41  ;;  %10232 = vst [vmem:[#allocation94_spill] sm:$0xff] %v7066_v40 }
  0xdc   :  { %1940 = vmatpush1.bf16.msra.mxu0 %v7034_v21  ;;  %1981 = vmatpush1.bf16.msra.mxu1 %v7036_v57  ;;  %v1087_v57 = vld [vmem:[%s9744_s5 + $0x30] sm:$0xff]  ;;  %10233 = vst [vmem:[#allocation95_spill] sm:$0xff] %v7082_v20 }
  0xdd   :  { %1941 = vmatprep.subr.bf16.mxu0 %v7040_v15  ;;  %1982 = vmatprep.subr.bf16.mxu1 %v7042_v50  ;;  %v7088_v50 = vcombine.high %v1083_v22, %v1087_v57  ;;  %v7090_v15 = vcombine.high %v1084_v8, %v1088_v56  ;;  %v1203_v21 = vld [vmem:[%s9744_s5 + $0x3d0] sm:$0xff]  ;;  %v7106_v53 = vcombine.low %v1083_v22, %v1087_v57  ;;  %v1196_v22 = vld [vmem:[%s9744_s5 + $0x398] sm:$0xff] }
  0xde   :  { %v1200_v57 = vld [vmem:[%s9744_s5 + $0x3b8] sm:$0xff] }
  0xdf   :  { %10235 = vst [vmem:[#allocation97_spill] sm:$0xff] %v7088_v50  ;;  %10236 = vst [vmem:[#allocation98_spill] sm:$0xff] %v7090_v15  ;;  %v7164_v13 = vcombine.low %v1196_v22, %v1200_v57 }
  0xe0   :  { %1942 = vmatpush1.bf16.msra.mxu0 %v7058_v1  ;;  %1983 = vmatpush1.bf16.msra.mxu1 %v7060_v4  ;;  %v1207_v4 = vld [vmem:[%s9744_s5 + $0x3f0] sm:$0xff]  ;;  %10237 = vst [vmem:[#allocation99_spill] sm:$0xff] %v7106_v53  ;;  %v7114_v1 = vcombine.high %v1204_v19, %v1208_v5 }
  0xe1   :  { %1943 = vmatprep.subr.bf16.mxu0 %v7064_v41  ;;  %1984 = vmatprep.subr.bf16.mxu1 %v7066_v40  ;;  %v7108_v40 = vcombine.low %v1084_v8, %v1088_v56  ;;  %v7112_v41 = vcombine.high %v1203_v21, %v1207_v4  ;;  %v7128_v8 = vshrl.u32 %v197_v27, 7  ;;  %v7132_v56 = vcombine.low %v1203_v21, %v1207_v4  ;;  %v1187_v27 = vld [vmem:[%s9744_s5 + $0x350] sm:$0xff]  ;;  %v1188_v21 = vld [vmem:[%s9744_s5 + $0x358] sm:$0xff] }
  0xe2   :  { %10240 = vst [vmem:[#allocation102_spill] sm:$0xff] %v7114_v1  ;;  %v1192_v4 = vld [vmem:[%s9744_s5 + $0x378] sm:$0xff]  ;;  %10248 = vst [vmem:[#allocation110_spill] sm:$0xff] %v7164_v13 }
  0xe3   :  { %10238 = vst [vmem:[#allocation100_spill] sm:$0xff] %v7108_v40  ;;  %10239 = vst [vmem:[#allocation101_spill] sm:$0xff] %v7112_v41 }
  0xe4   :  { %1944 = vmatpush1.bf16.msra.mxu0 %v7082_v20  ;;  %1985 = vmatpush1.bf16.msra.mxu1 %v7084_v52  ;;  %v1199_v52 = vld [vmem:[%s9744_s5 + $0x3b0] sm:$0xff]  ;;  %10241 = vst [vmem:[#allocation103_spill] sm:$0xff] %v7132_v56  ;;  %v7140_v20 = vcombine.high %v1196_v22, %v1200_v57  ;;  %v1180_v22 = vld [vmem:[%s9744_s5 + $0x318] sm:$0xff] }
  0xe5   :  { %1945 = vmatprep.subr.bf16.mxu0 %v7088_v50  ;;  %1986 = vmatprep.subr.bf16.mxu1 %v7090_v15  ;;  %v7134_v15 = vcombine.low %v1204_v19, %v1208_v5  ;;  %v7138_v50 = vcombine.high %v1195_v14, %v1199_v52  ;;  %v1184_v57 = vld [vmem:[%s9744_s5 + $0x338] sm:$0xff] }
  0xe6   :  { %10244 = vst [vmem:[#allocation106_spill] sm:$0xff] %v7140_v20 }
  0xe7   :  { %10242 = vst [vmem:[#allocation104_spill] sm:$0xff] %v7134_v15  ;;  %10243 = vst [vmem:[#allocation105_spill] sm:$0xff] %v7138_v50 }
  0xe8   :  { %1946 = vmatpush1.bf16.msra.mxu0 %v7106_v53  ;;  %1987 = vmatpush1.bf16.msra.mxu1 %v7108_v40  ;;  %v1191_v40 = vld [vmem:[%s9744_s5 + $0x370] sm:$0xff]  ;;  %v7162_v53 = vcombine.low %v1195_v14, %v1199_v52 }
  0xe9   :  { %1947 = vmatprep.subr.bf16.mxu0 %v7112_v41  ;;  %1988 = vmatprep.subr.bf16.mxu1 %v7114_v1  ;;  %v7177_v41 = vcombine.high %v1187_v27, %v1191_v40  ;;  %v7179_v1 = vcombine.high %v1188_v21, %v1192_v4  ;;  %v1179_v14 = vld [vmem:[%s9744_s5 + $0x310] sm:$0xff] }
  0xea   :  { %v7154_v19 = vpop.f32.mrf.mxu0  ;;  %v7156_v5 = vpop.f32.mrf.mxu1  ;;  %10247 = vst [vmem:[#allocation109_spill] sm:$0xff] %v7162_v53  ;;  %v1183_v52 = vld [vmem:[%s9744_s5 + $0x330] sm:$0xff] }
  0xeb   :  { %10245 = vst [vmem:[#allocation107_spill] sm:$0xff] %v7154_v19  ;;  %10246 = vst [vmem:[#allocation108_spill] sm:$0xff] %v7156_v5  ;;  %v7209_v0 = vcombine.high %v1179_v14, %v1183_v52 }
  0xec   :  { %1948 = vmatpush2.bf16.msra.mxu0 %v7132_v56  ;;  %1989 = vmatpush2.bf16.msra.mxu1 %v7134_v15  ;;  %v7171_v19 = vpop.f32.mrf.mxu0  ;;  %v7173_v5 = vpop.f32.mrf.mxu1  ;;  %10251 = vst [vmem:[#allocation113_spill] sm:$0xff] %v7177_v41  ;;  %10252 = vst [vmem:[#allocation114_spill] sm:$0xff] %v7179_v1  ;;  %v10254_v15 = vsub.s32 2, %v7128_v8 }
  0xed   :  { %10249 = vst [vmem:[#allocation111_spill] sm:$0xff] %v7171_v19  ;;  %10250 = vst [vmem:[#allocation112_spill] sm:$0xff] %v7173_v5  ;;  %1949 = vmatprep.subr.bf16.mxu0 %v7138_v50  ;;  %1990 = vmatprep.subr.bf16.mxu1 %v7140_v20  ;;  %v10253_v20 = vsub.s32 0, %v7128_v8  ;;  %v7205_v5 = vcombine.low %v1187_v27, %v1191_v40  ;;  %v7207_v19 = vcombine.low %v1188_v21, %v1192_v4  ;;  %v1175_v27 = vld [vmem:[%s9744_s5 + $0x2f0] sm:$0xff]  ;;  %v1172_v21 = vld [vmem:[%s9744_s5 + $0x2d8] sm:$0xff] }
  0xee   :  { %v7201_v56 = vrot.slane %v7169_v12, %v10254_v15  ;;  %10257 = vst [vmem:[#allocation117_spill] sm:$0xff] %v7209_v0  ;;  %v1171_v15 = vld [vmem:[%s9744_s5 + $0x2d0] sm:$0xff]  ;;  %v1176_v4 = vld [vmem:[%s9744_s5 + $0x2f8] sm:$0xff] }
  0xef   :  { %v7196_v50 = vrot.slane %v7169_v12, %v10253_v20  ;;  %10255 = vst [vmem:[#allocation115_spill] sm:$0xff] %v7205_v5  ;;  %10256 = vst [vmem:[#allocation116_spill] sm:$0xff] %v7207_v19  ;;  %v7213_v20 = vcombine.high %v1180_v22, %v1184_v57  ;;  %v7281_v49 = vcombine.low %v1171_v15, %v1175_v27 }
  0xf0   :  { %1950 = vmatpush2.bf16.msra.mxu0 %v7162_v53  ;;  %1991 = vmatpush2.bf16.msra.mxu1 %v7164_v13  ;;  %v309_v61 = vpop.f32.mrf.mxu0  ;;  %v422_v59 = vpop.f32.mrf.mxu1  ;;  %v7247_v53 = vcombine.high %v1171_v15, %v1175_v27  ;;  %v7283_v48 = vcombine.low %v1172_v21, %v1176_v4  ;;  %v1159_v15 = vld [vmem:[%s9744_s5 + $0x270] sm:$0xff] }
  0xf1   :  { %1951 = vmatprep.subr.bf16.mxu0 %v7177_v41  ;;  %1992 = vmatprep.subr.bf16.mxu1 %v7179_v1  ;;  %10258 = vst [vmem:[#allocation118_spill] sm:$0xff] %v7213_v20  ;;  %v7219_v13 = vadd.f32 %v309_v61, %v7196_v50  ;;  %v7222_v40 = vadd.f32 %v422_v59, %v7201_v56  ;;  %v1163_v59 = vld [vmem:[%s9744_s5 + $0x290] sm:$0xff]  ;;  %10273 = vst [vmem:[#allocation131_spill] sm:$0xff] %v7281_v49 }
  0xf2   :  { %v7233_v1 = vpop.f32.mrf.mxu0  ;;  %v7235_v41 = vpop.f32.mrf.mxu1  ;;  %10265 = vst [vmem:[#allocation125_spill] sm:$0xff] %v7247_v53  ;;  %v1167_v61 = vld [vmem:[%s9744_s5 + $0x2b0] sm:$0xff]  ;;  %10274 = vst [vmem:[#allocation132_spill] sm:$0xff] %v7283_v48 }
  0xf3   :  { %10259 = vst [vmem:[#allocation119_spill] sm:$0xff] %v7219_v13  ;;  %10260 = vst [vmem:[#allocation120_spill] sm:$0xff] %v7222_v40  ;;  %v7241_v40 = vcombine.low %v1179_v14, %v1183_v52  ;;  %v7243_v13 = vcombine.low %v1180_v22, %v1184_v57  ;;  %v1164_v14 = vld [vmem:[%s9744_s5 + $0x298] sm:$0xff] }
  0xf4   :  { %10261 = vst [vmem:[#allocation121_spill] sm:$0xff] %v7233_v1  ;;  %10262 = vst [vmem:[#allocation122_spill] sm:$0xff] %v7235_v41  ;;  %1952 = vmatpush2.bf16.msra.mxu0 %v7205_v5  ;;  %1993 = vmatpush2.bf16.msra.mxu1 %v7207_v19  ;;  %v7249_v1 = vcombine.high %v1172_v21, %v1176_v4  ;;  %v1168_v52 = vld [vmem:[%s9744_s5 + $0x2b8] sm:$0xff]  ;;  %v10267_v41 = vsub.s32 1, %v7128_v8 }
  0xf5   :  { %10263 = vst [vmem:[#allocation123_spill] sm:$0xff] %v7241_v40  ;;  %10264 = vst [vmem:[#allocation124_spill] sm:$0xff] %v7243_v13  ;;  %1953 = vmatprep.subr.bf16.mxu0 %v7209_v0  ;;  %1994 = vmatprep.subr.bf16.mxu1 %v7213_v20  ;;  %v10269_v0 = vsub.s32 3, %v7128_v8  ;;  %v1156_v4 = vld [vmem:[%s9744_s5 + $0x258] sm:$0xff] }
  0xf6   :  { %10266 = vst [vmem:[#allocation126_spill] sm:$0xff] %v7249_v1  ;;  %v315_v22 = vpop.f32.mrf.mxu0  ;;  %v428_v57 = vpop.f32.mrf.mxu1  ;;  %v7266_v20 = vrot.slane %v7169_v12, %v10267_v41  ;;  %v7285_v41 = vcombine.high %v1163_v59, %v1167_v61 }
  0xf7   :  { %v7271_v19 = vrot.slane %v7169_v12, %v10269_v0  ;;  %v7274_v5 = vadd.f32 %v315_v22, %v7196_v50  ;;  %v7277_v58 = vadd.f32 %v428_v57, %v7201_v56  ;;  %v7289_v0 = vcombine.high %v1164_v14, %v1168_v52  ;;  %v1155_v22 = vld [vmem:[%s9744_s5 + $0x250] sm:$0xff]  ;;  %v1160_v57 = vld [vmem:[%s9744_s5 + $0x278] sm:$0xff] }
  0xf8   :  { %10268 = vst [vmem:[#allocation127_spill] sm:$0xff] %v7266_v20  ;;  %1954 = vmatpush2.bf16.msra.mxu0 %v7241_v40  ;;  %1995 = vmatpush2.bf16.msra.mxu1 %v7243_v13  ;;  %10275 = vst [vmem:[#allocation133_spill] sm:$0xff] %v7285_v41  ;;  %v317_v44 = vpop.f32.mrf.mxu0  ;;  %v430_v29 = vpop.f32.mrf.mxu1 }
  0xf9   :  { %10270 = vst [vmem:[#allocation128_spill] sm:$0xff] %v7271_v19  ;;  %10271 = vst [vmem:[#allocation129_spill] sm:$0xff] %v7274_v5  ;;  %1955 = vmatprep.subr.bf16.mxu0 %v7247_v53  ;;  %1996 = vmatprep.subr.bf16.mxu1 %v7249_v1  ;;  %v7298_v27 = vadd.f32 %v317_v44, %v7266_v20  ;;  %v7301_v21 = vadd.f32 %v430_v29, %v7271_v19 }
  0xfa   :  { %10272 = vst [vmem:[#allocation130_spill] sm:$0xff] %v7277_v58  ;;  %10276 = vst [vmem:[#allocation134_spill] sm:$0xff] %v7289_v0  ;;  %v7311_v58 = vcombine.low %v1163_v59, %v1167_v61  ;;  %v7313_v5 = vcombine.low %v1164_v14, %v1168_v52  ;;  %v7315_v44 = vcombine.high %v1155_v22, %v1159_v15  ;;  %v1151_v59 = vld [vmem:[%s9744_s5 + $0x230] sm:$0xff]  ;;  %v1148_v14 = vld [vmem:[%s9744_s5 + $0x218] sm:$0xff] }
  0xfb   :  { %10277 = vst [vmem:[#allocation135_spill] sm:$0xff] %v7298_v27  ;;  %10278 = vst [vmem:[#allocation136_spill] sm:$0xff] %v7301_v21  ;;  %v7319_v27 = vcombine.high %v1156_v4, %v1160_v57  ;;  %v1152_v52 = vld [vmem:[%s9744_s5 + $0x238] sm:$0xff] }
  0xfc   :  { %1956 = vmatpush2.bf16.msra.mxu0 %v7281_v49  ;;  %1997 = vmatpush2.bf16.msra.mxu1 %v7283_v48  ;;  %10279 = vst [vmem:[#allocation137_spill] sm:$0xff] %v7311_v58  ;;  %10280 = vst [vmem:[#allocation138_spill] sm:$0xff] %v7313_v5  ;;  %v321_v29 = vpop.f32.mrf.mxu0  ;;  %v434_v21 = vpop.f32.mrf.mxu1  ;;  %v1147_v49 = vld [vmem:[%s9744_s5 + $0x210] sm:$0xff] }
  0xfd   :  { %10281 = vst [vmem:[#allocation139_spill] sm:$0xff] %v7315_v44  ;;  %1957 = vmatprep.subr.bf16.mxu0 %v7285_v41  ;;  %1998 = vmatprep.subr.bf16.mxu1 %v7289_v0  ;;  %10282 = vst [vmem:[#allocation140_spill] sm:$0xff] %v7319_v27  ;;  %v7325_v48 = vadd.f32 %v321_v29, %v7196_v50  ;;  %v7328_v61 = vadd.f32 %v434_v21, %v7201_v56 }
  0xfe   :  { %v7339_v0 = vpop.f32.mrf.mxu0  ;;  %v7341_v41 = vpop.f32.mrf.mxu1  ;;  %v7345_v21 = vcombine.low %v1155_v22, %v1159_v15  ;;  %v7347_v29 = vcombine.low %v1156_v4, %v1160_v57  ;;  %v7363_v22 = vcombine.low %v1147_v49, %v1151_v59  ;;  %v7365_v15 = vcombine.low %v1148_v14, %v1152_v52 }
  0xff   :  { %10283 = vst [vmem:[#allocation141_spill] sm:$0xff] %v7325_v48  ;;  %10284 = vst [vmem:[#allocation142_spill] sm:$0xff] %v7328_v61  ;;  %v7351_v61 = vcombine.high %v1147_v49, %v1151_v59  ;;  %v7353_v48 = vcombine.high %v1148_v14, %v1152_v52  ;;  %v7390_v14 = vld [vmem:[%s9746_s8 + $0xe0] ss:$16 sps:$4 sm:$0xff]   ;;  %v7395_v52 = vld [vmem:[%s9746_s8 + $0xe8] ss:$16 sps:$4 sm:$0xff]  }
 0x100   :  { %10285 = vst [vmem:[#allocation143_spill] sm:$0xff] %v7339_v0  ;;  %10286 = vst [vmem:[#allocation144_spill] sm:$0xff] %v7341_v41  ;;  %1958 = vmatpush2.bf16.msra.mxu0 %v7311_v58  ;;  %1999 = vmatpush2.bf16.msra.mxu1 %v7313_v5 }
 0x101   :  { %10287 = vst [vmem:[#allocation145_spill] sm:$0xff] %v7345_v21  ;;  %10288 = vst [vmem:[#allocation146_spill] sm:$0xff] %v7347_v29  ;;  %1959 = vmatprep.subr.bf16.mxu0 %v7315_v44  ;;  %2000 = vmatprep.subr.bf16.mxu1 %v7319_v27 }
 0x102   :  { %10289 = vst [vmem:[#allocation147_spill] sm:$0xff] %v7351_v61  ;;  %10290 = vst [vmem:[#allocation148_spill] sm:$0xff] %v7353_v48  ;;  %v327_v1 = vpop.f32.mrf.mxu0  ;;  %v440_v0 = vpop.f32.mrf.mxu1 }
 0x103   :  { %v7356_v41 = vadd.f32 %v327_v1, %v7196_v50  ;;  %v7359_v58 = vadd.f32 %v440_v0, %v7201_v56  ;;  %10293 = vst [vmem:[#allocation151_spill] sm:$0xff] %v7363_v22  ;;  %10294 = vst [vmem:[#allocation152_spill] sm:$0xff] %v7365_v15  ;;  %v7372_v1 = vld [vmem:[%s9746_s8 + $0xe4] ss:$16 sps:$4 sm:$0xff]   ;;  %v7377_v0 = vld [vmem:[%s9746_s8 + $0xec] ss:$16 sps:$4 sm:$0xff]  }
 0x104   :  { %1960 = vmatpush2.bf16.msra.mxu0 %v7345_v21  ;;  %2001 = vmatpush2.bf16.msra.mxu1 %v7347_v29  ;;  %v329_v4 = vpop.f32.mrf.mxu0  ;;  %v442_v57 = vpop.f32.mrf.mxu1  ;;  %10295 = vst [vmem:[#allocation153_spill] sm:$0xff] %v7372_v1  ;;  %10296 = vst [vmem:[#allocation154_spill] sm:$0xff] %v7377_v0  ;;  %v7593_v29 = vld [vmem:[%s9746_s8 + $0x28] ss:$16 sps:$4 sm:$0xff]  }
 0x105   :  { %10291 = vst [vmem:[#allocation149_spill] sm:$0xff] %v7356_v41  ;;  %10292 = vst [vmem:[#allocation150_spill] sm:$0xff] %v7359_v58  ;;  %1961 = vmatprep.subr.bf16.mxu0 %v7351_v61  ;;  %2002 = vmatprep.subr.bf16.mxu1 %v7353_v48  ;;  %v7380_v49 = vadd.f32 %v329_v4, %v7266_v20  ;;  %v7383_v59 = vadd.f32 %v442_v57, %v7271_v19  ;;  %v7402_v57 = vld [vmem:[%s9746_s8 + $0xc4] ss:$16 sps:$4 sm:$0xff]  }
 0x106   :  { %10299 = vst [vmem:[#allocation157_spill] sm:$0xff] %v7390_v14  ;;  %10300 = vst [vmem:[#allocation158_spill] sm:$0xff] %v7395_v52 }
 0x107   :  { %10297 = vst [vmem:[#allocation155_spill] sm:$0xff] %v7380_v49  ;;  %10298 = vst [vmem:[#allocation156_spill] sm:$0xff] %v7383_v59  ;;  %v7407_v59 = vld [vmem:[%s9746_s8 + $0xcc] ss:$16 sps:$4 sm:$0xff]  }
 0x108   :  { %1962 = vmatpush2.bf16.msra.mxu0 %v7363_v22  ;;  %2003 = vmatpush2.bf16.msra.mxu1 %v7365_v15  ;;  %v333_v58 = vpop.f32.mrf.mxu0  ;;  %v446_v4 = vpop.f32.mrf.mxu1  ;;  %10301 = vst [vmem:[#allocation159_spill] sm:$0xff] %v7402_v57  ;;  %10302 = vst [vmem:[#allocation160_spill] sm:$0xff] %v7407_v59 }
 0x109   :  { %2273 = vmatprep.subr.bf16.mxu0 %v7372_v1  ;;  %2314 = vmatprep.subr.bf16.mxu1 %v7377_v0  ;;  %v7410_v49 = vadd.f32 %v333_v58, %v7196_v50  ;;  %v7413_v41 = vadd.f32 %v446_v4, %v7201_v56  ;;  %v7426_v58 = vld [vmem:[%s9746_s8 + $0xc0] ss:$16 sps:$4 sm:$0xff]   ;;  %v7431_v4 = vld [vmem:[%s9746_s8 + $0xc8] ss:$16 sps:$4 sm:$0xff]   ;;  %10335 = vst [vmem:[#allocation193_spill] sm:$0xff] %v7593_v29 }
 0x10a   :  { %v7415_v15 = vpop.f32.mrf.mxu0  ;;  %v7417_v1 = vpop.f32.mrf.mxu1  ;;  %10307 = vst [vmem:[#allocation165_spill] sm:$0xff] %v7426_v58  ;;  %10308 = vst [vmem:[#allocation166_spill] sm:$0xff] %v7431_v4 }
 0x10b   :  { %10303 = vst [vmem:[#allocation161_spill] sm:$0xff] %v7410_v49  ;;  %10304 = vst [vmem:[#allocation162_spill] sm:$0xff] %v7413_v41  ;;  %1964 = vmatmul.mubr.bf16.vlgmr.msra.gmra.mxu0 %v10212_v3  ;;  %2005 = vmatmul.mubr.bf16.vlgmr.msra.gmra.mxu1 %v10212_v3  ;;  %v7443_v41 = vld [vmem:[%s9746_s8 + $0xac] ss:$16 sps:$4 sm:$0xff]  }
 0x10c   :  { %10305 = vst [vmem:[#allocation163_spill] sm:$0xff] %v7415_v15  ;;  %10306 = vst [vmem:[#allocation164_spill] sm:$0xff] %v7417_v1  ;;  %2274 = vmatpush1.bf16.msra.mxu0 %v7390_v14  ;;  %2315 = vmatpush1.bf16.msra.mxu1 %v7395_v52  ;;  %v7438_v1 = vld [vmem:[%s9746_s8 + $0xa4] ss:$16 sps:$4 sm:$0xff]   ;;  %v7458_v52 = vld [vmem:[%s9746_s8 + $0xa0] ss:$16 sps:$4 sm:$0xff]  }
 0x10d   :  { %2275 = vmatprep.subr.bf16.mxu0 %v7402_v57  ;;  %2316 = vmatprep.subr.bf16.mxu1 %v7407_v59  ;;  %10309 = vst [vmem:[#allocation167_spill] sm:$0xff] %v7438_v1  ;;  %10310 = vst [vmem:[#allocation168_spill] sm:$0xff] %v7443_v41  ;;  %v7463_v14 = vld [vmem:[%s9746_s8 + $0xa8] ss:$16 sps:$4 sm:$0xff]  }
 0x10e   :  { %v339_v49 = vpop.f32.mrf.mxu0  ;;  %v452_v15 = vpop.f32.mrf.mxu1  ;;  %2305 = vmatprep.mubr.bf16.mxu0 %v10212_v3  ;;  %2346 = vmatprep.mubr.bf16.mxu1 %v10212_v3  ;;  %10313 = vst [vmem:[#allocation171_spill] sm:$0xff] %v7458_v52  ;;  %10314 = vst [vmem:[#allocation172_spill] sm:$0xff] %v7463_v14 }
 0x10f   :  { %v7448_v57 = vadd.f32 %v339_v49, %v7196_v50  ;;  %v7451_v59 = vadd.f32 %v452_v15, %v7201_v56  ;;  %v7470_v15 = vld [vmem:[%s9746_s8 + $0x84] ss:$16 sps:$4 sm:$0xff]  }
 0x110   :  { %2276 = vmatpush1.bf16.msra.mxu0 %v7426_v58  ;;  %2317 = vmatpush1.bf16.msra.mxu1 %v7431_v4  ;;  %v341_v0 = vpop.f32.mrf.mxu0  ;;  %v454_v49 = vpop.f32.mrf.mxu1  ;;  %10315 = vst [vmem:[#allocation173_spill] sm:$0xff] %v7470_v15 }
 0x111   :  { %10311 = vst [vmem:[#allocation169_spill] sm:$0xff] %v7448_v57  ;;  %10312 = vst [vmem:[#allocation170_spill] sm:$0xff] %v7451_v59  ;;  %2277 = vmatprep.subr.bf16.mxu0 %v7438_v1  ;;  %2318 = vmatprep.subr.bf16.mxu1 %v7443_v41  ;;  %v7475_v59 = vld [vmem:[%s9746_s8 + $0x8c] ss:$16 sps:$4 sm:$0xff]   ;;  %v7478_v57 = vadd.f32 %v341_v0, %v7266_v20  ;;  %v7481_v4 = vadd.f32 %v454_v49, %v7271_v19  ;;  %v7488_v41 = vld [vmem:[%s9746_s8 + $0x80] ss:$16 sps:$4 sm:$0xff]  }
 0x112   :  { %10316 = vst [vmem:[#allocation174_spill] sm:$0xff] %v7475_v59  ;;  %10319 = vst [vmem:[#allocation177_spill] sm:$0xff] %v7488_v41  ;;  %v7493_v1 = vld [vmem:[%s9746_s8 + $0x88] ss:$16 sps:$4 sm:$0xff]   ;;  %v7500_v49 = vld [vmem:[%s9746_s8 + $0x64] ss:$16 sps:$4 sm:$0xff]  }
 0x113   :  { %10317 = vst [vmem:[#allocation175_spill] sm:$0xff] %v7478_v57  ;;  %10318 = vst [vmem:[#allocation176_spill] sm:$0xff] %v7481_v4  ;;  %v7505_v4 = vld [vmem:[%s9746_s8 + $0x6c] ss:$16 sps:$4 sm:$0xff]  }
 0x114   :  { %2278 = vmatpush1.bf16.msra.mxu0 %v7458_v52  ;;  %2319 = vmatpush1.bf16.msra.mxu1 %v7463_v14  ;;  %10320 = vst [vmem:[#allocation178_spill] sm:$0xff] %v7493_v1  ;;  %v345_v58 = vpop.f32.mrf.mxu0  ;;  %v458_v0 = vpop.f32.mrf.mxu1  ;;  %10321 = vst [vmem:[#allocation179_spill] sm:$0xff] %v7500_v49 }
 0x115   :  { %2279 = vmatprep.subr.bf16.mxu0 %v7470_v15  ;;  %2320 = vmatprep.subr.bf16.mxu1 %v7475_v59  ;;  %10322 = vst [vmem:[#allocation180_spill] sm:$0xff] %v7505_v4  ;;  %v7508_v57 = vadd.f32 %v345_v58, %v7196_v50  ;;  %v7511_v14 = vadd.f32 %v458_v0, %v7201_v56  ;;  %v7522_v59 = vld [vmem:[%s9746_s8 + $0x60] ss:$16 sps:$4 sm:$0xff]   ;;  %v7527_v58 = vld [vmem:[%s9746_s8 + $0x68] ss:$16 sps:$4 sm:$0xff]  }
 0x116   :  { %v7513_v52 = vpop.f32.mrf.mxu0  ;;  %v7515_v15 = vpop.f32.mrf.mxu1  ;;  %10327 = vst [vmem:[#allocation185_spill] sm:$0xff] %v7522_v59  ;;  %10328 = vst [vmem:[#allocation186_spill] sm:$0xff] %v7527_v58  ;;  %v7534_v0 = vld [vmem:[%s9746_s8 + $0x44] ss:$16 sps:$4 sm:$0xff]  }
 0x117   :  { %10323 = vst [vmem:[#allocation181_spill] sm:$0xff] %v7508_v57  ;;  %10324 = vst [vmem:[#allocation182_spill] sm:$0xff] %v7511_v14 }
 0x118   :  { %10325 = vst [vmem:[#allocation183_spill] sm:$0xff] %v7513_v52  ;;  %10326 = vst [vmem:[#allocation184_spill] sm:$0xff] %v7515_v15  ;;  %2280 = vmatpush1.bf16.msra.mxu0 %v7488_v41  ;;  %2321 = vmatpush1.bf16.msra.mxu1 %v7493_v1  ;;  %v7539_v15 = vld [vmem:[%s9746_s8 + $0x4c] ss:$16 sps:$4 sm:$0xff]   ;;  %v215_v52 = vsub.s32 4, %v7128_v8 }
 0x119   :  { %2281 = vmatprep.subr.bf16.mxu0 %v7500_v49  ;;  %2322 = vmatprep.subr.bf16.mxu1 %v7505_v4  ;;  %10329 = vst [vmem:[#allocation187_spill] sm:$0xff] %v7534_v0  ;;  %10330 = vst [vmem:[#allocation188_spill] sm:$0xff] %v7539_v15  ;;  %v223_v49 = vsub.s32 6, %v7128_v8  ;;  %v7552_v4 = vld [vmem:[%s9746_s8 + $0x40] ss:$16 sps:$4 sm:$0xff]  }
 0x11a   :  { %v7541_v14 = vpop.f32.mrf.mxu0  ;;  %v7543_v57 = vpop.f32.mrf.mxu1  ;;  %10331 = vst [vmem:[#allocation189_spill] sm:$0xff] %v7552_v4  ;;  %v7557_v1 = vld [vmem:[%s9746_s8 + $0x48] ss:$16 sps:$4 sm:$0xff]   ;;  %v7577_v48 = vrot.slane %v7169_v12, %v215_v52 }
 0x11b   :  { %10332 = vst [vmem:[#allocation190_spill] sm:$0xff] %v7557_v1  ;;  %v7580_v61 = vrot.slane %v7169_v12, %v223_v49  ;;  %v7600_v49 = vld [vmem:[%s9746_s8 + $0x4] ss:$16 sps:$4 sm:$0xff]  }
 0x11c   :  { %2282 = vmatpush1.bf16.msra.mxu0 %v7522_v59  ;;  %2323 = vmatpush1.bf16.msra.mxu1 %v7527_v58  ;;  %v7559_v41 = vpop.f32.mrf.mxu0  ;;  %v7561_v22 = vpop.f32.mrf.mxu1  ;;  %v7568_v58 = vld [vmem:[%s9746_s8 + $0x24] ss:$16 sps:$4 sm:$0xff]   ;;  %v7573_v59 = vld [vmem:[%s9746_s8 + $0x2c] ss:$16 sps:$4 sm:$0xff]   ;;  %10336 = vst [vmem:[#allocation194_spill] sm:$0xff] %v7600_v49 }
 0x11d   :  { %2283 = vmatprep.subr.bf16.mxu0 %v7534_v0  ;;  %2324 = vmatprep.subr.bf16.mxu1 %v7539_v15  ;;  %10333 = vst [vmem:[#allocation191_spill] sm:$0xff] %v7568_v58  ;;  %10334 = vst [vmem:[#allocation192_spill] sm:$0xff] %v7573_v59  ;;  %v2621_v15 = vsel %vm2620_vm1, 1, %v10212_v3  ;;  %v7588_v0 = vld [vmem:[%s9746_s8 + $0x20] ss:$16 sps:$4 sm:$0xff]  }
 0x11e   :  { %2623 = vperm.xlu0 %5235, %v2621_v15  }
 0x120   :  { %2284 = vmatpush1.bf16.msra.mxu0 %v7552_v4  ;;  %2325 = vmatpush1.bf16.msra.mxu1 %v7557_v1  ;;  %v535_v52 = vpop.f32.mrf.mxu0  ;;  %v648_v21 = vpop.f32.mrf.mxu1  ;;  %v7605_v1 = vld [vmem:[%s9746_s8 + $0xc] ss:$16 sps:$4 sm:$0xff]  }
 0x121   :  { %2285 = vmatprep.subr.bf16.mxu0 %v7568_v58  ;;  %2326 = vmatprep.subr.bf16.mxu1 %v7573_v59  ;;  %10337 = vst [vmem:[#allocation195_spill] sm:$0xff] %v7605_v1  ;;  %v7608_v4 = vadd.f32 %v535_v52, %v7577_v48  ;;  %v7611_v27 = vadd.f32 %v648_v21, %v7580_v61  ;;  %v3701_v59 = vsel %vm3700_vm2, 1, %v10212_v3  ;;  %v7624_v52 = vld [vmem:[%s9746_s8] ss:$16 sps:$4 sm:$0xff]   ;;  %v7629_v21 = vld [vmem:[%s9746_s8 + $0x8] ss:$16 sps:$4 sm:$0xff]  }
 0x122   :  { %v7613_v44 = vpop.f32.mrf.mxu0  ;;  %v7615_v58 = vpop.f32.mrf.mxu1  ;;  %3703 = vperm.xlu0 %5235, %v3701_v59   ;;  %v227_v59 = vsub.s32 7, %v7128_v8 }
 0x123   :  { %10338 = vst [vmem:[#allocation196_spill] sm:$0xff] %v7608_v4  ;;  %10339 = vst [vmem:[#allocation197_spill] sm:$0xff] %v7611_v27 }
 0x124   :  { %10340 = vst [vmem:[#allocation198_spill] sm:$0xff] %v7613_v44  ;;  %10341 = vst [vmem:[#allocation199_spill] sm:$0xff] %v7615_v58  ;;  %2286 = vmatpush1.bf16.msra.mxu0 %v7588_v0  ;;  %2327 = vmatpush1.bf16.msra.mxu1 %v7593_v29  ;;  %v2384_v44 = vsel %vm2383_vm3, 1, %v10212_v3 }
 0x125   :  { %2287 = vmatprep.subr.bf16.mxu0 %v7600_v49  ;;  %2328 = vmatprep.subr.bf16.mxu1 %v7605_v1  ;;  %v219_v1 = vsub.s32 5, %v7128_v8 }
 0x126   :  { %v541_v15 = vpop.f32.mrf.mxu0  ;;  %v654_v27 = vpop.f32.mrf.mxu1  ;;  %2386 = vperm.xlu0 %5235, %v2384_v44  }
 0x127   :  { %v7640_v4 = vadd.f32 %v541_v15, %v7577_v48  ;;  %v7643_v58 = vadd.f32 %v654_v27, %v7580_v61  ;;  %v7659_v27 = vrot.slane %v7169_v12, %v219_v1 }
 0x128   :  { %2288 = vmatpush1.bf16.msra.mxu0 %v7624_v52  ;;  %2329 = vmatpush1.bf16.msra.mxu1 %v7629_v21  ;;  %v7649_v49 = vpop.f32.mrf.mxu0  ;;  %v7651_v29 = vpop.f32.mrf.mxu1 }
 0x129   :  { %10342 = vst [vmem:[#allocation200_spill] sm:$0xff] %v7640_v4  ;;  %10343 = vst [vmem:[#allocation201_spill] sm:$0xff] %v7643_v58  ;;  %2400 = vmatprep.subr.bf16.mxu0 %v6508_v23  ;;  %2441 = vmatprep.subr.bf16.mxu1 %v6510_v24  ;;  %v7664_v4 = vrot.slane %v7169_v12, %v227_v59 }
 0x12a   :  { %10344 = vst [vmem:[#allocation202_spill] sm:$0xff] %v7649_v49  ;;  %10345 = vst [vmem:[#allocation203_spill] sm:$0xff] %v7651_v29 }
 0x12b   :  { %2306 = vmatmul.mubr.bf16.vlgmr.msra.gmra.mxu0 %v10212_v3  ;;  %2347 = vmatmul.mubr.bf16.vlgmr.msra.gmra.mxu1 %v10212_v3 }
 0x12c   :  { %v547_v15 = vpop.f32.mrf.mxu0  ;;  %v660_v58 = vpop.f32.mrf.mxu1  ;;  %2401 = vmatpush1.bf16.msra.mxu0 %v6513_v25  ;;  %2442 = vmatpush1.bf16.msra.mxu1 %v6515_v26 }
 0x12d   :  { %v7667_v29 = vadd.f32 %v547_v15, %v7577_v48  ;;  %v7670_v44 = vadd.f32 %v660_v58, %v7580_v61  ;;  %2402 = vmatprep.subr.bf16.mxu0 %v6524_v28  ;;  %2443 = vmatprep.subr.bf16.mxu1 %v6526_v30 }
 0x12e   :  { %v549_v1 = vpop.f32.mrf.mxu0  ;;  %v662_v49 = vpop.f32.mrf.mxu1 }
 0x12f   :  { %10346 = vst [vmem:[#allocation204_spill] sm:$0xff] %v7667_v29  ;;  %10347 = vst [vmem:[#allocation205_spill] sm:$0xff] %v7670_v44  ;;  %v7675_v24 = vadd.f32 %v549_v1, %v7659_v27  ;;  %v7678_v26 = vadd.f32 %v662_v49, %v7664_v4  ;;  %v10366_v29 = vsub.s32 0, %v7128_v8 }
 0x130   :  { %2403 = vmatpush1.bf16.msra.mxu0 %v6538_v33  ;;  %2444 = vmatpush1.bf16.msra.mxu1 %v6540_v34 }
 0x131   :  { %10348 = vst [vmem:[#allocation206_spill] sm:$0xff] %v7675_v24  ;;  %10349 = vst [vmem:[#allocation207_spill] sm:$0xff] %v7678_v26  ;;  %2404 = vmatprep.subr.bf16.mxu0 %v6550_v36  ;;  %2445 = vmatprep.subr.bf16.mxu1 %v6552_v37 }
 0x132   :  { %v553_v12 = vpop.f32.mrf.mxu0  ;;  %v666_v58 = vpop.f32.mrf.mxu1 }
 0x133   :  { %v7685_v59 = vadd.f32 %v553_v12, %v7577_v48  ;;  %v7688_v15 = vadd.f32 %v666_v58, %v7580_v61 }
 0x134   :  { %v555_v1 = vpop.f32.mrf.mxu0  ;;  %v668_v24 = vpop.f32.mrf.mxu1  ;;  %2405 = vmatpush1.bf16.msra.mxu0 %v6567_v42  ;;  %2446 = vmatpush1.bf16.msra.mxu1 %v6569_v43 }
 0x135   :  { %10350 = vst [vmem:[#allocation208_spill] sm:$0xff] %v7685_v59  ;;  %10351 = vst [vmem:[#allocation209_spill] sm:$0xff] %v7688_v15  ;;  %v7693_v49 = vadd.f32 %v555_v1, %v7659_v27  ;;  %v7696_v26 = vadd.f32 %v668_v24, %v7664_v4  ;;  %2406 = vmatprep.subr.bf16.mxu0 %v6579_v45  ;;  %2447 = vmatprep.subr.bf16.mxu1 %v6581_v46 }
 0x137   :  { %10352 = vst [vmem:[#allocation210_spill] sm:$0xff] %v7693_v49  ;;  %10353 = vst [vmem:[#allocation211_spill] sm:$0xff] %v7696_v26 }
 0x138   :  { %v559_v12 = vpop.f32.mrf.mxu0  ;;  %v672_v59 = vpop.f32.mrf.mxu1  ;;  %2407 = vmatpush1.bf16.msra.mxu0 %v6596_v51  ;;  %2448 = vmatpush1.bf16.msra.mxu1 %v6598_v38 }
 0x139   :  { %v7703_v58 = vadd.f32 %v559_v12, %v7577_v48  ;;  %v7706_v15 = vadd.f32 %v672_v59, %v7580_v61  ;;  %2408 = vmatprep.subr.bf16.mxu0 %v6608_v54  ;;  %2449 = vmatprep.subr.bf16.mxu1 %v6610_v55 }
 0x13a   :  { %v561_v24 = vpop.f32.mrf.mxu0  ;;  %v674_v1 = vpop.f32.mrf.mxu1 }
 0x13b   :  { %10354 = vst [vmem:[#allocation212_spill] sm:$0xff] %v7703_v58  ;;  %10355 = vst [vmem:[#allocation213_spill] sm:$0xff] %v7706_v15  ;;  %v7711_v26 = vadd.f32 %v561_v24, %v7659_v27  ;;  %v7714_v49 = vadd.f32 %v674_v1, %v7664_v4 }
 0x13c   :  { %2409 = vmatpush1.bf16.msra.mxu0 %v6625_v47  ;;  %2450 = vmatpush1.bf16.msra.mxu1 %v6627_v60 }
 0x13d   :  { %10356 = vst [vmem:[#allocation214_spill] sm:$0xff] %v7711_v26  ;;  %10357 = vst [vmem:[#allocation215_spill] sm:$0xff] %v7714_v49  ;;  %2410 = vmatprep.subr.bf16.mxu0 %v6634_v62  ;;  %2451 = vmatprep.subr.bf16.mxu1 %v6636_v63 }
 0x13e   :  { %v565_v59 = vpop.f32.mrf.mxu0  ;;  %v678_v12 = vpop.f32.mrf.mxu1 }
 0x13f   :  { %v7721_v15 = vadd.f32 %v565_v59, %v7577_v48  ;;  %v7724_v58 = vadd.f32 %v678_v12, %v7580_v61  ;;  %v823_v12 = vld [vmem:[%s9750_s9] sm:$0xf] }
 0x140   :  { %v567_v24 = vpop.f32.mrf.mxu0  ;;  %v680_v26 = vpop.f32.mrf.mxu1  ;;  %2411 = vmatpush1.bf16.msra.mxu0 %v6654_v6  ;;  %2452 = vmatpush1.bf16.msra.mxu1 %v6656_v7 }
 0x141   :  { %10358 = vst [vmem:[#allocation216_spill] sm:$0xff] %v7721_v15  ;;  %10359 = vst [vmem:[#allocation217_spill] sm:$0xff] %v7724_v58  ;;  %v7729_v1 = vadd.f32 %v567_v24, %v7659_v27  ;;  %v7732_v49 = vadd.f32 %v680_v26, %v7664_v4  ;;  %2412 = vmatprep.subr.bf16.mxu0 %v6663_v9  ;;  %2453 = vmatprep.subr.bf16.mxu1 %v6665_v10  ;;  %v10379_v10 = vld [vmem:[#allocation46_spill] sm:$0xff]  ;;  %v10386_v9 = vld [vmem:[#allocation49_spill] sm:$0xff] }
 0x143   :  { %10360 = vst [vmem:[#allocation218_spill] sm:$0xff] %v7729_v1  ;;  %10361 = vst [vmem:[#allocation219_spill] sm:$0xff] %v7732_v49 }
 0x144   :  { %v571_v59 = vpop.f32.mrf.mxu0  ;;  %v684_v15 = vpop.f32.mrf.mxu1  ;;  %2413 = vmatpush1.bf16.msra.mxu0 %v6683_v16  ;;  %2454 = vmatpush1.bf16.msra.mxu1 %v6685_v17  ;;  %v7757_v17 = vrot.slane %v823_v12, %v10366_v29 }
 0x145   :  { %v7742_v24 = vadd.f32 %v571_v59, %v7577_v48  ;;  %v7745_v26 = vadd.f32 %v684_v15, %v7580_v61  ;;  %2414 = vmatprep.subr.bf16.mxu0 %v6689_v2  ;;  %2455 = vmatprep.subr.bf16.mxu1 %v6691_v18  ;;  %v10367_v59 = vsub.s32 2, %v7128_v8  ;;  %v10371_v18 = vld [vmem:[#allocation40_spill] sm:$0xff] }
 0x146   :  { %v573_v49 = vpop.f32.mrf.mxu0  ;;  %v686_v1 = vpop.f32.mrf.mxu1 }
 0x147   :  { %10362 = vst [vmem:[#allocation220_spill] sm:$0xff] %v7742_v24  ;;  %10363 = vst [vmem:[#allocation221_spill] sm:$0xff] %v7745_v26  ;;  %v7750_v58 = vadd.f32 %v573_v49, %v7659_v27  ;;  %v7753_v44 = vadd.f32 %v686_v1, %v7664_v4  ;;  %v7761_v15 = vrot.slane %v823_v12, %v10367_v59  ;;  %v10368_v26 = vsub.s32 1, %v7128_v8 }
 0x148   :  { %2415 = vmatpush1.bf16.msra.mxu0 %v6711_v11  ;;  %2456 = vmatpush1.bf16.msra.mxu1 %v6713_v31  ;;  %v10369_v49 = vsub.s32 3, %v7128_v8 }
 0x149   :  { %10364 = vst [vmem:[#allocation222_spill] sm:$0xff] %v7750_v58  ;;  %10365 = vst [vmem:[#allocation223_spill] sm:$0xff] %v7753_v44  ;;  %v7767_v24 = vrot.slane %v823_v12, %v10368_v26  ;;  %2416 = vmatprep.subr.bf16.mxu0 %v6717_v32  ;;  %2457 = vmatprep.subr.bf16.mxu1 %v6719_v35  ;;  %v10370_v26 = vld [vmem:[#allocation39_spill] sm:$0xff]  ;;  %v10373_v35 = vld [vmem:[#allocation42_spill] sm:$0xff] }
 0x14a   :  { %v7771_v1 = vrot.slane %v823_v12, %v10369_v49  ;;  %v911_v29 = vpop.f32.mrf.mxu0  ;;  %v1012_v44 = vpop.f32.mrf.mxu1  ;;  %v10372_v49 = vld [vmem:[#allocation41_spill] sm:$0xff] }
 0x14b   :  { %v7776_v59 = vadd.f32 %v911_v29, %v7757_v17  ;;  %v7779_v58 = vadd.f32 %v1012_v44, %v7761_v15 }
 0x14c   :  { %v913_v31 = vpop.f32.mrf.mxu0  ;;  %v1014_v11 = vpop.f32.mrf.mxu1  ;;  %2417 = vmatpush2.bf16.msra.mxu0 %v10370_v26  ;;  %2458 = vmatpush2.bf16.msra.mxu1 %v10371_v18  ;;  %v10376_v26 = vld [vmem:[#allocation43_spill] sm:$0xff]  ;;  %v10377_v18 = vld [vmem:[#allocation44_spill] sm:$0xff] }
 0x14d   :  { %v7784_v8 = vadd.f32 %v913_v31, %v7767_v24  ;;  %v7787_v12 = vadd.f32 %v1014_v11, %v7771_v1  ;;  %2418 = vmatprep.subr.bf16.mxu0 %v10372_v49  ;;  %2459 = vmatprep.subr.bf16.mxu1 %v10373_v35  ;;  %v10378_v11 = vld [vmem:[#allocation45_spill] sm:$0xff] }
 0x14f   :  { %v917_v29 = vpop.f32.mrf.mxu0  ;;  %v1018_v32 = vpop.f32.mrf.mxu1 }
 0x150   :  { %v7792_v44 = vadd.f32 %v917_v29, %v7757_v17  ;;  %v7795_v2 = vadd.f32 %v1018_v32, %v7761_v15  ;;  %2419 = vmatpush2.bf16.msra.mxu0 %v10376_v26  ;;  %2460 = vmatpush2.bf16.msra.mxu1 %v10377_v18  ;;  %v10384_v18 = vld [vmem:[#allocation47_spill] sm:$0xff]  ;;  %v10385_v26 = vld [vmem:[#allocation48_spill] sm:$0xff] }
 0x151   :  { %v919_v31 = vpop.f32.mrf.mxu0  ;;  %v1020_v16 = vpop.f32.mrf.mxu1  ;;  %2420 = vmatprep.subr.bf16.mxu0 %v10378_v11  ;;  %2461 = vmatprep.subr.bf16.mxu1 %v10379_v10 }
 0x152   :  { %10374 = vst [vmem:[#allocation224_spill] sm:$0xff] %v7792_v44  ;;  %10375 = vst [vmem:[#allocation225_spill] sm:$0xff] %v7795_v2  ;;  %v7802_v35 = vadd.f32 %v919_v31, %v7767_v24  ;;  %v7805_v49 = vadd.f32 %v1020_v16, %v7771_v1  ;;  %v10387_v31 = vld [vmem:[#allocation50_spill] sm:$0xff] }
 0x153   :  { %v923_v29 = vpop.f32.mrf.mxu0  ;;  %v1024_v44 = vpop.f32.mrf.mxu1 }
 0x154   :  { %10380 = vst [vmem:[#allocation226_spill] sm:$0xff] %v7802_v35  ;;  %10381 = vst [vmem:[#allocation227_spill] sm:$0xff] %v7805_v49  ;;  %v7808_v32 = vadd.f32 %v923_v29, %v7757_v17  ;;  %v7811_v2 = vadd.f32 %v1024_v44, %v7761_v15  ;;  %2421 = vmatpush2.bf16.msra.mxu0 %v10384_v18  ;;  %2462 = vmatpush2.bf16.msra.mxu1 %v10385_v26  ;;  %v10392_v35 = vld [vmem:[#allocation51_spill] sm:$0xff]  ;;  %v10393_v26 = vld [vmem:[#allocation52_spill] sm:$0xff] }
 0x155   :  { %v925_v11 = vpop.f32.mrf.mxu0  ;;  %v1026_v10 = vpop.f32.mrf.mxu1  ;;  %2422 = vmatprep.subr.bf16.mxu0 %v10386_v9  ;;  %2463 = vmatprep.subr.bf16.mxu1 %v10387_v31  ;;  %v10394_v18 = vld [vmem:[#allocation53_spill] sm:$0xff] }
 0x156   :  { %10382 = vst [vmem:[#allocation228_spill] sm:$0xff] %v7808_v32  ;;  %10383 = vst [vmem:[#allocation229_spill] sm:$0xff] %v7811_v2  ;;  %v7818_v16 = vadd.f32 %v925_v11, %v7767_v24  ;;  %v7821_v49 = vadd.f32 %v1026_v10, %v7771_v1  ;;  %v10395_v11 = vld [vmem:[#allocation54_spill] sm:$0xff] }
 0x157   :  { %v929_v29 = vpop.f32.mrf.mxu0  ;;  %v1030_v32 = vpop.f32.mrf.mxu1 }
 0x158   :  { %10388 = vst [vmem:[#allocation230_spill] sm:$0xff] %v7818_v16  ;;  %10389 = vst [vmem:[#allocation231_spill] sm:$0xff] %v7821_v49  ;;  %v7824_v44 = vadd.f32 %v929_v29, %v7757_v17  ;;  %v7827_v2 = vadd.f32 %v1030_v32, %v7761_v15  ;;  %2423 = vmatpush2.bf16.msra.mxu0 %v10392_v35  ;;  %2464 = vmatpush2.bf16.msra.mxu1 %v10393_v26  ;;  %v10400_v16 = vld [vmem:[#allocation55_spill] sm:$0xff]  ;;  %v10401_v26 = vld [vmem:[#allocation56_spill] sm:$0xff] }
 0x159   :  { %v931_v9 = vpop.f32.mrf.mxu0  ;;  %v1032_v31 = vpop.f32.mrf.mxu1  ;;  %2424 = vmatprep.subr.bf16.mxu0 %v10394_v18  ;;  %2465 = vmatprep.subr.bf16.mxu1 %v10395_v11  ;;  %v10402_v35 = vld [vmem:[#allocation57_spill] sm:$0xff] }
 0x15a   :  { %10390 = vst [vmem:[#allocation232_spill] sm:$0xff] %v7824_v44  ;;  %10391 = vst [vmem:[#allocation233_spill] sm:$0xff] %v7827_v2  ;;  %v7834_v10 = vadd.f32 %v931_v9, %v7767_v24  ;;  %v7837_v49 = vadd.f32 %v1032_v31, %v7771_v1  ;;  %v10403_v9 = vld [vmem:[#allocation58_spill] sm:$0xff] }
 0x15b   :  { %v935_v29 = vpop.f32.mrf.mxu0  ;;  %v1036_v44 = vpop.f32.mrf.mxu1 }
 0x15c   :  { %10396 = vst [vmem:[#allocation234_spill] sm:$0xff] %v7834_v10  ;;  %10397 = vst [vmem:[#allocation235_spill] sm:$0xff] %v7837_v49  ;;  %v7840_v32 = vadd.f32 %v935_v29, %v7757_v17  ;;  %v7843_v2 = vadd.f32 %v1036_v44, %v7761_v15  ;;  %2425 = vmatpush2.bf16.msra.mxu0 %v10400_v16  ;;  %2466 = vmatpush2.bf16.msra.mxu1 %v10401_v26  ;;  %v10408_v10 = vld [vmem:[#allocation59_spill] sm:$0xff]  ;;  %v10409_v26 = vld [vmem:[#allocation60_spill] sm:$0xff] }
 0x15d   :  { %v937_v18 = vpop.f32.mrf.mxu0  ;;  %v1038_v11 = vpop.f32.mrf.mxu1  ;;  %2426 = vmatprep.subr.bf16.mxu0 %v10402_v35  ;;  %2467 = vmatprep.subr.bf16.mxu1 %v10403_v9  ;;  %v10410_v16 = vld [vmem:[#allocation61_spill] sm:$0xff] }
 0x15e   :  { %10398 = vst [vmem:[#allocation236_spill] sm:$0xff] %v7840_v32  ;;  %10399 = vst [vmem:[#allocation237_spill] sm:$0xff] %v7843_v2  ;;  %v7850_v31 = vadd.f32 %v937_v18, %v7767_v24  ;;  %v7853_v49 = vadd.f32 %v1038_v11, %v7771_v1  ;;  %v10411_v18 = vld [vmem:[#allocation62_spill] sm:$0xff] }
 0x15f   :  { %v941_v29 = vpop.f32.mrf.mxu0  ;;  %v1042_v32 = vpop.f32.mrf.mxu1 }
 0x160   :  { %10404 = vst [vmem:[#allocation238_spill] sm:$0xff] %v7850_v31  ;;  %10405 = vst [vmem:[#allocation239_spill] sm:$0xff] %v7853_v49  ;;  %v7856_v44 = vadd.f32 %v941_v29, %v7757_v17  ;;  %v7859_v2 = vadd.f32 %v1042_v32, %v7761_v15  ;;  %2427 = vmatpush2.bf16.msra.mxu0 %v10408_v10  ;;  %2468 = vmatpush2.bf16.msra.mxu1 %v10409_v26  ;;  %v10414_v17 = vld [vmem:[#allocation63_spill] sm:$0xff]  ;;  %v10415_v15 = vld [vmem:[#allocation64_spill] sm:$0xff] }
 0x161   :  { %v943_v35 = vpop.f32.mrf.mxu0  ;;  %v1044_v9 = vpop.f32.mrf.mxu1  ;;  %2428 = vmatprep.subr.bf16.mxu0 %v10410_v16  ;;  %2469 = vmatprep.subr.bf16.mxu1 %v10411_v18  ;;  %v10416_v32 = vld [vmem:[#allocation65_spill] sm:$0xff]  ;;  %v10417_v29 = vld [vmem:[#allocation66_spill] sm:$0xff] }
 0x162   :  { %10406 = vst [vmem:[#allocation240_spill] sm:$0xff] %v7856_v44  ;;  %10407 = vst [vmem:[#allocation241_spill] sm:$0xff] %v7859_v2  ;;  %v7866_v11 = vadd.f32 %v943_v35, %v7767_v24  ;;  %v7869_v49 = vadd.f32 %v1044_v9, %v7771_v1  ;;  %v10418_v2 = vld [vmem:[#allocation67_spill] sm:$0xff]  ;;  %v10419_v44 = vld [vmem:[#allocation68_spill] sm:$0xff] }
 0x163   :  { %v10420_v31 = vld [vmem:[#allocation69_spill] sm:$0xff]  ;;  %v10421_v18 = vld [vmem:[#allocation70_spill] sm:$0xff] }
 0x164   :  { %10412 = vst [vmem:[#allocation242_spill] sm:$0xff] %v7866_v11  ;;  %10413 = vst [vmem:[#allocation243_spill] sm:$0xff] %v7869_v49  ;;  %2429 = vmatpush2.bf16.msra.mxu0 %v10414_v17  ;;  %2470 = vmatpush2.bf16.msra.mxu1 %v10415_v15 }
 0x165   :  { %2430 = vmatprep.subr.bf16.mxu0 %v10416_v32  ;;  %2471 = vmatprep.subr.bf16.mxu1 %v10417_v29  ;;  %v10422_v32 = vld [vmem:[#allocation107_spill] sm:$0xff]  ;;  %v10423_v29 = vld [vmem:[#allocation108_spill] sm:$0xff] }
 0x166   :  { %v304_v16 = vadd.f32 %v10422_v32, %v7196_v50 }
 0x168   :  { %2431 = vmatpush2.bf16.msra.mxu0 %v10418_v2  ;;  %2472 = vmatpush2.bf16.msra.mxu1 %v10419_v44  ;;  %v417_v2 = vadd.f32 %v10423_v29, %v7201_v56  ;;  %v10424_v44 = vld [vmem:[#allocation111_spill] sm:$0xff] }
 0x169   :  { %2482 = vmatprep.subr.bf16.mxu0 %v10420_v31  ;;  %2523 = vmatprep.subr.bf16.mxu1 %v10421_v18  ;;  %v306_v26 = vadd.f32 %v10424_v44, %v7266_v20  ;;  %v10425_v18 = vld [vmem:[#allocation112_spill] sm:$0xff] }
 0x16a   :  { %v419_v7 = vadd.f32 %v10425_v18, %v7271_v19  ;;  %v530_v18 = vadd.f32 %v7541_v14, %v7577_v48 }
 0x18b   :  { %v1883_v35 = vpop.f32.mrf.mxu0  ;;  %v1924_v24 = vpop.f32.mrf.mxu1 }
 0x18c   :  { %v2013_v31 = vadd.f32 %v1883_v35, %v304_v16  ;;  %v2015_v10 = vadd.f32 %v1924_v24, %v417_v2 }
 0x18d   :  { %v1885_v1 = vpop.f32.mrf.mxu0  ;;  %v1926_v9 = vpop.f32.mrf.mxu1 }
 0x18e   :  { %v2014_v6 = vadd.f32 %v1885_v1, %v306_v26  ;;  %v5041_v63 = vmul.f32 -1.442695, %v2013_v31  ;;  %v645_v31 = vadd.f32 %v7561_v22, %v7664_v4 }
 0x18f   :  { %v1887_v49 = vpop.f32.mrf.mxu0  ;;  %v1928_v11 = vpop.f32.mrf.mxu1 }
 0x190   :  { %v2016_v49 = vadd.f32 %v1926_v9, %v419_v7  ;;  %v5043_v11 = vmul.f32 -1.442695, %v2015_v10  ;;  %5285 = vpow2.f32 %v5041_v63  ;;  %v643_v7 = vadd.f32 %v7543_v57, %v7580_v61 }
 0x191   :  { %v1888_v17 = vpop.f32.mrf.mxu0  ;;  %v1929_v15 = vpop.f32.mrf.mxu1  ;;  %v532_v63 = vadd.f32 %v7559_v41, %v7659_v27 }
 0x192   :  { %v5042_v17 = vmul.f32 -1.442695, %v2014_v6  ;;  %v5044_v15 = vmul.f32 -1.442695, %v2016_v49  ;;  %5287 = vpow2.f32 %v5043_v11 }
 0x194   :  { %5289 = vpow2.f32 %v5042_v17 }
 0x195   :  { %5291 = vpow2.f32 %v5044_v15 }
 0x19d   :  { %v5286_v50 = vpop.eup %5285 }
 0x19e   :  { %v2039_v29 = vadd.f32 1.0, %v5286_v50 }
 0x19f   :  { %v5288_v56 = vpop.eup %5287 }
 0x1a0   :  { %v2041_v16 = vadd.f32 1.0, %v5288_v56  ;;  %5293 = vrcp.f32 %v2039_v29 }
 0x1a1   :  { %v5290_v32 = vpop.eup %5289 }
 0x1a2   :  { %v5292_v44 = vpop.eup %5291  ;;  %v2040_v2 = vadd.f32 1.0, %v5290_v32  ;;  %5295 = vrcp.f32 %v2041_v16 }
 0x1a3   :  { %v2042_v6 = vadd.f32 1.0, %v5292_v44 }
 0x1a4   :  { %5297 = vrcp.f32 %v2040_v2 }
 0x1ad   :  { %v5294_v22 = vpop.eup %5293 }
 0x1af   :  { %v5296_v15 = vpop.eup %5295 }
 0x1b0   :  { %v2059_v29 = vmul.f32 0.0, %v5296_v15 }
 0x1b1   :  { %v5298_v50 = vpop.eup %5297 }
 0x1cb   :  { %v1965_v26 = vpop.f32.mrf.mxu0  ;;  %v2006_v10 = vpop.f32.mrf.mxu1 }
 0x1cc   :  { %v2017_v35 = vadd.f32 %v1965_v26, %v530_v18  ;;  %v2019_v24 = vadd.f32 %v2006_v10, %v643_v7 }
 0x1cd   :  { %v1967_v1 = vpop.f32.mrf.mxu0  ;;  %v2008_v9 = vpop.f32.mrf.mxu1 }
 0x1ce   :  { %v5045_v48 = vmul.f32 -1.442695, %v2017_v35  ;;  %5299 = vtanh.f32 %v2019_v24  ;;  %v2018_v14 = vadd.f32 %v1967_v1, %v532_v63  ;;  %v2020_v61 = vadd.f32 %v2008_v9, %v645_v31  ;;  %v2073_v35 = vpop.permute.xlu0 %2072 }
 0x1cf   :  { %5301 = vrcp.f32 %v2042_v6  ;;  %v1969_v57 = vpop.f32.mrf.mxu0  ;;  %v2010_v41 = vpop.f32.mrf.mxu1  ;;  %vm2074_vm4 = vcmp.eq.s32.totalorder %v2073_v35, 1  ;;  %v10431_v35 = vld [vmem:[#allocation76_spill] sm:$0xff] }
 0x1d0   :  { %5303 = vpow2.f32 %v5045_v48  ;;  %v5046_v49 = vmul.f32 -1.442695, %v2018_v14 }
 0x1d1   :  { %5305 = vtanh.f32 %v2020_v61  ;;  %v1970_v11 = vpop.f32.mrf.mxu0  ;;  %v2011_v17 = vpop.f32.mrf.mxu1 }
 0x1d2   :  { %5307 = vpow2.f32 %v5046_v49 }
 0x1db   :  { %v5300_v56 = vpop.eup %5299 }
 0x1dc   :  { %v5302_v32 = vpop.eup %5301  ;;  %v2061_v44 = vmul.f32 %v5300_v56, %v5294_v22 }
 0x1dd   :  { %v5304_v16 = vpop.eup %5303  ;;  %v2060_v6 = vmul.f32 0.0, %v5302_v32 }
 0x1de   :  { %v5306_v2 = vpop.eup %5305  ;;  %v2043_v18 = vadd.f32 1.0, %v5304_v16  ;;  %v7895_v7 = vadd.f32 %v2061_v44, %v2059_v29 }
 0x1df   :  { %v5308_v63 = vpop.eup %5307  ;;  %v2062_v26 = vmul.f32 %v5306_v2, %v5298_v50 }
 0x1e0   :  { %5309 = vrcp.f32 %v2043_v18  ;;  %v2044_v10 = vadd.f32 1.0, %v5308_v63  ;;  %v10427_v63 = vld [vmem:[#allocation72_spill] sm:$0xff] }
 0x1e1   :  { %v7897_v31 = vadd.f32 %v2062_v26, %v2060_v6  ;;  %5311 = vtanh.f32 %v7895_v7  ;;  %v10428_v6 = vld [vmem:[#allocation73_spill] sm:$0xff]  ;;  %v10429_v26 = vld [vmem:[#allocation74_spill] sm:$0xff] }
 0x1e2   :  { %5313 = vrcp.f32 %v2044_v10  ;;  %v10430_v10 = vld [vmem:[#allocation75_spill] sm:$0xff] }
 0x1e3   :  { %5315 = vtanh.f32 %v7897_v31 }
 0x1eb   :  { %v2307_v24 = vpop.f32.mrf.mxu0  ;;  %v2348_v1 = vpop.f32.mrf.mxu1 }
 0x1ec   :  { %v2355_v9 = vadd.f32 %v2307_v24, %v7776_v59  ;;  %v7903_v48 = vadd.f32 %v2348_v1, %v7779_v58  ;;  %v10432_v24 = vld [vmem:[#allocation77_spill] sm:$0xff]  ;;  %v10433_v1 = vld [vmem:[#allocation78_spill] sm:$0xff] }
 0x1ed   :  { %v5310_v14 = vpop.eup %5309  ;;  %v2309_v61 = vpop.f32.mrf.mxu0 }
 0x1ee   :  { %v2350_v57 = vpop.f32.mrf.mxu1  ;;  %v5312_v41 = vpop.eup %5311  ;;  %v5079_v49 = vmul.f32 -1.442695, %v2355_v9  ;;  %v2356_v11 = vadd.f32 %v2309_v61, %v7784_v8 }
 0x1ef   :  { %v2358_v17 = vadd.f32 %v2350_v57, %v7787_v12  ;;  %v5314_v22 = vpop.eup %5313  ;;  %v2067_v15 = vmul.f32 %v5312_v41, %v5310_v14  ;;  %v2311_v50 = vpop.f32.mrf.mxu0  ;;  %v10426_v12 = vld [vmem:[#allocation71_spill] sm:$0xff]  ;;  %v10435_v41 = vld [vmem:[#allocation80_spill] sm:$0xff] }
 0x1f0   :  { %v2352_v56 = vpop.f32.mrf.mxu1  ;;  %v5316_v32 = vpop.eup %5315  ;;  %5317 = vpow2.f32 %v5079_v49  ;;  %v5080_v59 = vmul.f32 -1.442695, %v2356_v11  ;;  %v10434_v57 = vld [vmem:[#allocation79_spill] sm:$0xff]  ;;  %v10436_v11 = vld [vmem:[#allocation81_spill] sm:$0xff]  ;;  %v10439_v50 = vld [vmem:[#allocation84_spill] sm:$0xff] }
 0x1f1   :  { %v2068_v29 = vmul.f32 %v5316_v32, %v5314_v22  ;;  %v7907_v58 = vsel %vm2074_vm4, %v2067_v15, 0.0  ;;  %v2312_v44 = vpop.f32.mrf.mxu0  ;;  %v7911_v8 = vpack.c.bf16 %v2067_v15, %v2067_v15  ;;  %v10437_v22 = vld [vmem:[#allocation82_spill] sm:$0xff]  ;;  %v10438_v15 = vld [vmem:[#allocation83_spill] sm:$0xff]  ;;  %v10440_v56 = vld [vmem:[#allocation85_spill] sm:$0xff] }
 0x1f2   :  { %v2353_v16 = vpop.f32.mrf.mxu1  ;;  %5319 = vpow2.f32 %v5080_v59  ;;  %v10441_v32 = vld [vmem:[#allocation86_spill] sm:$0xff]  ;;  %v10443_v59 = vld [vmem:[#allocation88_spill] sm:$0xff] }
 0x1f3   :  { %v2399_v2 = vpack.c.bf16 %v2068_v29, %v2068_v29  ;;  %v7909_v18 = vsel %vm2074_vm4, %v2068_v29, 0.0  ;;  %5321 = vtanh.f32 %v2358_v17  ;;  %v10442_v17 = vld [vmem:[#allocation87_spill] sm:$0xff]  ;;  %v10444_v29 = vld [vmem:[#allocation89_spill] sm:$0xff]  ;;  %v10445_v44 = vld [vmem:[#allocation90_spill] sm:$0xff] }
 0x1f4   :  { %v10446_v16 = vld [vmem:[#allocation91_spill] sm:$0xff] }
 0x1f5   :  { %2432 = vmatprep.mubr.bf16.mxu0 %v2399_v2  ;;  %2473 = vmatprep.mubr.bf16.mxu1 %v2399_v2 }
 0x1f6   :  { %2433 = vmatmul.mubr.bf16.vlgmr.msra.gmra.mxu0 %v7911_v8  ;;  %2474 = vmatmul.mubr.bf16.vlgmr.msra.gmra.mxu1 %v7911_v8 }
 0x1f7   :  { %2483 = vmatpush1.bf16.msra.mxu0 %v10426_v12  ;;  %2524 = vmatpush1.bf16.msra.mxu1 %v10427_v63 }
 0x1f8   :  { %2514 = vmatprep.mubr.bf16.mxu0 %v2399_v2  ;;  %2555 = vmatprep.mubr.bf16.mxu1 %v2399_v2  ;;  %v10447_v2 = vld [vmem:[#allocation92_spill] sm:$0xff] }
 0x1f9   :  { %2484 = vmatprep.subr.bf16.mxu0 %v10428_v6  ;;  %2525 = vmatprep.subr.bf16.mxu1 %v10429_v26 }
 0x1fb   :  { %2485 = vmatpush1.bf16.msra.mxu0 %v10430_v10  ;;  %2526 = vmatpush1.bf16.msra.mxu1 %v10431_v35 }
 0x1fc   :  { %2486 = vmatprep.subr.bf16.mxu0 %v10432_v24  ;;  %2527 = vmatprep.subr.bf16.mxu1 %v10433_v1 }
 0x1fd   :  { %v5318_v9 = vpop.eup %5317 }
 0x1fe   :  { %v2368_v14 = vadd.f32 1.0, %v5318_v9 }
 0x1ff   :  { %v5320_v61 = vpop.eup %5319  ;;  %2487 = vmatpush1.bf16.msra.mxu0 %v10434_v57  ;;  %2528 = vmatpush1.bf16.msra.mxu1 %v10435_v41 }
 0x200   :  { %5323 = vrcp.f32 %v2368_v14  ;;  %v2369_v49 = vadd.f32 1.0, %v5320_v61  ;;  %2488 = vmatprep.subr.bf16.mxu0 %v10436_v11  ;;  %2529 = vmatprep.subr.bf16.mxu1 %v10437_v22  ;;  %v5322_v9 = vpop.eup %5321  ;;  %v10448_v14 = vld [vmem:[#allocation93_spill] sm:$0xff]  ;;  %v10449_v61 = vld [vmem:[#allocation94_spill] sm:$0xff] }
 0x202   :  { %5325 = vrcp.f32 %v2369_v49 }
 0x203   :  { %2489 = vmatpush1.bf16.msra.mxu0 %v10438_v15  ;;  %2530 = vmatpush1.bf16.msra.mxu1 %v10439_v50  ;;  %v10450_v50 = vld [vmem:[#allocation95_spill] sm:$0xff]  ;;  %v10455_v15 = vld [vmem:[#allocation100_spill] sm:$0xff] }
 0x204   :  { %2490 = vmatprep.subr.bf16.mxu0 %v10440_v56  ;;  %2531 = vmatprep.subr.bf16.mxu1 %v10441_v32 }
 0x207   :  { %2491 = vmatpush1.bf16.msra.mxu0 %v10442_v17  ;;  %2532 = vmatpush1.bf16.msra.mxu1 %v10443_v59  ;;  %v10451_v17 = vld [vmem:[#allocation96_spill] sm:$0xff] }
 0x208   :  { %2492 = vmatprep.subr.bf16.mxu0 %v10444_v29  ;;  %2533 = vmatprep.subr.bf16.mxu1 %v10445_v44  ;;  %v10452_v29 = vld [vmem:[#allocation97_spill] sm:$0xff]  ;;  %v10453_v44 = vld [vmem:[#allocation98_spill] sm:$0xff] }
 0x20b   :  { %2493 = vmatpush1.bf16.msra.mxu0 %v10446_v16  ;;  %2534 = vmatpush1.bf16.msra.mxu1 %v10447_v2  ;;  %v10454_v2 = vld [vmem:[#allocation99_spill] sm:$0xff] }
 0x20c   :  { %2494 = vmatprep.subr.bf16.mxu0 %v10448_v14  ;;  %2535 = vmatprep.subr.bf16.mxu1 %v10449_v61  ;;  %v10456_v14 = vld [vmem:[#allocation101_spill] sm:$0xff]  ;;  %v10457_v61 = vld [vmem:[#allocation102_spill] sm:$0xff] }
 0x20d   :  { %v5324_v49 = vpop.eup %5323 }
 0x20e   :  { %v2379_v56 = vmul.f32 %v5324_v49, %v5322_v9  ;;  %v10458_v9 = vld [vmem:[#allocation103_spill] sm:$0xff]  ;;  %v10459_v49 = vld [vmem:[#allocation104_spill] sm:$0xff] }
 0x20f   :  { %v5326_v32 = vpop.eup %5325  ;;  %2495 = vmatpush1.bf16.msra.mxu0 %v10450_v50  ;;  %2536 = vmatpush1.bf16.msra.mxu1 %v10451_v17  ;;  %v10460_v17 = vld [vmem:[#allocation105_spill] sm:$0xff] }
 0x210   :  { %v2378_v59 = vmul.f32 0.0, %v5326_v32  ;;  %2496 = vmatprep.subr.bf16.mxu0 %v10452_v29  ;;  %2537 = vmatprep.subr.bf16.mxu1 %v10453_v44  ;;  %v10461_v32 = vld [vmem:[#allocation106_spill] sm:$0xff]  ;;  %v10462_v29 = vld [vmem:[#allocation109_spill] sm:$0xff] }
 0x212   :  { %v7943_v16 = vadd.f32 %v2379_v56, %v2378_v59  ;;  %v10463_v56 = vld [vmem:[#allocation110_spill] sm:$0xff]  ;;  %v10464_v59 = vld [vmem:[#allocation113_spill] sm:$0xff] }
 0x213   :  { %2497 = vmatpush1.bf16.msra.mxu0 %v10454_v2  ;;  %2538 = vmatpush1.bf16.msra.mxu1 %v10455_v15  ;;  %v10465_v2 = vld [vmem:[#allocation114_spill] sm:$0xff]  ;;  %v10466_v15 = vld [vmem:[#allocation115_spill] sm:$0xff] }
 0x214   :  { %2498 = vmatprep.subr.bf16.mxu0 %v10456_v14  ;;  %2539 = vmatprep.subr.bf16.mxu1 %v10457_v61  ;;  %v10467_v14 = vld [vmem:[#allocation116_spill] sm:$0xff]  ;;  %v10468_v61 = vld [vmem:[#allocation117_spill] sm:$0xff] }
 0x217   :  { %2499 = vmatpush2.bf16.msra.mxu0 %v10458_v9  ;;  %2540 = vmatpush2.bf16.msra.mxu1 %v10459_v49  ;;  %v10469_v9 = vld [vmem:[#allocation118_spill] sm:$0xff] }
 0x218   :  { %2500 = vmatprep.subr.bf16.mxu0 %v10460_v17  ;;  %2541 = vmatprep.subr.bf16.mxu1 %v10461_v32 }
 0x21b   :  { %2501 = vmatpush2.bf16.msra.mxu0 %v10462_v29  ;;  %2542 = vmatpush2.bf16.msra.mxu1 %v10463_v56  ;;  %v10470_v29 = vld [vmem:[#allocation126_spill] sm:$0xff]  ;;  %v10471_v56 = vld [vmem:[#allocation131_spill] sm:$0xff] }
 0x21c   :  { %2502 = vmatprep.subr.bf16.mxu0 %v10464_v59  ;;  %2543 = vmatprep.subr.bf16.mxu1 %v10465_v2  ;;  %v10472_v59 = vld [vmem:[#allocation132_spill] sm:$0xff]  ;;  %v10473_v2 = vld [vmem:[#allocation133_spill] sm:$0xff] }
 0x21f   :  { %2503 = vmatpush2.bf16.msra.mxu0 %v10466_v15  ;;  %2544 = vmatpush2.bf16.msra.mxu1 %v10467_v14  ;;  %v10474_v15 = vld [vmem:[#allocation134_spill] sm:$0xff]  ;;  %v10475_v14 = vld [vmem:[#allocation137_spill] sm:$0xff] }
 0x220   :  { %2504 = vmatprep.subr.bf16.mxu0 %v10468_v61  ;;  %2545 = vmatprep.subr.bf16.mxu1 %v10469_v9  ;;  %v5081_v61 = vmul.f32 -1.442695, %v7903_v48  ;;  %v10483_v48 = vld [vmem:[#allocation152_spill] sm:$0xff] }
 0x222   :  { %5327 = vpow2.f32 %v5081_v61  ;;  %v10486_v61 = vld [vmem:[#allocation157_spill] sm:$0xff] }
 0x223   :  { %2505 = vmatpush2.bf16.msra.mxu0 %v7241_v40  ;;  %2546 = vmatpush2.bf16.msra.mxu1 %v7243_v13  ;;  %v10476_v40 = vld [vmem:[#allocation139_spill] sm:$0xff]  ;;  %v10477_v13 = vld [vmem:[#allocation140_spill] sm:$0xff]  ;;  %5329 = vtanh.f32 %v7943_v16 }
 0x224   :  { %2506 = vmatprep.subr.bf16.mxu0 %v7247_v53  ;;  %2547 = vmatprep.subr.bf16.mxu1 %v10470_v29  ;;  %v10478_v29 = vld [vmem:[#allocation145_spill] sm:$0xff] }
 0x227   :  { %2507 = vmatpush2.bf16.msra.mxu0 %v10471_v56  ;;  %2548 = vmatpush2.bf16.msra.mxu1 %v10472_v59  ;;  %v10479_v56 = vld [vmem:[#allocation146_spill] sm:$0xff]  ;;  %v10480_v59 = vld [vmem:[#allocation147_spill] sm:$0xff] }
 0x228   :  { %2508 = vmatprep.subr.bf16.mxu0 %v10473_v2  ;;  %2549 = vmatprep.subr.bf16.mxu1 %v10474_v15  ;;  %v10481_v2 = vld [vmem:[#allocation148_spill] sm:$0xff]  ;;  %v10482_v15 = vld [vmem:[#allocation151_spill] sm:$0xff] }
 0x22b   :  { %2509 = vmatpush2.bf16.msra.mxu0 %v10475_v14  ;;  %2550 = vmatpush2.bf16.msra.mxu1 %v7313_v5  ;;  %v10484_v14 = vld [vmem:[#allocation153_spill] sm:$0xff]  ;;  %v10485_v5 = vld [vmem:[#allocation154_spill] sm:$0xff] }
 0x22c   :  { %2510 = vmatprep.subr.bf16.mxu0 %v10476_v40  ;;  %2551 = vmatprep.subr.bf16.mxu1 %v10477_v13  ;;  %v10498_v13 = vld [vmem:[#allocation177_spill] sm:$0xff] }
 0x22f   :  { %2511 = vmatpush2.bf16.msra.mxu0 %v10478_v29  ;;  %2552 = vmatpush2.bf16.msra.mxu1 %v10479_v56  ;;  %v10487_v29 = vld [vmem:[#allocation158_spill] sm:$0xff]  ;;  %v10488_v56 = vld [vmem:[#allocation159_spill] sm:$0xff] }
 0x230   :  { %2512 = vmatprep.subr.bf16.mxu0 %v10480_v59  ;;  %2553 = vmatprep.subr.bf16.mxu1 %v10481_v2  ;;  %v10489_v59 = vld [vmem:[#allocation160_spill] sm:$0xff]  ;;  %v10494_v2 = vld [vmem:[#allocation171_spill] sm:$0xff] }
 0x233   :  { %2513 = vmatpush2.bf16.msra.mxu0 %v10482_v15  ;;  %2554 = vmatpush2.bf16.msra.mxu1 %v10483_v48  ;;  %v5328_v48 = vpop.eup %5327  ;;  %v10492_v15 = vld [vmem:[#allocation167_spill] sm:$0xff] }
 0x234   :  { %2633 = vmatprep.subr.bf16.mxu0 %v10484_v14  ;;  %2674 = vmatprep.subr.bf16.mxu1 %v10485_v5  ;;  %v10490_v14 = vld [vmem:[#allocation165_spill] sm:$0xff]  ;;  %v10491_v5 = vld [vmem:[#allocation166_spill] sm:$0xff] }
 0x236   :  { %2515 = vmatmul.mubr.bf16.vlgmr.msra.gmra.mxu0 %v7911_v8  ;;  %2556 = vmatmul.mubr.bf16.vlgmr.msra.gmra.mxu1 %v7911_v8  ;;  %v10493_v8 = vld [vmem:[#allocation168_spill] sm:$0xff] }
 0x237   :  { %2634 = vmatpush1.bf16.msra.mxu0 %v10486_v61  ;;  %2675 = vmatpush1.bf16.msra.mxu1 %v10487_v29  ;;  %v2370_v61 = vadd.f32 1.0, %v5328_v48  ;;  %v10495_v29 = vld [vmem:[#allocation172_spill] sm:$0xff]  ;;  %v10502_v48 = vld [vmem:[#allocation185_spill] sm:$0xff] }
 0x238   :  { %2635 = vmatprep.subr.bf16.mxu0 %v10488_v56  ;;  %2676 = vmatprep.subr.bf16.mxu1 %v10489_v59  ;;  %v10496_v56 = vld [vmem:[#allocation173_spill] sm:$0xff]  ;;  %v10497_v59 = vld [vmem:[#allocation174_spill] sm:$0xff] }
 0x239   :  { %2665 = vmatprep.mubr.bf16.mxu0 %v10212_v3  ;;  %2706 = vmatprep.mubr.bf16.mxu1 %v10212_v3  ;;  %5331 = vrcp.f32 %v2370_v61  ;;  %v10508_v61 = vld [vmem:[#allocation191_spill] sm:$0xff] }
 0x23b   :  { %2636 = vmatpush1.bf16.msra.mxu0 %v10490_v14  ;;  %2677 = vmatpush1.bf16.msra.mxu1 %v10491_v5  ;;  %v10499_v14 = vld [vmem:[#allocation178_spill] sm:$0xff]  ;;  %v10500_v5 = vld [vmem:[#allocation179_spill] sm:$0xff] }
 0x23c   :  { %2637 = vmatprep.subr.bf16.mxu0 %v10492_v15  ;;  %2678 = vmatprep.subr.bf16.mxu1 %v10493_v8  ;;  %v10501_v15 = vld [vmem:[#allocation180_spill] sm:$0xff]  ;;  %v10504_v8 = vld [vmem:[#allocation187_spill] sm:$0xff] }
 0x23f   :  { %2638 = vmatpush1.bf16.msra.mxu0 %v10494_v2  ;;  %2679 = vmatpush1.bf16.msra.mxu1 %v10495_v29  ;;  %v10503_v2 = vld [vmem:[#allocation186_spill] sm:$0xff]  ;;  %v10505_v29 = vld [vmem:[#allocation188_spill] sm:$0xff] }
 0x240   :  { %2639 = vmatprep.subr.bf16.mxu0 %v10496_v56  ;;  %2680 = vmatprep.subr.bf16.mxu1 %v10497_v59  ;;  %v10506_v56 = vld [vmem:[#allocation189_spill] sm:$0xff]  ;;  %v10507_v59 = vld [vmem:[#allocation190_spill] sm:$0xff] }
 0x243   :  { %2640 = vmatpush1.bf16.msra.mxu0 %v10498_v13  ;;  %2681 = vmatpush1.bf16.msra.mxu1 %v10499_v14  ;;  %v10509_v13 = vld [vmem:[#allocation192_spill] sm:$0xff]  ;;  %v5330_v14 = vpop.eup %5329 }
 0x244   :  { %2641 = vmatprep.subr.bf16.mxu0 %v10500_v5  ;;  %2682 = vmatprep.subr.bf16.mxu1 %v10501_v15  ;;  %v10510_v15 = vld [vmem:[#allocation193_spill] sm:$0xff] }
 0x246   :  { %v5332_v5 = vpop.eup %5331 }
 0x247   :  { %2642 = vmatpush1.bf16.msra.mxu0 %v10502_v48  ;;  %2683 = vmatpush1.bf16.msra.mxu1 %v10503_v2  ;;  %v2744_v48 = vsel %vm2743_vm5, 1, %v10212_v3  ;;  %v8015_v2 = vmul.f32 %v5332_v5, %v5330_v14  ;;  %v10520_v14 = vld [vmem:[#allocation31_spill] sm:$0xff]  ;;  %v10521_v5 = vld [vmem:[#allocation32_spill] sm:$0xff] }
 0x248   :  { %2643 = vmatprep.subr.bf16.mxu0 %v10504_v8  ;;  %2684 = vmatprep.subr.bf16.mxu1 %v10505_v29  ;;  %v10511_v8 = vld [vmem:[#allocation194_spill] sm:$0xff]  ;;  %v10512_v29 = vld [vmem:[#allocation195_spill] sm:$0xff] }
 0x249   :  { %2746 = vperm.xlu0 %5235, %v2744_v48   ;;  %v2632_v39 = vpack.c.bf16 %v8015_v2, %v8015_v2  ;;  %v10523_v48 = vld [vmem:[#allocation34_spill] sm:$0xff] }
 0x24b   :  { %2644 = vmatpush1.bf16.msra.mxu0 %v10506_v56  ;;  %2685 = vmatpush1.bf16.msra.mxu1 %v10507_v59  ;;  %v10514_v56 = vld [vmem:[#allocation8_spill] sm:$0xff] }
 0x24c   :  { %2645 = vmatprep.subr.bf16.mxu0 %v10508_v61  ;;  %2686 = vmatprep.subr.bf16.mxu1 %v10509_v13  ;;  %v10517_v59 = vld [vmem:[#allocation28_spill] sm:$0xff]  ;;  %v10518_v61 = vld [vmem:[#allocation29_spill] sm:$0xff]  ;;  %v10519_v13 = vld [vmem:[#allocation30_spill] sm:$0xff] }
 0x24f   :  { %2646 = vmatpush1.bf16.msra.mxu0 %v7588_v0  ;;  %2687 = vmatpush1.bf16.msra.mxu1 %v10510_v15  ;;  %v10513_v0 = vld [vmem:[#allocation6_spill] sm:$0xff]  ;;  %v10522_v15 = vld [vmem:[#allocation33_spill] sm:$0xff] }
 0x250   :  { %2647 = vmatprep.subr.bf16.mxu0 %v10511_v8  ;;  %2688 = vmatprep.subr.bf16.mxu1 %v10512_v29  ;;  %v10524_v8 = vld [vmem:[#allocation35_spill] sm:$0xff]  ;;  %v10525_v29 = vld [vmem:[#allocation36_spill] sm:$0xff] }
 0x253   :  { %2648 = vmatpush1.bf16.msra.mxu0 %v7624_v52  ;;  %2689 = vmatpush1.bf16.msra.mxu1 %v7629_v21  ;;  %v10515_v52 = vld [vmem:[#allocation26_spill] sm:$0xff]  ;;  %v10516_v21 = vld [vmem:[#allocation27_spill] sm:$0xff] }
 0x254   :  { %2760 = vmatprep.subr.bf16.mxu0 %v6508_v23  ;;  %2801 = vmatprep.subr.bf16.mxu1 %v10513_v0 }
 0x256   :  { %2666 = vmatmul.mubr.bf16.vlgmr.msra.gmra.mxu0 %v2632_v39  ;;  %2707 = vmatmul.mubr.bf16.vlgmr.msra.gmra.mxu1 %v2632_v39  ;;  %v10526_v39 = vld [vmem:[#allocation37_spill] sm:$0xff] }
 0x257   :  { %2761 = vmatpush1.bf16.msra.mxu0 %v6513_v25  ;;  %2802 = vmatpush1.bf16.msra.mxu1 %v10514_v56 }
 0x258   :  { %2762 = vmatprep.subr.bf16.mxu0 %v6524_v28  ;;  %2803 = vmatprep.subr.bf16.mxu1 %v6526_v30 }
 0x25b   :  { %2763 = vmatpush1.bf16.msra.mxu0 %v6538_v33  ;;  %2804 = vmatpush1.bf16.msra.mxu1 %v6540_v34 }
 0x25c   :  { %2764 = vmatprep.subr.bf16.mxu0 %v6550_v36  ;;  %2805 = vmatprep.subr.bf16.mxu1 %v6552_v37 }
 0x25f   :  { %2765 = vmatpush1.bf16.msra.mxu0 %v6567_v42  ;;  %2806 = vmatpush1.bf16.msra.mxu1 %v6569_v43 }
 0x260   :  { %2766 = vmatprep.subr.bf16.mxu0 %v6579_v45  ;;  %2807 = vmatprep.subr.bf16.mxu1 %v6581_v46 }
 0x263   :  { %2767 = vmatpush1.bf16.msra.mxu0 %v6596_v51  ;;  %2808 = vmatpush1.bf16.msra.mxu1 %v6598_v38 }
 0x264   :  { %2768 = vmatprep.subr.bf16.mxu0 %v6608_v54  ;;  %2809 = vmatprep.subr.bf16.mxu1 %v6610_v55 }
 0x267   :  { %2769 = vmatpush1.bf16.msra.mxu0 %v6625_v47  ;;  %2810 = vmatpush1.bf16.msra.mxu1 %v6627_v60 }
 0x268   :  { %2770 = vmatprep.subr.bf16.mxu0 %v6634_v62  ;;  %2811 = vmatprep.subr.bf16.mxu1 %v10515_v52 }
 0x26b   :  { %2771 = vmatpush1.bf16.msra.mxu0 %v10516_v21  ;;  %2812 = vmatpush1.bf16.msra.mxu1 %v10517_v59  ;;  %v10527_v21 = vld [vmem:[#allocation38_spill] sm:$0xff]  ;;  %v10528_v59 = vld [vmem:[#allocation39_spill] sm:$0xff] }
 0x26c   :  { %2772 = vmatprep.subr.bf16.mxu0 %v10518_v61  ;;  %2813 = vmatprep.subr.bf16.mxu1 %v10519_v13  ;;  %v10529_v61 = vld [vmem:[#allocation40_spill] sm:$0xff]  ;;  %v10530_v13 = vld [vmem:[#allocation41_spill] sm:$0xff] }
 0x26f   :  { %2773 = vmatpush1.bf16.msra.mxu0 %v10520_v14  ;;  %2814 = vmatpush1.bf16.msra.mxu1 %v10521_v5  ;;  %v10531_v14 = vld [vmem:[#allocation42_spill] sm:$0xff]  ;;  %v10532_v5 = vld [vmem:[#allocation43_spill] sm:$0xff] }
 0x270   :  { %2774 = vmatprep.subr.bf16.mxu0 %v10522_v15  ;;  %2815 = vmatprep.subr.bf16.mxu1 %v10523_v48  ;;  %v10533_v15 = vld [vmem:[#allocation44_spill] sm:$0xff]  ;;  %v10534_v48 = vld [vmem:[#allocation45_spill] sm:$0xff] }
 0x273   :  { %2775 = vmatpush1.bf16.msra.mxu0 %v10524_v8  ;;  %2816 = vmatpush1.bf16.msra.mxu1 %v10525_v29  ;;  %v10535_v8 = vld [vmem:[#allocation46_spill] sm:$0xff]  ;;  %v10536_v29 = vld [vmem:[#allocation47_spill] sm:$0xff] }
 0x274   :  { %2776 = vmatprep.subr.bf16.mxu0 %v10526_v39  ;;  %2817 = vmatprep.subr.bf16.mxu1 %v10527_v21  ;;  %v10537_v39 = vld [vmem:[#allocation48_spill] sm:$0xff]  ;;  %v10538_v21 = vld [vmem:[#allocation49_spill] sm:$0xff] }
 0x277   :  { %2777 = vmatpush2.bf16.msra.mxu0 %v10528_v59  ;;  %2818 = vmatpush2.bf16.msra.mxu1 %v10529_v61  ;;  %v10539_v59 = vld [vmem:[#allocation50_spill] sm:$0xff]  ;;  %v10540_v61 = vld [vmem:[#allocation51_spill] sm:$0xff] }
 0x278   :  { %2778 = vmatprep.subr.bf16.mxu0 %v10530_v13  ;;  %2819 = vmatprep.subr.bf16.mxu1 %v10531_v14  ;;  %v10541_v13 = vld [vmem:[#allocation52_spill] sm:$0xff]  ;;  %v10542_v14 = vld [vmem:[#allocation53_spill] sm:$0xff] }
 0x27b   :  { %2779 = vmatpush2.bf16.msra.mxu0 %v10532_v5  ;;  %2820 = vmatpush2.bf16.msra.mxu1 %v10533_v15  ;;  %v10543_v5 = vld [vmem:[#allocation54_spill] sm:$0xff]  ;;  %v10544_v15 = vld [vmem:[#allocation55_spill] sm:$0xff] }
 0x27c   :  { %2780 = vmatprep.subr.bf16.mxu0 %v10534_v48  ;;  %2821 = vmatprep.subr.bf16.mxu1 %v10535_v8  ;;  %v10545_v48 = vld [vmem:[#allocation56_spill] sm:$0xff]  ;;  %v10546_v8 = vld [vmem:[#allocation57_spill] sm:$0xff] }
 0x27f   :  { %2781 = vmatpush2.bf16.msra.mxu0 %v10536_v29  ;;  %2822 = vmatpush2.bf16.msra.mxu1 %v10537_v39  ;;  %v10547_v29 = vld [vmem:[#allocation58_spill] sm:$0xff]  ;;  %v10548_v39 = vld [vmem:[#allocation59_spill] sm:$0xff] }
 0x280   :  { %2782 = vmatprep.subr.bf16.mxu0 %v10538_v21  ;;  %2823 = vmatprep.subr.bf16.mxu1 %v10539_v59  ;;  %v10549_v21 = vld [vmem:[#allocation60_spill] sm:$0xff]  ;;  %v10550_v59 = vld [vmem:[#allocation61_spill] sm:$0xff] }
 0x283   :  { %2783 = vmatpush2.bf16.msra.mxu0 %v10540_v61  ;;  %2824 = vmatpush2.bf16.msra.mxu1 %v10541_v13  ;;  %v10551_v61 = vld [vmem:[#allocation62_spill] sm:$0xff]  ;;  %v10552_v13 = vld [vmem:[#allocation63_spill] sm:$0xff] }
 0x284   :  { %2784 = vmatprep.subr.bf16.mxu0 %v10542_v14  ;;  %2825 = vmatprep.subr.bf16.mxu1 %v10543_v5  ;;  %v10553_v14 = vld [vmem:[#allocation64_spill] sm:$0xff]  ;;  %v10554_v5 = vld [vmem:[#allocation65_spill] sm:$0xff] }
 0x287   :  { %2785 = vmatpush2.bf16.msra.mxu0 %v10544_v15  ;;  %2826 = vmatpush2.bf16.msra.mxu1 %v10545_v48  ;;  %v10555_v15 = vld [vmem:[#allocation66_spill] sm:$0xff]  ;;  %v10556_v48 = vld [vmem:[#allocation67_spill] sm:$0xff] }
 0x288   :  { %2786 = vmatprep.subr.bf16.mxu0 %v10546_v8  ;;  %2827 = vmatprep.subr.bf16.mxu1 %v10547_v29  ;;  %v10557_v8 = vld [vmem:[#allocation68_spill] sm:$0xff]  ;;  %v10558_v29 = vld [vmem:[#allocation69_spill] sm:$0xff] }
 0x28b   :  { %2787 = vmatpush2.bf16.msra.mxu0 %v10548_v39  ;;  %2828 = vmatpush2.bf16.msra.mxu1 %v10549_v21  ;;  %v10559_v39 = vld [vmem:[#allocation70_spill] sm:$0xff] }
 0x28c   :  { %2788 = vmatprep.subr.bf16.mxu0 %v10550_v59  ;;  %2829 = vmatprep.subr.bf16.mxu1 %v10551_v61 }
 0x28f   :  { %2789 = vmatpush2.bf16.msra.mxu0 %v10552_v13  ;;  %2830 = vmatpush2.bf16.msra.mxu1 %v10553_v14 }
 0x290   :  { %2790 = vmatprep.subr.bf16.mxu0 %v10554_v5  ;;  %2831 = vmatprep.subr.bf16.mxu1 %v10555_v15  ;;  %v10560_v5 = vld [vmem:[#allocation121_spill] sm:$0xff]  ;;  %v10561_v15 = vld [vmem:[#allocation119_spill] sm:$0xff] }
 0x291   :  { %v312_v47 = vadd.f32 %v10560_v5, %v7266_v20 }
 0x293   :  { %2791 = vmatpush2.bf16.msra.mxu0 %v10556_v48  ;;  %2832 = vmatpush2.bf16.msra.mxu1 %v10557_v8  ;;  %v10562_v48 = vld [vmem:[#allocation120_spill] sm:$0xff]  ;;  %v10563_v8 = vld [vmem:[#allocation122_spill] sm:$0xff] }
 0x294   :  { %2842 = vmatprep.subr.bf16.mxu0 %v10558_v29  ;;  %2883 = vmatprep.subr.bf16.mxu1 %v10559_v39  ;;  %v425_v29 = vadd.f32 %v10563_v8, %v7271_v19 }
 0x2b6   :  { %v2434_v21 = vpop.f32.mrf.mxu0  ;;  %v2475_v59 = vpop.f32.mrf.mxu1 }
 0x2b7   :  { %v2564_v55 = vadd.f32 %v2434_v21, %v10561_v15  ;;  %v2566_v54 = vadd.f32 %v2475_v59, %v10562_v48  ;;  %v10564_v48 = vld [vmem:[#allocation198_spill] sm:$0xff] }
 0x2b8   :  { %v2436_v52 = vpop.f32.mrf.mxu0  ;;  %v2477_v61 = vpop.f32.mrf.mxu1  ;;  %v538_v8 = vadd.f32 %v10564_v48, %v7659_v27 }
 0x2b9   :  { %v2565_v38 = vadd.f32 %v2436_v52, %v312_v47  ;;  %v5082_v39 = vmul.f32 -1.442695, %v2564_v55  ;;  %v2567_v51 = vadd.f32 %v2477_v61, %v425_v29  ;;  %v5084_v46 = vmul.f32 -1.442695, %v2566_v54  ;;  %v10567_v52 = vld [vmem:[#allocation197_spill] sm:$0xff] }
 0x2ba   :  { %v2438_v62 = vpop.f32.mrf.mxu0  ;;  %v2479_v13 = vpop.f32.mrf.mxu1 }
 0x2bb   :  { %v5083_v45 = vmul.f32 -1.442695, %v2565_v38  ;;  %5333 = vpow2.f32 %v5082_v39  ;;  %v5085_v62 = vmul.f32 -1.442695, %v2567_v51  ;;  %v10565_v38 = vld [vmem:[#allocation199_spill] sm:$0xff] }
 0x2bc   :  { %v2439_v60 = vpop.f32.mrf.mxu0  ;;  %v2480_v14 = vpop.f32.mrf.mxu1  ;;  %5335 = vpow2.f32 %v5084_v46  ;;  %v651_v51 = vadd.f32 %v10565_v38, %v7664_v4 }
 0x2bd   :  { %5337 = vpow2.f32 %v5083_v45  ;;  %v10566_v45 = vld [vmem:[#allocation196_spill] sm:$0xff] }
 0x2be   :  { %5339 = vpow2.f32 %v5085_v62 }
 0x2c8   :  { %v5334_v60 = vpop.eup %5333 }
 0x2c9   :  { %v5336_v13 = vpop.eup %5335  ;;  %v2590_v5 = vadd.f32 1.0, %v5334_v60 }
 0x2ca   :  { %v5338_v14 = vpop.eup %5337  ;;  %v2592_v15 = vadd.f32 1.0, %v5336_v13 }
 0x2cb   :  { %v5340_v21 = vpop.eup %5339  ;;  %v2591_v59 = vadd.f32 1.0, %v5338_v14  ;;  %5341 = vrcp.f32 %v2590_v5 }
 0x2cc   :  { %v2593_v55 = vadd.f32 1.0, %v5340_v21  ;;  %5343 = vrcp.f32 %v2592_v15  ;;  %v8104_v15 = vld [vmem:[%s9747_s0] sm:$0xff] }
 0x2cd   :  { %5345 = vrcp.f32 %v2591_v59  ;;  %vm2980_vm6 = vcmp.eq.s32.totalorder %v8104_v15, 3  ;;  %vm3340_vm11 = vcmp.eq.s32.totalorder %v8104_v15, 4  ;;  %vm4060_vm14 = vcmp.eq.s32.totalorder %v8104_v15, 6 }
 0x2ce   :  { %v2981_v59 = vsel %vm2980_vm6, 1, %v10212_v3  ;;  %vm4420_vm15 = vcmp.eq.s32.totalorder %v8104_v15, 7  ;;  %vm4658_vm0 = vcmp.eq.s32.totalorder %v8104_v15, 8 }
 0x2cf   :  { %2983 = vperm.xlu1 %5236, %v2981_v59  }
 0x2f6   :  { %v2516_v47 = vpop.f32.mrf.mxu0  ;;  %v2557_v54 = vpop.f32.mrf.mxu1 }
 0x2f7   :  { %v2568_v46 = vadd.f32 %v2516_v47, %v10566_v45  ;;  %v2570_v61 = vadd.f32 %v2557_v54, %v10567_v52 }
 0x2f8   :  { %v2518_v29 = vpop.f32.mrf.mxu0  ;;  %v2559_v39 = vpop.f32.mrf.mxu1 }
 0x2f9   :  { %v5086_v62 = vmul.f32 -1.442695, %v2568_v46  ;;  %5347 = vtanh.f32 %v2570_v61  ;;  %v2569_v60 = vadd.f32 %v2518_v29, %v538_v8  ;;  %v2571_v13 = vadd.f32 %v2559_v39, %v651_v51  ;;  %v5342_v8 = vpop.eup %5341 }
 0x2fa   :  { %5349 = vrcp.f32 %v2593_v55  ;;  %v2520_v14 = vpop.f32.mrf.mxu0  ;;  %v2561_v5 = vpop.f32.mrf.mxu1 }
 0x2fb   :  { %5351 = vpow2.f32 %v5086_v62  ;;  %v5087_v21 = vmul.f32 -1.442695, %v2569_v60  ;;  %v5344_v55 = vpop.eup %5343 }
 0x2fc   :  { %5353 = vtanh.f32 %v2571_v13  ;;  %v2521_v48 = vpop.f32.mrf.mxu0  ;;  %v2562_v38 = vpop.f32.mrf.mxu1  ;;  %v2610_v45 = vmul.f32 %v5344_v55, %v7895_v7 }
 0x2fd   :  { %5355 = vpow2.f32 %v5087_v21  ;;  %v5346_v47 = vpop.eup %5345  ;;  %v2624_v48 = vpop.permute.xlu0 %2623  ;;  %v10568_v38 = vld [vmem:[#allocation224_spill] sm:$0xff] }
 0x2fe   :  { %vm2625_vm7 = vcmp.eq.s32.totalorder %v2624_v48, 1 }
 0x306   :  { %v5348_v54 = vpop.eup %5347 }
 0x307   :  { %v5350_v51 = vpop.eup %5349  ;;  %v2612_v46 = vmul.f32 %v5348_v54, %v5342_v8  ;;  %v10569_v8 = vld [vmem:[#allocation225_spill] sm:$0xff] }
 0x308   :  { %v5352_v52 = vpop.eup %5351  ;;  %v2611_v60 = vmul.f32 %v5350_v51, %v7897_v31 }
 0x309   :  { %v5354_v61 = vpop.eup %5353  ;;  %v2594_v29 = vadd.f32 1.0, %v5352_v52  ;;  %v8109_v39 = vadd.f32 %v2612_v46, %v2610_v45  ;;  %v10570_v46 = vld [vmem:[#allocation226_spill] sm:$0xff] }
 0x30a   :  { %v5356_v62 = vpop.eup %5355  ;;  %v2613_v13 = vmul.f32 %v5354_v61, %v5346_v47  ;;  %v10571_v61 = vld [vmem:[#allocation227_spill] sm:$0xff] }
 0x30b   :  { %5357 = vrcp.f32 %v2594_v29  ;;  %v2595_v14 = vadd.f32 1.0, %v5356_v62 }
 0x30c   :  { %5359 = vtanh.f32 %v8109_v39  ;;  %v8113_v5 = vadd.f32 %v2613_v13, %v2611_v60 }
 0x30d   :  { %5361 = vrcp.f32 %v2595_v14 }
 0x30e   :  { %5363 = vtanh.f32 %v8113_v5 }
 0x316   :  { %v2667_v7 = vpop.f32.mrf.mxu0  ;;  %v2708_v21 = vpop.f32.mrf.mxu1 }
 0x317   :  { %v2715_v59 = vadd.f32 %v2667_v7, %v10568_v38  ;;  %v2717_v55 = vadd.f32 %v2708_v21, %v10569_v8 }
 0x318   :  { %v5358_v54 = vpop.eup %5357  ;;  %v2669_v45 = vpop.f32.mrf.mxu0 }
 0x319   :  { %v2710_v31 = vpop.f32.mrf.mxu1  ;;  %v5360_v47 = vpop.eup %5359  ;;  %v5088_v51 = vmul.f32 -1.442695, %v2715_v59  ;;  %v2716_v52 = vadd.f32 %v2669_v45, %v10570_v46  ;;  %v10576_v46 = vld [vmem:[#allocation87_spill] sm:$0xff] }
 0x31a   :  { %v2718_v29 = vadd.f32 %v2710_v31, %v10571_v61  ;;  %v5362_v62 = vpop.eup %5361  ;;  %v2671_v60 = vpop.f32.mrf.mxu0  ;;  %v2618_v14 = vmul.f32 %v5360_v47, %v5358_v54  ;;  %v10573_v54 = vld [vmem:[#allocation84_spill] sm:$0xff]  ;;  %v10574_v47 = vld [vmem:[#allocation85_spill] sm:$0xff] }
 0x31b   :  { %v2712_v13 = vpop.f32.mrf.mxu1  ;;  %v5364_v19 = vpop.eup %5363  ;;  %5365 = vpow2.f32 %v5088_v51  ;;  %v5089_v20 = vmul.f32 -1.442695, %v2716_v52  ;;  %v10575_v51 = vld [vmem:[#allocation86_spill] sm:$0xff]  ;;  %v10577_v52 = vld [vmem:[#allocation88_spill] sm:$0xff]  ;;  %v10578_v61 = vld [vmem:[#allocation89_spill] sm:$0xff] }
 0x31c   :  { %v2672_v7 = vpop.f32.mrf.mxu0  ;;  %v2619_v21 = vmul.f32 %v5364_v19, %v5362_v62  ;;  %v8122_v8 = vsel %vm2625_vm7, %v2618_v14, %v7907_v58  ;;  %v8128_v31 = vpack.c.bf16 %v2618_v14, %v2618_v14  ;;  %v5090_v19 = vmul.f32 -1.442695, %v2717_v55  ;;  %v10572_v55 = vld [vmem:[#allocation83_spill] sm:$0xff]  ;;  %v10581_v13 = vld [vmem:[#allocation92_spill] sm:$0xff] }
 0x31d   :  { %v2713_v38 = vpop.f32.mrf.mxu1  ;;  %5367 = vpow2.f32 %v5089_v20  ;;  %v10580_v60 = vld [vmem:[#allocation91_spill] sm:$0xff]  ;;  %v10582_v7 = vld [vmem:[#allocation93_spill] sm:$0xff] }
 0x31e   :  { %v2759_v59 = vpack.c.bf16 %v2619_v21, %v2619_v21  ;;  %v8126_v45 = vsel %vm2625_vm7, %v2619_v21, %v7909_v18  ;;  %5369 = vpow2.f32 %v5090_v19  ;;  %v10583_v38 = vld [vmem:[#allocation94_spill] sm:$0xff] }
 0x31f   :  { %5371 = vtanh.f32 %v2718_v29  ;;  %v10579_v29 = vld [vmem:[#allocation90_spill] sm:$0xff] }
 0x320   :  { %2792 = vmatprep.mubr.bf16.mxu0 %v2759_v59  ;;  %2833 = vmatprep.mubr.bf16.mxu1 %v2759_v59 }
 0x321   :  { %2793 = vmatmul.mubr.bf16.vlgmr.msra.gmra.mxu0 %v8128_v31  ;;  %2834 = vmatmul.mubr.bf16.vlgmr.msra.gmra.mxu1 %v8128_v31 }
 0x322   :  { %2843 = vmatpush1.bf16.msra.mxu0 %v10426_v12  ;;  %2884 = vmatpush1.bf16.msra.mxu1 %v10427_v63 }
 0x323   :  { %2874 = vmatprep.mubr.bf16.mxu0 %v2759_v59  ;;  %2915 = vmatprep.mubr.bf16.mxu1 %v2759_v59 }
 0x324   :  { %2844 = vmatprep.subr.bf16.mxu0 %v10428_v6  ;;  %2885 = vmatprep.subr.bf16.mxu1 %v10429_v26 }
 0x326   :  { %2845 = vmatpush1.bf16.msra.mxu0 %v10430_v10  ;;  %2886 = vmatpush1.bf16.msra.mxu1 %v10431_v35 }
 0x327   :  { %2846 = vmatprep.subr.bf16.mxu0 %v10432_v24  ;;  %2887 = vmatprep.subr.bf16.mxu1 %v10433_v1 }
 0x328   :  { %v5366_v20 = vpop.eup %5365 }
 0x329   :  { %v2728_v58 = vadd.f32 1.0, %v5366_v20 }
 0x32a   :  { %v5368_v18 = vpop.eup %5367  ;;  %2847 = vmatpush1.bf16.msra.mxu0 %v10434_v57  ;;  %2888 = vmatpush1.bf16.msra.mxu1 %v10435_v41 }
 0x32b   :  { %5373 = vrcp.f32 %v2728_v58  ;;  %v2729_v48 = vadd.f32 1.0, %v5368_v18  ;;  %2848 = vmatprep.subr.bf16.mxu0 %v10436_v11  ;;  %2889 = vmatprep.subr.bf16.mxu1 %v10437_v22  ;;  %v5370_v62 = vpop.eup %5369  ;;  %v10584_v58 = vld [vmem:[#allocation96_spill] sm:$0xff] }
 0x32c   :  { %v5372_v14 = vpop.eup %5371  ;;  %v2730_v20 = vadd.f32 1.0, %v5370_v62  ;;  %v10589_v62 = vld [vmem:[#allocation101_spill] sm:$0xff] }
 0x32d   :  { %5375 = vrcp.f32 %v2729_v48  ;;  %v10585_v48 = vld [vmem:[#allocation97_spill] sm:$0xff] }
 0x32e   :  { %2849 = vmatpush1.bf16.msra.mxu0 %v10572_v55  ;;  %2890 = vmatpush1.bf16.msra.mxu1 %v10573_v54  ;;  %5377 = vrcp.f32 %v2730_v20  ;;  %v10593_v20 = vld [vmem:[#allocation110_spill] sm:$0xff] }
 0x32f   :  { %2850 = vmatprep.subr.bf16.mxu0 %v10574_v47  ;;  %2891 = vmatprep.subr.bf16.mxu1 %v10575_v51 }
 0x332   :  { %2851 = vmatpush1.bf16.msra.mxu0 %v10576_v46  ;;  %2892 = vmatpush1.bf16.msra.mxu1 %v10577_v52 }
 0x333   :  { %2852 = vmatprep.subr.bf16.mxu0 %v10578_v61  ;;  %2893 = vmatprep.subr.bf16.mxu1 %v10579_v29 }
 0x336   :  { %2853 = vmatpush1.bf16.msra.mxu0 %v10580_v60  ;;  %2894 = vmatpush1.bf16.msra.mxu1 %v10581_v13 }
 0x337   :  { %2854 = vmatprep.subr.bf16.mxu0 %v10582_v7  ;;  %2895 = vmatprep.subr.bf16.mxu1 %v10583_v38  ;;  %v10586_v7 = vld [vmem:[#allocation99_spill] sm:$0xff]  ;;  %v10587_v38 = vld [vmem:[#allocation100_spill] sm:$0xff] }
 0x338   :  { %v5374_v21 = vpop.eup %5373 }
 0x339   :  { %v2739_v59 = vmul.f32 %v5374_v21, %v5372_v14  ;;  %v8165_v14 = vpop.permute.xlu0 %3703  ;;  %v10590_v21 = vld [vmem:[#allocation102_spill] sm:$0xff] }
 0x33a   :  { %v5376_v19 = vpop.eup %5375  ;;  %2855 = vmatpush1.bf16.msra.mxu0 %v10450_v50  ;;  %2896 = vmatpush1.bf16.msra.mxu1 %v10584_v58  ;;  %10588 = vst [vmem:[#allocation107_spill] sm:$0xff] %v8165_v14  ;;  %v10595_v14 = vld [vmem:[#allocation114_spill] sm:$0xff] }
 0x33b   :  { %v2738_v18 = vmul.f32 %v5376_v19, %v7943_v16  ;;  %2856 = vmatprep.subr.bf16.mxu0 %v10585_v48  ;;  %2897 = vmatprep.subr.bf16.mxu1 %v10453_v44  ;;  %v10591_v16 = vld [vmem:[#allocation103_spill] sm:$0xff]  ;;  %v10592_v19 = vld [vmem:[#allocation109_spill] sm:$0xff] }
 0x33d   :  { %v8161_v13 = vadd.f32 %v2739_v59, %v2738_v18  ;;  %v2387_v59 = vpop.permute.xlu0 %2386  ;;  %v10594_v18 = vld [vmem:[#allocation113_spill] sm:$0xff] }
 0x33e   :  { %2857 = vmatpush1.bf16.msra.mxu0 %v10586_v7  ;;  %2898 = vmatpush1.bf16.msra.mxu1 %v10587_v38  ;;  %v10596_v38 = vld [vmem:[#allocation115_spill] sm:$0xff]  ;;  %vm2388_vm8 = vcmp.eq.s32.totalorder %v2387_v59, 1  ;;  %v10602_v59 = vld [vmem:[#allocation126_spill] sm:$0xff] }
 0x33f   :  { %5379 = vtanh.f32 %v8161_v13  ;;  %2858 = vmatprep.subr.bf16.mxu0 %v10589_v62  ;;  %2899 = vmatprep.subr.bf16.mxu1 %v10590_v21  ;;  %v10597_v21 = vld [vmem:[#allocation116_spill] sm:$0xff] }
 0x341   :  { %v2747_v62 = vpop.permute.xlu0 %2746 }
 0x342   :  { %2859 = vmatpush2.bf16.msra.mxu0 %v10591_v16  ;;  %2900 = vmatpush2.bf16.msra.mxu1 %v10459_v49  ;;  %v5378_v16 = vpop.eup %5377  ;;  %v10598_v49 = vld [vmem:[#allocation117_spill] sm:$0xff]  ;;  %vm2748_vm9 = vcmp.eq.s32.totalorder %v2747_v62, 1 }
 0x343   :  { %2860 = vmatprep.subr.bf16.mxu0 %v10460_v17  ;;  %2901 = vmatprep.subr.bf16.mxu1 %v10461_v32  ;;  %v10605_v62 = vld [vmem:[#allocation133_spill] sm:$0xff] }
 0x346   :  { %2861 = vmatpush2.bf16.msra.mxu0 %v10592_v19  ;;  %2902 = vmatpush2.bf16.msra.mxu1 %v10593_v20  ;;  %v2389_v20 = vsel %vm2388_vm8, %v8015_v2, 0.0  ;;  %v10607_v2 = vld [vmem:[#allocation137_spill] sm:$0xff] }
 0x347   :  { %2862 = vmatprep.subr.bf16.mxu0 %v10594_v18  ;;  %2903 = vmatprep.subr.bf16.mxu1 %v10595_v14  ;;  %v10599_v18 = vld [vmem:[#allocation123_spill] sm:$0xff]  ;;  %v10600_v14 = vld [vmem:[#allocation124_spill] sm:$0xff] }
 0x34a   :  { %2863 = vmatpush2.bf16.msra.mxu0 %v10596_v38  ;;  %2904 = vmatpush2.bf16.msra.mxu1 %v10597_v21 }
 0x34b   :  { %2864 = vmatprep.subr.bf16.mxu0 %v10598_v49  ;;  %2905 = vmatprep.subr.bf16.mxu1 %v10469_v9  ;;  %v10603_v49 = vld [vmem:[#allocation131_spill] sm:$0xff]  ;;  %v10604_v9 = vld [vmem:[#allocation132_spill] sm:$0xff] }
 0x34c   :  { %v5380_v32 = vpop.eup %5379 }
 0x34d   :  { %v8182_v19 = vmul.f32 %v5380_v32, %v5378_v16  ;;  %v10606_v32 = vld [vmem:[#allocation134_spill] sm:$0xff] }
 0x34e   :  { %2865 = vmatpush2.bf16.msra.mxu0 %v10599_v18  ;;  %2906 = vmatpush2.bf16.msra.mxu1 %v10600_v14  ;;  %v10608_v16 = vld [vmem:[#allocation138_spill] sm:$0xff] }
 0x34f   :  { %v8188_v38 = vsel %vm2748_vm9, %v8182_v19, %v2389_v20  ;;  %2866 = vmatprep.subr.bf16.mxu0 %v7247_v53  ;;  %2907 = vmatprep.subr.bf16.mxu1 %v10602_v59  ;;  %v10609_v20 = vld [vmem:[#allocation140_spill] sm:$0xff]  ;;  %v10611_v53 = vld [vmem:[#allocation146_spill] sm:$0xff]  ;;  %v10612_v59 = vld [vmem:[#allocation147_spill] sm:$0xff] }
 0x350   :  { %10601 = vst [vmem:[#allocation108_spill] sm:$0xff] %v8188_v38  ;;  %v10610_v38 = vld [vmem:[#allocation145_spill] sm:$0xff] }
 0x352   :  { %2867 = vmatpush2.bf16.msra.mxu0 %v10603_v49  ;;  %2908 = vmatpush2.bf16.msra.mxu1 %v10604_v9  ;;  %v10613_v49 = vld [vmem:[#allocation148_spill] sm:$0xff]  ;;  %v10614_v9 = vld [vmem:[#allocation151_spill] sm:$0xff] }
 0x353   :  { %2868 = vmatprep.subr.bf16.mxu0 %v10605_v62  ;;  %2909 = vmatprep.subr.bf16.mxu1 %v10606_v32  ;;  %v10615_v62 = vld [vmem:[#allocation152_spill] sm:$0xff] }
 0x356   :  { %2869 = vmatpush2.bf16.msra.mxu0 %v10607_v2  ;;  %2910 = vmatpush2.bf16.msra.mxu1 %v10608_v16  ;;  %v8209_v16 = vld [vmem:[%s9746_s8 + $0xe4] ss:$16 sps:$4 sm:$0xff]  }
 0x357   :  { %2870 = vmatprep.subr.bf16.mxu0 %v10476_v40  ;;  %2911 = vmatprep.subr.bf16.mxu1 %v10609_v20  ;;  %10616 = vst [vmem:[#allocation111_spill] sm:$0xff] %v8209_v16 }
 0x35a   :  { %2871 = vmatpush2.bf16.msra.mxu0 %v10610_v38  ;;  %2912 = vmatpush2.bf16.msra.mxu1 %v10611_v53  ;;  %v8215_v38 = vld [vmem:[%s9746_s8 + $0xec] ss:$16 sps:$4 sm:$0xff]  }
 0x35b   :  { %2872 = vmatprep.subr.bf16.mxu0 %v10612_v59  ;;  %2913 = vmatprep.subr.bf16.mxu1 %v10613_v49  ;;  %10617 = vst [vmem:[#allocation112_spill] sm:$0xff] %v8215_v38 }
 0x35e   :  { %2873 = vmatpush2.bf16.msra.mxu0 %v10614_v9  ;;  %2914 = vmatpush2.bf16.msra.mxu1 %v10615_v62  ;;  %v8223_v62 = vld [vmem:[%s9746_s8 + $0xe0] ss:$16 sps:$4 sm:$0xff]   ;;  %v8406_v9 = vld [vmem:[%s9746_s8 + $0x8] ss:$16 sps:$4 sm:$0xff]  }
 0x35f   :  { %2993 = vmatprep.subr.bf16.mxu0 %v8209_v16  ;;  %3034 = vmatprep.subr.bf16.mxu1 %v8215_v38  ;;  %10618 = vst [vmem:[#allocation71_spill] sm:$0xff] %v8223_v62  ;;  %v8229_v16 = vld [vmem:[%s9746_s8 + $0xe8] ss:$16 sps:$4 sm:$0xff]   ;;  %v8235_v38 = vld [vmem:[%s9746_s8 + $0xc4] ss:$16 sps:$4 sm:$0xff]   ;;  %10648 = vst [vmem:[#allocation178_spill] sm:$0xff] %v8406_v9 }
 0x360   :  { %10619 = vst [vmem:[#allocation72_spill] sm:$0xff] %v8229_v16  ;;  %10620 = vst [vmem:[#allocation73_spill] sm:$0xff] %v8235_v38 }
 0x361   :  { %2875 = vmatmul.mubr.bf16.vlgmr.msra.gmra.mxu0 %v8128_v31  ;;  %2916 = vmatmul.mubr.bf16.vlgmr.msra.gmra.mxu1 %v8128_v31  ;;  %v8241_v31 = vld [vmem:[%s9746_s8 + $0xcc] ss:$16 sps:$4 sm:$0xff]  }
 0x362   :  { %2994 = vmatpush1.bf16.msra.mxu0 %v8223_v62  ;;  %3035 = vmatpush1.bf16.msra.mxu1 %v8229_v16  ;;  %10621 = vst [vmem:[#allocation74_spill] sm:$0xff] %v8241_v31  ;;  %v8249_v16 = vld [vmem:[%s9746_s8 + $0xc0] ss:$16 sps:$4 sm:$0xff]   ;;  %v8267_v62 = vld [vmem:[%s9746_s8 + $0xac] ss:$16 sps:$4 sm:$0xff]  }
 0x363   :  { %2995 = vmatprep.subr.bf16.mxu0 %v8235_v38  ;;  %3036 = vmatprep.subr.bf16.mxu1 %v8241_v31  ;;  %10622 = vst [vmem:[#allocation75_spill] sm:$0xff] %v8249_v16  ;;  %v8255_v38 = vld [vmem:[%s9746_s8 + $0xc8] ss:$16 sps:$4 sm:$0xff]   ;;  %v8261_v31 = vld [vmem:[%s9746_s8 + $0xa4] ss:$16 sps:$4 sm:$0xff]   ;;  %10625 = vst [vmem:[#allocation78_spill] sm:$0xff] %v8267_v62 }
 0x364   :  { %3025 = vmatprep.mubr.bf16.mxu0 %v10212_v3  ;;  %3066 = vmatprep.mubr.bf16.mxu1 %v10212_v3  ;;  %10623 = vst [vmem:[#allocation76_spill] sm:$0xff] %v8255_v38  ;;  %10624 = vst [vmem:[#allocation77_spill] sm:$0xff] %v8261_v31 }
 0x366   :  { %2996 = vmatpush1.bf16.msra.mxu0 %v8249_v16  ;;  %3037 = vmatpush1.bf16.msra.mxu1 %v8255_v38  ;;  %v8273_v16 = vld [vmem:[%s9746_s8 + $0xa0] ss:$16 sps:$4 sm:$0xff]   ;;  %v8279_v38 = vld [vmem:[%s9746_s8 + $0xa8] ss:$16 sps:$4 sm:$0xff]  }
 0x367   :  { %2997 = vmatprep.subr.bf16.mxu0 %v8261_v31  ;;  %3038 = vmatprep.subr.bf16.mxu1 %v8267_v62  ;;  %10626 = vst [vmem:[#allocation79_spill] sm:$0xff] %v8273_v16  ;;  %10627 = vst [vmem:[#allocation80_spill] sm:$0xff] %v8279_v38  ;;  %v8285_v31 = vld [vmem:[%s9746_s8 + $0x84] ss:$16 sps:$4 sm:$0xff]   ;;  %v8291_v62 = vld [vmem:[%s9746_s8 + $0x8c] ss:$16 sps:$4 sm:$0xff]  }
 0x368   :  { %10628 = vst [vmem:[#allocation81_spill] sm:$0xff] %v8285_v31  ;;  %10629 = vst [vmem:[#allocation82_spill] sm:$0xff] %v8291_v62 }
 0x36a   :  { %2998 = vmatpush1.bf16.msra.mxu0 %v8273_v16  ;;  %3039 = vmatpush1.bf16.msra.mxu1 %v8279_v38  ;;  %v8297_v16 = vld [vmem:[%s9746_s8 + $0x80] ss:$16 sps:$4 sm:$0xff]   ;;  %v8303_v38 = vld [vmem:[%s9746_s8 + $0x88] ss:$16 sps:$4 sm:$0xff]  }
 0x36b   :  { %2999 = vmatprep.subr.bf16.mxu0 %v8285_v31  ;;  %3040 = vmatprep.subr.bf16.mxu1 %v8291_v62  ;;  %10630 = vst [vmem:[#allocation95_spill] sm:$0xff] %v8297_v16  ;;  %10631 = vst [vmem:[#allocation98_spill] sm:$0xff] %v8303_v38  ;;  %v8309_v31 = vld [vmem:[%s9746_s8 + $0x64] ss:$16 sps:$4 sm:$0xff]   ;;  %v8315_v62 = vld [vmem:[%s9746_s8 + $0x6c] ss:$16 sps:$4 sm:$0xff]  }
 0x36c   :  { %10632 = vst [vmem:[#allocation105_spill] sm:$0xff] %v8309_v31  ;;  %10633 = vst [vmem:[#allocation153_spill] sm:$0xff] %v8315_v62 }
 0x36e   :  { %3000 = vmatpush1.bf16.msra.mxu0 %v8297_v16  ;;  %3041 = vmatpush1.bf16.msra.mxu1 %v8303_v38  ;;  %v8321_v16 = vld [vmem:[%s9746_s8 + $0x60] ss:$16 sps:$4 sm:$0xff]   ;;  %v8327_v38 = vld [vmem:[%s9746_s8 + $0x68] ss:$16 sps:$4 sm:$0xff]  }
 0x36f   :  { %3001 = vmatprep.subr.bf16.mxu0 %v8309_v31  ;;  %3042 = vmatprep.subr.bf16.mxu1 %v8315_v62  ;;  %10634 = vst [vmem:[#allocation154_spill] sm:$0xff] %v8321_v16  ;;  %10635 = vst [vmem:[#allocation157_spill] sm:$0xff] %v8327_v38  ;;  %v8333_v31 = vld [vmem:[%s9746_s8 + $0x44] ss:$16 sps:$4 sm:$0xff]   ;;  %v8339_v62 = vld [vmem:[%s9746_s8 + $0x4c] ss:$16 sps:$4 sm:$0xff]  }
 0x370   :  { %10636 = vst [vmem:[#allocation158_spill] sm:$0xff] %v8333_v31  ;;  %10637 = vst [vmem:[#allocation159_spill] sm:$0xff] %v8339_v62 }
 0x372   :  { %3002 = vmatpush1.bf16.msra.mxu0 %v8321_v16  ;;  %3043 = vmatpush1.bf16.msra.mxu1 %v8327_v38  ;;  %v8345_v16 = vld [vmem:[%s9746_s8 + $0x40] ss:$16 sps:$4 sm:$0xff]   ;;  %v8351_v38 = vld [vmem:[%s9746_s8 + $0x48] ss:$16 sps:$4 sm:$0xff]  }
 0x373   :  { %3003 = vmatprep.subr.bf16.mxu0 %v8333_v31  ;;  %3044 = vmatprep.subr.bf16.mxu1 %v8339_v62  ;;  %10638 = vst [vmem:[#allocation160_spill] sm:$0xff] %v8345_v16  ;;  %10639 = vst [vmem:[#allocation165_spill] sm:$0xff] %v8351_v38  ;;  %v8357_v31 = vld [vmem:[%s9746_s8 + $0x24] ss:$16 sps:$4 sm:$0xff]   ;;  %v8363_v62 = vld [vmem:[%s9746_s8 + $0x2c] ss:$16 sps:$4 sm:$0xff]  }
 0x374   :  { %10640 = vst [vmem:[#allocation166_spill] sm:$0xff] %v8357_v31  ;;  %10641 = vst [vmem:[#allocation167_spill] sm:$0xff] %v8363_v62 }
 0x376   :  { %3004 = vmatpush1.bf16.msra.mxu0 %v8345_v16  ;;  %3045 = vmatpush1.bf16.msra.mxu1 %v8351_v38  ;;  %v8369_v16 = vld [vmem:[%s9749_s1] sm:$0xff] }
 0x377   :  { %3005 = vmatprep.subr.bf16.mxu0 %v8357_v31  ;;  %3046 = vmatprep.subr.bf16.mxu1 %v8363_v62  ;;  %10642 = vst [vmem:[#allocation168_spill] sm:$0xff] %v8369_v16  ;;  %vm3103_vm10 = vcmp.eq.s32.totalorder %v8369_v16, 3  ;;  %v8375_v38 = vld [vmem:[%s9746_s8 + $0x20] ss:$16 sps:$4 sm:$0xff]   ;;  %v8381_v31 = vld [vmem:[%s9746_s8 + $0x28] ss:$16 sps:$4 sm:$0xff]  }
 0x378   :  { %10643 = vst [vmem:[#allocation171_spill] sm:$0xff] %v8375_v38  ;;  %10644 = vst [vmem:[#allocation172_spill] sm:$0xff] %v8381_v31  ;;  %v3104_v62 = vsel %vm3103_vm10, 1, %v10212_v3  ;;  %v8388_v16 = vld [vmem:[%s9746_s8 + $0x4] ss:$16 sps:$4 sm:$0xff]  }
 0x379   :  { %10645 = vst [vmem:[#allocation173_spill] sm:$0xff] %v8388_v16  ;;  %3106 = vperm.xlu0 %5235, %v3104_v62   ;;  %v10650_v62 = vld [vmem:[#allocation18_spill] sm:$0xff] }
 0x37a   :  { %3006 = vmatpush1.bf16.msra.mxu0 %v8375_v38  ;;  %3047 = vmatpush1.bf16.msra.mxu1 %v8381_v31  ;;  %v8394_v38 = vld [vmem:[%s9746_s8 + $0xc] ss:$16 sps:$4 sm:$0xff]   ;;  %v8400_v31 = vld [vmem:[%s9746_s8] ss:$16 sps:$4 sm:$0xff]  }
 0x37b   :  { %3007 = vmatprep.subr.bf16.mxu0 %v8388_v16  ;;  %10646 = vst [vmem:[#allocation174_spill] sm:$0xff] %v8394_v38  ;;  %3048 = vmatprep.subr.bf16.mxu1 %v8394_v38  ;;  %10647 = vst [vmem:[#allocation177_spill] sm:$0xff] %v8400_v31  ;;  %v2992_v16 = vpack.c.bf16 %v8182_v19, %v8182_v19  ;;  %v10649_v19 = vld [vmem:[#allocation17_spill] sm:$0xff] }
 0x37e   :  { %3008 = vmatpush1.bf16.msra.mxu0 %v8400_v31  ;;  %3049 = vmatpush1.bf16.msra.mxu1 %v8406_v9  ;;  %v10704_v9 = vld [vmem:[#allocation130_spill] sm:$0xff]  ;;  %v10705_v31 = vld [vmem:[#allocation135_spill] sm:$0xff] }
 0x37f   :  { %3120 = vmatprep.subr.bf16.mxu0 %v6508_v23  ;;  %3161 = vmatprep.subr.bf16.mxu1 %v10513_v0  ;;  %v10703_v23 = vld [vmem:[#allocation129_spill] sm:$0xff] }
 0x381   :  { %3026 = vmatmul.mubr.bf16.vlgmr.msra.gmra.mxu0 %v2992_v16  ;;  %3067 = vmatmul.mubr.bf16.vlgmr.msra.gmra.mxu1 %v2992_v16  ;;  %v10651_v16 = vld [vmem:[#allocation19_spill] sm:$0xff] }
 0x382   :  { %3121 = vmatpush1.bf16.msra.mxu0 %v6513_v25  ;;  %3162 = vmatpush1.bf16.msra.mxu1 %v10514_v56 }
 0x383   :  { %3122 = vmatprep.subr.bf16.mxu0 %v6524_v28  ;;  %3163 = vmatprep.subr.bf16.mxu1 %v6526_v30  ;;  %v10652_v28 = vld [vmem:[#allocation20_spill] sm:$0xff]  ;;  %v10653_v30 = vld [vmem:[#allocation21_spill] sm:$0xff] }
 0x386   :  { %3123 = vmatpush1.bf16.msra.mxu0 %v6538_v33  ;;  %3164 = vmatpush1.bf16.msra.mxu1 %v6540_v34  ;;  %v10654_v33 = vld [vmem:[#allocation22_spill] sm:$0xff]  ;;  %v10655_v34 = vld [vmem:[#allocation23_spill] sm:$0xff] }
 0x387   :  { %3124 = vmatprep.subr.bf16.mxu0 %v6550_v36  ;;  %3165 = vmatprep.subr.bf16.mxu1 %v6552_v37  ;;  %v10656_v36 = vld [vmem:[#allocation24_spill] sm:$0xff]  ;;  %v10657_v37 = vld [vmem:[#allocation25_spill] sm:$0xff] }
 0x38a   :  { %3125 = vmatpush1.bf16.msra.mxu0 %v6567_v42  ;;  %3166 = vmatpush1.bf16.msra.mxu1 %v6569_v43  ;;  %v10658_v42 = vld [vmem:[#allocation26_spill] sm:$0xff]  ;;  %v10659_v43 = vld [vmem:[#allocation27_spill] sm:$0xff] }
 0x38b   :  { %3126 = vmatprep.subr.bf16.mxu0 %v10649_v19  ;;  %3167 = vmatprep.subr.bf16.mxu1 %v10650_v62  ;;  %v10660_v19 = vld [vmem:[#allocation28_spill] sm:$0xff]  ;;  %v10661_v62 = vld [vmem:[#allocation29_spill] sm:$0xff] }
 0x38e   :  { %3127 = vmatpush1.bf16.msra.mxu0 %v10651_v16  ;;  %3168 = vmatpush1.bf16.msra.mxu1 %v10652_v28  ;;  %v10662_v16 = vld [vmem:[#allocation30_spill] sm:$0xff]  ;;  %v10663_v28 = vld [vmem:[#allocation31_spill] sm:$0xff] }
 0x38f   :  { %3128 = vmatprep.subr.bf16.mxu0 %v10653_v30  ;;  %3169 = vmatprep.subr.bf16.mxu1 %v10654_v33  ;;  %v10664_v30 = vld [vmem:[#allocation32_spill] sm:$0xff]  ;;  %v10665_v33 = vld [vmem:[#allocation33_spill] sm:$0xff] }
 0x392   :  { %3129 = vmatpush1.bf16.msra.mxu0 %v10655_v34  ;;  %3170 = vmatpush1.bf16.msra.mxu1 %v10656_v36  ;;  %v10666_v34 = vld [vmem:[#allocation34_spill] sm:$0xff]  ;;  %v10667_v36 = vld [vmem:[#allocation35_spill] sm:$0xff] }
 0x393   :  { %3130 = vmatprep.subr.bf16.mxu0 %v10657_v37  ;;  %3171 = vmatprep.subr.bf16.mxu1 %v10658_v42  ;;  %v10668_v37 = vld [vmem:[#allocation36_spill] sm:$0xff]  ;;  %v10669_v42 = vld [vmem:[#allocation37_spill] sm:$0xff] }
 0x396   :  { %3131 = vmatpush1.bf16.msra.mxu0 %v10659_v43  ;;  %3172 = vmatpush1.bf16.msra.mxu1 %v10660_v19  ;;  %v10670_v43 = vld [vmem:[#allocation38_spill] sm:$0xff]  ;;  %v10671_v19 = vld [vmem:[#allocation39_spill] sm:$0xff] }
 0x397   :  { %3132 = vmatprep.subr.bf16.mxu0 %v10661_v62  ;;  %3173 = vmatprep.subr.bf16.mxu1 %v10662_v16  ;;  %v10672_v62 = vld [vmem:[#allocation40_spill] sm:$0xff]  ;;  %v10673_v16 = vld [vmem:[#allocation41_spill] sm:$0xff] }
 0x39a   :  { %3133 = vmatpush1.bf16.msra.mxu0 %v10663_v28  ;;  %3174 = vmatpush1.bf16.msra.mxu1 %v10664_v30  ;;  %v10674_v28 = vld [vmem:[#allocation42_spill] sm:$0xff]  ;;  %v10675_v30 = vld [vmem:[#allocation43_spill] sm:$0xff] }
 0x39b   :  { %3134 = vmatprep.subr.bf16.mxu0 %v10665_v33  ;;  %3175 = vmatprep.subr.bf16.mxu1 %v10666_v34  ;;  %v10676_v33 = vld [vmem:[#allocation44_spill] sm:$0xff]  ;;  %v10677_v34 = vld [vmem:[#allocation45_spill] sm:$0xff] }
 0x39e   :  { %3135 = vmatpush1.bf16.msra.mxu0 %v10667_v36  ;;  %3176 = vmatpush1.bf16.msra.mxu1 %v10668_v37  ;;  %v10678_v36 = vld [vmem:[#allocation46_spill] sm:$0xff]  ;;  %v10679_v37 = vld [vmem:[#allocation47_spill] sm:$0xff] }
 0x39f   :  { %3136 = vmatprep.subr.bf16.mxu0 %v10669_v42  ;;  %3177 = vmatprep.subr.bf16.mxu1 %v10670_v43  ;;  %v10680_v42 = vld [vmem:[#allocation48_spill] sm:$0xff]  ;;  %v10681_v43 = vld [vmem:[#allocation49_spill] sm:$0xff] }
 0x3a2   :  { %3137 = vmatpush2.bf16.msra.mxu0 %v10671_v19  ;;  %3178 = vmatpush2.bf16.msra.mxu1 %v10672_v62  ;;  %v10682_v19 = vld [vmem:[#allocation50_spill] sm:$0xff]  ;;  %v10683_v62 = vld [vmem:[#allocation51_spill] sm:$0xff] }
 0x3a3   :  { %3138 = vmatprep.subr.bf16.mxu0 %v10673_v16  ;;  %3179 = vmatprep.subr.bf16.mxu1 %v10674_v28  ;;  %v10684_v16 = vld [vmem:[#allocation52_spill] sm:$0xff]  ;;  %v10685_v28 = vld [vmem:[#allocation53_spill] sm:$0xff] }
 0x3a6   :  { %3139 = vmatpush2.bf16.msra.mxu0 %v10675_v30  ;;  %3180 = vmatpush2.bf16.msra.mxu1 %v10676_v33  ;;  %v10686_v30 = vld [vmem:[#allocation54_spill] sm:$0xff]  ;;  %v10687_v33 = vld [vmem:[#allocation55_spill] sm:$0xff] }
 0x3a7   :  { %3140 = vmatprep.subr.bf16.mxu0 %v10677_v34  ;;  %3181 = vmatprep.subr.bf16.mxu1 %v10678_v36  ;;  %v10688_v34 = vld [vmem:[#allocation56_spill] sm:$0xff]  ;;  %v10689_v36 = vld [vmem:[#allocation57_spill] sm:$0xff] }
 0x3aa   :  { %3141 = vmatpush2.bf16.msra.mxu0 %v10679_v37  ;;  %3182 = vmatpush2.bf16.msra.mxu1 %v10680_v42  ;;  %v10690_v37 = vld [vmem:[#allocation58_spill] sm:$0xff]  ;;  %v10691_v42 = vld [vmem:[#allocation59_spill] sm:$0xff] }
 0x3ab   :  { %3142 = vmatprep.subr.bf16.mxu0 %v10681_v43  ;;  %3183 = vmatprep.subr.bf16.mxu1 %v10682_v19  ;;  %v10692_v43 = vld [vmem:[#allocation60_spill] sm:$0xff]  ;;  %v10693_v19 = vld [vmem:[#allocation61_spill] sm:$0xff] }
 0x3ae   :  { %3143 = vmatpush2.bf16.msra.mxu0 %v10683_v62  ;;  %3184 = vmatpush2.bf16.msra.mxu1 %v10684_v16  ;;  %v10694_v62 = vld [vmem:[#allocation62_spill] sm:$0xff]  ;;  %v10695_v16 = vld [vmem:[#allocation63_spill] sm:$0xff] }
 0x3af   :  { %3144 = vmatprep.subr.bf16.mxu0 %v10685_v28  ;;  %3185 = vmatprep.subr.bf16.mxu1 %v10686_v30  ;;  %v10696_v28 = vld [vmem:[#allocation64_spill] sm:$0xff]  ;;  %v10697_v30 = vld [vmem:[#allocation65_spill] sm:$0xff] }
 0x3b2   :  { %3145 = vmatpush2.bf16.msra.mxu0 %v10687_v33  ;;  %3186 = vmatpush2.bf16.msra.mxu1 %v10688_v34  ;;  %v10698_v33 = vld [vmem:[#allocation66_spill] sm:$0xff]  ;;  %v10699_v34 = vld [vmem:[#allocation67_spill] sm:$0xff] }
 0x3b3   :  { %3146 = vmatprep.subr.bf16.mxu0 %v10689_v36  ;;  %3187 = vmatprep.subr.bf16.mxu1 %v10690_v37  ;;  %v10700_v36 = vld [vmem:[#allocation68_spill] sm:$0xff]  ;;  %v10701_v37 = vld [vmem:[#allocation69_spill] sm:$0xff] }
 0x3b6   :  { %3147 = vmatpush2.bf16.msra.mxu0 %v10691_v42  ;;  %3188 = vmatpush2.bf16.msra.mxu1 %v10692_v43  ;;  %v10702_v42 = vld [vmem:[#allocation70_spill] sm:$0xff] }
 0x3b7   :  { %3148 = vmatprep.subr.bf16.mxu0 %v10693_v19  ;;  %3189 = vmatprep.subr.bf16.mxu1 %v10694_v62 }
 0x3ba   :  { %3149 = vmatpush2.bf16.msra.mxu0 %v10695_v16  ;;  %3190 = vmatpush2.bf16.msra.mxu1 %v10696_v28 }
 0x3bb   :  { %3150 = vmatprep.subr.bf16.mxu0 %v10697_v30  ;;  %3191 = vmatprep.subr.bf16.mxu1 %v10698_v33 }
 0x3be   :  { %3151 = vmatpush2.bf16.msra.mxu0 %v10699_v34  ;;  %3192 = vmatpush2.bf16.msra.mxu1 %v10700_v36  ;;  %v10706_v36 = vld [vmem:[#allocation136_spill] sm:$0xff] }
 0x3bf   :  { %3202 = vmatprep.subr.bf16.mxu0 %v10701_v37  ;;  %3243 = vmatprep.subr.bf16.mxu1 %v10702_v42 }
 0x3e1   :  { %v2794_v43 = vpop.f32.mrf.mxu0  ;;  %v2835_v19 = vpop.f32.mrf.mxu1 }
 0x3e2   :  { %v2924_v30 = vadd.f32 %v2794_v43, %v10703_v23  ;;  %v2926_v33 = vadd.f32 %v2835_v19, %v10704_v9  ;;  %v10707_v9 = vld [vmem:[#allocation202_spill] sm:$0xff] }
 0x3e3   :  { %v2796_v56 = vpop.f32.mrf.mxu0  ;;  %v2837_v62 = vpop.f32.mrf.mxu1 }
 0x3e4   :  { %v2925_v34 = vadd.f32 %v2796_v56, %v10705_v31  ;;  %v5091_v38 = vmul.f32 -1.442695, %v2924_v30  ;;  %v2927_v49 = vadd.f32 %v2837_v62, %v10706_v36  ;;  %v5093_v37 = vmul.f32 -1.442695, %v2926_v33 }
 0x3e5   :  { %v2798_v25 = vpop.f32.mrf.mxu0  ;;  %v2839_v16 = vpop.f32.mrf.mxu1  ;;  %v544_v56 = vadd.f32 %v10707_v9, %v7659_v27 }
 0x3e6   :  { %v5092_v59 = vmul.f32 -1.442695, %v2925_v34  ;;  %5381 = vpow2.f32 %v5091_v38  ;;  %v5094_v42 = vmul.f32 -1.442695, %v2927_v49  ;;  %v10708_v34 = vld [vmem:[#allocation203_spill] sm:$0xff]  ;;  %v10710_v38 = vld [vmem:[#allocation201_spill] sm:$0xff] }
 0x3e7   :  { %v2799_v0 = vpop.f32.mrf.mxu0  ;;  %v2840_v28 = vpop.f32.mrf.mxu1  ;;  %5383 = vpow2.f32 %v5093_v37  ;;  %v657_v49 = vadd.f32 %v10708_v34, %v7664_v4  ;;  %v10709_v37 = vld [vmem:[#allocation200_spill] sm:$0xff] }
 0x3e8   :  { %5385 = vpow2.f32 %v5092_v59 }
 0x3e9   :  { %5387 = vpow2.f32 %v5094_v42 }
 0x3f3   :  { %v5382_v25 = vpop.eup %5381 }
 0x3f4   :  { %v5384_v16 = vpop.eup %5383  ;;  %v2950_v28 = vadd.f32 1.0, %v5382_v25 }
 0x3f5   :  { %v5386_v0 = vpop.eup %5385  ;;  %v2952_v23 = vadd.f32 1.0, %v5384_v16 }
 0x3f6   :  { %v5388_v53 = vpop.eup %5387  ;;  %v2951_v43 = vadd.f32 1.0, %v5386_v0  ;;  %5389 = vrcp.f32 %v2950_v28 }
 0x3f7   :  { %v2953_v30 = vadd.f32 1.0, %v5388_v53  ;;  %5391 = vrcp.f32 %v2952_v23  ;;  %v3341_v23 = vsel %vm3340_vm11, 1, %v10212_v3  ;;  %vm5710_vm11 = vmmov 0  }
 0x3f8   :  { %5393 = vrcp.f32 %v2951_v43  ;;  %3343 = vperm.xlu1 %5236, %v3341_v23  }
 0x403   :  { %v5390_v43 = vpop.eup %5389 }
 0x404   :  { %v5392_v9 = vpop.eup %5391 }
 0x421   :  { %v2876_v36 = vpop.f32.mrf.mxu0  ;;  %v2917_v33 = vpop.f32.mrf.mxu1 }
 0x422   :  { %v2928_v42 = vadd.f32 %v2876_v36, %v10709_v37  ;;  %v2930_v59 = vadd.f32 %v2917_v33, %v10710_v38  ;;  %v5394_v36 = vpop.eup %5393 }
 0x423   :  { %v2878_v31 = vpop.f32.mrf.mxu0  ;;  %v2919_v19 = vpop.f32.mrf.mxu1 }
 0x424   :  { %v5095_v62 = vmul.f32 -1.442695, %v2928_v42  ;;  %5395 = vtanh.f32 %v2930_v59  ;;  %v2929_v25 = vadd.f32 %v2878_v31, %v544_v56  ;;  %v2931_v16 = vadd.f32 %v2919_v19, %v657_v49 }
 0x425   :  { %5397 = vrcp.f32 %v2953_v30  ;;  %v2880_v27 = vpop.f32.mrf.mxu0  ;;  %v2921_v53 = vpop.f32.mrf.mxu1  ;;  %v2970_v30 = vmul.f32 %v5392_v9, %v8109_v39 }
 0x426   :  { %5399 = vpow2.f32 %v5095_v62  ;;  %v5096_v0 = vmul.f32 -1.442695, %v2929_v25  ;;  %v2984_v39 = vpop.permute.xlu1 %2983  ;;  %v10711_v53 = vld [vmem:[#allocation228_spill] sm:$0xff] }
 0x427   :  { %5401 = vtanh.f32 %v2931_v16  ;;  %v2881_v28 = vpop.f32.mrf.mxu0  ;;  %v2922_v4 = vpop.f32.mrf.mxu1  ;;  %vm2985_vm12 = vcmp.eq.s32.totalorder %v2984_v39, 1 }
 0x428   :  { %5403 = vpow2.f32 %v5096_v0  ;;  %v10712_v28 = vld [vmem:[#allocation229_spill] sm:$0xff] }
 0x431   :  { %v5396_v33 = vpop.eup %5395 }
 0x432   :  { %v5398_v56 = vpop.eup %5397  ;;  %v2972_v34 = vmul.f32 %v5396_v33, %v5390_v43  ;;  %v10713_v33 = vld [vmem:[#allocation230_spill] sm:$0xff] }
 0x433   :  { %v5400_v49 = vpop.eup %5399  ;;  %v2971_v31 = vmul.f32 %v5398_v56, %v8113_v5 }
 0x434   :  { %v5402_v37 = vpop.eup %5401  ;;  %v2954_v42 = vadd.f32 1.0, %v5400_v49  ;;  %v8490_v38 = vadd.f32 %v2972_v34, %v2970_v30  ;;  %v10714_v30 = vld [vmem:[#allocation231_spill] sm:$0xff] }
 0x435   :  { %v5404_v59 = vpop.eup %5403  ;;  %v2973_v19 = vmul.f32 %v5402_v37, %v5394_v36 }
 0x436   :  { %5405 = vrcp.f32 %v2954_v42  ;;  %v2955_v62 = vadd.f32 1.0, %v5404_v59 }
 0x437   :  { %5407 = vtanh.f32 %v8490_v38  ;;  %v8494_v25 = vadd.f32 %v2973_v19, %v2971_v31 }
 0x438   :  { %5409 = vrcp.f32 %v2955_v62 }
 0x439   :  { %5411 = vtanh.f32 %v8494_v25 }
 0x441   :  { %v3027_v16 = vpop.f32.mrf.mxu0  ;;  %v3068_v27 = vpop.f32.mrf.mxu1 }
 0x442   :  { %v3075_v0 = vadd.f32 %v3027_v16, %v10711_v53  ;;  %v3077_v4 = vadd.f32 %v3068_v27, %v10712_v28 }
 0x443   :  { %v5406_v23 = vpop.eup %5405  ;;  %v3029_v43 = vpop.f32.mrf.mxu0 }
 0x444   :  { %v3070_v5 = vpop.f32.mrf.mxu1  ;;  %v5408_v9 = vpop.eup %5407  ;;  %v5097_v36 = vmul.f32 -1.442695, %v3075_v0  ;;  %v3076_v56 = vadd.f32 %v3029_v43, %v10713_v33  ;;  %v10716_v33 = vld [vmem:[#allocation93_spill] sm:$0xff] }
 0x445   :  { %v3078_v34 = vadd.f32 %v3070_v5, %v10714_v30  ;;  %v5410_v49 = vpop.eup %5409  ;;  %v2978_v37 = vmul.f32 %v5408_v9, %v5406_v23  ;;  %v3031_v42 = vpop.f32.mrf.mxu0  ;;  %v10715_v9 = vld [vmem:[#allocation92_spill] sm:$0xff] }
 0x446   :  { %v3072_v59 = vpop.f32.mrf.mxu1  ;;  %v5412_v31 = vpop.eup %5411  ;;  %5413 = vpow2.f32 %v5097_v36  ;;  %v5098_v19 = vmul.f32 -1.442695, %v3076_v56  ;;  %v10717_v56 = vld [vmem:[#allocation94_spill] sm:$0xff] }
 0x447   :  { %v2979_v62 = vmul.f32 %v5412_v31, %v5410_v49  ;;  %v8502_v16 = vsel %vm2985_vm12, %v2978_v37, %v8122_v8  ;;  %v3032_v27 = vpop.f32.mrf.mxu0  ;;  %v8507_v43 = vpack.c.bf16 %v2978_v37, %v2978_v37  ;;  %v5099_v8 = vmul.f32 -1.442695, %v3077_v4  ;;  %v10718_v31 = vld [vmem:[#allocation100_spill] sm:$0xff] }
 0x448   :  { %v3073_v53 = vpop.f32.mrf.mxu1  ;;  %5415 = vpow2.f32 %v5098_v19  ;;  %v10719_v19 = vld [vmem:[#allocation101_spill] sm:$0xff]  ;;  %v10721_v27 = vld [vmem:[#allocation103_spill] sm:$0xff] }
 0x449   :  { %v8505_v0 = vsel %vm2985_vm12, %v2979_v62, %v8126_v45  ;;  %v3119_v28 = vpack.c.bf16 %v2979_v62, %v2979_v62  ;;  %5417 = vpow2.f32 %v5099_v8  ;;  %v10720_v62 = vld [vmem:[#allocation102_spill] sm:$0xff]  ;;  %vm4888_vm12 = vcmask 523264  }
 0x44a   :  { %5419 = vtanh.f32 %v3078_v34  ;;  %v10723_v53 = vld [vmem:[#allocation106_spill] sm:$0xff] }
 0x44b   :  { %3152 = vmatprep.mubr.bf16.mxu0 %v3119_v28  ;;  %3193 = vmatprep.mubr.bf16.mxu1 %v3119_v28  ;;  %v10725_v8 = vld [vmem:[#allocation110_spill] sm:$0xff] }
 0x44c   :  { %3153 = vmatmul.mubr.bf16.vlgmr.msra.gmra.mxu0 %v8507_v43  ;;  %3194 = vmatmul.mubr.bf16.vlgmr.msra.gmra.mxu1 %v8507_v43 }
 0x44d   :  { %3203 = vmatpush1.bf16.msra.mxu0 %v10426_v12  ;;  %3244 = vmatpush1.bf16.msra.mxu1 %v10427_v63 }
 0x44e   :  { %3234 = vmatprep.mubr.bf16.mxu0 %v3119_v28  ;;  %3275 = vmatprep.mubr.bf16.mxu1 %v3119_v28  ;;  %v10724_v28 = vld [vmem:[#allocation109_spill] sm:$0xff] }
 0x44f   :  { %3204 = vmatprep.subr.bf16.mxu0 %v10428_v6  ;;  %3245 = vmatprep.subr.bf16.mxu1 %v10429_v26 }
 0x451   :  { %3205 = vmatpush1.bf16.msra.mxu0 %v10430_v10  ;;  %3246 = vmatpush1.bf16.msra.mxu1 %v10431_v35 }
 0x452   :  { %3206 = vmatprep.subr.bf16.mxu0 %v10432_v24  ;;  %3247 = vmatprep.subr.bf16.mxu1 %v10433_v1 }
 0x453   :  { %v5414_v45 = vpop.eup %5413 }
 0x454   :  { %v3088_v39 = vadd.f32 1.0, %v5414_v45  ;;  %v10726_v45 = vld [vmem:[#allocation113_spill] sm:$0xff] }
 0x455   :  { %v5416_v23 = vpop.eup %5415  ;;  %3207 = vmatpush1.bf16.msra.mxu0 %v10434_v57  ;;  %3248 = vmatpush1.bf16.msra.mxu1 %v10435_v41 }
 0x456   :  { %5421 = vrcp.f32 %v3088_v39  ;;  %v3089_v5 = vadd.f32 1.0, %v5416_v23  ;;  %3208 = vmatprep.subr.bf16.mxu0 %v10436_v11  ;;  %3249 = vmatprep.subr.bf16.mxu1 %v10437_v22  ;;  %v5418_v4 = vpop.eup %5417  ;;  %v10727_v39 = vld [vmem:[#allocation114_spill] sm:$0xff]  ;;  %v3107_v23 = vpop.permute.xlu0 %3106 }
 0x457   :  { %v5420_v36 = vpop.eup %5419  ;;  %v3090_v37 = vadd.f32 1.0, %v5418_v4  ;;  %vm3108_vm13 = vcmp.eq.s32.totalorder %v3107_v23, 1  ;;  %v10738_v23 = vld [vmem:[#allocation138_spill] sm:$0xff] }
 0x458   :  { %5423 = vrcp.f32 %v3089_v5  ;;  %v10728_v5 = vld [vmem:[#allocation115_spill] sm:$0xff] }
 0x459   :  { %3209 = vmatpush1.bf16.msra.mxu0 %v10572_v55  ;;  %3250 = vmatpush1.bf16.msra.mxu1 %v10573_v54  ;;  %5425 = vrcp.f32 %v3090_v37  ;;  %v10731_v37 = vld [vmem:[#allocation108_spill] sm:$0xff] }
 0x45a   :  { %3210 = vmatprep.subr.bf16.mxu0 %v10574_v47  ;;  %3251 = vmatprep.subr.bf16.mxu1 %v10575_v51 }
 0x45d   :  { %3211 = vmatpush1.bf16.msra.mxu0 %v10576_v46  ;;  %3252 = vmatpush1.bf16.msra.mxu1 %v10577_v52 }
 0x45e   :  { %3212 = vmatprep.subr.bf16.mxu0 %v10578_v61  ;;  %3253 = vmatprep.subr.bf16.mxu1 %v10579_v29 }
 0x461   :  { %3213 = vmatpush1.bf16.msra.mxu0 %v10580_v60  ;;  %3254 = vmatpush1.bf16.msra.mxu1 %v10715_v9 }
 0x462   :  { %3214 = vmatprep.subr.bf16.mxu0 %v10716_v33  ;;  %3255 = vmatprep.subr.bf16.mxu1 %v10717_v56 }
 0x463   :  { %v5422_v30 = vpop.eup %5421 }
 0x464   :  { %v3099_v34 = vmul.f32 %v5422_v30, %v5420_v36  ;;  %v10729_v36 = vld [vmem:[#allocation117_spill] sm:$0xff]  ;;  %v10730_v30 = vld [vmem:[#allocation118_spill] sm:$0xff] }
 0x465   :  { %v5424_v49 = vpop.eup %5423  ;;  %3215 = vmatpush1.bf16.msra.mxu0 %v10450_v50  ;;  %3256 = vmatpush1.bf16.msra.mxu1 %v10584_v58 }
 0x466   :  { %v3098_v42 = vmul.f32 %v5424_v49, %v8161_v13  ;;  %3216 = vmatprep.subr.bf16.mxu0 %v10585_v48  ;;  %3257 = vmatprep.subr.bf16.mxu1 %v10453_v44  ;;  %v10722_v13 = vld [vmem:[#allocation104_spill] sm:$0xff]  ;;  %v5426_v4 = vpop.eup %5425 }
 0x468   :  { %v8540_v59 = vadd.f32 %v3099_v34, %v3098_v42 }
 0x469   :  { %3217 = vmatpush1.bf16.msra.mxu0 %v10586_v7  ;;  %3258 = vmatpush1.bf16.msra.mxu1 %v10718_v31 }
 0x46a   :  { %5427 = vtanh.f32 %v8540_v59  ;;  %3218 = vmatprep.subr.bf16.mxu0 %v10719_v19  ;;  %3259 = vmatprep.subr.bf16.mxu1 %v10720_v62 }
 0x46d   :  { %3219 = vmatpush2.bf16.msra.mxu0 %v10721_v27  ;;  %3260 = vmatpush2.bf16.msra.mxu1 %v10722_v13 }
 0x46e   :  { %3220 = vmatprep.subr.bf16.mxu0 %v10460_v17  ;;  %3261 = vmatprep.subr.bf16.mxu1 %v10723_v53 }
 0x471   :  { %3221 = vmatpush2.bf16.msra.mxu0 %v10724_v28  ;;  %3262 = vmatpush2.bf16.msra.mxu1 %v10725_v8 }
 0x472   :  { %3222 = vmatprep.subr.bf16.mxu0 %v10726_v45  ;;  %3263 = vmatprep.subr.bf16.mxu1 %v10727_v39  ;;  %v10735_v39 = vld [vmem:[#allocation131_spill] sm:$0xff] }
 0x475   :  { %3223 = vmatpush2.bf16.msra.mxu0 %v10728_v5  ;;  %3264 = vmatpush2.bf16.msra.mxu1 %v10597_v21  ;;  %v10733_v5 = vld [vmem:[#allocation125_spill] sm:$0xff]  ;;  %v10734_v21 = vld [vmem:[#allocation126_spill] sm:$0xff] }
 0x476   :  { %3224 = vmatprep.subr.bf16.mxu0 %v10729_v36  ;;  %3265 = vmatprep.subr.bf16.mxu1 %v10730_v30  ;;  %v10736_v36 = vld [vmem:[#allocation132_spill] sm:$0xff]  ;;  %v10737_v30 = vld [vmem:[#allocation133_spill] sm:$0xff] }
 0x477   :  { %v5428_v34 = vpop.eup %5427 }
 0x478   :  { %v8559_v49 = vmul.f32 %v5428_v34, %v5426_v4  ;;  %v10739_v4 = vld [vmem:[#allocation145_spill] sm:$0xff]  ;;  %v10740_v34 = vld [vmem:[#allocation146_spill] sm:$0xff] }
 0x479   :  { %3225 = vmatpush2.bf16.msra.mxu0 %v10599_v18  ;;  %3266 = vmatpush2.bf16.msra.mxu1 %v10600_v14  ;;  %v10849_v14 = vld [vmem:[#allocation144_spill] sm:$0xff] }
 0x47a   :  { %v8565_v42 = vsel %vm3108_vm13, %v8559_v49, %v10731_v37  ;;  %3226 = vmatprep.subr.bf16.mxu0 %v10733_v5  ;;  %3267 = vmatprep.subr.bf16.mxu1 %v10734_v21  ;;  %v10741_v37 = vld [vmem:[#allocation147_spill] sm:$0xff]  ;;  %v3352_v15 = vpack.c.bf16 %v8559_v49, %v8559_v49  ;;  %v10786_v49 = vld [vmem:[#allocation13_spill] sm:$0xff] }
 0x47b   :  { %10732 = vst [vmem:[#allocation179_spill] sm:$0xff] %v8565_v42 }
 0x47d   :  { %3227 = vmatpush2.bf16.msra.mxu0 %v10735_v39  ;;  %3268 = vmatpush2.bf16.msra.mxu1 %v10736_v36  ;;  %v10742_v39 = vld [vmem:[#allocation148_spill] sm:$0xff]  ;;  %v10743_v36 = vld [vmem:[#allocation151_spill] sm:$0xff] }
 0x47e   :  { %3228 = vmatprep.subr.bf16.mxu0 %v10737_v30  ;;  %3269 = vmatprep.subr.bf16.mxu1 %v10606_v32  ;;  %v10744_v30 = vld [vmem:[#allocation152_spill] sm:$0xff]  ;;  %v10745_v32 = vld [vmem:[#allocation111_spill] sm:$0xff] }
 0x481   :  { %3229 = vmatpush2.bf16.msra.mxu0 %v10607_v2  ;;  %3270 = vmatpush2.bf16.msra.mxu1 %v10738_v23  ;;  %v10746_v2 = vld [vmem:[#allocation112_spill] sm:$0xff]  ;;  %v10844_v23 = vld [vmem:[#allocation127_spill] sm:$0xff] }
 0x482   :  { %3230 = vmatprep.subr.bf16.mxu0 %v10476_v40  ;;  %3271 = vmatprep.subr.bf16.mxu1 %v10609_v20  ;;  %v10747_v20 = vld [vmem:[#allocation71_spill] sm:$0xff]  ;;  %v10761_v40 = vld [vmem:[#allocation105_spill] sm:$0xff] }
 0x485   :  { %3231 = vmatpush2.bf16.msra.mxu0 %v10739_v4  ;;  %3272 = vmatpush2.bf16.msra.mxu1 %v10740_v34  ;;  %v10748_v4 = vld [vmem:[#allocation72_spill] sm:$0xff]  ;;  %v10749_v34 = vld [vmem:[#allocation73_spill] sm:$0xff] }
 0x486   :  { %3232 = vmatprep.subr.bf16.mxu0 %v10741_v37  ;;  %3273 = vmatprep.subr.bf16.mxu1 %v10742_v39  ;;  %v10750_v37 = vld [vmem:[#allocation74_spill] sm:$0xff] }
 0x487   :  { %v10760_v39 = vld [vmem:[#allocation98_spill] sm:$0xff] }
 0x489   :  { %3233 = vmatpush2.bf16.msra.mxu0 %v10743_v36  ;;  %3274 = vmatpush2.bf16.msra.mxu1 %v10744_v30  ;;  %v10751_v30 = vld [vmem:[#allocation75_spill] sm:$0xff]  ;;  %v10754_v36 = vld [vmem:[#allocation78_spill] sm:$0xff] }
 0x48a   :  { %3353 = vmatprep.subr.bf16.mxu0 %v10745_v32  ;;  %3394 = vmatprep.subr.bf16.mxu1 %v10746_v2  ;;  %v10752_v32 = vld [vmem:[#allocation76_spill] sm:$0xff]  ;;  %v10753_v2 = vld [vmem:[#allocation77_spill] sm:$0xff] }
 0x48c   :  { %3235 = vmatmul.mubr.bf16.vlgmr.msra.gmra.mxu0 %v8507_v43  ;;  %3276 = vmatmul.mubr.bf16.vlgmr.msra.gmra.mxu1 %v8507_v43  ;;  %v10755_v43 = vld [vmem:[#allocation79_spill] sm:$0xff] }
 0x48d   :  { %3354 = vmatpush1.bf16.msra.mxu0 %v10747_v20  ;;  %3395 = vmatpush1.bf16.msra.mxu1 %v10748_v4  ;;  %v10756_v20 = vld [vmem:[#allocation80_spill] sm:$0xff]  ;;  %v10757_v4 = vld [vmem:[#allocation81_spill] sm:$0xff] }
 0x48e   :  { %3355 = vmatprep.subr.bf16.mxu0 %v10749_v34  ;;  %3396 = vmatprep.subr.bf16.mxu1 %v10750_v37  ;;  %v10758_v34 = vld [vmem:[#allocation82_spill] sm:$0xff]  ;;  %v10759_v37 = vld [vmem:[#allocation95_spill] sm:$0xff] }
 0x48f   :  { %3385 = vmatprep.mubr.bf16.mxu0 %v10212_v3  ;;  %3426 = vmatprep.mubr.bf16.mxu1 %v10212_v3 }
 0x491   :  { %3356 = vmatpush1.bf16.msra.mxu0 %v10751_v30  ;;  %3397 = vmatpush1.bf16.msra.mxu1 %v10752_v32  ;;  %v10762_v30 = vld [vmem:[#allocation153_spill] sm:$0xff]  ;;  %v10763_v32 = vld [vmem:[#allocation154_spill] sm:$0xff] }
 0x492   :  { %3357 = vmatprep.subr.bf16.mxu0 %v10753_v2  ;;  %3398 = vmatprep.subr.bf16.mxu1 %v10754_v36  ;;  %v4061_v36 = vsel %vm4060_vm14, 1, %v10212_v3  ;;  %v10764_v2 = vld [vmem:[#allocation157_spill] sm:$0xff]  ;;  %vm4907_vm14 = vcmask 7168  }
 0x493   :  { %4063 = vperm.xlu1 %5236, %v4061_v36   ;;  %v10772_v36 = vld [vmem:[#allocation172_spill] sm:$0xff] }
 0x495   :  { %3358 = vmatpush1.bf16.msra.mxu0 %v10755_v43  ;;  %3399 = vmatpush1.bf16.msra.mxu1 %v10756_v20  ;;  %v10765_v43 = vld [vmem:[#allocation158_spill] sm:$0xff]  ;;  %v10766_v20 = vld [vmem:[#allocation159_spill] sm:$0xff] }
 0x496   :  { %3359 = vmatprep.subr.bf16.mxu0 %v10757_v4  ;;  %3400 = vmatprep.subr.bf16.mxu1 %v10758_v34  ;;  %v10768_v4 = vld [vmem:[#allocation165_spill] sm:$0xff]  ;;  %v10769_v34 = vld [vmem:[#allocation166_spill] sm:$0xff] }
 0x499   :  { %3360 = vmatpush1.bf16.msra.mxu0 %v10759_v37  ;;  %3401 = vmatpush1.bf16.msra.mxu1 %v10760_v39  ;;  %v4421_v39 = vsel %vm4420_vm15, 1, %v10212_v3  ;;  %v10770_v37 = vld [vmem:[#allocation167_spill] sm:$0xff] }
 0x49a   :  { %3361 = vmatprep.subr.bf16.mxu0 %v10761_v40  ;;  %3402 = vmatprep.subr.bf16.mxu1 %v10762_v30  ;;  %v10767_v40 = vld [vmem:[#allocation160_spill] sm:$0xff]  ;;  %v4659_v30 = vsel %vm4658_vm0, 1, %v10212_v3 }
 0x49b   :  { %4423 = vperm.xlu1 %5236, %v4421_v39   ;;  %v10777_v39 = vld [vmem:[#allocation178_spill] sm:$0xff] }
 0x49d   :  { %3362 = vmatpush1.bf16.msra.mxu0 %v10763_v32  ;;  %3403 = vmatpush1.bf16.msra.mxu1 %v10764_v2  ;;  %v10771_v32 = vld [vmem:[#allocation171_spill] sm:$0xff]  ;;  %v10773_v2 = vld [vmem:[#allocation168_spill] sm:$0xff] }
 0x49e   :  { %3363 = vmatprep.subr.bf16.mxu0 %v10765_v43  ;;  %3404 = vmatprep.subr.bf16.mxu1 %v10766_v20  ;;  %vm3463_vm1 = vcmp.eq.s32.totalorder %v10773_v2, 4  ;;  %v10774_v43 = vld [vmem:[#allocation173_spill] sm:$0xff]  ;;  %v10775_v20 = vld [vmem:[#allocation174_spill] sm:$0xff] }
 0x49f   :  { %4661 = vperm.xlu1 %5236, %v4659_v30   ;;  %v10782_v30 = vld [vmem:[#allocation9_spill] sm:$0xff]  ;;  %v10783_v2 = vld [vmem:[#allocation10_spill] sm:$0xff] }
 0x4a1   :  { %3364 = vmatpush1.bf16.msra.mxu0 %v10767_v40  ;;  %3405 = vmatpush1.bf16.msra.mxu1 %v10768_v4  ;;  %v3464_v40 = vsel %vm3463_vm1, 1, %v10212_v3  ;;  %v10776_v4 = vld [vmem:[#allocation177_spill] sm:$0xff] }
 0x4a2   :  { %3365 = vmatprep.subr.bf16.mxu0 %v10769_v34  ;;  %3406 = vmatprep.subr.bf16.mxu1 %v10770_v37  ;;  %v10778_v34 = vld [vmem:[#allocation5_spill] sm:$0xff]  ;;  %v10779_v37 = vld [vmem:[#allocation6_spill] sm:$0xff] }
 0x4a3   :  { %3466 = vperm.xlu1 %5236, %v3464_v40   ;;  %v10789_v40 = vld [vmem:[#allocation16_spill] sm:$0xff] }
 0x4a5   :  { %3366 = vmatpush1.bf16.msra.mxu0 %v10771_v32  ;;  %3407 = vmatpush1.bf16.msra.mxu1 %v10772_v36  ;;  %v10780_v32 = vld [vmem:[#allocation7_spill] sm:$0xff]  ;;  %v10781_v36 = vld [vmem:[#allocation8_spill] sm:$0xff] }
 0x4a6   :  { %3367 = vmatprep.subr.bf16.mxu0 %v10774_v43  ;;  %3408 = vmatprep.subr.bf16.mxu1 %v10775_v20  ;;  %v10784_v43 = vld [vmem:[#allocation11_spill] sm:$0xff]  ;;  %v10785_v20 = vld [vmem:[#allocation12_spill] sm:$0xff] }
 0x4a9   :  { %3368 = vmatpush1.bf16.msra.mxu0 %v10776_v4  ;;  %3409 = vmatpush1.bf16.msra.mxu1 %v10777_v39  ;;  %v10787_v4 = vld [vmem:[#allocation14_spill] sm:$0xff]  ;;  %v10788_v39 = vld [vmem:[#allocation15_spill] sm:$0xff] }
 0x4aa   :  { %3480 = vmatprep.subr.bf16.mxu0 %v10778_v34  ;;  %3521 = vmatprep.subr.bf16.mxu1 %v10779_v37 }
 0x4ac   :  { %3386 = vmatmul.mubr.bf16.vlgmr.msra.gmra.mxu0 %v3352_v15  ;;  %3427 = vmatmul.mubr.bf16.vlgmr.msra.gmra.mxu1 %v3352_v15  ;;  %v10790_v15 = vld [vmem:[#allocation17_spill] sm:$0xff] }
 0x4ad   :  { %3481 = vmatpush1.bf16.msra.mxu0 %v10780_v32  ;;  %3522 = vmatpush1.bf16.msra.mxu1 %v10781_v36  ;;  %v10791_v32 = vld [vmem:[#allocation18_spill] sm:$0xff]  ;;  %v10792_v36 = vld [vmem:[#allocation19_spill] sm:$0xff] }
 0x4ae   :  { %3482 = vmatprep.subr.bf16.mxu0 %v10782_v30  ;;  %3523 = vmatprep.subr.bf16.mxu1 %v10783_v2  ;;  %v10793_v30 = vld [vmem:[#allocation20_spill] sm:$0xff]  ;;  %v10794_v2 = vld [vmem:[#allocation21_spill] sm:$0xff] }
 0x4b1   :  { %3483 = vmatpush1.bf16.msra.mxu0 %v10784_v43  ;;  %3524 = vmatpush1.bf16.msra.mxu1 %v10785_v20  ;;  %v10795_v43 = vld [vmem:[#allocation22_spill] sm:$0xff]  ;;  %v10796_v20 = vld [vmem:[#allocation23_spill] sm:$0xff] }
 0x4b2   :  { %3484 = vmatprep.subr.bf16.mxu0 %v10786_v49  ;;  %3525 = vmatprep.subr.bf16.mxu1 %v10787_v4  ;;  %v10797_v49 = vld [vmem:[#allocation24_spill] sm:$0xff]  ;;  %v10798_v4 = vld [vmem:[#allocation25_spill] sm:$0xff] }
 0x4b5   :  { %3485 = vmatpush1.bf16.msra.mxu0 %v10788_v39  ;;  %3526 = vmatpush1.bf16.msra.mxu1 %v10789_v40  ;;  %v10799_v39 = vld [vmem:[#allocation26_spill] sm:$0xff]  ;;  %v10800_v40 = vld [vmem:[#allocation27_spill] sm:$0xff] }
 0x4b6   :  { %3486 = vmatprep.subr.bf16.mxu0 %v10790_v15  ;;  %3527 = vmatprep.subr.bf16.mxu1 %v10791_v32  ;;  %v10801_v15 = vld [vmem:[#allocation28_spill] sm:$0xff]  ;;  %v10802_v32 = vld [vmem:[#allocation29_spill] sm:$0xff] }
 0x4b9   :  { %3487 = vmatpush1.bf16.msra.mxu0 %v10792_v36  ;;  %3528 = vmatpush1.bf16.msra.mxu1 %v10793_v30  ;;  %v10803_v36 = vld [vmem:[#allocation30_spill] sm:$0xff]  ;;  %v10804_v30 = vld [vmem:[#allocation31_spill] sm:$0xff] }
 0x4ba   :  { %3488 = vmatprep.subr.bf16.mxu0 %v10794_v2  ;;  %3529 = vmatprep.subr.bf16.mxu1 %v10795_v43  ;;  %v10805_v2 = vld [vmem:[#allocation32_spill] sm:$0xff]  ;;  %v10806_v43 = vld [vmem:[#allocation33_spill] sm:$0xff] }
 0x4bd   :  { %3489 = vmatpush1.bf16.msra.mxu0 %v10796_v20  ;;  %3530 = vmatpush1.bf16.msra.mxu1 %v10797_v49  ;;  %v10807_v20 = vld [vmem:[#allocation34_spill] sm:$0xff]  ;;  %v10808_v49 = vld [vmem:[#allocation35_spill] sm:$0xff] }
 0x4be   :  { %3490 = vmatprep.subr.bf16.mxu0 %v10798_v4  ;;  %3531 = vmatprep.subr.bf16.mxu1 %v10799_v39  ;;  %v10809_v4 = vld [vmem:[#allocation36_spill] sm:$0xff]  ;;  %v10810_v39 = vld [vmem:[#allocation37_spill] sm:$0xff] }
 0x4c1   :  { %3491 = vmatpush1.bf16.msra.mxu0 %v10800_v40  ;;  %3532 = vmatpush1.bf16.msra.mxu1 %v10801_v15  ;;  %v10811_v40 = vld [vmem:[#allocation38_spill] sm:$0xff]  ;;  %v10812_v15 = vld [vmem:[#allocation39_spill] sm:$0xff] }
 0x4c2   :  { %3492 = vmatprep.subr.bf16.mxu0 %v10802_v32  ;;  %3533 = vmatprep.subr.bf16.mxu1 %v10803_v36  ;;  %v10813_v32 = vld [vmem:[#allocation40_spill] sm:$0xff]  ;;  %v10814_v36 = vld [vmem:[#allocation41_spill] sm:$0xff] }
 0x4c5   :  { %3493 = vmatpush1.bf16.msra.mxu0 %v10804_v30  ;;  %3534 = vmatpush1.bf16.msra.mxu1 %v10805_v2  ;;  %v10815_v30 = vld [vmem:[#allocation42_spill] sm:$0xff]  ;;  %v10816_v2 = vld [vmem:[#allocation43_spill] sm:$0xff] }
 0x4c6   :  { %3494 = vmatprep.subr.bf16.mxu0 %v10806_v43  ;;  %3535 = vmatprep.subr.bf16.mxu1 %v10807_v20  ;;  %v10817_v43 = vld [vmem:[#allocation44_spill] sm:$0xff]  ;;  %v10818_v20 = vld [vmem:[#allocation45_spill] sm:$0xff] }
 0x4c9   :  { %3495 = vmatpush1.bf16.msra.mxu0 %v10808_v49  ;;  %3536 = vmatpush1.bf16.msra.mxu1 %v10809_v4  ;;  %v10819_v49 = vld [vmem:[#allocation46_spill] sm:$0xff]  ;;  %v10820_v4 = vld [vmem:[#allocation47_spill] sm:$0xff] }
 0x4ca   :  { %3496 = vmatprep.subr.bf16.mxu0 %v10810_v39  ;;  %3537 = vmatprep.subr.bf16.mxu1 %v10811_v40  ;;  %v10821_v39 = vld [vmem:[#allocation48_spill] sm:$0xff]  ;;  %v10822_v40 = vld [vmem:[#allocation49_spill] sm:$0xff] }
 0x4cd   :  { %3497 = vmatpush2.bf16.msra.mxu0 %v10812_v15  ;;  %3538 = vmatpush2.bf16.msra.mxu1 %v10813_v32  ;;  %v10823_v15 = vld [vmem:[#allocation50_spill] sm:$0xff]  ;;  %v10824_v32 = vld [vmem:[#allocation51_spill] sm:$0xff] }
 0x4ce   :  { %3498 = vmatprep.subr.bf16.mxu0 %v10814_v36  ;;  %3539 = vmatprep.subr.bf16.mxu1 %v10815_v30  ;;  %v10825_v36 = vld [vmem:[#allocation52_spill] sm:$0xff]  ;;  %v10826_v30 = vld [vmem:[#allocation53_spill] sm:$0xff] }
 0x4d1   :  { %3499 = vmatpush2.bf16.msra.mxu0 %v10816_v2  ;;  %3540 = vmatpush2.bf16.msra.mxu1 %v10817_v43  ;;  %v10827_v2 = vld [vmem:[#allocation54_spill] sm:$0xff]  ;;  %v10828_v43 = vld [vmem:[#allocation55_spill] sm:$0xff] }
 0x4d2   :  { %3500 = vmatprep.subr.bf16.mxu0 %v10818_v20  ;;  %3541 = vmatprep.subr.bf16.mxu1 %v10819_v49  ;;  %v10829_v20 = vld [vmem:[#allocation56_spill] sm:$0xff]  ;;  %v10830_v49 = vld [vmem:[#allocation57_spill] sm:$0xff] }
 0x4d5   :  { %3501 = vmatpush2.bf16.msra.mxu0 %v10820_v4  ;;  %3542 = vmatpush2.bf16.msra.mxu1 %v10821_v39  ;;  %v10831_v4 = vld [vmem:[#allocation58_spill] sm:$0xff]  ;;  %v10832_v39 = vld [vmem:[#allocation59_spill] sm:$0xff] }
 0x4d6   :  { %3502 = vmatprep.subr.bf16.mxu0 %v10822_v40  ;;  %3543 = vmatprep.subr.bf16.mxu1 %v10823_v15  ;;  %v10833_v40 = vld [vmem:[#allocation60_spill] sm:$0xff]  ;;  %v10834_v15 = vld [vmem:[#allocation61_spill] sm:$0xff] }
 0x4d9   :  { %3503 = vmatpush2.bf16.msra.mxu0 %v10824_v32  ;;  %3544 = vmatpush2.bf16.msra.mxu1 %v10825_v36  ;;  %v10835_v32 = vld [vmem:[#allocation62_spill] sm:$0xff]  ;;  %v10836_v36 = vld [vmem:[#allocation63_spill] sm:$0xff] }
 0x4da   :  { %3504 = vmatprep.subr.bf16.mxu0 %v10826_v30  ;;  %3545 = vmatprep.subr.bf16.mxu1 %v10827_v2  ;;  %v10837_v30 = vld [vmem:[#allocation64_spill] sm:$0xff]  ;;  %v10838_v2 = vld [vmem:[#allocation65_spill] sm:$0xff] }
 0x4dd   :  { %3505 = vmatpush2.bf16.msra.mxu0 %v10828_v43  ;;  %3546 = vmatpush2.bf16.msra.mxu1 %v10829_v20  ;;  %v10839_v43 = vld [vmem:[#allocation66_spill] sm:$0xff]  ;;  %v10840_v20 = vld [vmem:[#allocation67_spill] sm:$0xff] }
 0x4de   :  { %3506 = vmatprep.subr.bf16.mxu0 %v10830_v49  ;;  %3547 = vmatprep.subr.bf16.mxu1 %v10831_v4  ;;  %v10841_v49 = vld [vmem:[#allocation68_spill] sm:$0xff]  ;;  %v10842_v4 = vld [vmem:[#allocation69_spill] sm:$0xff] }
 0x4e1   :  { %3507 = vmatpush2.bf16.msra.mxu0 %v10832_v39  ;;  %3548 = vmatpush2.bf16.msra.mxu1 %v10833_v40  ;;  %v10843_v39 = vld [vmem:[#allocation70_spill] sm:$0xff] }
 0x4e2   :  { %3508 = vmatprep.subr.bf16.mxu0 %v10834_v15  ;;  %3549 = vmatprep.subr.bf16.mxu1 %v10835_v32 }
 0x4e5   :  { %3509 = vmatpush2.bf16.msra.mxu0 %v10836_v36  ;;  %3550 = vmatpush2.bf16.msra.mxu1 %v10837_v30 }
 0x4e6   :  { %3510 = vmatprep.subr.bf16.mxu0 %v10838_v2  ;;  %3551 = vmatprep.subr.bf16.mxu1 %v10839_v43  ;;  %v10845_v2 = vld [vmem:[#allocation143_spill] sm:$0xff]  ;;  %v10846_v43 = vld [vmem:[#allocation141_spill] sm:$0xff] }
 0x4e7   :  { %v324_v21 = vadd.f32 %v10845_v2, %v10844_v23  ;;  %v10881_v23 = vld [vmem:[#allocation139_spill] sm:$0xff] }
 0x4e9   :  { %3511 = vmatpush2.bf16.msra.mxu0 %v10840_v20  ;;  %3552 = vmatpush2.bf16.msra.mxu1 %v10841_v49  ;;  %v10847_v20 = vld [vmem:[#allocation142_spill] sm:$0xff]  ;;  %v10848_v49 = vld [vmem:[#allocation128_spill] sm:$0xff] }
 0x4ea   :  { %3562 = vmatprep.subr.bf16.mxu0 %v10842_v4  ;;  %3603 = vmatprep.subr.bf16.mxu1 %v10843_v39  ;;  %v437_v4 = vadd.f32 %v10849_v14, %v10848_v49 }
 0x50c   :  { %v3154_v40 = vpop.f32.mrf.mxu0  ;;  %v3195_v15 = vpop.f32.mrf.mxu1 }
 0x50d   :  { %v3284_v5 = vadd.f32 %v3154_v40, %v10846_v43  ;;  %v3286_v42 = vadd.f32 %v3195_v15, %v10847_v20 }
 0x50e   :  { %v3156_v37 = vpop.f32.mrf.mxu0  ;;  %v3197_v32 = vpop.f32.mrf.mxu1 }
 0x50f   :  { %v3285_v18 = vadd.f32 %v3156_v37, %v324_v21  ;;  %v5100_v39 = vmul.f32 -1.442695, %v3284_v5  ;;  %v3287_v45 = vadd.f32 %v3197_v32, %v437_v4  ;;  %v5102_v8 = vmul.f32 -1.442695, %v3286_v42  ;;  %v10850_v5 = vld [vmem:[#allocation204_spill] sm:$0xff]  ;;  %v10852_v32 = vld [vmem:[#allocation206_spill] sm:$0xff] }
 0x510   :  { %v3158_v34 = vpop.f32.mrf.mxu0  ;;  %v3199_v36 = vpop.f32.mrf.mxu1 }
 0x511   :  { %v5101_v28 = vmul.f32 -1.442695, %v3285_v18  ;;  %5429 = vpow2.f32 %v5100_v39  ;;  %v5103_v34 = vmul.f32 -1.442695, %v3287_v45  ;;  %v10851_v18 = vld [vmem:[#allocation205_spill] sm:$0xff]  ;;  %v10853_v39 = vld [vmem:[#allocation207_spill] sm:$0xff] }
 0x512   :  { %v3159_v3 = vpop.f32.mrf.mxu0  ;;  %v3200_v30 = vpop.f32.mrf.mxu1  ;;  %5431 = vpow2.f32 %v5102_v8 }
 0x513   :  { %5433 = vpow2.f32 %v5101_v28 }
 0x514   :  { %5435 = vpow2.f32 %v5103_v34 }
 0x51e   :  { %v5430_v3 = vpop.eup %5429 }
 0x51f   :  { %v5432_v36 = vpop.eup %5431  ;;  %v3310_v2 = vadd.f32 1.0, %v5430_v3 }
 0x520   :  { %v5434_v30 = vpop.eup %5433  ;;  %v3312_v40 = vadd.f32 1.0, %v5432_v36 }
 0x521   :  { %v5436_v43 = vpop.eup %5435  ;;  %v3311_v20 = vadd.f32 1.0, %v5434_v30  ;;  %5437 = vrcp.f32 %v3310_v2 }
 0x522   :  { %v3313_v15 = vadd.f32 1.0, %v5436_v43  ;;  %5439 = vrcp.f32 %v3312_v40 }
 0x523   :  { %5441 = vrcp.f32 %v3311_v20 }
 0x52e   :  { %v5438_v40 = vpop.eup %5437 }
 0x54c   :  { %v3236_v14 = vpop.f32.mrf.mxu0  ;;  %v3277_v21 = vpop.f32.mrf.mxu1 }
 0x54d   :  { %v3288_v42 = vadd.f32 %v3236_v14, %v10850_v5  ;;  %v3290_v37 = vadd.f32 %v3277_v21, %v10851_v18  ;;  %v5440_v14 = vpop.eup %5439 }
 0x54e   :  { %v3238_v8 = vpop.f32.mrf.mxu0  ;;  %v3279_v28 = vpop.f32.mrf.mxu1 }
 0x54f   :  { %v5104_v45 = vmul.f32 -1.442695, %v3288_v42  ;;  %5443 = vtanh.f32 %v3290_v37  ;;  %v3289_v4 = vadd.f32 %v3238_v8, %v10852_v32  ;;  %v3291_v34 = vadd.f32 %v3279_v28, %v10853_v39  ;;  %v5442_v20 = vpop.eup %5441 }
 0x550   :  { %5445 = vrcp.f32 %v3313_v15  ;;  %v3240_v3 = vpop.f32.mrf.mxu0  ;;  %v3281_v36 = vpop.f32.mrf.mxu1  ;;  %v3330_v42 = vmul.f32 %v5440_v14, %v8490_v38 }
 0x551   :  { %5447 = vpow2.f32 %v5104_v45  ;;  %v5105_v30 = vmul.f32 -1.442695, %v3289_v4  ;;  %v3344_v38 = vpop.permute.xlu1 %3343 }
 0x552   :  { %5449 = vtanh.f32 %v3291_v34  ;;  %v3241_v2 = vpop.f32.mrf.mxu0  ;;  %v3282_v43 = vpop.f32.mrf.mxu1  ;;  %vm3345_vm2 = vcmp.eq.s32.totalorder %v3344_v38, 1 }
 0x553   :  { %5451 = vpow2.f32 %v5105_v30  ;;  %v10854_v30 = vld [vmem:[#allocation232_spill] sm:$0xff]  ;;  %v10855_v43 = vld [vmem:[#allocation233_spill] sm:$0xff] }
 0x55c   :  { %v5444_v21 = vpop.eup %5443 }
 0x55d   :  { %v5446_v5 = vpop.eup %5445  ;;  %v3332_v18 = vmul.f32 %v5444_v21, %v5438_v40 }
 0x55e   :  { %v5448_v37 = vpop.eup %5447  ;;  %v3331_v45 = vmul.f32 %v5446_v5, %v8494_v25 }
 0x55f   :  { %v5450_v8 = vpop.eup %5449  ;;  %v3314_v28 = vadd.f32 1.0, %v5448_v37  ;;  %v8706_v15 = vadd.f32 %v3332_v18, %v3330_v42  ;;  %v10856_v42 = vld [vmem:[#allocation234_spill] sm:$0xff]  ;;  %v10857_v37 = vld [vmem:[#allocation235_spill] sm:$0xff] }
 0x560   :  { %v5452_v32 = vpop.eup %5451  ;;  %v3333_v4 = vmul.f32 %v5450_v8, %v5442_v20 }
 0x561   :  { %5453 = vrcp.f32 %v3314_v28  ;;  %v3315_v39 = vadd.f32 1.0, %v5452_v32 }
 0x562   :  { %5455 = vtanh.f32 %v8706_v15  ;;  %v8710_v34 = vadd.f32 %v3333_v4, %v3331_v45 }
 0x563   :  { %5457 = vrcp.f32 %v3315_v39 }
 0x564   :  { %5459 = vtanh.f32 %v8710_v34 }
 0x56c   :  { %v3387_v3 = vpop.f32.mrf.mxu0  ;;  %v3428_v36 = vpop.f32.mrf.mxu1 }
 0x56d   :  { %v3435_v2 = vadd.f32 %v3387_v3, %v10854_v30  ;;  %v3437_v40 = vadd.f32 %v3428_v36, %v10855_v43 }
 0x56e   :  { %v5454_v14 = vpop.eup %5453  ;;  %v3389_v21 = vpop.f32.mrf.mxu0 }
 0x56f   :  { %v3430_v25 = vpop.f32.mrf.mxu1  ;;  %v5456_v20 = vpop.eup %5455  ;;  %v5106_v5 = vmul.f32 -1.442695, %v3435_v2  ;;  %v3436_v18 = vadd.f32 %v3389_v21, %v10856_v42 }
 0x570   :  { %v3438_v8 = vadd.f32 %v3430_v25, %v10857_v37  ;;  %v5458_v28 = vpop.eup %5457  ;;  %v3338_v32 = vmul.f32 %v5456_v20, %v5454_v14  ;;  %v3391_v45 = vpop.f32.mrf.mxu0 }
 0x571   :  { %v3432_v4 = vpop.f32.mrf.mxu1  ;;  %v5460_v39 = vpop.eup %5459  ;;  %5461 = vpow2.f32 %v5106_v5  ;;  %v5107_v49 = vmul.f32 -1.442695, %v3436_v18 }
 0x572   :  { %v3339_v3 = vmul.f32 %v5460_v39, %v5458_v28  ;;  %v8718_v36 = vsel %vm3345_vm2, %v3338_v32, %v8502_v16  ;;  %v3392_v30 = vpop.f32.mrf.mxu0  ;;  %v8723_v25 = vpack.c.bf16 %v3338_v32, %v3338_v32  ;;  %v5108_v16 = vmul.f32 -1.442695, %v3437_v40  ;;  %v8751_v5 = vpop.permute.xlu1 %4063  ;;  %v10861_v4 = vld [vmem:[#allocation109_spill] sm:$0xff]  ;;  %v10862_v39 = vld [vmem:[#allocation110_spill] sm:$0xff] }
 0x573   :  { %v3433_v43 = vpop.f32.mrf.mxu1  ;;  %5463 = vpow2.f32 %v5107_v49  ;;  %10858 = vst [vmem:[#allocation180_spill] sm:$0xff] %v8751_v5  ;;  %v10864_v30 = vld [vmem:[#allocation114_spill] sm:$0xff]  ;;  %v10877_v5 = vld [vmem:[#allocation133_spill] sm:$0xff] }
 0x574   :  { %v8721_v2 = vsel %vm3345_vm2, %v3339_v3, %v8505_v0  ;;  %v3479_v21 = vpack.c.bf16 %v3339_v3, %v3339_v3  ;;  %5465 = vpow2.f32 %v5108_v16  ;;  %v10863_v3 = vld [vmem:[#allocation113_spill] sm:$0xff]  ;;  %v10866_v16 = vld [vmem:[#allocation116_spill] sm:$0xff] }
 0x575   :  { %5467 = vtanh.f32 %v3438_v8 }
 0x576   :  { %3512 = vmatprep.mubr.bf16.mxu0 %v3479_v21  ;;  %3553 = vmatprep.mubr.bf16.mxu1 %v3479_v21  ;;  %v8760_v45 = vpop.permute.xlu1 %4423 }
 0x577   :  { %3513 = vmatmul.mubr.bf16.vlgmr.msra.gmra.mxu0 %v8723_v25  ;;  %3554 = vmatmul.mubr.bf16.vlgmr.msra.gmra.mxu1 %v8723_v25  ;;  %10859 = vst [vmem:[#allocation185_spill] sm:$0xff] %v8760_v45  ;;  %v10876_v45 = vld [vmem:[#allocation132_spill] sm:$0xff] }
 0x578   :  { %3563 = vmatpush1.bf16.msra.mxu0 %v10426_v12  ;;  %3604 = vmatpush1.bf16.msra.mxu1 %v10427_v63 }
 0x579   :  { %3594 = vmatprep.mubr.bf16.mxu0 %v3479_v21  ;;  %3635 = vmatprep.mubr.bf16.mxu1 %v3479_v21  ;;  %v10865_v21 = vld [vmem:[#allocation115_spill] sm:$0xff] }
 0x57a   :  { %3564 = vmatprep.subr.bf16.mxu0 %v10428_v6  ;;  %3605 = vmatprep.subr.bf16.mxu1 %v10429_v26 }
 0x57c   :  { %3565 = vmatpush1.bf16.msra.mxu0 %v10430_v10  ;;  %3606 = vmatpush1.bf16.msra.mxu1 %v10431_v35 }
 0x57d   :  { %3566 = vmatprep.subr.bf16.mxu0 %v10432_v24  ;;  %3607 = vmatprep.subr.bf16.mxu1 %v10433_v1 }
 0x57e   :  { %v5462_v0 = vpop.eup %5461 }
 0x57f   :  { %v3448_v49 = vadd.f32 1.0, %v5462_v0 }
 0x580   :  { %v5464_v38 = vpop.eup %5463  ;;  %3567 = vmatpush1.bf16.msra.mxu0 %v10434_v57  ;;  %3608 = vmatpush1.bf16.msra.mxu1 %v10435_v41 }
 0x581   :  { %5469 = vrcp.f32 %v3448_v49  ;;  %v3449_v14 = vadd.f32 1.0, %v5464_v38  ;;  %3568 = vmatprep.subr.bf16.mxu0 %v10436_v11  ;;  %3609 = vmatprep.subr.bf16.mxu1 %v10437_v22  ;;  %v5466_v40 = vpop.eup %5465  ;;  %v10867_v49 = vld [vmem:[#allocation117_spill] sm:$0xff]  ;;  %v10868_v38 = vld [vmem:[#allocation118_spill] sm:$0xff] }
 0x582   :  { %v5468_v20 = vpop.eup %5467  ;;  %v3450_v8 = vadd.f32 1.0, %v5466_v40 }
 0x583   :  { %5471 = vrcp.f32 %v3449_v14 }
 0x584   :  { %3569 = vmatpush1.bf16.msra.mxu0 %v10572_v55  ;;  %3610 = vmatpush1.bf16.msra.mxu1 %v10573_v54  ;;  %5473 = vrcp.f32 %v3450_v8  ;;  %v10873_v8 = vld [vmem:[#allocation125_spill] sm:$0xff] }
 0x585   :  { %3570 = vmatprep.subr.bf16.mxu0 %v10574_v47  ;;  %3611 = vmatprep.subr.bf16.mxu1 %v10575_v51 }
 0x588   :  { %3571 = vmatpush1.bf16.msra.mxu0 %v10576_v46  ;;  %3612 = vmatpush1.bf16.msra.mxu1 %v10577_v52 }
 0x589   :  { %3572 = vmatprep.subr.bf16.mxu0 %v10578_v61  ;;  %3613 = vmatprep.subr.bf16.mxu1 %v10579_v29 }
 0x58c   :  { %3573 = vmatpush1.bf16.msra.mxu0 %v10580_v60  ;;  %3614 = vmatpush1.bf16.msra.mxu1 %v10715_v9 }
 0x58d   :  { %3574 = vmatprep.subr.bf16.mxu0 %v10716_v33  ;;  %3615 = vmatprep.subr.bf16.mxu1 %v10717_v56 }
 0x58e   :  { %v5470_v42 = vpop.eup %5469 }
 0x58f   :  { %v3459_v18 = vmul.f32 %v5470_v42, %v5468_v20  ;;  %v10869_v20 = vld [vmem:[#allocation123_spill] sm:$0xff]  ;;  %v10870_v42 = vld [vmem:[#allocation124_spill] sm:$0xff] }
 0x590   :  { %v5472_v37 = vpop.eup %5471  ;;  %3575 = vmatpush1.bf16.msra.mxu0 %v10450_v50  ;;  %3616 = vmatpush1.bf16.msra.mxu1 %v10584_v58 }
 0x591   :  { %v3458_v28 = vmul.f32 %v5472_v37, %v8540_v59  ;;  %3576 = vmatprep.subr.bf16.mxu0 %v10585_v48  ;;  %3617 = vmatprep.subr.bf16.mxu1 %v10453_v44  ;;  %v8771_v59 = vpop.permute.xlu1 %4661  ;;  %v5474_v0 = vpop.eup %5473 }
 0x592   :  { %10860 = vst [vmem:[#allocation186_spill] sm:$0xff] %v8771_v59  ;;  %v10875_v59 = vld [vmem:[#allocation131_spill] sm:$0xff] }
 0x593   :  { %v8758_v32 = vadd.f32 %v3459_v18, %v3458_v28  ;;  %v10871_v18 = vld [vmem:[#allocation179_spill] sm:$0xff]  ;;  %v10874_v28 = vld [vmem:[#allocation126_spill] sm:$0xff] }
 0x594   :  { %3577 = vmatpush1.bf16.msra.mxu0 %v10586_v7  ;;  %3618 = vmatpush1.bf16.msra.mxu1 %v10718_v31 }
 0x595   :  { %5475 = vtanh.f32 %v8758_v32  ;;  %3578 = vmatprep.subr.bf16.mxu0 %v10719_v19  ;;  %3619 = vmatprep.subr.bf16.mxu1 %v10720_v62  ;;  %v3467_v43 = vpop.permute.xlu1 %3466 }
 0x596   :  { %vm3468_vm3 = vcmp.eq.s32.totalorder %v3467_v43, 1  ;;  %v10878_v43 = vld [vmem:[#allocation134_spill] sm:$0xff] }
 0x598   :  { %3579 = vmatpush2.bf16.msra.mxu0 %v10721_v27  ;;  %3620 = vmatpush2.bf16.msra.mxu1 %v10722_v13 }
 0x599   :  { %3580 = vmatprep.subr.bf16.mxu0 %v10460_v17  ;;  %3621 = vmatprep.subr.bf16.mxu1 %v10723_v53 }
 0x59c   :  { %3581 = vmatpush2.bf16.msra.mxu0 %v10861_v4  ;;  %3622 = vmatpush2.bf16.msra.mxu1 %v10862_v39 }
 0x59d   :  { %3582 = vmatprep.subr.bf16.mxu0 %v10863_v3  ;;  %3623 = vmatprep.subr.bf16.mxu1 %v10864_v30 }
 0x5a0   :  { %3583 = vmatpush2.bf16.msra.mxu0 %v10865_v21  ;;  %3624 = vmatpush2.bf16.msra.mxu1 %v10866_v16 }
 0x5a1   :  { %3584 = vmatprep.subr.bf16.mxu0 %v10867_v49  ;;  %3625 = vmatprep.subr.bf16.mxu1 %v10868_v38  ;;  %v10990_v38 = vld [vmem:[#allocation150_spill] sm:$0xff]  ;;  %v10991_v49 = vld [vmem:[#allocation155_spill] sm:$0xff] }
 0x5a2   :  { %v5476_v14 = vpop.eup %5475 }
 0x5a3   :  { %v8781_v40 = vmul.f32 %v5476_v14, %v5474_v0  ;;  %v10879_v0 = vld [vmem:[#allocation137_spill] sm:$0xff]  ;;  %v10880_v14 = vld [vmem:[#allocation138_spill] sm:$0xff] }
 0x5a4   :  { %3585 = vmatpush2.bf16.msra.mxu0 %v10869_v20  ;;  %3626 = vmatpush2.bf16.msra.mxu1 %v10870_v42  ;;  %v10989_v20 = vld [vmem:[#allocation149_spill] sm:$0xff] }
 0x5a5   :  { %v8787_v37 = vsel %vm3468_vm3, %v8781_v40, %v10871_v18  ;;  %3586 = vmatprep.subr.bf16.mxu0 %v10873_v8  ;;  %3627 = vmatprep.subr.bf16.mxu1 %v10874_v28  ;;  %v10882_v18 = vld [vmem:[#allocation140_spill] sm:$0xff]  ;;  %v10884_v8 = vld [vmem:[#allocation146_spill] sm:$0xff]  ;;  %v10885_v28 = vld [vmem:[#allocation147_spill] sm:$0xff] }
 0x5a6   :  { %10872 = vst [vmem:[#allocation187_spill] sm:$0xff] %v8787_v37  ;;  %v10883_v37 = vld [vmem:[#allocation145_spill] sm:$0xff] }
 0x5a8   :  { %3587 = vmatpush2.bf16.msra.mxu0 %v10875_v59  ;;  %3628 = vmatpush2.bf16.msra.mxu1 %v10876_v45  ;;  %v10886_v59 = vld [vmem:[#allocation148_spill] sm:$0xff]  ;;  %v10887_v45 = vld [vmem:[#allocation151_spill] sm:$0xff] }
 0x5a9   :  { %3588 = vmatprep.subr.bf16.mxu0 %v10877_v5  ;;  %3629 = vmatprep.subr.bf16.mxu1 %v10878_v43  ;;  %v10888_v5 = vld [vmem:[#allocation152_spill] sm:$0xff] }
 0x5ac   :  { %3589 = vmatpush2.bf16.msra.mxu0 %v10879_v0  ;;  %3630 = vmatpush2.bf16.msra.mxu1 %v10880_v14  ;;  %v8808_v14 = vld [vmem:[%s9746_s8 + $0xe4] ss:$16 sps:$4 sm:$0xff]  }
 0x5ad   :  { %3590 = vmatprep.subr.bf16.mxu0 %v10881_v23  ;;  %3631 = vmatprep.subr.bf16.mxu1 %v10882_v18  ;;  %10889 = vst [vmem:[#allocation188_spill] sm:$0xff] %v8808_v14  ;;  %v10929_v18 = vld [vmem:[#allocation11_spill] sm:$0xff]  ;;  %v10931_v23 = vld [vmem:[#allocation13_spill] sm:$0xff] }
 0x5b0   :  { %3591 = vmatpush2.bf16.msra.mxu0 %v10883_v37  ;;  %3632 = vmatpush2.bf16.msra.mxu1 %v10884_v8  ;;  %v8814_v37 = vld [vmem:[%s9746_s8 + $0xec] ss:$16 sps:$4 sm:$0xff]  }
 0x5b1   :  { %3592 = vmatprep.subr.bf16.mxu0 %v10885_v28  ;;  %3633 = vmatprep.subr.bf16.mxu1 %v10886_v59  ;;  %10890 = vst [vmem:[#allocation189_spill] sm:$0xff] %v8814_v37  ;;  %v10923_v59 = vld [vmem:[#allocation5_spill] sm:$0xff]  ;;  %v10926_v28 = vld [vmem:[#allocation8_spill] sm:$0xff]  ;;  %v10928_v8 = vld [vmem:[#allocation10_spill] sm:$0xff] }
 0x5b4   :  { %3593 = vmatpush2.bf16.msra.mxu0 %v10887_v45  ;;  %3634 = vmatpush2.bf16.msra.mxu1 %v10888_v5  ;;  %v8822_v5 = vld [vmem:[%s9746_s8 + $0xe0] ss:$16 sps:$4 sm:$0xff]   ;;  %v8866_v45 = vld [vmem:[%s9746_s8 + $0xac] ss:$16 sps:$4 sm:$0xff]  }
 0x5b5   :  { %3713 = vmatprep.subr.bf16.mxu0 %v8808_v14  ;;  %3754 = vmatprep.subr.bf16.mxu1 %v8814_v37  ;;  %10891 = vst [vmem:[#allocation190_spill] sm:$0xff] %v8822_v5  ;;  %v8828_v14 = vld [vmem:[%s9746_s8 + $0xe8] ss:$16 sps:$4 sm:$0xff]   ;;  %v8834_v37 = vld [vmem:[%s9746_s8 + $0xc4] ss:$16 sps:$4 sm:$0xff]   ;;  %10899 = vst [vmem:[#allocation119_spill] sm:$0xff] %v8866_v45 }
 0x5b6   :  { %10892 = vst [vmem:[#allocation191_spill] sm:$0xff] %v8828_v14  ;;  %10893 = vst [vmem:[#allocation192_spill] sm:$0xff] %v8834_v37 }
 0x5b7   :  { %3595 = vmatmul.mubr.bf16.vlgmr.msra.gmra.mxu0 %v8723_v25  ;;  %3636 = vmatmul.mubr.bf16.vlgmr.msra.gmra.mxu1 %v8723_v25  ;;  %v8840_v25 = vld [vmem:[%s9746_s8 + $0xcc] ss:$16 sps:$4 sm:$0xff]  }
 0x5b8   :  { %3714 = vmatpush1.bf16.msra.mxu0 %v8822_v5  ;;  %3755 = vmatpush1.bf16.msra.mxu1 %v8828_v14  ;;  %10894 = vst [vmem:[#allocation193_spill] sm:$0xff] %v8840_v25  ;;  %v10895_v5 = vmov 0   ;;  %v8848_v14 = vld [vmem:[%s9746_s8 + $0xc0] ss:$16 sps:$4 sm:$0xff]  }
 0x5b9   :  { %3715 = vmatprep.subr.bf16.mxu0 %v8834_v37  ;;  %3756 = vmatprep.subr.bf16.mxu1 %v8840_v25  ;;  %10896 = vst [vmem:[#allocation194_spill] sm:$0xff] %v8848_v14  ;;  %v8854_v37 = vld [vmem:[%s9746_s8 + $0xc8] ss:$16 sps:$4 sm:$0xff]   ;;  %v8860_v25 = vld [vmem:[%s9746_s8 + $0xa4] ss:$16 sps:$4 sm:$0xff]  }
 0x5ba   :  { %3745 = vmatprep.mubr.bf16.mxu0 %v10895_v5  ;;  %3786 = vmatprep.mubr.bf16.mxu1 %v10895_v5  ;;  %10897 = vst [vmem:[#allocation195_spill] sm:$0xff] %v8854_v37  ;;  %10898 = vst [vmem:[#allocation121_spill] sm:$0xff] %v8860_v25 }
 0x5bc   :  { %3716 = vmatpush1.bf16.msra.mxu0 %v8848_v14  ;;  %3757 = vmatpush1.bf16.msra.mxu1 %v8854_v37  ;;  %v8872_v14 = vld [vmem:[%s9746_s8 + $0xa0] ss:$16 sps:$4 sm:$0xff]   ;;  %v8878_v37 = vld [vmem:[%s9746_s8 + $0xa8] ss:$16 sps:$4 sm:$0xff]  }
 0x5bd   :  { %3717 = vmatprep.subr.bf16.mxu0 %v8860_v25  ;;  %3758 = vmatprep.subr.bf16.mxu1 %v8866_v45  ;;  %10900 = vst [vmem:[#allocation120_spill] sm:$0xff] %v8872_v14  ;;  %10901 = vst [vmem:[#allocation122_spill] sm:$0xff] %v8878_v37  ;;  %v8884_v25 = vld [vmem:[%s9746_s8 + $0x84] ss:$16 sps:$4 sm:$0xff]   ;;  %v8890_v45 = vld [vmem:[%s9746_s8 + $0x8c] ss:$16 sps:$4 sm:$0xff]  }
 0x5be   :  { %10902 = vst [vmem:[#allocation198_spill] sm:$0xff] %v8884_v25  ;;  %10903 = vst [vmem:[#allocation199_spill] sm:$0xff] %v8890_v45 }
 0x5c0   :  { %3718 = vmatpush1.bf16.msra.mxu0 %v8872_v14  ;;  %3759 = vmatpush1.bf16.msra.mxu1 %v8878_v37  ;;  %v8896_v14 = vld [vmem:[%s9746_s8 + $0x80] ss:$16 sps:$4 sm:$0xff]   ;;  %v8902_v37 = vld [vmem:[%s9746_s8 + $0x88] ss:$16 sps:$4 sm:$0xff]  }
 0x5c1   :  { %3719 = vmatprep.subr.bf16.mxu0 %v8884_v25  ;;  %3760 = vmatprep.subr.bf16.mxu1 %v8890_v45  ;;  %10904 = vst [vmem:[#allocation196_spill] sm:$0xff] %v8896_v14  ;;  %10905 = vst [vmem:[#allocation197_spill] sm:$0xff] %v8902_v37  ;;  %v8908_v25 = vld [vmem:[%s9746_s8 + $0x64] ss:$16 sps:$4 sm:$0xff]   ;;  %v8914_v45 = vld [vmem:[%s9746_s8 + $0x6c] ss:$16 sps:$4 sm:$0xff]  }
 0x5c2   :  { %10906 = vst [vmem:[#allocation224_spill] sm:$0xff] %v8908_v25  ;;  %10907 = vst [vmem:[#allocation225_spill] sm:$0xff] %v8914_v45 }
 0x5c4   :  { %3720 = vmatpush1.bf16.msra.mxu0 %v8896_v14  ;;  %3761 = vmatpush1.bf16.msra.mxu1 %v8902_v37  ;;  %v8920_v14 = vld [vmem:[%s9746_s8 + $0x60] ss:$16 sps:$4 sm:$0xff]   ;;  %v8926_v37 = vld [vmem:[%s9746_s8 + $0x68] ss:$16 sps:$4 sm:$0xff]  }
 0x5c5   :  { %3721 = vmatprep.subr.bf16.mxu0 %v8908_v25  ;;  %3762 = vmatprep.subr.bf16.mxu1 %v8914_v45  ;;  %10908 = vst [vmem:[#allocation226_spill] sm:$0xff] %v8920_v14  ;;  %10909 = vst [vmem:[#allocation227_spill] sm:$0xff] %v8926_v37  ;;  %v8932_v25 = vld [vmem:[%s9746_s8 + $0x44] ss:$16 sps:$4 sm:$0xff]   ;;  %v8938_v45 = vld [vmem:[%s9746_s8 + $0x4c] ss:$16 sps:$4 sm:$0xff]  }
 0x5c6   :  { %10910 = vst [vmem:[#allocation83_spill] sm:$0xff] %v8932_v25  ;;  %10911 = vst [vmem:[#allocation84_spill] sm:$0xff] %v8938_v45 }
 0x5c8   :  { %3722 = vmatpush1.bf16.msra.mxu0 %v8920_v14  ;;  %3763 = vmatpush1.bf16.msra.mxu1 %v8926_v37  ;;  %v8944_v14 = vld [vmem:[%s9746_s8 + $0x40] ss:$16 sps:$4 sm:$0xff]   ;;  %v8950_v37 = vld [vmem:[%s9746_s8 + $0x48] ss:$16 sps:$4 sm:$0xff]  }
 0x5c9   :  { %3723 = vmatprep.subr.bf16.mxu0 %v8932_v25  ;;  %3764 = vmatprep.subr.bf16.mxu1 %v8938_v45  ;;  %10912 = vst [vmem:[#allocation85_spill] sm:$0xff] %v8944_v14  ;;  %10913 = vst [vmem:[#allocation86_spill] sm:$0xff] %v8950_v37  ;;  %v8956_v25 = vld [vmem:[%s9746_s8 + $0x24] ss:$16 sps:$4 sm:$0xff]   ;;  %v8962_v45 = vld [vmem:[%s9746_s8 + $0x2c] ss:$16 sps:$4 sm:$0xff]  }
 0x5ca   :  { %10914 = vst [vmem:[#allocation87_spill] sm:$0xff] %v8956_v25  ;;  %10915 = vst [vmem:[#allocation88_spill] sm:$0xff] %v8962_v45 }
 0x5cc   :  { %3724 = vmatpush1.bf16.msra.mxu0 %v8944_v14  ;;  %3765 = vmatpush1.bf16.msra.mxu1 %v8950_v37  ;;  %v8968_v14 = vld [vmem:[%s9749_s1] sm:$0xff] }
 0x5cd   :  { %3725 = vmatprep.subr.bf16.mxu0 %v8956_v25  ;;  %3766 = vmatprep.subr.bf16.mxu1 %v8962_v45  ;;  %10916 = vst [vmem:[#allocation89_spill] sm:$0xff] %v8968_v14  ;;  %vm3823_vm4 = vcmp.eq.s32.totalorder %v8968_v14, 5  ;;  %v8974_v37 = vld [vmem:[%s9746_s8 + $0x20] ss:$16 sps:$4 sm:$0xff]   ;;  %v8980_v25 = vld [vmem:[%s9746_s8 + $0x28] ss:$16 sps:$4 sm:$0xff]  }
 0x5ce   :  { %10917 = vst [vmem:[#allocation90_spill] sm:$0xff] %v8974_v37  ;;  %10918 = vst [vmem:[#allocation91_spill] sm:$0xff] %v8980_v25  ;;  %v3824_v45 = vsel %vm3823_vm4, 1, %v10895_v5  ;;  %v8987_v14 = vld [vmem:[%s9746_s8 + $0x4] ss:$16 sps:$4 sm:$0xff]  }
 0x5cf   :  { %10919 = vst [vmem:[#allocation96_spill] sm:$0xff] %v8987_v14  ;;  %3826 = vperm.xlu0 %5235, %v3824_v45   ;;  %v9005_v5 = vld [vmem:[%s9746_s8 + $0x8] ss:$16 sps:$4 sm:$0xff]  }
 0x5d0   :  { %3726 = vmatpush1.bf16.msra.mxu0 %v8974_v37  ;;  %3767 = vmatpush1.bf16.msra.mxu1 %v8980_v25  ;;  %v8993_v37 = vld [vmem:[%s9746_s8 + $0xc] ss:$16 sps:$4 sm:$0xff]   ;;  %v8999_v25 = vld [vmem:[%s9746_s8] ss:$16 sps:$4 sm:$0xff]   ;;  %10922 = vst [vmem:[#allocation129_spill] sm:$0xff] %v9005_v5 }
 0x5d1   :  { %3727 = vmatprep.subr.bf16.mxu0 %v8987_v14  ;;  %10920 = vst [vmem:[#allocation97_spill] sm:$0xff] %v8993_v37  ;;  %3768 = vmatprep.subr.bf16.mxu1 %v8993_v37  ;;  %10921 = vst [vmem:[#allocation99_spill] sm:$0xff] %v8999_v25  ;;  %v3712_v14 = vpack.c.bf16 %v8781_v40, %v8781_v40  ;;  %v10924_v45 = vld [vmem:[#allocation6_spill] sm:$0xff]  ;;  %v10925_v37 = vld [vmem:[#allocation7_spill] sm:$0xff] }
 0x5d2   :  { %v10932_v40 = vld [vmem:[#allocation14_spill] sm:$0xff] }
 0x5d4   :  { %3728 = vmatpush1.bf16.msra.mxu0 %v8999_v25  ;;  %3769 = vmatpush1.bf16.msra.mxu1 %v9005_v5  ;;  %v10927_v25 = vld [vmem:[#allocation9_spill] sm:$0xff]  ;;  %v10930_v5 = vld [vmem:[#allocation12_spill] sm:$0xff] }
 0x5d5   :  { %3840 = vmatprep.subr.bf16.mxu0 %v10923_v59  ;;  %3881 = vmatprep.subr.bf16.mxu1 %v10924_v45  ;;  %v10933_v59 = vld [vmem:[#allocation15_spill] sm:$0xff]  ;;  %v10934_v45 = vld [vmem:[#allocation16_spill] sm:$0xff] }
 0x5d7   :  { %3746 = vmatmul.mubr.bf16.vlgmr.msra.gmra.mxu0 %v3712_v14  ;;  %3787 = vmatmul.mubr.bf16.vlgmr.msra.gmra.mxu1 %v3712_v14  ;;  %v10935_v14 = vld [vmem:[#allocation17_spill] sm:$0xff] }
 0x5d8   :  { %3841 = vmatpush1.bf16.msra.mxu0 %v10925_v37  ;;  %3882 = vmatpush1.bf16.msra.mxu1 %v10926_v28  ;;  %v10936_v37 = vld [vmem:[#allocation18_spill] sm:$0xff]  ;;  %v10937_v28 = vld [vmem:[#allocation19_spill] sm:$0xff] }
 0x5d9   :  { %3842 = vmatprep.subr.bf16.mxu0 %v10927_v25  ;;  %3883 = vmatprep.subr.bf16.mxu1 %v10928_v8  ;;  %v10938_v25 = vld [vmem:[#allocation20_spill] sm:$0xff]  ;;  %v10939_v8 = vld [vmem:[#allocation21_spill] sm:$0xff] }
 0x5dc   :  { %3843 = vmatpush1.bf16.msra.mxu0 %v10929_v18  ;;  %3884 = vmatpush1.bf16.msra.mxu1 %v10930_v5  ;;  %v10940_v18 = vld [vmem:[#allocation22_spill] sm:$0xff]  ;;  %v10941_v5 = vld [vmem:[#allocation23_spill] sm:$0xff] }
 0x5dd   :  { %3844 = vmatprep.subr.bf16.mxu0 %v10931_v23  ;;  %3885 = vmatprep.subr.bf16.mxu1 %v10932_v40  ;;  %v10942_v23 = vld [vmem:[#allocation24_spill] sm:$0xff]  ;;  %v10943_v40 = vld [vmem:[#allocation25_spill] sm:$0xff] }
 0x5e0   :  { %3845 = vmatpush1.bf16.msra.mxu0 %v10933_v59  ;;  %3886 = vmatpush1.bf16.msra.mxu1 %v10934_v45  ;;  %v10944_v59 = vld [vmem:[#allocation26_spill] sm:$0xff]  ;;  %v10945_v45 = vld [vmem:[#allocation27_spill] sm:$0xff] }
 0x5e1   :  { %3846 = vmatprep.subr.bf16.mxu0 %v10935_v14  ;;  %3887 = vmatprep.subr.bf16.mxu1 %v10936_v37  ;;  %v10946_v14 = vld [vmem:[#allocation28_spill] sm:$0xff]  ;;  %v10947_v37 = vld [vmem:[#allocation29_spill] sm:$0xff] }
 0x5e4   :  { %3847 = vmatpush1.bf16.msra.mxu0 %v10937_v28  ;;  %3888 = vmatpush1.bf16.msra.mxu1 %v10938_v25  ;;  %v10948_v28 = vld [vmem:[#allocation30_spill] sm:$0xff]  ;;  %v10949_v25 = vld [vmem:[#allocation31_spill] sm:$0xff] }
 0x5e5   :  { %3848 = vmatprep.subr.bf16.mxu0 %v10939_v8  ;;  %3889 = vmatprep.subr.bf16.mxu1 %v10940_v18  ;;  %v10950_v8 = vld [vmem:[#allocation32_spill] sm:$0xff]  ;;  %v10951_v18 = vld [vmem:[#allocation33_spill] sm:$0xff] }
 0x5e8   :  { %3849 = vmatpush1.bf16.msra.mxu0 %v10941_v5  ;;  %3890 = vmatpush1.bf16.msra.mxu1 %v10942_v23  ;;  %v10952_v5 = vld [vmem:[#allocation34_spill] sm:$0xff]  ;;  %v10953_v23 = vld [vmem:[#allocation35_spill] sm:$0xff] }
 0x5e9   :  { %3850 = vmatprep.subr.bf16.mxu0 %v10943_v40  ;;  %3891 = vmatprep.subr.bf16.mxu1 %v10944_v59  ;;  %v10954_v40 = vld [vmem:[#allocation36_spill] sm:$0xff]  ;;  %v10955_v59 = vld [vmem:[#allocation37_spill] sm:$0xff] }
 0x5ec   :  { %3851 = vmatpush1.bf16.msra.mxu0 %v10945_v45  ;;  %3892 = vmatpush1.bf16.msra.mxu1 %v10946_v14  ;;  %v10956_v45 = vld [vmem:[#allocation38_spill] sm:$0xff]  ;;  %v10957_v14 = vld [vmem:[#allocation39_spill] sm:$0xff] }
 0x5ed   :  { %3852 = vmatprep.subr.bf16.mxu0 %v10947_v37  ;;  %3893 = vmatprep.subr.bf16.mxu1 %v10948_v28  ;;  %v10958_v37 = vld [vmem:[#allocation40_spill] sm:$0xff]  ;;  %v10959_v28 = vld [vmem:[#allocation41_spill] sm:$0xff] }
 0x5f0   :  { %3853 = vmatpush1.bf16.msra.mxu0 %v10949_v25  ;;  %3894 = vmatpush1.bf16.msra.mxu1 %v10950_v8  ;;  %v10960_v25 = vld [vmem:[#allocation42_spill] sm:$0xff]  ;;  %v10961_v8 = vld [vmem:[#allocation43_spill] sm:$0xff] }
 0x5f1   :  { %3854 = vmatprep.subr.bf16.mxu0 %v10951_v18  ;;  %3895 = vmatprep.subr.bf16.mxu1 %v10952_v5  ;;  %v10962_v18 = vld [vmem:[#allocation44_spill] sm:$0xff]  ;;  %v10963_v5 = vld [vmem:[#allocation45_spill] sm:$0xff] }
 0x5f4   :  { %3855 = vmatpush1.bf16.msra.mxu0 %v10953_v23  ;;  %3896 = vmatpush1.bf16.msra.mxu1 %v10954_v40  ;;  %v10964_v23 = vld [vmem:[#allocation46_spill] sm:$0xff]  ;;  %v10965_v40 = vld [vmem:[#allocation47_spill] sm:$0xff] }
 0x5f5   :  { %3856 = vmatprep.subr.bf16.mxu0 %v10955_v59  ;;  %3897 = vmatprep.subr.bf16.mxu1 %v10956_v45  ;;  %v10966_v59 = vld [vmem:[#allocation48_spill] sm:$0xff]  ;;  %v10967_v45 = vld [vmem:[#allocation49_spill] sm:$0xff] }
 0x5f8   :  { %3857 = vmatpush2.bf16.msra.mxu0 %v10957_v14  ;;  %3898 = vmatpush2.bf16.msra.mxu1 %v10958_v37  ;;  %v10968_v14 = vld [vmem:[#allocation50_spill] sm:$0xff]  ;;  %v10969_v37 = vld [vmem:[#allocation51_spill] sm:$0xff] }
 0x5f9   :  { %3858 = vmatprep.subr.bf16.mxu0 %v10959_v28  ;;  %3899 = vmatprep.subr.bf16.mxu1 %v10960_v25  ;;  %v10970_v28 = vld [vmem:[#allocation52_spill] sm:$0xff]  ;;  %v10971_v25 = vld [vmem:[#allocation53_spill] sm:$0xff] }
 0x5fc   :  { %3859 = vmatpush2.bf16.msra.mxu0 %v10961_v8  ;;  %3900 = vmatpush2.bf16.msra.mxu1 %v10962_v18  ;;  %v10972_v8 = vld [vmem:[#allocation54_spill] sm:$0xff]  ;;  %v10973_v18 = vld [vmem:[#allocation55_spill] sm:$0xff] }
 0x5fd   :  { %3860 = vmatprep.subr.bf16.mxu0 %v10963_v5  ;;  %3901 = vmatprep.subr.bf16.mxu1 %v10964_v23  ;;  %v10974_v5 = vld [vmem:[#allocation56_spill] sm:$0xff]  ;;  %v10975_v23 = vld [vmem:[#allocation57_spill] sm:$0xff] }
 0x600   :  { %3861 = vmatpush2.bf16.msra.mxu0 %v10965_v40  ;;  %3902 = vmatpush2.bf16.msra.mxu1 %v10966_v59  ;;  %v10976_v40 = vld [vmem:[#allocation58_spill] sm:$0xff]  ;;  %v10977_v59 = vld [vmem:[#allocation59_spill] sm:$0xff] }
 0x601   :  { %3862 = vmatprep.subr.bf16.mxu0 %v10967_v45  ;;  %3903 = vmatprep.subr.bf16.mxu1 %v10968_v14  ;;  %v10978_v45 = vld [vmem:[#allocation60_spill] sm:$0xff]  ;;  %v10979_v14 = vld [vmem:[#allocation61_spill] sm:$0xff] }
 0x604   :  { %3863 = vmatpush2.bf16.msra.mxu0 %v10969_v37  ;;  %3904 = vmatpush2.bf16.msra.mxu1 %v10970_v28  ;;  %v10980_v37 = vld [vmem:[#allocation62_spill] sm:$0xff]  ;;  %v10981_v28 = vld [vmem:[#allocation63_spill] sm:$0xff] }
 0x605   :  { %3864 = vmatprep.subr.bf16.mxu0 %v10971_v25  ;;  %3905 = vmatprep.subr.bf16.mxu1 %v10972_v8  ;;  %v10982_v25 = vld [vmem:[#allocation64_spill] sm:$0xff]  ;;  %v10983_v8 = vld [vmem:[#allocation65_spill] sm:$0xff] }
 0x608   :  { %3865 = vmatpush2.bf16.msra.mxu0 %v10973_v18  ;;  %3906 = vmatpush2.bf16.msra.mxu1 %v10974_v5  ;;  %v10984_v18 = vld [vmem:[#allocation66_spill] sm:$0xff]  ;;  %v10985_v5 = vld [vmem:[#allocation67_spill] sm:$0xff] }
 0x609   :  { %3866 = vmatprep.subr.bf16.mxu0 %v10975_v23  ;;  %3907 = vmatprep.subr.bf16.mxu1 %v10976_v40  ;;  %v10986_v23 = vld [vmem:[#allocation68_spill] sm:$0xff]  ;;  %v10987_v40 = vld [vmem:[#allocation69_spill] sm:$0xff] }
 0x60c   :  { %3867 = vmatpush2.bf16.msra.mxu0 %v10977_v59  ;;  %3908 = vmatpush2.bf16.msra.mxu1 %v10978_v45  ;;  %v10988_v59 = vld [vmem:[#allocation70_spill] sm:$0xff] }
 0x60d   :  { %3868 = vmatprep.subr.bf16.mxu0 %v10979_v14  ;;  %3909 = vmatprep.subr.bf16.mxu1 %v10980_v37 }
 0x610   :  { %3869 = vmatpush2.bf16.msra.mxu0 %v10981_v28  ;;  %3910 = vmatpush2.bf16.msra.mxu1 %v10982_v25 }
 0x611   :  { %3870 = vmatprep.subr.bf16.mxu0 %v10983_v8  ;;  %3911 = vmatprep.subr.bf16.mxu1 %v10984_v18 }
 0x614   :  { %3871 = vmatpush2.bf16.msra.mxu0 %v10985_v5  ;;  %3912 = vmatpush2.bf16.msra.mxu1 %v10986_v23  ;;  %v10992_v23 = vld [vmem:[#allocation156_spill] sm:$0xff] }
 0x615   :  { %3922 = vmatprep.subr.bf16.mxu0 %v10987_v40  ;;  %3963 = vmatprep.subr.bf16.mxu1 %v10988_v59 }
 0x637   :  { %v3514_v45 = vpop.f32.mrf.mxu0  ;;  %v3555_v14 = vpop.f32.mrf.mxu1 }
 0x638   :  { %v3644_v8 = vadd.f32 %v3514_v45, %v10989_v20  ;;  %v3646_v18 = vadd.f32 %v3555_v14, %v10990_v38 }
 0x639   :  { %v3516_v0 = vpop.f32.mrf.mxu0  ;;  %v3557_v37 = vpop.f32.mrf.mxu1 }
 0x63a   :  { %v3645_v5 = vadd.f32 %v3516_v0, %v10991_v49  ;;  %v5109_v16 = vmul.f32 -1.442695, %v3644_v8  ;;  %v3647_v21 = vadd.f32 %v3557_v37, %v10992_v23  ;;  %v5111_v40 = vmul.f32 -1.442695, %v3646_v18  ;;  %v10993_v23 = vld [vmem:[#allocation208_spill] sm:$0xff]  ;;  %v10995_v0 = vld [vmem:[#allocation210_spill] sm:$0xff] }
 0x63b   :  { %v3518_v43 = vpop.f32.mrf.mxu0  ;;  %v3559_v28 = vpop.f32.mrf.mxu1 }
 0x63c   :  { %v5110_v30 = vmul.f32 -1.442695, %v3645_v5  ;;  %5477 = vpow2.f32 %v5109_v16  ;;  %v5112_v59 = vmul.f32 -1.442695, %v3647_v21  ;;  %v10994_v5 = vld [vmem:[#allocation209_spill] sm:$0xff] }
 0x63d   :  { %v3519_v42 = vpop.f32.mrf.mxu0  ;;  %v3560_v25 = vpop.f32.mrf.mxu1  ;;  %5479 = vpow2.f32 %v5111_v40  ;;  %v10996_v40 = vld [vmem:[#allocation211_spill] sm:$0xff] }
 0x63e   :  { %5481 = vpow2.f32 %v5110_v30 }
 0x63f   :  { %5483 = vpow2.f32 %v5112_v59 }
 0x649   :  { %v5478_v43 = vpop.eup %5477 }
 0x64a   :  { %v5480_v28 = vpop.eup %5479  ;;  %v3670_v25 = vadd.f32 1.0, %v5478_v43 }
 0x64b   :  { %v5482_v42 = vpop.eup %5481  ;;  %v3672_v20 = vadd.f32 1.0, %v5480_v28 }
 0x64c   :  { %v5484_v3 = vpop.eup %5483  ;;  %v3671_v45 = vadd.f32 1.0, %v5482_v42  ;;  %5485 = vrcp.f32 %v3670_v25 }
 0x64d   :  { %v3673_v38 = vadd.f32 1.0, %v5484_v3  ;;  %5487 = vrcp.f32 %v3672_v20 }
 0x64e   :  { %5489 = vrcp.f32 %v3671_v45 }
 0x659   :  { %v5486_v20 = vpop.eup %5485 }
 0x677   :  { %v3596_v49 = vpop.f32.mrf.mxu0  ;;  %v3637_v8 = vpop.f32.mrf.mxu1 }
 0x678   :  { %v3648_v37 = vadd.f32 %v3596_v49, %v10993_v23  ;;  %v3650_v16 = vadd.f32 %v3637_v8, %v10994_v5  ;;  %v5488_v49 = vpop.eup %5487 }
 0x679   :  { %v3598_v21 = vpop.f32.mrf.mxu0  ;;  %v3639_v30 = vpop.f32.mrf.mxu1 }
 0x67a   :  { %v5113_v59 = vmul.f32 -1.442695, %v3648_v37  ;;  %5491 = vtanh.f32 %v3650_v16  ;;  %v3649_v18 = vadd.f32 %v3598_v21, %v10995_v0  ;;  %v3651_v14 = vadd.f32 %v3639_v30, %v10996_v40  ;;  %v5490_v45 = vpop.eup %5489 }
 0x67b   :  { %5493 = vrcp.f32 %v3673_v38  ;;  %v3600_v43 = vpop.f32.mrf.mxu0  ;;  %v3641_v28 = vpop.f32.mrf.mxu1  ;;  %v3690_v37 = vmul.f32 %v5488_v49, %v8706_v15 }
 0x67c   :  { %5495 = vpow2.f32 %v5113_v59  ;;  %v5114_v3 = vmul.f32 -1.442695, %v3649_v18  ;;  %v10998_v28 = vld [vmem:[#allocation236_spill] sm:$0xff] }
 0x67d   :  { %5497 = vtanh.f32 %v3651_v14  ;;  %v3601_v42 = vpop.f32.mrf.mxu0  ;;  %v3642_v25 = vpop.f32.mrf.mxu1 }
 0x67e   :  { %5499 = vpow2.f32 %v5114_v3  ;;  %v10999_v42 = vld [vmem:[#allocation237_spill] sm:$0xff] }
 0x687   :  { %v5492_v8 = vpop.eup %5491 }
 0x688   :  { %v5494_v23 = vpop.eup %5493  ;;  %v3692_v5 = vmul.f32 %v5492_v8, %v5486_v20 }
 0x689   :  { %v5496_v16 = vpop.eup %5495  ;;  %v3691_v59 = vmul.f32 %v5494_v23, %v8710_v34 }
 0x68a   :  { %v5498_v21 = vpop.eup %5497  ;;  %v3674_v30 = vadd.f32 1.0, %v5496_v16  ;;  %v9085_v38 = vadd.f32 %v3692_v5, %v3690_v37  ;;  %v11001_v37 = vld [vmem:[#allocation238_spill] sm:$0xff]  ;;  %v11002_v16 = vld [vmem:[#allocation239_spill] sm:$0xff] }
 0x68b   :  { %v5500_v0 = vpop.eup %5499  ;;  %v3693_v18 = vmul.f32 %v5498_v21, %v5490_v45  ;;  %v11000_v45 = vld [vmem:[#allocation107_spill] sm:$0xff] }
 0x68c   :  { %5501 = vrcp.f32 %v3674_v30  ;;  %v3675_v40 = vadd.f32 1.0, %v5500_v0  ;;  %vm3705_vm5 = vcmp.eq.s32.totalorder %v11000_v45, 1 }
 0x68d   :  { %5503 = vtanh.f32 %v9085_v38  ;;  %v9089_v14 = vadd.f32 %v3693_v18, %v3691_v59 }
 0x68e   :  { %5505 = vrcp.f32 %v3675_v40 }
 0x68f   :  { %10997 = vst [vmem:[#allocation130_spill] sm:$0xff] %v9089_v14  ;;  %5507 = vtanh.f32 %v9089_v14 }
 0x697   :  { %v3747_v15 = vpop.f32.mrf.mxu0  ;;  %v3788_v43 = vpop.f32.mrf.mxu1 }
 0x698   :  { %v3795_v3 = vadd.f32 %v3747_v15, %v10998_v28  ;;  %v3797_v25 = vadd.f32 %v3788_v43, %v10999_v42 }
 0x699   :  { %v5502_v20 = vpop.eup %5501  ;;  %v3749_v49 = vpop.f32.mrf.mxu0 }
 0x69a   :  { %v3790_v8 = vpop.f32.mrf.mxu1  ;;  %v5504_v34 = vpop.eup %5503  ;;  %v5115_v23 = vmul.f32 -1.442695, %v3795_v3  ;;  %v3796_v5 = vadd.f32 %v3749_v49, %v11001_v37 }
 0x69b   :  { %v3798_v21 = vadd.f32 %v3790_v8, %v11002_v16  ;;  %v5506_v30 = vpop.eup %5505  ;;  %v3751_v0 = vpop.f32.mrf.mxu0  ;;  %v3698_v18 = vmul.f32 %v5504_v34, %v5502_v20 }
 0x69c   :  { %v3792_v59 = vpop.f32.mrf.mxu1  ;;  %v5508_v40 = vpop.eup %5507  ;;  %5509 = vpow2.f32 %v5115_v23  ;;  %v5116_v15 = vmul.f32 -1.442695, %v3796_v5 }
 0x69d   :  { %v3752_v28 = vpop.f32.mrf.mxu0  ;;  %v3699_v42 = vmul.f32 %v5508_v40, %v5506_v30  ;;  %v9100_v14 = vsel %vm3705_vm5, %v3698_v18, %v8718_v36  ;;  %v9107_v8 = vpack.c.bf16 %v3698_v18, %v3698_v18  ;;  %v5117_v36 = vmul.f32 -1.442695, %v3797_v25  ;;  %v11004_v59 = vld [vmem:[#allocation114_spill] sm:$0xff]  ;;  %v3827_v18 = vpop.permute.xlu0 %3826  ;;  %v11005_v40 = vld [vmem:[#allocation115_spill] sm:$0xff] }
 0x69e   :  { %v3793_v43 = vpop.f32.mrf.mxu1  ;;  %5511 = vpow2.f32 %v5116_v15  ;;  %v11006_v15 = vld [vmem:[#allocation116_spill] sm:$0xff]  ;;  %vm3828_vm6 = vcmp.eq.s32.totalorder %v3827_v18, 1  ;;  %v11020_v18 = vld [vmem:[#allocation138_spill] sm:$0xff] }
 0x69f   :  { %v3839_v3 = vpack.c.bf16 %v3699_v42, %v3699_v42  ;;  %v9105_v49 = vsel %vm3705_vm5, %v3699_v42, %v8721_v2  ;;  %5513 = vpow2.f32 %v5117_v36  ;;  %v11007_v43 = vld [vmem:[#allocation117_spill] sm:$0xff]  ;;  %v11008_v42 = vld [vmem:[#allocation118_spill] sm:$0xff] }
 0x6a0   :  { %5515 = vtanh.f32 %v3798_v21 }
 0x6a1   :  { %3872 = vmatprep.mubr.bf16.mxu0 %v3839_v3  ;;  %3913 = vmatprep.mubr.bf16.mxu1 %v3839_v3 }
 0x6a2   :  { %3873 = vmatmul.mubr.bf16.vlgmr.msra.gmra.mxu0 %v9107_v8  ;;  %3914 = vmatmul.mubr.bf16.vlgmr.msra.gmra.mxu1 %v9107_v8 }
 0x6a3   :  { %3923 = vmatpush1.bf16.msra.mxu0 %v10426_v12  ;;  %3964 = vmatpush1.bf16.msra.mxu1 %v10427_v63 }
 0x6a4   :  { %3954 = vmatprep.mubr.bf16.mxu0 %v3839_v3  ;;  %3995 = vmatprep.mubr.bf16.mxu1 %v3839_v3 }
 0x6a5   :  { %3924 = vmatprep.subr.bf16.mxu0 %v10428_v6  ;;  %3965 = vmatprep.subr.bf16.mxu1 %v10429_v26 }
 0x6a7   :  { %3925 = vmatpush1.bf16.msra.mxu0 %v10430_v10  ;;  %3966 = vmatpush1.bf16.msra.mxu1 %v10431_v35 }
 0x6a8   :  { %3926 = vmatprep.subr.bf16.mxu0 %v10432_v24  ;;  %3967 = vmatprep.subr.bf16.mxu1 %v10433_v1 }
 0x6a9   :  { %v5510_v2 = vpop.eup %5509 }
 0x6aa   :  { %v3808_v20 = vadd.f32 1.0, %v5510_v2  ;;  %v11009_v2 = vld [vmem:[#allocation123_spill] sm:$0xff] }
 0x6ab   :  { %v5512_v34 = vpop.eup %5511  ;;  %3927 = vmatpush1.bf16.msra.mxu0 %v10434_v57  ;;  %3968 = vmatpush1.bf16.msra.mxu1 %v10435_v41 }
 0x6ac   :  { %5517 = vrcp.f32 %v3808_v20  ;;  %v3809_v45 = vadd.f32 1.0, %v5512_v34  ;;  %3928 = vmatprep.subr.bf16.mxu0 %v10436_v11  ;;  %3969 = vmatprep.subr.bf16.mxu1 %v10437_v22  ;;  %v5514_v25 = vpop.eup %5513  ;;  %v11010_v20 = vld [vmem:[#allocation124_spill] sm:$0xff]  ;;  %v11011_v34 = vld [vmem:[#allocation187_spill] sm:$0xff] }
 0x6ad   :  { %v5516_v23 = vpop.eup %5515  ;;  %v3810_v21 = vadd.f32 1.0, %v5514_v25  ;;  %v11013_v25 = vld [vmem:[#allocation125_spill] sm:$0xff] }
 0x6ae   :  { %5519 = vrcp.f32 %v3809_v45 }
 0x6af   :  { %3929 = vmatpush1.bf16.msra.mxu0 %v10572_v55  ;;  %3970 = vmatpush1.bf16.msra.mxu1 %v10573_v54  ;;  %5521 = vrcp.f32 %v3810_v21  ;;  %v11018_v21 = vld [vmem:[#allocation134_spill] sm:$0xff] }
 0x6b0   :  { %3930 = vmatprep.subr.bf16.mxu0 %v10574_v47  ;;  %3971 = vmatprep.subr.bf16.mxu1 %v10575_v51 }
 0x6b3   :  { %3931 = vmatpush1.bf16.msra.mxu0 %v10576_v46  ;;  %3972 = vmatpush1.bf16.msra.mxu1 %v10577_v52 }
 0x6b4   :  { %3932 = vmatprep.subr.bf16.mxu0 %v10578_v61  ;;  %3973 = vmatprep.subr.bf16.mxu1 %v10579_v29 }
 0x6b7   :  { %3933 = vmatpush1.bf16.msra.mxu0 %v10580_v60  ;;  %3974 = vmatpush1.bf16.msra.mxu1 %v10715_v9 }
 0x6b8   :  { %3934 = vmatprep.subr.bf16.mxu0 %v10716_v33  ;;  %3975 = vmatprep.subr.bf16.mxu1 %v10717_v56 }
 0x6b9   :  { %v5518_v37 = vpop.eup %5517 }
 0x6ba   :  { %v3819_v5 = vmul.f32 %v5518_v37, %v5516_v23  ;;  %v11014_v23 = vld [vmem:[#allocation126_spill] sm:$0xff]  ;;  %v11015_v37 = vld [vmem:[#allocation131_spill] sm:$0xff] }
 0x6bb   :  { %v5520_v16 = vpop.eup %5519  ;;  %3935 = vmatpush1.bf16.msra.mxu0 %v10450_v50  ;;  %3976 = vmatpush1.bf16.msra.mxu1 %v10584_v58 }
 0x6bc   :  { %v3818_v30 = vmul.f32 %v5520_v16, %v8758_v32  ;;  %3936 = vmatprep.subr.bf16.mxu0 %v10585_v48  ;;  %3977 = vmatprep.subr.bf16.mxu1 %v10453_v44  ;;  %v11003_v32 = vld [vmem:[#allocation113_spill] sm:$0xff]  ;;  %v5522_v28 = vpop.eup %5521 }
 0x6bd   :  { %v11017_v16 = vld [vmem:[#allocation133_spill] sm:$0xff] }
 0x6be   :  { %v9140_v0 = vadd.f32 %v3819_v5, %v3818_v30  ;;  %v11016_v5 = vld [vmem:[#allocation132_spill] sm:$0xff]  ;;  %v11019_v30 = vld [vmem:[#allocation137_spill] sm:$0xff] }
 0x6bf   :  { %3937 = vmatpush1.bf16.msra.mxu0 %v10586_v7  ;;  %3978 = vmatpush1.bf16.msra.mxu1 %v10718_v31 }
 0x6c0   :  { %5523 = vtanh.f32 %v9140_v0  ;;  %3938 = vmatprep.subr.bf16.mxu0 %v10719_v19  ;;  %3979 = vmatprep.subr.bf16.mxu1 %v10720_v62 }
 0x6c3   :  { %3939 = vmatpush2.bf16.msra.mxu0 %v10721_v27  ;;  %3980 = vmatpush2.bf16.msra.mxu1 %v10722_v13 }
 0x6c4   :  { %3940 = vmatprep.subr.bf16.mxu0 %v10460_v17  ;;  %3981 = vmatprep.subr.bf16.mxu1 %v10723_v53 }
 0x6c7   :  { %3941 = vmatpush2.bf16.msra.mxu0 %v10861_v4  ;;  %3982 = vmatpush2.bf16.msra.mxu1 %v10862_v39 }
 0x6c8   :  { %3942 = vmatprep.subr.bf16.mxu0 %v11003_v32  ;;  %3983 = vmatprep.subr.bf16.mxu1 %v11004_v59 }
 0x6cb   :  { %3943 = vmatpush2.bf16.msra.mxu0 %v11005_v40  ;;  %3984 = vmatpush2.bf16.msra.mxu1 %v11006_v15  ;;  %v11134_v15 = vld [vmem:[#allocation164_spill] sm:$0xff] }
 0x6cc   :  { %3944 = vmatprep.subr.bf16.mxu0 %v11007_v43  ;;  %3985 = vmatprep.subr.bf16.mxu1 %v11008_v42 }
 0x6cd   :  { %v5524_v3 = vpop.eup %5523 }
 0x6ce   :  { %v3822_v36 = vmul.f32 %v5524_v3, %v5522_v28  ;;  %v11021_v28 = vld [vmem:[#allocation139_spill] sm:$0xff]  ;;  %v11022_v3 = vld [vmem:[#allocation140_spill] sm:$0xff] }
 0x6cf   :  { %3945 = vmatpush2.bf16.msra.mxu0 %v11009_v2  ;;  %3986 = vmatpush2.bf16.msra.mxu1 %v11010_v20  ;;  %v11129_v20 = vld [vmem:[#allocation127_spill] sm:$0xff] }
 0x6d0   :  { %v9162_v45 = vsel %vm3828_vm6, %v3822_v36, %v11011_v34  ;;  %3946 = vmatprep.subr.bf16.mxu0 %v11013_v25  ;;  %3987 = vmatprep.subr.bf16.mxu1 %v11014_v23  ;;  %v11023_v34 = vld [vmem:[#allocation145_spill] sm:$0xff]  ;;  %v11024_v25 = vld [vmem:[#allocation146_spill] sm:$0xff]  ;;  %v11025_v23 = vld [vmem:[#allocation147_spill] sm:$0xff] }
 0x6d1   :  { %11012 = vst [vmem:[#allocation135_spill] sm:$0xff] %v9162_v45 }
 0x6d3   :  { %3947 = vmatpush2.bf16.msra.mxu0 %v11015_v37  ;;  %3988 = vmatpush2.bf16.msra.mxu1 %v11016_v5  ;;  %v11026_v37 = vld [vmem:[#allocation148_spill] sm:$0xff]  ;;  %v11027_v5 = vld [vmem:[#allocation151_spill] sm:$0xff] }
 0x6d4   :  { %3948 = vmatprep.subr.bf16.mxu0 %v11017_v16  ;;  %3989 = vmatprep.subr.bf16.mxu1 %v11018_v21  ;;  %v11028_v16 = vld [vmem:[#allocation152_spill] sm:$0xff] }
 0x6d5   :  { %v11029_v21 = vld [vmem:[#allocation188_spill] sm:$0xff] }
 0x6d7   :  { %3949 = vmatpush2.bf16.msra.mxu0 %v11019_v30  ;;  %3990 = vmatpush2.bf16.msra.mxu1 %v11020_v18  ;;  %v11030_v30 = vld [vmem:[#allocation189_spill] sm:$0xff]  ;;  %v11046_v18 = vld [vmem:[#allocation224_spill] sm:$0xff] }
 0x6d8   :  { %3950 = vmatprep.subr.bf16.mxu0 %v11021_v28  ;;  %3991 = vmatprep.subr.bf16.mxu1 %v11022_v3  ;;  %v11031_v3 = vld [vmem:[#allocation190_spill] sm:$0xff]  ;;  %v11045_v28 = vld [vmem:[#allocation197_spill] sm:$0xff] }
 0x6db   :  { %3951 = vmatpush2.bf16.msra.mxu0 %v11023_v34  ;;  %3992 = vmatpush2.bf16.msra.mxu1 %v11024_v25  ;;  %v11032_v34 = vld [vmem:[#allocation191_spill] sm:$0xff]  ;;  %v11033_v25 = vld [vmem:[#allocation192_spill] sm:$0xff] }
 0x6dc   :  { %3952 = vmatprep.subr.bf16.mxu0 %v11025_v23  ;;  %3993 = vmatprep.subr.bf16.mxu1 %v11026_v37  ;;  %v11034_v23 = vld [vmem:[#allocation193_spill] sm:$0xff]  ;;  %v11035_v37 = vmov 0  }
 0x6df   :  { %3953 = vmatpush2.bf16.msra.mxu0 %v11027_v5  ;;  %3994 = vmatpush2.bf16.msra.mxu1 %v11028_v16  ;;  %v11036_v16 = vld [vmem:[#allocation194_spill] sm:$0xff]  ;;  %v11039_v5 = vld [vmem:[#allocation119_spill] sm:$0xff] }
 0x6e0   :  { %4073 = vmatprep.subr.bf16.mxu0 %v11029_v21  ;;  %4114 = vmatprep.subr.bf16.mxu1 %v11030_v30  ;;  %v11037_v21 = vld [vmem:[#allocation195_spill] sm:$0xff]  ;;  %v11038_v30 = vld [vmem:[#allocation121_spill] sm:$0xff] }
 0x6e2   :  { %3955 = vmatmul.mubr.bf16.vlgmr.msra.gmra.mxu0 %v9107_v8  ;;  %3996 = vmatmul.mubr.bf16.vlgmr.msra.gmra.mxu1 %v9107_v8  ;;  %v11040_v8 = vld [vmem:[#allocation120_spill] sm:$0xff] }
 0x6e3   :  { %4074 = vmatpush1.bf16.msra.mxu0 %v11031_v3  ;;  %4115 = vmatpush1.bf16.msra.mxu1 %v11032_v34  ;;  %v11041_v3 = vld [vmem:[#allocation122_spill] sm:$0xff] }
 0x6e4   :  { %4075 = vmatprep.subr.bf16.mxu0 %v11033_v25  ;;  %4116 = vmatprep.subr.bf16.mxu1 %v11034_v23  ;;  %v11042_v34 = vld [vmem:[#allocation198_spill] sm:$0xff]  ;;  %v11043_v25 = vld [vmem:[#allocation199_spill] sm:$0xff]  ;;  %v11044_v23 = vld [vmem:[#allocation196_spill] sm:$0xff] }
 0x6e5   :  { %4105 = vmatprep.mubr.bf16.mxu0 %v11035_v37  ;;  %4146 = vmatprep.mubr.bf16.mxu1 %v11035_v37 }
 0x6e7   :  { %4076 = vmatpush1.bf16.msra.mxu0 %v11036_v16  ;;  %4117 = vmatpush1.bf16.msra.mxu1 %v11037_v21  ;;  %v11047_v16 = vld [vmem:[#allocation225_spill] sm:$0xff]  ;;  %v11048_v21 = vld [vmem:[#allocation226_spill] sm:$0xff] }
 0x6e8   :  { %4077 = vmatprep.subr.bf16.mxu0 %v11038_v30  ;;  %4118 = vmatprep.subr.bf16.mxu1 %v11039_v5  ;;  %v11049_v30 = vld [vmem:[#allocation227_spill] sm:$0xff] }
 0x6e9   :  { %v11050_v5 = vld [vmem:[#allocation83_spill] sm:$0xff] }
 0x6eb   :  { %4078 = vmatpush1.bf16.msra.mxu0 %v11040_v8  ;;  %4119 = vmatpush1.bf16.msra.mxu1 %v11041_v3  ;;  %v11051_v8 = vld [vmem:[#allocation84_spill] sm:$0xff]  ;;  %v11052_v3 = vld [vmem:[#allocation85_spill] sm:$0xff] }
 0x6ec   :  { %4079 = vmatprep.subr.bf16.mxu0 %v11042_v34  ;;  %4120 = vmatprep.subr.bf16.mxu1 %v11043_v25  ;;  %v11053_v34 = vld [vmem:[#allocation86_spill] sm:$0xff]  ;;  %v11054_v25 = vld [vmem:[#allocation87_spill] sm:$0xff] }
 0x6ef   :  { %4080 = vmatpush1.bf16.msra.mxu0 %v11044_v23  ;;  %4121 = vmatpush1.bf16.msra.mxu1 %v11045_v28  ;;  %v11055_v23 = vld [vmem:[#allocation88_spill] sm:$0xff]  ;;  %v11056_v28 = vld [vmem:[#allocation89_spill] sm:$0xff] }
 0x6f0   :  { %4081 = vmatprep.subr.bf16.mxu0 %v11046_v18  ;;  %4122 = vmatprep.subr.bf16.mxu1 %v11047_v16  ;;  %vm4183_vm7 = vcmp.eq.s32.totalorder %v11056_v28, 6  ;;  %v11057_v18 = vld [vmem:[#allocation90_spill] sm:$0xff]  ;;  %v11058_v16 = vld [vmem:[#allocation91_spill] sm:$0xff] }
 0x6f1   :  { %v11065_v28 = vld [vmem:[#allocation7_spill] sm:$0xff] }
 0x6f3   :  { %4082 = vmatpush1.bf16.msra.mxu0 %v11048_v21  ;;  %4123 = vmatpush1.bf16.msra.mxu1 %v11049_v30  ;;  %v4184_v21 = vsel %vm4183_vm7, 1, %v11035_v37  ;;  %v11059_v30 = vld [vmem:[#allocation96_spill] sm:$0xff]  ;;  %v11067_v37 = vld [vmem:[#allocation9_spill] sm:$0xff] }
 0x6f4   :  { %4083 = vmatprep.subr.bf16.mxu0 %v11050_v5  ;;  %4124 = vmatprep.subr.bf16.mxu1 %v11051_v8  ;;  %v11060_v5 = vld [vmem:[#allocation97_spill] sm:$0xff]  ;;  %v11061_v8 = vld [vmem:[#allocation99_spill] sm:$0xff] }
 0x6f5   :  { %4186 = vperm.xlu1 %5236, %v4184_v21   ;;  %v11069_v21 = vld [vmem:[#allocation11_spill] sm:$0xff] }
 0x6f7   :  { %4084 = vmatpush1.bf16.msra.mxu0 %v11052_v3  ;;  %4125 = vmatpush1.bf16.msra.mxu1 %v11053_v34  ;;  %v11062_v3 = vld [vmem:[#allocation129_spill] sm:$0xff]  ;;  %v4072_v34 = vpack.c.bf16 %v3822_v36, %v3822_v36  ;;  %v11072_v36 = vld [vmem:[#allocation14_spill] sm:$0xff] }
 0x6f8   :  { %4085 = vmatprep.subr.bf16.mxu0 %v11054_v25  ;;  %4126 = vmatprep.subr.bf16.mxu1 %v11055_v23  ;;  %v11063_v25 = vld [vmem:[#allocation5_spill] sm:$0xff]  ;;  %v11064_v23 = vld [vmem:[#allocation6_spill] sm:$0xff] }
 0x6fb   :  { %4086 = vmatpush1.bf16.msra.mxu0 %v11057_v18  ;;  %4127 = vmatpush1.bf16.msra.mxu1 %v11058_v16  ;;  %v11066_v18 = vld [vmem:[#allocation8_spill] sm:$0xff]  ;;  %v11068_v16 = vld [vmem:[#allocation10_spill] sm:$0xff] }
 0x6fc   :  { %4087 = vmatprep.subr.bf16.mxu0 %v11059_v30  ;;  %4128 = vmatprep.subr.bf16.mxu1 %v11060_v5  ;;  %v11070_v30 = vld [vmem:[#allocation12_spill] sm:$0xff]  ;;  %v11071_v5 = vld [vmem:[#allocation13_spill] sm:$0xff] }
 0x6ff   :  { %4088 = vmatpush1.bf16.msra.mxu0 %v11061_v8  ;;  %4129 = vmatpush1.bf16.msra.mxu1 %v11062_v3  ;;  %v11073_v8 = vld [vmem:[#allocation15_spill] sm:$0xff]  ;;  %v11074_v3 = vld [vmem:[#allocation16_spill] sm:$0xff] }
 0x700   :  { %4200 = vmatprep.subr.bf16.mxu0 %v11063_v25  ;;  %4241 = vmatprep.subr.bf16.mxu1 %v11064_v23 }
 0x702   :  { %4106 = vmatmul.mubr.bf16.vlgmr.msra.gmra.mxu0 %v4072_v34  ;;  %4147 = vmatmul.mubr.bf16.vlgmr.msra.gmra.mxu1 %v4072_v34  ;;  %v11075_v34 = vld [vmem:[#allocation17_spill] sm:$0xff] }
 0x703   :  { %4201 = vmatpush1.bf16.msra.mxu0 %v11065_v28  ;;  %4242 = vmatpush1.bf16.msra.mxu1 %v11066_v18  ;;  %v11076_v28 = vld [vmem:[#allocation18_spill] sm:$0xff]  ;;  %v11077_v18 = vld [vmem:[#allocation19_spill] sm:$0xff] }
 0x704   :  { %4202 = vmatprep.subr.bf16.mxu0 %v11067_v37  ;;  %4243 = vmatprep.subr.bf16.mxu1 %v11068_v16  ;;  %v11078_v37 = vld [vmem:[#allocation20_spill] sm:$0xff]  ;;  %v11079_v16 = vld [vmem:[#allocation21_spill] sm:$0xff] }
 0x707   :  { %4203 = vmatpush1.bf16.msra.mxu0 %v11069_v21  ;;  %4244 = vmatpush1.bf16.msra.mxu1 %v11070_v30  ;;  %v11080_v21 = vld [vmem:[#allocation22_spill] sm:$0xff]  ;;  %v11081_v30 = vld [vmem:[#allocation23_spill] sm:$0xff] }
 0x708   :  { %4204 = vmatprep.subr.bf16.mxu0 %v11071_v5  ;;  %4245 = vmatprep.subr.bf16.mxu1 %v11072_v36  ;;  %v11082_v5 = vld [vmem:[#allocation24_spill] sm:$0xff]  ;;  %v11083_v36 = vld [vmem:[#allocation25_spill] sm:$0xff] }
 0x70b   :  { %4205 = vmatpush1.bf16.msra.mxu0 %v11073_v8  ;;  %4246 = vmatpush1.bf16.msra.mxu1 %v11074_v3  ;;  %v11084_v8 = vld [vmem:[#allocation26_spill] sm:$0xff]  ;;  %v11085_v3 = vld [vmem:[#allocation27_spill] sm:$0xff] }
 0x70c   :  { %4206 = vmatprep.subr.bf16.mxu0 %v11075_v34  ;;  %4247 = vmatprep.subr.bf16.mxu1 %v11076_v28  ;;  %v11086_v34 = vld [vmem:[#allocation28_spill] sm:$0xff]  ;;  %v11087_v28 = vld [vmem:[#allocation29_spill] sm:$0xff] }
 0x70f   :  { %4207 = vmatpush1.bf16.msra.mxu0 %v11077_v18  ;;  %4248 = vmatpush1.bf16.msra.mxu1 %v11078_v37  ;;  %v11088_v18 = vld [vmem:[#allocation30_spill] sm:$0xff]  ;;  %v11089_v37 = vld [vmem:[#allocation31_spill] sm:$0xff] }
 0x710   :  { %4208 = vmatprep.subr.bf16.mxu0 %v11079_v16  ;;  %4249 = vmatprep.subr.bf16.mxu1 %v11080_v21  ;;  %v11090_v16 = vld [vmem:[#allocation32_spill] sm:$0xff]  ;;  %v11091_v21 = vld [vmem:[#allocation33_spill] sm:$0xff] }
 0x713   :  { %4209 = vmatpush1.bf16.msra.mxu0 %v11081_v30  ;;  %4250 = vmatpush1.bf16.msra.mxu1 %v11082_v5  ;;  %v11092_v30 = vld [vmem:[#allocation34_spill] sm:$0xff]  ;;  %v11093_v5 = vld [vmem:[#allocation35_spill] sm:$0xff] }
 0x714   :  { %4210 = vmatprep.subr.bf16.mxu0 %v11083_v36  ;;  %4251 = vmatprep.subr.bf16.mxu1 %v11084_v8  ;;  %v11094_v36 = vld [vmem:[#allocation36_spill] sm:$0xff]  ;;  %v11095_v8 = vld [vmem:[#allocation37_spill] sm:$0xff] }
 0x717   :  { %4211 = vmatpush1.bf16.msra.mxu0 %v11085_v3  ;;  %4252 = vmatpush1.bf16.msra.mxu1 %v11086_v34  ;;  %v11096_v3 = vld [vmem:[#allocation38_spill] sm:$0xff]  ;;  %v11097_v34 = vld [vmem:[#allocation39_spill] sm:$0xff] }
 0x718   :  { %4212 = vmatprep.subr.bf16.mxu0 %v11087_v28  ;;  %4253 = vmatprep.subr.bf16.mxu1 %v11088_v18  ;;  %v11098_v28 = vld [vmem:[#allocation40_spill] sm:$0xff]  ;;  %v11099_v18 = vld [vmem:[#allocation41_spill] sm:$0xff] }
 0x71b   :  { %4213 = vmatpush1.bf16.msra.mxu0 %v11089_v37  ;;  %4254 = vmatpush1.bf16.msra.mxu1 %v11090_v16  ;;  %v11100_v37 = vld [vmem:[#allocation42_spill] sm:$0xff]  ;;  %v11101_v16 = vld [vmem:[#allocation43_spill] sm:$0xff] }
 0x71c   :  { %4214 = vmatprep.subr.bf16.mxu0 %v11091_v21  ;;  %4255 = vmatprep.subr.bf16.mxu1 %v11092_v30  ;;  %v11102_v21 = vld [vmem:[#allocation44_spill] sm:$0xff]  ;;  %v11103_v30 = vld [vmem:[#allocation45_spill] sm:$0xff] }
 0x71f   :  { %4215 = vmatpush1.bf16.msra.mxu0 %v11093_v5  ;;  %4256 = vmatpush1.bf16.msra.mxu1 %v11094_v36  ;;  %v11104_v5 = vld [vmem:[#allocation46_spill] sm:$0xff]  ;;  %v11105_v36 = vld [vmem:[#allocation47_spill] sm:$0xff] }
 0x720   :  { %4216 = vmatprep.subr.bf16.mxu0 %v11095_v8  ;;  %4257 = vmatprep.subr.bf16.mxu1 %v11096_v3  ;;  %v11106_v8 = vld [vmem:[#allocation48_spill] sm:$0xff]  ;;  %v11107_v3 = vld [vmem:[#allocation49_spill] sm:$0xff] }
 0x723   :  { %4217 = vmatpush2.bf16.msra.mxu0 %v11097_v34  ;;  %4258 = vmatpush2.bf16.msra.mxu1 %v11098_v28  ;;  %v11108_v34 = vld [vmem:[#allocation50_spill] sm:$0xff]  ;;  %v11109_v28 = vld [vmem:[#allocation51_spill] sm:$0xff] }
 0x724   :  { %4218 = vmatprep.subr.bf16.mxu0 %v11099_v18  ;;  %4259 = vmatprep.subr.bf16.mxu1 %v11100_v37  ;;  %v11110_v18 = vld [vmem:[#allocation52_spill] sm:$0xff]  ;;  %v11111_v37 = vld [vmem:[#allocation53_spill] sm:$0xff] }
 0x727   :  { %4219 = vmatpush2.bf16.msra.mxu0 %v11101_v16  ;;  %4260 = vmatpush2.bf16.msra.mxu1 %v11102_v21  ;;  %v11112_v16 = vld [vmem:[#allocation54_spill] sm:$0xff]  ;;  %v11113_v21 = vld [vmem:[#allocation55_spill] sm:$0xff] }
 0x728   :  { %4220 = vmatprep.subr.bf16.mxu0 %v11103_v30  ;;  %4261 = vmatprep.subr.bf16.mxu1 %v11104_v5  ;;  %v11114_v30 = vld [vmem:[#allocation56_spill] sm:$0xff]  ;;  %v11115_v5 = vld [vmem:[#allocation57_spill] sm:$0xff] }
 0x72b   :  { %4221 = vmatpush2.bf16.msra.mxu0 %v11105_v36  ;;  %4262 = vmatpush2.bf16.msra.mxu1 %v11106_v8  ;;  %v11116_v36 = vld [vmem:[#allocation58_spill] sm:$0xff]  ;;  %v11117_v8 = vld [vmem:[#allocation59_spill] sm:$0xff] }
 0x72c   :  { %4222 = vmatprep.subr.bf16.mxu0 %v11107_v3  ;;  %4263 = vmatprep.subr.bf16.mxu1 %v11108_v34  ;;  %v11118_v3 = vld [vmem:[#allocation60_spill] sm:$0xff]  ;;  %v11119_v34 = vld [vmem:[#allocation61_spill] sm:$0xff] }
 0x72f   :  { %4223 = vmatpush2.bf16.msra.mxu0 %v11109_v28  ;;  %4264 = vmatpush2.bf16.msra.mxu1 %v11110_v18  ;;  %v11120_v28 = vld [vmem:[#allocation62_spill] sm:$0xff]  ;;  %v11121_v18 = vld [vmem:[#allocation63_spill] sm:$0xff] }
 0x730   :  { %4224 = vmatprep.subr.bf16.mxu0 %v11111_v37  ;;  %4265 = vmatprep.subr.bf16.mxu1 %v11112_v16  ;;  %v11122_v37 = vld [vmem:[#allocation64_spill] sm:$0xff]  ;;  %v11123_v16 = vld [vmem:[#allocation65_spill] sm:$0xff] }
 0x733   :  { %4225 = vmatpush2.bf16.msra.mxu0 %v11113_v21  ;;  %4266 = vmatpush2.bf16.msra.mxu1 %v11114_v30  ;;  %v11124_v21 = vld [vmem:[#allocation66_spill] sm:$0xff]  ;;  %v11125_v30 = vld [vmem:[#allocation67_spill] sm:$0xff] }
 0x734   :  { %4226 = vmatprep.subr.bf16.mxu0 %v11115_v5  ;;  %4267 = vmatprep.subr.bf16.mxu1 %v11116_v36  ;;  %v11126_v5 = vld [vmem:[#allocation68_spill] sm:$0xff]  ;;  %v11127_v36 = vld [vmem:[#allocation69_spill] sm:$0xff] }
 0x737   :  { %4227 = vmatpush2.bf16.msra.mxu0 %v11117_v8  ;;  %4268 = vmatpush2.bf16.msra.mxu1 %v11118_v3  ;;  %v11128_v8 = vld [vmem:[#allocation70_spill] sm:$0xff] }
 0x738   :  { %4228 = vmatprep.subr.bf16.mxu0 %v11119_v34  ;;  %4269 = vmatprep.subr.bf16.mxu1 %v11120_v28 }
 0x73b   :  { %4229 = vmatpush2.bf16.msra.mxu0 %v11121_v18  ;;  %4270 = vmatpush2.bf16.msra.mxu1 %v11122_v37 }
 0x73c   :  { %4230 = vmatprep.subr.bf16.mxu0 %v11123_v16  ;;  %4271 = vmatprep.subr.bf16.mxu1 %v11124_v21  ;;  %v11130_v16 = vld [vmem:[#allocation163_spill] sm:$0xff]  ;;  %v11131_v21 = vld [vmem:[#allocation161_spill] sm:$0xff] }
 0x73d   :  { %v336_v2 = vadd.f32 %v11130_v16, %v11129_v20 }
 0x73f   :  { %4231 = vmatpush2.bf16.msra.mxu0 %v11125_v30  ;;  %4272 = vmatpush2.bf16.msra.mxu1 %v11126_v5  ;;  %v11132_v30 = vld [vmem:[#allocation162_spill] sm:$0xff]  ;;  %v11133_v5 = vld [vmem:[#allocation128_spill] sm:$0xff] }
 0x740   :  { %4282 = vmatprep.subr.bf16.mxu0 %v11127_v36  ;;  %4323 = vmatprep.subr.bf16.mxu1 %v11128_v8  ;;  %v449_v36 = vadd.f32 %v11134_v15, %v11133_v5 }
 0x762   :  { %v3874_v3 = vpop.f32.mrf.mxu0  ;;  %v3915_v34 = vpop.f32.mrf.mxu1 }
 0x763   :  { %v4004_v42 = vadd.f32 %v3874_v3, %v11131_v21  ;;  %v4006_v43 = vadd.f32 %v3915_v34, %v11132_v30 }
 0x764   :  { %v3876_v23 = vpop.f32.mrf.mxu0  ;;  %v3917_v28 = vpop.f32.mrf.mxu1 }
 0x765   :  { %v4005_v40 = vadd.f32 %v3876_v23, %v336_v2  ;;  %v5118_v8 = vmul.f32 -1.442695, %v4004_v42  ;;  %v4007_v59 = vadd.f32 %v3917_v28, %v449_v36  ;;  %v5120_v32 = vmul.f32 -1.442695, %v4006_v43  ;;  %v11135_v42 = vld [vmem:[#allocation212_spill] sm:$0xff]  ;;  %v11137_v28 = vld [vmem:[#allocation214_spill] sm:$0xff] }
 0x766   :  { %v3878_v25 = vpop.f32.mrf.mxu0  ;;  %v3919_v18 = vpop.f32.mrf.mxu1 }
 0x767   :  { %v5119_v39 = vmul.f32 -1.442695, %v4005_v40  ;;  %5525 = vpow2.f32 %v5118_v8  ;;  %v5121_v25 = vmul.f32 -1.442695, %v4007_v59  ;;  %v11136_v40 = vld [vmem:[#allocation213_spill] sm:$0xff]  ;;  %v11138_v8 = vld [vmem:[#allocation215_spill] sm:$0xff] }
 0x768   :  { %v3879_v45 = vpop.f32.mrf.mxu0  ;;  %v3920_v37 = vpop.f32.mrf.mxu1  ;;  %5527 = vpow2.f32 %v5120_v32 }
 0x769   :  { %5529 = vpow2.f32 %v5119_v39 }
 0x76a   :  { %5531 = vpow2.f32 %v5121_v25 }
 0x774   :  { %v5526_v45 = vpop.eup %5525 }
 0x775   :  { %v5528_v18 = vpop.eup %5527  ;;  %v4030_v16 = vadd.f32 1.0, %v5526_v45 }
 0x776   :  { %v5530_v37 = vpop.eup %5529  ;;  %v4032_v3 = vadd.f32 1.0, %v5528_v18 }
 0x777   :  { %v5532_v21 = vpop.eup %5531  ;;  %v4031_v30 = vadd.f32 1.0, %v5530_v37  ;;  %5533 = vrcp.f32 %v4030_v16 }
 0x778   :  { %v4033_v34 = vadd.f32 1.0, %v5532_v21  ;;  %5535 = vrcp.f32 %v4032_v3 }
 0x779   :  { %5537 = vrcp.f32 %v4031_v30 }
 0x784   :  { %v5534_v3 = vpop.eup %5533 }
 0x7a2   :  { %v3956_v15 = vpop.f32.mrf.mxu0  ;;  %v3997_v2 = vpop.f32.mrf.mxu1 }
 0x7a3   :  { %v4008_v43 = vadd.f32 %v3956_v15, %v11135_v42  ;;  %v4010_v23 = vadd.f32 %v3997_v2, %v11136_v40  ;;  %v5536_v15 = vpop.eup %5535 }
 0x7a4   :  { %v3958_v32 = vpop.f32.mrf.mxu0  ;;  %v3999_v39 = vpop.f32.mrf.mxu1 }
 0x7a5   :  { %v5122_v59 = vmul.f32 -1.442695, %v4008_v43  ;;  %5539 = vtanh.f32 %v4010_v23  ;;  %v4009_v36 = vadd.f32 %v3958_v32, %v11137_v28  ;;  %v4011_v25 = vadd.f32 %v3999_v39, %v11138_v8  ;;  %v5538_v30 = vpop.eup %5537 }
 0x7a6   :  { %5541 = vrcp.f32 %v4033_v34  ;;  %v3960_v45 = vpop.f32.mrf.mxu0  ;;  %v4001_v18 = vpop.f32.mrf.mxu1  ;;  %v4050_v43 = vmul.f32 %v5536_v15, %v9085_v38 }
 0x7a7   :  { %5543 = vpow2.f32 %v5122_v59  ;;  %v5123_v37 = vmul.f32 -1.442695, %v4009_v36  ;;  %v11139_v59 = vld [vmem:[#allocation130_spill] sm:$0xff] }
 0x7a8   :  { %5545 = vtanh.f32 %v4011_v25  ;;  %v3961_v16 = vpop.f32.mrf.mxu0  ;;  %v4002_v21 = vpop.f32.mrf.mxu1 }
 0x7a9   :  { %5547 = vpow2.f32 %v5123_v37  ;;  %v11140_v37 = vld [vmem:[#allocation240_spill] sm:$0xff]  ;;  %v11141_v21 = vld [vmem:[#allocation241_spill] sm:$0xff] }
 0x7b2   :  { %v5540_v2 = vpop.eup %5539 }
 0x7b3   :  { %v5542_v42 = vpop.eup %5541  ;;  %v4052_v40 = vmul.f32 %v5540_v2, %v5534_v3 }
 0x7b4   :  { %v5544_v23 = vpop.eup %5543  ;;  %v4051_v36 = vmul.f32 %v5542_v42, %v11139_v59 }
 0x7b5   :  { %v5546_v32 = vpop.eup %5545  ;;  %v4034_v39 = vadd.f32 1.0, %v5544_v23  ;;  %v9295_v34 = vadd.f32 %v4052_v40, %v4050_v43  ;;  %v11143_v23 = vld [vmem:[#allocation242_spill] sm:$0xff] }
 0x7b6   :  { %v5548_v28 = vpop.eup %5547  ;;  %v4053_v8 = vmul.f32 %v5546_v32, %v5538_v30  ;;  %v11142_v30 = vld [vmem:[#allocation180_spill] sm:$0xff] }
 0x7b7   :  { %5549 = vrcp.f32 %v4034_v39  ;;  %v4035_v25 = vadd.f32 1.0, %v5548_v28  ;;  %vm4065_vm8 = vcmp.eq.s32.totalorder %v11142_v30, 1  ;;  %v11144_v39 = vld [vmem:[#allocation243_spill] sm:$0xff] }
 0x7b8   :  { %5551 = vtanh.f32 %v9295_v34  ;;  %v9299_v45 = vadd.f32 %v4053_v8, %v4051_v36 }
 0x7b9   :  { %5553 = vrcp.f32 %v4035_v25 }
 0x7ba   :  { %5555 = vtanh.f32 %v9299_v45 }
 0x7c2   :  { %v4107_v38 = vpop.f32.mrf.mxu0  ;;  %v4148_v18 = vpop.f32.mrf.mxu1 }
 0x7c3   :  { %v4155_v16 = vadd.f32 %v4107_v38, %v11140_v37  ;;  %v4157_v3 = vadd.f32 %v4148_v18, %v11141_v21 }
 0x7c4   :  { %v5550_v15 = vpop.eup %5549  ;;  %v4109_v2 = vpop.f32.mrf.mxu0 }
 0x7c5   :  { %v4150_v43 = vpop.f32.mrf.mxu1  ;;  %v5552_v42 = vpop.eup %5551  ;;  %v5124_v40 = vmul.f32 -1.442695, %v4155_v16  ;;  %v4156_v32 = vadd.f32 %v4109_v2, %v11143_v23 }
 0x7c6   :  { %v4158_v28 = vadd.f32 %v4150_v43, %v11144_v39  ;;  %v5554_v59 = vpop.eup %5553  ;;  %v4111_v36 = vpop.f32.mrf.mxu0  ;;  %v4058_v25 = vmul.f32 %v5552_v42, %v5550_v15 }
 0x7c7   :  { %v4152_v8 = vpop.f32.mrf.mxu1  ;;  %v5556_v5 = vpop.eup %5555  ;;  %5557 = vpow2.f32 %v5124_v40  ;;  %v5125_v38 = vmul.f32 -1.442695, %v4156_v32  ;;  %v11146_v36 = vld [vmem:[#allocation113_spill] sm:$0xff] }
 0x7c8   :  { %v4112_v37 = vpop.f32.mrf.mxu0  ;;  %v4059_v21 = vmul.f32 %v5556_v5, %v5554_v59  ;;  %v9310_v20 = vsel %vm4065_vm8, %v4058_v25, %v9100_v14  ;;  %v9317_v43 = vpack.c.bf16 %v4058_v25, %v4058_v25  ;;  %v5126_v14 = vmul.f32 -1.442695, %v4157_v3  ;;  %v11147_v8 = vld [vmem:[#allocation114_spill] sm:$0xff]  ;;  %v4187_v25 = vpop.permute.xlu1 %4186 }
 0x7c9   :  { %v4153_v18 = vpop.f32.mrf.mxu1  ;;  %5559 = vpow2.f32 %v5125_v38  ;;  %v11148_v38 = vld [vmem:[#allocation115_spill] sm:$0xff]  ;;  %v11149_v37 = vld [vmem:[#allocation116_spill] sm:$0xff]  ;;  %vm4188_vm9 = vcmp.eq.s32.totalorder %v4187_v25, 1  ;;  %v11163_v25 = vld [vmem:[#allocation138_spill] sm:$0xff] }
 0x7ca   :  { %v4199_v16 = vpack.c.bf16 %v4059_v21, %v4059_v21  ;;  %v9315_v2 = vsel %vm4065_vm8, %v4059_v21, %v9105_v49  ;;  %5561 = vpow2.f32 %v5126_v14  ;;  %v11150_v21 = vld [vmem:[#allocation117_spill] sm:$0xff] }
 0x7cb   :  { %5563 = vtanh.f32 %v4158_v28 }
 0x7cc   :  { %4232 = vmatprep.mubr.bf16.mxu0 %v4199_v16  ;;  %4273 = vmatprep.mubr.bf16.mxu1 %v4199_v16 }
 0x7cd   :  { %4233 = vmatmul.mubr.bf16.vlgmr.msra.gmra.mxu0 %v9317_v43  ;;  %4274 = vmatmul.mubr.bf16.vlgmr.msra.gmra.mxu1 %v9317_v43 }
 0x7ce   :  { %4283 = vmatpush1.bf16.msra.mxu0 %v10426_v12  ;;  %4324 = vmatpush1.bf16.msra.mxu1 %v10427_v63 }
 0x7cf   :  { %4314 = vmatprep.mubr.bf16.mxu0 %v4199_v16  ;;  %4355 = vmatprep.mubr.bf16.mxu1 %v4199_v16  ;;  %v11151_v16 = vld [vmem:[#allocation118_spill] sm:$0xff] }
 0x7d0   :  { %4284 = vmatprep.subr.bf16.mxu0 %v10428_v6  ;;  %4325 = vmatprep.subr.bf16.mxu1 %v10429_v26 }
 0x7d2   :  { %4285 = vmatpush1.bf16.msra.mxu0 %v10430_v10  ;;  %4326 = vmatpush1.bf16.msra.mxu1 %v10431_v35 }
 0x7d3   :  { %4286 = vmatprep.subr.bf16.mxu0 %v10432_v24  ;;  %4327 = vmatprep.subr.bf16.mxu1 %v10433_v1 }
 0x7d4   :  { %v5558_v49 = vpop.eup %5557 }
 0x7d5   :  { %v4168_v5 = vadd.f32 1.0, %v5558_v49 }
 0x7d6   :  { %v5560_v15 = vpop.eup %5559  ;;  %4287 = vmatpush1.bf16.msra.mxu0 %v10434_v57  ;;  %4328 = vmatpush1.bf16.msra.mxu1 %v10435_v41 }
 0x7d7   :  { %5565 = vrcp.f32 %v4168_v5  ;;  %v4169_v42 = vadd.f32 1.0, %v5560_v15  ;;  %4288 = vmatprep.subr.bf16.mxu0 %v10436_v11  ;;  %4329 = vmatprep.subr.bf16.mxu1 %v10437_v22  ;;  %v5562_v3 = vpop.eup %5561  ;;  %v11152_v5 = vld [vmem:[#allocation123_spill] sm:$0xff]  ;;  %v11153_v15 = vld [vmem:[#allocation124_spill] sm:$0xff] }
 0x7d8   :  { %v5564_v30 = vpop.eup %5563  ;;  %v4170_v39 = vadd.f32 1.0, %v5562_v3 }
 0x7d9   :  { %5567 = vrcp.f32 %v4169_v42  ;;  %v11154_v42 = vld [vmem:[#allocation135_spill] sm:$0xff] }
 0x7da   :  { %4289 = vmatpush1.bf16.msra.mxu0 %v10572_v55  ;;  %4330 = vmatpush1.bf16.msra.mxu1 %v10573_v54  ;;  %5569 = vrcp.f32 %v4170_v39  ;;  %v11160_v39 = vld [vmem:[#allocation133_spill] sm:$0xff] }
 0x7db   :  { %4290 = vmatprep.subr.bf16.mxu0 %v10574_v47  ;;  %4331 = vmatprep.subr.bf16.mxu1 %v10575_v51 }
 0x7de   :  { %4291 = vmatpush1.bf16.msra.mxu0 %v10576_v46  ;;  %4332 = vmatpush1.bf16.msra.mxu1 %v10577_v52 }
 0x7df   :  { %4292 = vmatprep.subr.bf16.mxu0 %v10578_v61  ;;  %4333 = vmatprep.subr.bf16.mxu1 %v10579_v29 }
 0x7e2   :  { %4293 = vmatpush1.bf16.msra.mxu0 %v10580_v60  ;;  %4334 = vmatpush1.bf16.msra.mxu1 %v10715_v9 }
 0x7e3   :  { %4294 = vmatprep.subr.bf16.mxu0 %v10716_v33  ;;  %4335 = vmatprep.subr.bf16.mxu1 %v10717_v56 }
 0x7e4   :  { %v5566_v40 = vpop.eup %5565 }
 0x7e5   :  { %v4179_v23 = vmul.f32 %v5566_v40, %v5564_v30  ;;  %v11156_v30 = vld [vmem:[#allocation125_spill] sm:$0xff]  ;;  %v11157_v40 = vld [vmem:[#allocation126_spill] sm:$0xff] }
 0x7e6   :  { %v5568_v32 = vpop.eup %5567  ;;  %4295 = vmatpush1.bf16.msra.mxu0 %v10450_v50  ;;  %4336 = vmatpush1.bf16.msra.mxu1 %v10584_v58 }
 0x7e7   :  { %v4178_v28 = vmul.f32 %v5568_v32, %v9140_v0  ;;  %4296 = vmatprep.subr.bf16.mxu0 %v10585_v48  ;;  %4337 = vmatprep.subr.bf16.mxu1 %v10453_v44  ;;  %v11145_v0 = vld [vmem:[#allocation110_spill] sm:$0xff]  ;;  %v5570_v18 = vpop.eup %5569  ;;  %v11159_v32 = vld [vmem:[#allocation132_spill] sm:$0xff] }
 0x7e9   :  { %v4180_v59 = vadd.f32 %v4179_v23, %v4178_v28  ;;  %v11158_v23 = vld [vmem:[#allocation131_spill] sm:$0xff]  ;;  %v11161_v28 = vld [vmem:[#allocation134_spill] sm:$0xff] }
 0x7ea   :  { %4297 = vmatpush1.bf16.msra.mxu0 %v10586_v7  ;;  %4338 = vmatpush1.bf16.msra.mxu1 %v10718_v31 }
 0x7eb   :  { %5571 = vtanh.f32 %v4180_v59  ;;  %4298 = vmatprep.subr.bf16.mxu0 %v10719_v19  ;;  %4339 = vmatprep.subr.bf16.mxu1 %v10720_v62  ;;  %v11162_v59 = vld [vmem:[#allocation137_spill] sm:$0xff] }
 0x7ee   :  { %4299 = vmatpush2.bf16.msra.mxu0 %v10721_v27  ;;  %4340 = vmatpush2.bf16.msra.mxu1 %v10722_v13 }
 0x7ef   :  { %4300 = vmatprep.subr.bf16.mxu0 %v10460_v17  ;;  %4341 = vmatprep.subr.bf16.mxu1 %v10723_v53 }
 0x7f2   :  { %4301 = vmatpush2.bf16.msra.mxu0 %v10861_v4  ;;  %4342 = vmatpush2.bf16.msra.mxu1 %v11145_v0 }
 0x7f3   :  { %4302 = vmatprep.subr.bf16.mxu0 %v11146_v36  ;;  %4343 = vmatprep.subr.bf16.mxu1 %v11147_v8 }
 0x7f6   :  { %4303 = vmatpush2.bf16.msra.mxu0 %v11148_v38  ;;  %4344 = vmatpush2.bf16.msra.mxu1 %v11149_v37 }
 0x7f7   :  { %4304 = vmatprep.subr.bf16.mxu0 %v11150_v21  ;;  %4345 = vmatprep.subr.bf16.mxu1 %v11151_v16  ;;  %v11240_v16 = vld [vmem:[#allocation175_spill] sm:$0xff] }
 0x7f8   :  { %v5572_v14 = vpop.eup %5571 }
 0x7f9   :  { %v4182_v49 = vmul.f32 %v5572_v14, %v5570_v18  ;;  %v11164_v18 = vld [vmem:[#allocation139_spill] sm:$0xff]  ;;  %v11165_v14 = vld [vmem:[#allocation140_spill] sm:$0xff] }
 0x7fa   :  { %4305 = vmatpush2.bf16.msra.mxu0 %v11152_v5  ;;  %4346 = vmatpush2.bf16.msra.mxu1 %v11153_v15  ;;  %v11238_v15 = vld [vmem:[#allocation169_spill] sm:$0xff]  ;;  %v11239_v5 = vld [vmem:[#allocation170_spill] sm:$0xff] }
 0x7fb   :  { %v9369_v3 = vsel %vm4188_vm9, %v4182_v49, %v11154_v42  ;;  %4306 = vmatprep.subr.bf16.mxu0 %v11156_v30  ;;  %4347 = vmatprep.subr.bf16.mxu1 %v11157_v40  ;;  %v11166_v49 = vld [vmem:[#allocation145_spill] sm:$0xff]  ;;  %v11167_v42 = vld [vmem:[#allocation146_spill] sm:$0xff] }
 0x7fc   :  { %11155 = vst [vmem:[#allocation136_spill] sm:$0xff] %v9369_v3  ;;  %v11168_v3 = vld [vmem:[#allocation147_spill] sm:$0xff] }
 0x7fe   :  { %4307 = vmatpush2.bf16.msra.mxu0 %v11158_v23  ;;  %4348 = vmatpush2.bf16.msra.mxu1 %v11159_v32  ;;  %v11169_v23 = vld [vmem:[#allocation148_spill] sm:$0xff]  ;;  %v11170_v32 = vld [vmem:[#allocation151_spill] sm:$0xff] }
 0x7ff   :  { %4308 = vmatprep.subr.bf16.mxu0 %v11160_v39  ;;  %4349 = vmatprep.subr.bf16.mxu1 %v11161_v28  ;;  %v11171_v39 = vld [vmem:[#allocation152_spill] sm:$0xff]  ;;  %v11172_v28 = vld [vmem:[#allocation5_spill] sm:$0xff] }
 0x802   :  { %4309 = vmatpush2.bf16.msra.mxu0 %v11162_v59  ;;  %4350 = vmatpush2.bf16.msra.mxu1 %v11163_v25  ;;  %v11173_v59 = vld [vmem:[#allocation6_spill] sm:$0xff] }
 0x803   :  { %4310 = vmatprep.subr.bf16.mxu0 %v11164_v18  ;;  %4351 = vmatprep.subr.bf16.mxu1 %v11165_v14  ;;  %v11174_v14 = vld [vmem:[#allocation7_spill] sm:$0xff]  ;;  %v11183_v18 = vld [vmem:[#allocation16_spill] sm:$0xff] }
 0x806   :  { %4311 = vmatpush2.bf16.msra.mxu0 %v11166_v49  ;;  %4352 = vmatpush2.bf16.msra.mxu1 %v11167_v42  ;;  %v11175_v49 = vld [vmem:[#allocation8_spill] sm:$0xff]  ;;  %v11176_v42 = vld [vmem:[#allocation9_spill] sm:$0xff] }
 0x807   :  { %4312 = vmatprep.subr.bf16.mxu0 %v11168_v3  ;;  %4353 = vmatprep.subr.bf16.mxu1 %v11169_v23  ;;  %v11177_v3 = vld [vmem:[#allocation10_spill] sm:$0xff]  ;;  %v11178_v23 = vld [vmem:[#allocation11_spill] sm:$0xff] }
 0x80a   :  { %4313 = vmatpush2.bf16.msra.mxu0 %v11170_v32  ;;  %4354 = vmatpush2.bf16.msra.mxu1 %v11171_v39  ;;  %v11179_v32 = vld [vmem:[#allocation12_spill] sm:$0xff]  ;;  %v11180_v39 = vld [vmem:[#allocation13_spill] sm:$0xff] }
 0x80b   :  { %4438 = vmatprep.subr.bf16.mxu0 %v11172_v28  ;;  %4479 = vmatprep.subr.bf16.mxu1 %v11173_v59  ;;  %v11181_v28 = vld [vmem:[#allocation14_spill] sm:$0xff]  ;;  %v11182_v59 = vld [vmem:[#allocation15_spill] sm:$0xff] }
 0x80d   :  { %4315 = vmatmul.mubr.bf16.vlgmr.msra.gmra.mxu0 %v9317_v43  ;;  %4356 = vmatmul.mubr.bf16.vlgmr.msra.gmra.mxu1 %v9317_v43  ;;  %v11184_v43 = vld [vmem:[#allocation17_spill] sm:$0xff] }
 0x80e   :  { %4439 = vmatpush1.bf16.msra.mxu0 %v11174_v14  ;;  %4480 = vmatpush1.bf16.msra.mxu1 %v11175_v49  ;;  %v11185_v14 = vld [vmem:[#allocation18_spill] sm:$0xff]  ;;  %v11186_v49 = vld [vmem:[#allocation19_spill] sm:$0xff] }
 0x80f   :  { %4440 = vmatprep.subr.bf16.mxu0 %v11176_v42  ;;  %4481 = vmatprep.subr.bf16.mxu1 %v11177_v3  ;;  %v11187_v42 = vld [vmem:[#allocation20_spill] sm:$0xff]  ;;  %v11188_v3 = vld [vmem:[#allocation21_spill] sm:$0xff] }
 0x812   :  { %4441 = vmatpush1.bf16.msra.mxu0 %v11178_v23  ;;  %4482 = vmatpush1.bf16.msra.mxu1 %v11179_v32  ;;  %v11189_v23 = vld [vmem:[#allocation22_spill] sm:$0xff]  ;;  %v11190_v32 = vld [vmem:[#allocation23_spill] sm:$0xff] }
 0x813   :  { %4442 = vmatprep.subr.bf16.mxu0 %v11180_v39  ;;  %4483 = vmatprep.subr.bf16.mxu1 %v11181_v28  ;;  %v11191_v39 = vld [vmem:[#allocation24_spill] sm:$0xff]  ;;  %v11192_v28 = vld [vmem:[#allocation25_spill] sm:$0xff] }
 0x816   :  { %4443 = vmatpush1.bf16.msra.mxu0 %v11182_v59  ;;  %4484 = vmatpush1.bf16.msra.mxu1 %v11183_v18  ;;  %v11193_v59 = vld [vmem:[#allocation26_spill] sm:$0xff]  ;;  %v11194_v18 = vld [vmem:[#allocation27_spill] sm:$0xff] }
 0x817   :  { %4444 = vmatprep.subr.bf16.mxu0 %v11184_v43  ;;  %4485 = vmatprep.subr.bf16.mxu1 %v11185_v14  ;;  %v11195_v43 = vld [vmem:[#allocation28_spill] sm:$0xff]  ;;  %v11196_v14 = vld [vmem:[#allocation29_spill] sm:$0xff] }
 0x81a   :  { %4445 = vmatpush1.bf16.msra.mxu0 %v11186_v49  ;;  %4486 = vmatpush1.bf16.msra.mxu1 %v11187_v42  ;;  %v11197_v49 = vld [vmem:[#allocation30_spill] sm:$0xff]  ;;  %v11198_v42 = vld [vmem:[#allocation31_spill] sm:$0xff] }
 0x81b   :  { %4446 = vmatprep.subr.bf16.mxu0 %v11188_v3  ;;  %4487 = vmatprep.subr.bf16.mxu1 %v11189_v23  ;;  %v11199_v3 = vld [vmem:[#allocation32_spill] sm:$0xff]  ;;  %v11200_v23 = vld [vmem:[#allocation33_spill] sm:$0xff] }
 0x81e   :  { %4447 = vmatpush1.bf16.msra.mxu0 %v11190_v32  ;;  %4488 = vmatpush1.bf16.msra.mxu1 %v11191_v39  ;;  %v11201_v32 = vld [vmem:[#allocation34_spill] sm:$0xff]  ;;  %v11202_v39 = vld [vmem:[#allocation35_spill] sm:$0xff] }
 0x81f   :  { %4448 = vmatprep.subr.bf16.mxu0 %v11192_v28  ;;  %4489 = vmatprep.subr.bf16.mxu1 %v11193_v59  ;;  %v11203_v28 = vld [vmem:[#allocation36_spill] sm:$0xff]  ;;  %v11204_v59 = vld [vmem:[#allocation37_spill] sm:$0xff] }
 0x822   :  { %4449 = vmatpush1.bf16.msra.mxu0 %v11194_v18  ;;  %4490 = vmatpush1.bf16.msra.mxu1 %v11195_v43  ;;  %v11205_v18 = vld [vmem:[#allocation38_spill] sm:$0xff]  ;;  %v11206_v43 = vld [vmem:[#allocation39_spill] sm:$0xff] }
 0x823   :  { %4450 = vmatprep.subr.bf16.mxu0 %v11196_v14  ;;  %4491 = vmatprep.subr.bf16.mxu1 %v11197_v49  ;;  %v11207_v14 = vld [vmem:[#allocation40_spill] sm:$0xff]  ;;  %v11208_v49 = vld [vmem:[#allocation41_spill] sm:$0xff] }
 0x826   :  { %4451 = vmatpush1.bf16.msra.mxu0 %v11198_v42  ;;  %4492 = vmatpush1.bf16.msra.mxu1 %v11199_v3  ;;  %v11209_v42 = vld [vmem:[#allocation42_spill] sm:$0xff]  ;;  %v11210_v3 = vld [vmem:[#allocation43_spill] sm:$0xff] }
 0x827   :  { %4452 = vmatprep.subr.bf16.mxu0 %v11200_v23  ;;  %4493 = vmatprep.subr.bf16.mxu1 %v11201_v32  ;;  %v11211_v23 = vld [vmem:[#allocation44_spill] sm:$0xff]  ;;  %v11212_v32 = vld [vmem:[#allocation45_spill] sm:$0xff] }
 0x82a   :  { %4453 = vmatpush1.bf16.msra.mxu0 %v11202_v39  ;;  %4494 = vmatpush1.bf16.msra.mxu1 %v11203_v28  ;;  %v11213_v39 = vld [vmem:[#allocation46_spill] sm:$0xff]  ;;  %v11214_v28 = vld [vmem:[#allocation47_spill] sm:$0xff] }
 0x82b   :  { %4454 = vmatprep.subr.bf16.mxu0 %v11204_v59  ;;  %4495 = vmatprep.subr.bf16.mxu1 %v11205_v18  ;;  %v11215_v59 = vld [vmem:[#allocation48_spill] sm:$0xff]  ;;  %v11216_v18 = vld [vmem:[#allocation49_spill] sm:$0xff] }
 0x82e   :  { %4455 = vmatpush2.bf16.msra.mxu0 %v11206_v43  ;;  %4496 = vmatpush2.bf16.msra.mxu1 %v11207_v14  ;;  %v11217_v43 = vld [vmem:[#allocation50_spill] sm:$0xff]  ;;  %v11218_v14 = vld [vmem:[#allocation51_spill] sm:$0xff] }
 0x82f   :  { %4456 = vmatprep.subr.bf16.mxu0 %v11208_v49  ;;  %4497 = vmatprep.subr.bf16.mxu1 %v11209_v42  ;;  %v11219_v49 = vld [vmem:[#allocation52_spill] sm:$0xff]  ;;  %v11220_v42 = vld [vmem:[#allocation53_spill] sm:$0xff] }
 0x832   :  { %4457 = vmatpush2.bf16.msra.mxu0 %v11210_v3  ;;  %4498 = vmatpush2.bf16.msra.mxu1 %v11211_v23  ;;  %v11221_v3 = vld [vmem:[#allocation54_spill] sm:$0xff]  ;;  %v11222_v23 = vld [vmem:[#allocation55_spill] sm:$0xff] }
 0x833   :  { %4458 = vmatprep.subr.bf16.mxu0 %v11212_v32  ;;  %4499 = vmatprep.subr.bf16.mxu1 %v11213_v39  ;;  %v11223_v32 = vld [vmem:[#allocation56_spill] sm:$0xff]  ;;  %v11224_v39 = vld [vmem:[#allocation57_spill] sm:$0xff] }
 0x836   :  { %4459 = vmatpush2.bf16.msra.mxu0 %v11214_v28  ;;  %4500 = vmatpush2.bf16.msra.mxu1 %v11215_v59  ;;  %v11225_v28 = vld [vmem:[#allocation58_spill] sm:$0xff]  ;;  %v11226_v59 = vld [vmem:[#allocation59_spill] sm:$0xff] }
 0x837   :  { %4460 = vmatprep.subr.bf16.mxu0 %v11216_v18  ;;  %4501 = vmatprep.subr.bf16.mxu1 %v11217_v43  ;;  %v11227_v18 = vld [vmem:[#allocation60_spill] sm:$0xff]  ;;  %v11228_v43 = vld [vmem:[#allocation61_spill] sm:$0xff] }
 0x83a   :  { %4461 = vmatpush2.bf16.msra.mxu0 %v11218_v14  ;;  %4502 = vmatpush2.bf16.msra.mxu1 %v11219_v49  ;;  %v11229_v14 = vld [vmem:[#allocation62_spill] sm:$0xff]  ;;  %v11230_v49 = vld [vmem:[#allocation63_spill] sm:$0xff] }
 0x83b   :  { %4462 = vmatprep.subr.bf16.mxu0 %v11220_v42  ;;  %4503 = vmatprep.subr.bf16.mxu1 %v11221_v3  ;;  %v11231_v42 = vld [vmem:[#allocation64_spill] sm:$0xff]  ;;  %v11232_v3 = vld [vmem:[#allocation65_spill] sm:$0xff] }
 0x83e   :  { %4463 = vmatpush2.bf16.msra.mxu0 %v11222_v23  ;;  %4504 = vmatpush2.bf16.msra.mxu1 %v11223_v32  ;;  %v11233_v23 = vld [vmem:[#allocation66_spill] sm:$0xff]  ;;  %v11234_v32 = vld [vmem:[#allocation67_spill] sm:$0xff] }
 0x83f   :  { %4464 = vmatprep.subr.bf16.mxu0 %v11224_v39  ;;  %4505 = vmatprep.subr.bf16.mxu1 %v11225_v28  ;;  %v11235_v39 = vld [vmem:[#allocation68_spill] sm:$0xff]  ;;  %v11236_v28 = vld [vmem:[#allocation69_spill] sm:$0xff] }
 0x842   :  { %4465 = vmatpush2.bf16.msra.mxu0 %v11226_v59  ;;  %4506 = vmatpush2.bf16.msra.mxu1 %v11227_v18  ;;  %v11237_v59 = vld [vmem:[#allocation70_spill] sm:$0xff] }
 0x843   :  { %4466 = vmatprep.subr.bf16.mxu0 %v11228_v43  ;;  %4507 = vmatprep.subr.bf16.mxu1 %v11229_v14 }
 0x846   :  { %4467 = vmatpush2.bf16.msra.mxu0 %v11230_v49  ;;  %4508 = vmatpush2.bf16.msra.mxu1 %v11231_v42 }
 0x847   :  { %4468 = vmatprep.subr.bf16.mxu0 %v11232_v3  ;;  %4509 = vmatprep.subr.bf16.mxu1 %v11233_v23 }
 0x84a   :  { %4469 = vmatpush2.bf16.msra.mxu0 %v11234_v32  ;;  %4510 = vmatpush2.bf16.msra.mxu1 %v11235_v39  ;;  %v11241_v39 = vld [vmem:[#allocation176_spill] sm:$0xff] }
 0x84b   :  { %4520 = vmatprep.subr.bf16.mxu0 %v11236_v28  ;;  %4561 = vmatprep.subr.bf16.mxu1 %v11237_v59 }
 0x88d   :  { %v4234_v18 = vpop.f32.mrf.mxu0  ;;  %v4275_v43 = vpop.f32.mrf.mxu1 }
 0x88e   :  { %v4364_v3 = vadd.f32 %v4234_v18, %v11238_v15  ;;  %v4366_v23 = vadd.f32 %v4275_v43, %v11239_v5  ;;  %v11242_v43 = vld [vmem:[#allocation216_spill] sm:$0xff] }
 0x88f   :  { %v4236_v25 = vpop.f32.mrf.mxu0  ;;  %v4277_v14 = vpop.f32.mrf.mxu1 }
 0x890   :  { %v4365_v32 = vadd.f32 %v4236_v25, %v11240_v16  ;;  %v5127_v21 = vmul.f32 -1.442695, %v4364_v3  ;;  %v4367_v37 = vadd.f32 %v4277_v14, %v11241_v39  ;;  %v5129_v28 = vmul.f32 -1.442695, %v4366_v23  ;;  %v11243_v3 = vld [vmem:[#allocation217_spill] sm:$0xff] }
 0x891   :  { %v4238_v40 = vpop.f32.mrf.mxu0  ;;  %v4279_v49 = vpop.f32.mrf.mxu1 }
 0x892   :  { %v5128_v38 = vmul.f32 -1.442695, %v4365_v32  ;;  %5573 = vpow2.f32 %v5127_v21  ;;  %v5130_v59 = vmul.f32 -1.442695, %v4367_v37  ;;  %v11244_v32 = vld [vmem:[#allocation218_spill] sm:$0xff] }
 0x893   :  { %v4239_v30 = vpop.f32.mrf.mxu0  ;;  %v4280_v42 = vpop.f32.mrf.mxu1  ;;  %5575 = vpow2.f32 %v5129_v28  ;;  %v11245_v28 = vld [vmem:[#allocation219_spill] sm:$0xff] }
 0x894   :  { %5577 = vpow2.f32 %v5128_v38 }
 0x895   :  { %5579 = vpow2.f32 %v5130_v59 }
 0x89f   :  { %v5574_v40 = vpop.eup %5573 }
 0x8a0   :  { %v5576_v49 = vpop.eup %5575  ;;  %v4390_v42 = vadd.f32 1.0, %v5574_v40 }
 0x8a1   :  { %v5578_v30 = vpop.eup %5577  ;;  %v4392_v15 = vadd.f32 1.0, %v5576_v49 }
 0x8a2   :  { %v5580_v8 = vpop.eup %5579  ;;  %v4391_v18 = vadd.f32 1.0, %v5578_v30  ;;  %5581 = vrcp.f32 %v4390_v42 }
 0x8a3   :  { %v4393_v5 = vadd.f32 1.0, %v5580_v8  ;;  %5583 = vrcp.f32 %v4392_v15 }
 0x8a4   :  { %5585 = vrcp.f32 %v4391_v18 }
 0x8af   :  { %v5582_v15 = vpop.eup %5581 }
 0x8cd   :  { %v4316_v16 = vpop.f32.mrf.mxu0  ;;  %v4357_v25 = vpop.f32.mrf.mxu1 }
 0x8ce   :  { %v4368_v14 = vadd.f32 %v4316_v16, %v11242_v43  ;;  %v4370_v21 = vadd.f32 %v4357_v25, %v11243_v3  ;;  %v5584_v16 = vpop.eup %5583 }
 0x8cf   :  { %v4318_v37 = vpop.f32.mrf.mxu0  ;;  %v4359_v38 = vpop.f32.mrf.mxu1 }
 0x8d0   :  { %v5131_v23 = vmul.f32 -1.442695, %v4368_v14  ;;  %5587 = vtanh.f32 %v4370_v21  ;;  %v4369_v39 = vadd.f32 %v4318_v37, %v11244_v32  ;;  %v4371_v59 = vadd.f32 %v4359_v38, %v11245_v28  ;;  %v5586_v18 = vpop.eup %5585 }
 0x8d1   :  { %5589 = vrcp.f32 %v4393_v5  ;;  %v4320_v40 = vpop.f32.mrf.mxu0  ;;  %v4361_v49 = vpop.f32.mrf.mxu1  ;;  %v4410_v14 = vmul.f32 %v5584_v16, %v9295_v34 }
 0x8d2   :  { %5591 = vpow2.f32 %v5131_v23  ;;  %v5132_v8 = vmul.f32 -1.442695, %v4369_v39  ;;  %v11246_v49 = vld [vmem:[#allocation185_spill] sm:$0xff] }
 0x8d3   :  { %5593 = vtanh.f32 %v4371_v59  ;;  %v4321_v30 = vpop.f32.mrf.mxu0  ;;  %v4362_v42 = vpop.f32.mrf.mxu1  ;;  %vm4425_vm10 = vcmp.eq.s32.totalorder %v11246_v49, 1  ;;  %v4691_v49 = vld [vmem:[%s9752_s10 + $0xc8] sm:$0xff] }
 0x8d4   :  { %5595 = vpow2.f32 %v5132_v8 }
 0x8dd   :  { %v5588_v25 = vpop.eup %5587 }
 0x8de   :  { %v5590_v43 = vpop.eup %5589  ;;  %v4412_v3 = vmul.f32 %v5588_v25, %v5582_v15 }
 0x8df   :  { %v5592_v21 = vpop.eup %5591  ;;  %v4411_v23 = vmul.f32 %v5590_v43, %v9299_v45  ;;  %v4697_v43 = vld [vmem:[%s9752_s10 + $0xf8] sm:$0xff] }
 0x8e0   :  { %v5594_v37 = vpop.eup %5593  ;;  %v4394_v38 = vadd.f32 1.0, %v5592_v21  ;;  %v9464_v5 = vadd.f32 %v4412_v3, %v4410_v14  ;;  %v4681_v14 = vld [vmem:[%s9752_s10 + $0x78] sm:$0xff]  ;;  %v4696_v3 = vld [vmem:[%s9752_s10 + $0xf0] sm:$0xff] }
 0x8e1   :  { %v5596_v32 = vpop.eup %5595  ;;  %v4413_v39 = vmul.f32 %v5594_v37, %v5586_v18  ;;  %v4680_v21 = vld [vmem:[%s9752_s10 + $0x70] sm:$0xff]  ;;  %v4695_v37 = vld [vmem:[%s9752_s10 + $0xe8] sm:$0xff] }
 0x8e2   :  { %5597 = vrcp.f32 %v4394_v38  ;;  %v4395_v28 = vadd.f32 1.0, %v5596_v32  ;;  %v4679_v38 = vld [vmem:[%s9752_s10 + $0x68] sm:$0xff]  ;;  %v4694_v32 = vld [vmem:[%s9752_s10 + $0xe0] sm:$0xff] }
 0x8e3   :  { %5599 = vtanh.f32 %v9464_v5  ;;  %v9468_v59 = vadd.f32 %v4413_v39, %v4411_v23  ;;  %v4678_v23 = vld [vmem:[%s9752_s10 + $0x60] sm:$0xff]  ;;  %v4693_v39 = vld [vmem:[%s9752_s10 + $0xd8] sm:$0xff] }
 0x8e4   :  { %5601 = vrcp.f32 %v4395_v28  ;;  %v4677_v28 = vld [vmem:[%s9752_s10 + $0x58] sm:$0xff] }
 0x8e5   :  { %5603 = vtanh.f32 %v9468_v59 }
 0x8ef   :  { %v5598_v34 = vpop.eup %5597 }
 0x8f0   :  { %v5600_v40 = vpop.eup %5599 }
 0x8f1   :  { %v5602_v8 = vpop.eup %5601  ;;  %v4418_v30 = vmul.f32 %v5600_v40, %v5598_v34  ;;  %v4692_v34 = vld [vmem:[%s9752_s10 + $0xd0] sm:$0xff] }
 0x8f2   :  { %v5604_v42 = vpop.eup %5603  ;;  %v4676_v40 = vld [vmem:[%s9752_s10 + $0x50] sm:$0xff] }
 0x8f3   :  { %v4419_v15 = vmul.f32 %v5604_v42, %v5602_v8  ;;  %v9473_v45 = vsel %vm4425_vm10, %v4418_v30, %v9310_v20  ;;  %v9478_v25 = vpack.c.bf16 %v4418_v30, %v4418_v30  ;;  %v4778_v20 = vld [vmem:[%s9751_s12 + $0x10] sm:$0xff]  ;;  %v4675_v8 = vld [vmem:[%s9752_s10 + $0x48] sm:$0xff]  ;;  %v4690_v30 = vld [vmem:[%s9752_s10 + $0xc0] sm:$0xff] }
 0x8f4   :  { %v4674_v42 = vld [vmem:[%s9752_s10 + $0x40] sm:$0xff] }
 0x8f5   :  { %v4437_v16 = vpack.c.bf16 %v4419_v15, %v4419_v15  ;;  %v9476_v18 = vsel %vm4425_vm10, %v4419_v15, %v9315_v2  ;;  %v4777_v2 = vld [vmem:[%s9751_s12 + $0x8] sm:$0xff]  ;;  %v4689_v15 = vld [vmem:[%s9752_s10 + $0xb8] sm:$0xff] }
 0x8f7   :  { %4470 = vmatprep.mubr.bf16.mxu0 %v4437_v16  ;;  %4511 = vmatprep.mubr.bf16.mxu1 %v4437_v16 }
 0x8f8   :  { %4471 = vmatmul.mubr.bf16.vlgmr.msra.gmra.mxu0 %v9478_v25  ;;  %4512 = vmatmul.mubr.bf16.vlgmr.msra.gmra.mxu1 %v9478_v25 }
 0x8f9   :  { %4521 = vmatpush1.bf16.msra.mxu0 %v10426_v12  ;;  %4562 = vmatpush1.bf16.msra.mxu1 %v10427_v63  ;;  %v11247_v12 = vld [vmem:[#allocation114_spill] sm:$0xff]  ;;  %v11248_v63 = vld [vmem:[#allocation115_spill] sm:$0xff] }
 0x8fa   :  { %4552 = vmatprep.mubr.bf16.mxu0 %v4437_v16  ;;  %4593 = vmatprep.mubr.bf16.mxu1 %v4437_v16  ;;  %v4673_v16 = vld [vmem:[%s9752_s10 + $0x38] sm:$0xff] }
 0x8fb   :  { %4522 = vmatprep.subr.bf16.mxu0 %v10428_v6  ;;  %4563 = vmatprep.subr.bf16.mxu1 %v10429_v26  ;;  %v11249_v6 = vld [vmem:[#allocation116_spill] sm:$0xff]  ;;  %v11250_v26 = vld [vmem:[#allocation117_spill] sm:$0xff] }
 0x8fd   :  { %4523 = vmatpush1.bf16.msra.mxu0 %v10430_v10  ;;  %4564 = vmatpush1.bf16.msra.mxu1 %v10431_v35  ;;  %v11251_v10 = vld [vmem:[#allocation118_spill] sm:$0xff]  ;;  %v11252_v35 = vld [vmem:[#allocation123_spill] sm:$0xff] }
 0x8fe   :  { %4524 = vmatprep.subr.bf16.mxu0 %v10432_v24  ;;  %4565 = vmatprep.subr.bf16.mxu1 %v10433_v1  ;;  %v11253_v24 = vld [vmem:[#allocation124_spill] sm:$0xff]  ;;  %v11254_v1 = vld [vmem:[#allocation125_spill] sm:$0xff] }
 0x901   :  { %4525 = vmatpush1.bf16.msra.mxu0 %v10434_v57  ;;  %4566 = vmatpush1.bf16.msra.mxu1 %v10435_v41  ;;  %v11255_v57 = vld [vmem:[#allocation126_spill] sm:$0xff]  ;;  %v11256_v41 = vld [vmem:[#allocation131_spill] sm:$0xff] }
 0x902   :  { %4526 = vmatprep.subr.bf16.mxu0 %v10436_v11  ;;  %4567 = vmatprep.subr.bf16.mxu1 %v10437_v22  ;;  %v11257_v11 = vld [vmem:[#allocation132_spill] sm:$0xff]  ;;  %v11258_v22 = vld [vmem:[#allocation133_spill] sm:$0xff] }
 0x905   :  { %4527 = vmatpush1.bf16.msra.mxu0 %v10572_v55  ;;  %4568 = vmatpush1.bf16.msra.mxu1 %v10573_v54  ;;  %v11262_v55 = vld [vmem:[#allocation139_spill] sm:$0xff]  ;;  %v11263_v54 = vld [vmem:[#allocation140_spill] sm:$0xff] }
 0x906   :  { %4528 = vmatprep.subr.bf16.mxu0 %v10574_v47  ;;  %4569 = vmatprep.subr.bf16.mxu1 %v10575_v51  ;;  %v11264_v47 = vld [vmem:[#allocation145_spill] sm:$0xff]  ;;  %v11265_v51 = vld [vmem:[#allocation146_spill] sm:$0xff] }
 0x909   :  { %4529 = vmatpush1.bf16.msra.mxu0 %v10576_v46  ;;  %4570 = vmatpush1.bf16.msra.mxu1 %v10577_v52  ;;  %v11266_v46 = vld [vmem:[#allocation147_spill] sm:$0xff]  ;;  %v11267_v52 = vld [vmem:[#allocation148_spill] sm:$0xff] }
 0x90a   :  { %4530 = vmatprep.subr.bf16.mxu0 %v10578_v61  ;;  %4571 = vmatprep.subr.bf16.mxu1 %v10579_v29  ;;  %v11268_v61 = vld [vmem:[#allocation151_spill] sm:$0xff]  ;;  %v11269_v29 = vld [vmem:[#allocation152_spill] sm:$0xff] }
 0x90d   :  { %4531 = vmatpush1.bf16.msra.mxu0 %v10580_v60  ;;  %4572 = vmatpush1.bf16.msra.mxu1 %v10715_v9  ;;  %v11270_v60 = vmov 0.0   ;;  %v4788_v9 = vld [vmem:[%s9751_s12 + $0x60] sm:$0xff] }
 0x90e   :  { %4532 = vmatprep.subr.bf16.mxu0 %v10716_v33  ;;  %4573 = vmatprep.subr.bf16.mxu1 %v10717_v56  ;;  %v4787_v33 = vld [vmem:[%s9751_s12 + $0x58] sm:$0xff]  ;;  %v4786_v56 = vld [vmem:[%s9751_s12 + $0x50] sm:$0xff] }
 0x911   :  { %4533 = vmatpush1.bf16.msra.mxu0 %v10450_v50  ;;  %4574 = vmatpush1.bf16.msra.mxu1 %v10584_v58  ;;  %v11259_v50 = vld [vmem:[#allocation134_spill] sm:$0xff] }
 0x912   :  { %4534 = vmatprep.subr.bf16.mxu0 %v10585_v48  ;;  %4575 = vmatprep.subr.bf16.mxu1 %v10453_v44  ;;  %v11261_v44 = vld [vmem:[#allocation138_spill] sm:$0xff] }
 0x913   :  { %v4790_v58 = vld [vmem:[%s9751_s12 + $0x70] sm:$0xff]  ;;  %v4789_v48 = vld [vmem:[%s9751_s12 + $0x68] sm:$0xff] }
 0x915   :  { %4535 = vmatpush1.bf16.msra.mxu0 %v10586_v7  ;;  %4576 = vmatpush1.bf16.msra.mxu1 %v10718_v31  ;;  %v4791_v7 = vld [vmem:[%s9751_s12 + $0x78] sm:$0xff]  ;;  %v4785_v31 = vld [vmem:[%s9751_s12 + $0x48] sm:$0xff] }
 0x916   :  { %4536 = vmatprep.subr.bf16.mxu0 %v10719_v19  ;;  %4577 = vmatprep.subr.bf16.mxu1 %v10720_v62  ;;  %v4784_v19 = vld [vmem:[%s9751_s12 + $0x40] sm:$0xff]  ;;  %v4783_v62 = vld [vmem:[%s9751_s12 + $0x38] sm:$0xff] }
 0x919   :  { %4537 = vmatpush2.bf16.msra.mxu0 %v10721_v27  ;;  %4578 = vmatpush2.bf16.msra.mxu1 %v10722_v13  ;;  %v4782_v27 = vld [vmem:[%s9751_s12 + $0x30] sm:$0xff]  ;;  %v4781_v13 = vld [vmem:[%s9751_s12 + $0x28] sm:$0xff] }
 0x91a   :  { %4538 = vmatprep.subr.bf16.mxu0 %v10460_v17  ;;  %4579 = vmatprep.subr.bf16.mxu1 %v10723_v53  ;;  %v11260_v17 = vld [vmem:[#allocation137_spill] sm:$0xff] }
 0x91b   :  { %v4780_v53 = vld [vmem:[%s9751_s12 + $0x20] sm:$0xff] }
 0x91d   :  { %4539 = vmatpush2.bf16.msra.mxu0 %v10861_v4  ;;  %4580 = vmatpush2.bf16.msra.mxu1 %v11145_v0  ;;  %v4779_v4 = vld [vmem:[%s9751_s12 + $0x18] sm:$0xff]  ;;  %v4776_v0 = vld [vmem:[%s9751_s12] sm:$0xff] }
 0x91e   :  { %4540 = vmatprep.subr.bf16.mxu0 %v11146_v36  ;;  %4581 = vmatprep.subr.bf16.mxu1 %v11247_v12  ;;  %v11271_v36 = vld [vmem:[#allocation136_spill] sm:$0xff]  ;;  %v4672_v12 = vld [vmem:[%s9752_s10 + $0x30] sm:$0xff] }
 0x921   :  { %4541 = vmatpush2.bf16.msra.mxu0 %v11248_v63  ;;  %4582 = vmatpush2.bf16.msra.mxu1 %v11249_v6  ;;  %v4687_v63 = vld [vmem:[%s9752_s10 + $0xa8] sm:$0xff] }
 0x922   :  { %4542 = vmatprep.subr.bf16.mxu0 %v11250_v26  ;;  %4583 = vmatprep.subr.bf16.mxu1 %v11251_v10  ;;  %v4671_v6 = vld [vmem:[%s9752_s10 + $0x28] sm:$0xff]  ;;  %v4686_v26 = vld [vmem:[%s9752_s10 + $0xa0] sm:$0xff] }
 0x923   :  { %v4670_v10 = vld [vmem:[%s9752_s10 + $0x20] sm:$0xff] }
 0x925   :  { %4543 = vmatpush2.bf16.msra.mxu0 %v11252_v35  ;;  %4584 = vmatpush2.bf16.msra.mxu1 %v11253_v24  ;;  %v4685_v35 = vld [vmem:[%s9752_s10 + $0x98] sm:$0xff] }
 0x926   :  { %4544 = vmatprep.subr.bf16.mxu0 %v11254_v1  ;;  %4585 = vmatprep.subr.bf16.mxu1 %v11255_v57  ;;  %v4669_v24 = vld [vmem:[%s9752_s10 + $0x18] sm:$0xff]  ;;  %v4684_v1 = vld [vmem:[%s9752_s10 + $0x90] sm:$0xff] }
 0x927   :  { %v4668_v57 = vld [vmem:[%s9752_s10 + $0x10] sm:$0xff] }
 0x929   :  { %4545 = vmatpush2.bf16.msra.mxu0 %v11256_v41  ;;  %4586 = vmatpush2.bf16.msra.mxu1 %v11257_v11  ;;  %v4683_v41 = vld [vmem:[%s9752_s10 + $0x88] sm:$0xff] }
 0x92a   :  { %4546 = vmatprep.subr.bf16.mxu0 %v11258_v22  ;;  %4587 = vmatprep.subr.bf16.mxu1 %v11259_v50  ;;  %v4667_v11 = vld [vmem:[%s9752_s10 + $0x8] sm:$0xff]  ;;  %v4682_v22 = vld [vmem:[%s9752_s10 + $0x80] sm:$0xff] }
 0x92b   :  { %v4666_v50 = vld [vmem:[%s9752_s10] sm:$0xff] }
 0x92d   :  { %4547 = vmatpush2.bf16.msra.mxu0 %v11260_v17  ;;  %4588 = vmatpush2.bf16.msra.mxu1 %v11261_v44 }
 0x92e   :  { %4548 = vmatprep.subr.bf16.mxu0 %v11262_v55  ;;  %4589 = vmatprep.subr.bf16.mxu1 %v11263_v54 }
 0x931   :  { %4549 = vmatpush2.bf16.msra.mxu0 %v11264_v47  ;;  %4590 = vmatpush2.bf16.msra.mxu1 %v11265_v51 }
 0x932   :  { %4550 = vmatprep.subr.bf16.mxu0 %v11266_v46  ;;  %4591 = vmatprep.subr.bf16.mxu1 %v11267_v52 }
 0x935   :  { %4551 = vmatpush2.bf16.msra.mxu0 %v11268_v61  ;;  %4592 = vmatpush2.bf16.msra.mxu1 %v11269_v29  ;;  %v11272_v61 = vld [vmem:[#allocation127_spill] sm:$0xff] }
 0x936   :  { %5197 = vmatprep.subr.mxu1 %v11270_v60  ;;  %5145 = vmatprep.subr.mxu0 %v4697_v43  ;;  %v11273_v29 = vld [vmem:[#allocation183_spill] sm:$0xff] }
 0x938   :  { %4553 = vmatmul.mubr.bf16.vlgmr.msra.gmra.mxu0 %v9478_v25  ;;  %4594 = vmatmul.mubr.bf16.vlgmr.msra.gmra.mxu1 %v9478_v25  ;;  %v4688_v25 = vld [vmem:[%s9752_s10 + $0xb0] sm:$0xff] }
 0x939   :  { %5198 = vmatpush3.msra.mxu1 %v4791_v7  ;;  %5229 = vmatprep.mubr.msk.f32.mxu1 %vm5710_vm11, %v11270_v60  ;;  %v11274_v7 = vld [vmem:[#allocation181_spill] sm:$0xff] }
 0x93a   :  { %5199 = vmatprep.subr.mxu1 %v11270_v60  ;;  %5146 = vmatpush3.msra.mxu0 %v4681_v14 }
 0x93b   :  { %5200 = vmatpush3.msra.mxu1 %v4790_v58  ;;  %5147 = vmatprep.subr.mxu0 %v4696_v3 }
 0x93c   :  { %5201 = vmatprep.subr.mxu1 %v11270_v60  ;;  %5148 = vmatpush3.msra.mxu0 %v4680_v21 }
 0x93d   :  { %5202 = vmatpush3.msra.mxu1 %v4789_v48  ;;  %5149 = vmatprep.subr.mxu0 %v4695_v37  ;;  %v11275_v48 = vld [vmem:[#allocation182_spill] sm:$0xff] }
 0x93e   :  { %5203 = vmatprep.subr.mxu1 %v11270_v60  ;;  %5150 = vmatpush3.msra.mxu0 %v4679_v38 }
 0x93f   :  { %5204 = vmatpush3.msra.mxu1 %v4788_v9  ;;  %5151 = vmatprep.subr.mxu0 %v4694_v32  ;;  %v11278_v32 = vld [vmem:[#allocation220_spill] sm:$0xff] }
 0x940   :  { %5205 = vmatprep.subr.mxu1 %v11270_v60  ;;  %5152 = vmatpush3.msra.mxu0 %v4678_v23 }
 0x941   :  { %5206 = vmatpush3.msra.mxu1 %v4787_v33  ;;  %5153 = vmatprep.subr.mxu0 %v4693_v39  ;;  %v11276_v33 = vld [vmem:[#allocation128_spill] sm:$0xff]  ;;  %v11279_v39 = vld [vmem:[#allocation221_spill] sm:$0xff] }
 0x942   :  { %5207 = vmatprep.subr.mxu1 %v11270_v60  ;;  %5154 = vmatpush3.msra.mxu0 %v4677_v28 }
 0x943   :  { %5208 = vmatpush3.msra.mxu1 %v4786_v56  ;;  %5155 = vmatprep.subr.mxu0 %v4692_v34  ;;  %v11277_v56 = vld [vmem:[#allocation184_spill] sm:$0xff] }
 0x944   :  { %5209 = vmatprep.subr.mxu1 %v11270_v60  ;;  %5156 = vmatpush3.msra.mxu0 %v4676_v40 }
 0x945   :  { %5210 = vmatpush3.msra.mxu1 %v4785_v31  ;;  %5157 = vmatprep.subr.mxu0 %v4691_v49  ;;  %v461_v31 = vadd.f32 %v11277_v56, %v11276_v33  ;;  %v11282_v33 = vld [vmem:[#allocation186_spill] sm:$0xff] }
 0x946   :  { %5211 = vmatprep.subr.mxu1 %v11270_v60  ;;  %5158 = vmatpush3.msra.mxu0 %v4675_v8  ;;  %v11280_v8 = vld [vmem:[#allocation222_spill] sm:$0xff]  ;;  %vm4663_vm13 = vcmp.eq.s32.totalorder %v11282_v33, 1 }
 0x947   :  { %5212 = vmatpush3.msra.mxu1 %v4784_v19  ;;  %5159 = vmatprep.subr.mxu0 %v4690_v30 }
 0x948   :  { %5213 = vmatprep.subr.mxu1 %v11270_v60  ;;  %5160 = vmatpush3.msra.mxu0 %v4674_v42  ;;  %v11281_v42 = vld [vmem:[#allocation223_spill] sm:$0xff] }
 0x949   :  { %5214 = vmatpush3.msra.mxu1 %v4783_v62  ;;  %5161 = vmatprep.subr.mxu0 %v4689_v15 }
 0x94a   :  { %5215 = vmatprep.subr.mxu1 %v11270_v60  ;;  %5162 = vmatpush3.msra.mxu0 %v4673_v16 }
 0x94b   :  { %5216 = vmatpush3.msra.mxu1 %v4782_v27  ;;  %5163 = vmatprep.subr.mxu0 %v4688_v25 }
 0x94c   :  { %5217 = vmatprep.subr.mxu1 %v11270_v60  ;;  %5164 = vmatpush3.msra.mxu0 %v4672_v12 }
 0x94d   :  { %5218 = vmatpush3.msra.mxu1 %v4781_v13  ;;  %5165 = vmatprep.subr.mxu0 %v4687_v63 }
 0x94e   :  { %5219 = vmatprep.subr.mxu1 %v11270_v60  ;;  %5166 = vmatpush3.msra.mxu0 %v4671_v6 }
 0x94f   :  { %5220 = vmatpush3.msra.mxu1 %v4780_v53  ;;  %5167 = vmatprep.subr.mxu0 %v4686_v26 }
 0x950   :  { %5221 = vmatprep.subr.mxu1 %v11270_v60  ;;  %5168 = vmatpush3.msra.mxu0 %v4670_v10 }
 0x951   :  { %5222 = vmatpush3.msra.mxu1 %v4779_v4  ;;  %5169 = vmatprep.subr.mxu0 %v4685_v35 }
 0x952   :  { %5223 = vmatprep.subr.mxu1 %v11270_v60  ;;  %5170 = vmatpush3.msra.mxu0 %v4669_v24 }
 0x953   :  { %5224 = vmatpush3.msra.mxu1 %v4778_v20  ;;  %5171 = vmatprep.subr.mxu0 %v4684_v1 }
 0x954   :  { %5225 = vmatprep.subr.mxu1 %v11270_v60  ;;  %5172 = vmatpush3.msra.mxu0 %v4668_v57 }
 0x955   :  { %5226 = vmatpush3.msra.mxu1 %v4777_v2  ;;  %5173 = vmatprep.subr.mxu0 %v4683_v41 }
 0x956   :  { %5227 = vmatprep.subr.mxu1 %v11270_v60  ;;  %5174 = vmatpush3.msra.mxu0 %v4667_v11  ;;  %v348_v60 = vadd.f32 %v11273_v29, %v11272_v61 }
 0x957   :  { %5228 = vmatpush3.msra.mxu1 %v4776_v0  ;;  %5175 = vmatprep.subr.mxu0 %v4682_v22 }
 0x958   :  { %5230 = vmatmul.mubr.f32.vlgmr.msra.gmra.mxu1 %v11271_v36  ;;  %5176 = vmatpush3.msra.mxu0 %v4666_v50 }
 0x9b8   :  { %v4472_v17 = vpop.f32.mrf.mxu0  ;;  %v4513_v44 = vpop.f32.mrf.mxu1 }
 0x9b9   :  { %v4602_v58 = vadd.f32 %v4472_v17, %v11274_v7  ;;  %v4604_v9 = vadd.f32 %v4513_v44, %v11275_v48 }
 0x9ba   :  { %v4474_v55 = vpop.f32.mrf.mxu0  ;;  %v4515_v54 = vpop.f32.mrf.mxu1 }
 0x9bb   :  { %v4603_v19 = vadd.f32 %v4474_v55, %v348_v60  ;;  %v5133_v62 = vmul.f32 -1.442695, %v4602_v58  ;;  %v4605_v27 = vadd.f32 %v4515_v54, %v461_v31  ;;  %v5135_v13 = vmul.f32 -1.442695, %v4604_v9  ;;  %v5142_v60 = vld [vmem:[%s9754_s15] ss:$0 sm:$0xff] }
 0x9bc   :  { %v4476_v47 = vpop.f32.mrf.mxu0  ;;  %v4517_v51 = vpop.f32.mrf.mxu1 }
 0x9bd   :  { %v5134_v53 = vmul.f32 -1.442695, %v4603_v19  ;;  %5605 = vpow2.f32 %v5133_v62  ;;  %v5136_v4 = vmul.f32 -1.442695, %v4605_v27 }
 0x9be   :  { %v4477_v46 = vpop.f32.mrf.mxu0  ;;  %v4518_v52 = vpop.f32.mrf.mxu1  ;;  %5607 = vpow2.f32 %v5135_v13  ;;  %v22_v13 = vstv %s9755_s16 }
 0x9bf   :  { %5609 = vpow2.f32 %v5134_v53  ;;  %v5140_v46 = vld [vmem:[%s9753_s13] ss:$0 sm:$0xff]  ;;  %23 = vst [vmem:[#allocation4] sm:$0x1] %v22_v13 }
 0x9c0   :  { %5611 = vpow2.f32 %v5136_v4  ;;  %v5139_v4 = vld [vmem:[%s9756_s11] ss:$0 sm:$0xff] }
 0x9ca   :  { %v5606_v20 = vpop.eup %5605 }
 0x9cb   :  { %v5608_v2 = vpop.eup %5607  ;;  %v4628_v36 = vadd.f32 1.0, %v5606_v20 }
 0x9cc   :  { %v5610_v0 = vpop.eup %5609  ;;  %v4630_v14 = vadd.f32 1.0, %v5608_v2 }
 0x9cd   :  { %v5612_v43 = vpop.eup %5611  ;;  %v4629_v3 = vadd.f32 1.0, %v5610_v0  ;;  %5613 = vrcp.f32 %v4628_v36 }
 0x9ce   :  { %v4631_v21 = vadd.f32 1.0, %v5612_v43  ;;  %5615 = vrcp.f32 %v4630_v14  ;;  %v5143_v14 = vld [vmem:[#allocation4] ss:$0 sm:$0xff] }
 0x9cf   :  { %5617 = vrcp.f32 %v4629_v3 }
 0x9da   :  { %v5614_v26 = vpop.eup %5613 }
 0x9db   :  { %v5616_v10 = vpop.eup %5615 }
 0x9dc   :  { %v5618_v35 = vpop.eup %5617  ;;  %v4648_v57 = vmul.f32 %v5616_v10, %v9464_v5 }
 0x9f8   :  { %v4554_v37 = vpop.f32.mrf.mxu0  ;;  %v4595_v38 = vpop.f32.mrf.mxu1 }
 0x9f9   :  { %v4606_v23 = vadd.f32 %v4554_v37, %v11278_v32  ;;  %v4608_v28 = vadd.f32 %v4595_v38, %v11279_v39 }
 0x9fa   :  { %v4556_v34 = vpop.f32.mrf.mxu0  ;;  %v4597_v40 = vpop.f32.mrf.mxu1 }
 0x9fb   :  { %v5137_v49 = vmul.f32 -1.442695, %v4606_v23  ;;  %5619 = vtanh.f32 %v4608_v28  ;;  %v4607_v30 = vadd.f32 %v4556_v34, %v11280_v8  ;;  %v4609_v15 = vadd.f32 %v4597_v40, %v11281_v42 }
 0x9fc   :  { %5621 = vrcp.f32 %v4631_v21  ;;  %v4558_v16 = vpop.f32.mrf.mxu0  ;;  %v4599_v25 = vpop.f32.mrf.mxu1 }
 0x9fd   :  { %5623 = vpow2.f32 %v5137_v49  ;;  %v5138_v12 = vmul.f32 -1.442695, %v4607_v30 }
 0x9fe   :  { %5625 = vtanh.f32 %v4609_v15  ;;  %v4559_v63 = vpop.f32.mrf.mxu0  ;;  %v4600_v6 = vpop.f32.mrf.mxu1 }
 0x9ff   :  { %5627 = vpow2.f32 %v5138_v12 }
 0xa08   :  { %v5620_v24 = vpop.eup %5619 }
 0xa09   :  { %v5622_v1 = vpop.eup %5621  ;;  %v4650_v41 = vmul.f32 %v5620_v24, %v5614_v26 }
 0xa0a   :  { %v5624_v11 = vpop.eup %5623  ;;  %v4649_v55 = vmul.f32 %v5622_v1, %v9468_v59 }
 0xa0b   :  { %v5626_v22 = vpop.eup %5625  ;;  %v4632_v50 = vadd.f32 1.0, %v5624_v11  ;;  %v4652_v17 = vadd.f32 %v4650_v41, %v4648_v57 }
 0xa0c   :  { %v5628_v44 = vpop.eup %5627  ;;  %v4651_v54 = vmul.f32 %v5626_v22, %v5618_v35 }
 0xa0d   :  { %5629 = vrcp.f32 %v4632_v50  ;;  %v4633_v47 = vadd.f32 1.0, %v5628_v44 }
 0xa0e   :  { %5631 = vtanh.f32 %v4652_v17  ;;  %v4653_v51 = vadd.f32 %v4651_v54, %v4649_v55 }
 0xa0f   :  { %5633 = vrcp.f32 %v4633_v47 }
 0xa10   :  { %5635 = vtanh.f32 %v4653_v51 }
 0xa18   :  { %v4865_v5 = vpop.f32.mrf.mxu1 }
 0xa19   :  { %v4866_v52 = vadd.f32 %v5140_v46, %v4865_v5 }
 0xa1a   :  { %v5630_v61 = vpop.eup %5629  ;;  %v5231_v29 = vpop.f32.mrf.mxu1 }
 0xa1b   :  { %v5632_v59 = vpop.eup %5631  ;;  %v4869_v7 = vmax.f32 %v4866_v52, 0.0 }
 0xa1c   :  { %v5634_v58 = vpop.eup %5633  ;;  %v4656_v48 = vmul.f32 %v5632_v59, %v5630_v61 }
 0xa1d   :  { %v5636_v9 = vpop.eup %5635  ;;  %v4887_v56 = vmul.f32 %v5142_v60, %v4869_v7 }
 0xa1e   :  { %v4657_v31 = vmul.f32 %v5636_v9, %v5634_v58  ;;  %v4664_v19 = vsel %vm4663_vm13, %v4656_v48, %v9473_v45  ;;  %v5141_v45 = vld [vmem:[%s9757_s14] ss:$0 sm:$0xff] }
 0xa1f   :  { %v4889_v62 = vsel %vm4888_vm12, %v4887_v56, 0.0 }
 0xa20   :  { %v4665_v27 = vsel %vm4663_vm13, %v4657_v31, %v9476_v18  ;;  %4890 = vadd.xlane.f32.xlu1 %v4889_v62 }
 0xa21   :  { %4769 = vmatprep.mubr.f32.mxu0 %v4665_v27 }
 0xa22   :  { %4770 = vmatmul.mubr.f32.vlgmr.msra.gmra.mxu0 %v4664_v19 }
 0xaa9   :  { %v4891_v43 = vpop.xlane.xlu1 %4890 }
 0xae2   :  { %v5177_v53 = vpop.f32.mrf.mxu0 }
 0xae4   :  { %v5178_v20 = vpop.f32.mrf.mxu0 }
 0xae5   :  { %v5179_v2 = vadd.f32 %v5178_v20, %v5177_v53 }
 0xae7   :  { %v4772_v0 = vadd.f32 %v5179_v2, %v5139_v4 }
 0xae9   :  { %v4775_v18 = vmax.f32 %v4772_v0, 0.0 }
 0xaeb   :  { %v4877_v36 = vmul.f32 %v5141_v45, %v4775_v18 }
 0xaed   :  { %4878 = vadd.xlane.f32.xlu0 %v4877_v36 }
 0xb76   :  { %v4879_v3 = vpop.xlane.xlu0 %4878 }
 0xb77   :  { %v4892_v21 = vadd.f32 %v4891_v43, %v4879_v3 }
 0xb79   :  { %v4900_v37 = vadd.f32 %v5143_v14, %v4892_v21 }
 0xb7b   :  { %v5144_v38 = vmul.f32 -1.442695, %v4900_v37 }
 0xb7d   :  { %5637 = vpow2.f32 %v5144_v38 }
 0xb8a   :  { %v5638_v32 = vpop.eup %5637 }
 0xb8b   :  { %v4904_v23 = vadd.f32 1.0, %v5638_v32 }
 0xb8d   :  { %5639 = vrcp.f32 %v4904_v23 }
 0xb9a   :  { %v5640_v39 = vpop.eup %5639 }
 0xb9b   :  { %4908 = vst.msk [vmem:[%s9758_s17] sm:$0xff] %vm4907_vm14, %v5640_v39 }

</bundles_post_ra>
